<compile_context>
chip_gen: v5e
topology: v5e:2x2
jax: 0.10.0
libtpu: 0.0.40
codegen_flags: <defaults>
</compile_context>

<pallas_src>
import functools

import numpy as np
import jax
import jax.numpy as jnp
from jax import lax
from jax.experimental import pallas as pl
from jax.experimental.pallas import tpu as pltpu

EPS = 1e-5     # nn.InstanceNorm3d default eps
_TD = 8        # output depths per grid step (depth blocking)


def _round_up(v, m):
    return (v + m - 1) // m * m


def _fused_kernel(w_ref, mask_ref, x_hbm, o_ref,
                  buf, sem, rhs_sc, sum_sc, ssq_sc, *,
                  kd, kh, kw, stride, dilation, wp, l_out, cin, cout,
                  td, td_in, do_valid, do_pad, inv_count, negative_slope):
    """Fused conv3d (folded-K MXU matmul) + InstanceNorm + LeakyReLU.

    One grid step handles `td` output depths of one batch element; the output
    block is resident in VMEM across the depth ("arbitrary") grid axis and is
    normalized in place at the last depth step.
    """
    n = pl.program_id(0)
    t = pl.program_id(1)
    nt = pl.num_programs(1)
    slot = t % 2

    def window_copy(dst_slot, ti):
        d0 = ti * (td * stride)
        return pltpu.make_async_copy(
            x_hbm.at[n, pl.ds(d0, td_in)], buf.at[dst_slot], sem.at[dst_slot])

    @pl.when(t == 0)
    def _prime():
        window_copy(0, t).start()
        sum_sc[...] = jnp.zeros_like(sum_sc)
        ssq_sc[...] = jnp.zeros_like(ssq_sc)

    # Wait for the current depth window, then prefetch the next one.
    window_copy(slot, t).wait()

    @pl.when(t + 1 < nt)
    def _prefetch():
        window_copy(1 - slot, t + 1).start()

    w = w_ref[...]            # (Cout, K), lane-dense K
    m = mask_ref[...]         # (1, Lout) spatial/stride validity mask

    blk_sum = jnp.zeros((cout, 1), jnp.float32)
    blk_ssq = jnp.zeros((cout, 1), jnp.float32)

    for j in range(td):                       # static unroll over the block
        od = t * td + j                       # strided output-depth index
        # Assemble the folded-K RHS: rows [tap*Cin, (tap+1)*Cin) hold the
        # (b, c)-shifted window of input depth plane (j*stride + a*dilation).
        for a in range(kd):
            dplane = j * stride + a * dilation
            for b in range(kh):
                for c in range(kw):
                    tap = (a * kh + b) * kw + c
                    shift = dilation * (b * wp + c)
                    rhs_sc[tap * cin:(tap + 1) * cin, :] = (
                        buf[slot, dplane, :, pl.ds(shift, l_out)])
        # Single MXU matmul with K = kd*kh*kw*Cin.
        y = jnp.dot(w, rhs_sc[...], preferred_element_type=jnp.float32) * m
        o_ref[od] = y                         # resident output block (VMEM)

        if do_pad != do_valid:
            dv = (od < do_valid).astype(jnp.float32)   # scalar depth validity
        else:
            dv = 1.0
        blk_sum = blk_sum + dv * jnp.sum(y, axis=1, keepdims=True)
        blk_ssq = blk_ssq + dv * jnp.sum(y * y, axis=1, keepdims=True)

    sum_sc[...] += blk_sum
    ssq_sc[...] += blk_ssq

    @pl.when(t == nt - 1)
    def _finalize():
        mean = sum_sc[...] * inv_count                              # (Cout, 1)
        var = jnp.maximum(ssq_sc[...] * inv_count - mean * mean, 0.0)
        inv = lax.rsqrt(var + EPS)
        scale = inv.reshape(1, cout, 1)
        shift = (-mean * inv).reshape(1, cout, 1)
        # In-place, fully vectorized normalize + LeakyReLU over the resident
        # (Do_pad, Cout, Lout) output slab, in 8-depth chunks.
        for dj in range(do_pad // 8):
            sl = slice(dj * 8, dj * 8 + 8)
            yb = o_ref[sl] * scale + shift
            o_ref[sl] = jnp.where(yb >= 0, yb, negative_slope * yb)


def cnn_layer_3d(x, weight, bias, *, kernel_size, stride=1, dilation=1,
                 negative_slope=0.2):
    """Forward pass matching CNNLayer3d.forward.  x: (N, Cin, D, H, W) f32.

    NOTE: the conv bias is intentionally unused -- a per-channel constant is
    cancelled exactly by InstanceNorm3d(affine=False).
    """
    del bias
    N, Cin, D, H, W = x.shape
    Cout = weight.shape[0]
    kd, kh, kw = kernel_size
    s, dil = stride, dilation

    pad_d = dil * (kd - 1) // 2
    pad_h = dil * (kh - 1) // 2
    pad_w = dil * (kw - 1) // 2

    xp = jnp.pad(x.astype(jnp.float32),
                 ((0, 0), (0, 0), (pad_d, pad_d), (pad_h, pad_h), (pad_w, pad_w)),
                 mode="reflect")
    Dp, Hp, Wp = xp.shape[2:]

    # Dense (stride-1) h/w output extents; kernel computes these, the wrapper
    # subsamples.  Depth is strided directly in the kernel.
    Do1 = Dp - dil * (kd - 1)
    Ho1 = Hp - dil * (kh - 1)
    Wo1 = Wp - dil * (kw - 1)
    Do = (Do1 - 1) // s + 1
    Ho = (Ho1 - 1) // s + 1
    Wo = (Wo1 - 1) // s + 1
    count = Do * Ho * Wo

    TD = _TD
    Do_pad = _round_up(Do, TD)
    NT = Do_pad // TD
    TD_in = (TD - 1) * s + dil * (kd - 1) + 1         # input window depth

    Lout = _round_up(Ho1 * Wp, 128)                   # lane-dense flat plane
    max_shift = dil * ((kh - 1) * Wp + (kw - 1))
    Lin = _round_up(max(Hp * Wp, Lout + max_shift), 128)
    Dp_pad = max(Dp, (Do_pad - 1) * s + dil * (kd - 1) + 1)

    # Input as per-depth planes: (N, Dp_pad, Cin, Lin), zero padded.
    x_planes = jnp.transpose(xp.reshape(N, Cin, Dp, Hp * Wp), (0, 2, 1, 3))
    x_planes = jnp.pad(
        x_planes, ((0, 0), (0, Dp_pad - Dp), (0, 0), (0, Lin - Hp * Wp)))

    # Lane-dense folded weights: (Cout, K), K = kd*kh*kw*Cin,
    # row (tap, ci) <-> rhs row tap*Cin + ci.
    K = kd * kh * kw * Cin
    w2 = jnp.transpose(weight.astype(jnp.float32),
                       (0, 2, 3, 4, 1)).reshape(Cout, K)

    # Static validity mask over the flattened dense (h, w) plane (kills
    # reflect-pad garbage columns and non-strided positions for the stats).
    q = np.arange(Lout)
    hq, wq = q // Wp, q % Wp
    valid = (q < Ho1 * Wp) & (wq < Wo1) & (hq % s == 0) & (wq % s == 0)
    mask = jnp.asarray(valid.astype(np.float32)).reshape(1, Lout)

    kernel = functools.partial(
        _fused_kernel, kd=kd, kh=kh, kw=kw, stride=s, dilation=dil, wp=Wp,
        l_out=Lout, cin=Cin, cout=Cout, td=TD, td_in=TD_in, do_valid=Do,
        do_pad=Do_pad, inv_count=1.0 / float(count),
        negative_slope=float(negative_slope))

    out_full = pl.pallas_call(
        kernel,
        out_shape=jax.ShapeDtypeStruct((N, Do_pad, Cout, Lout), jnp.float32),
        grid_spec=pltpu.PrefetchScalarGridSpec(
            num_scalar_prefetch=0,
            grid=(N, NT),
            in_specs=[
                pl.BlockSpec((Cout, K), lambda n, t: (0, 0)),     # weights
                pl.BlockSpec((1, Lout), lambda n, t: (0, 0)),     # mask
                pl.BlockSpec(memory_space=pl.ANY),                # x (HBM)
            ],
            out_specs=pl.BlockSpec((None, Do_pad, Cout, Lout),
                                   lambda n, t: (n, 0, 0, 0)),
            scratch_shapes=[
                pltpu.VMEM((2, TD_in, Cin, Lin), jnp.float32),    # DMA buffers
                pltpu.SemaphoreType.DMA((2,)),
                pltpu.VMEM((K, Lout), jnp.float32),               # folded RHS
                pltpu.VMEM((Cout, 1), jnp.float32),               # sum
                pltpu.VMEM((Cout, 1), jnp.float32),               # sum of sq
            ]),
        compiler_params=pltpu.CompilerParams(
            dimension_semantics=("parallel", "arbitrary"),
            vmem_limit_bytes=48 * 1024 * 1024),
    )(w2, mask, x_planes)

    # Crop padded depths / garbage plane columns, subsample for stride > 1,
    # restore (N, C, D, H, W).
    out = out_full[:, :Do, :, :Ho1 * Wp].reshape(N, Do, Cout, Ho1, Wp)
    out = out[:, :, :, ::s, :Wo1:s]
    return jnp.transpose(out, (0, 2, 1, 3, 4))


def _reference(x, weight, bias, *, kernel_size, stride, dilation,
               negative_slope):
    """Pure-JAX reference mirroring the PyTorch forward (incl. bias add)."""
    kd, kh, kw = kernel_size
    pad_d = dilation * (kd - 1) // 2
    pad_h = dilation * (kh - 1) // 2
    pad_w = dilation * (kw - 1) // 2
    xp = jnp.pad(x, ((0, 0), (0, 0),
                     (pad_d, pad_d), (pad_h, pad_h), (pad_w, pad_w)),
                 mode="reflect")
    y = lax.conv_general_dilated(
        xp, weight, window_strides=(stride,) * 3, padding="VALID",
        rhs_dilation=(dilation,) * 3,
        dimension_numbers=("NCDHW", "OIDHW", "NCDHW"),
        precision=lax.Precision.HIGHEST)
    y = y + bias.reshape(1, -1, 1, 1, 1)
    mean = jnp.mean(y, axis=(2, 3, 4), keepdims=True)
    var = jnp.mean(jnp.square(y - mean), axis=(2, 3, 4), keepdims=True)
    y = (y - mean) * lax.rsqrt(var + EPS)
    return jnp.where(y >= 0, y, negative_slope * y)


if __name__ == "__main__":
    in_channels, out_channels = 4, 8
    kernel_size = (3, 3, 3)
    stride, dilation, negative_slope = 1, 1, 0.2

    key = jax.random.PRNGKey(0)
    kw_key, kb_key, kx_key = jax.random.split(key, 3)
    fan_in = in_channels * kernel_size[0] * kernel_size[1] * kernel_size[2]
    fan_out = out_channels * kernel_size[0] * kernel_size[1] * kernel_size[2]
    bound = (6.0 / (fan_in + fan_out)) ** 0.5
    weight = jax.random.uniform(
        kw_key, (out_channels, in_channels, *kernel_size),
        minval=-bound, maxval=bound, dtype=jnp.float32)
    # Non-zero bias on purpose: it must be exactly cancelled by InstanceNorm.
    bias = 0.1 * jax.random.normal(kb_key, (out_channels,), dtype=jnp.float32)

    x = jax.random.normal(kx_key, (2, in_channels, 8, 8, 8), dtype=jnp.float32)

    out = cnn_layer_3d(x, weight, bias, kernel_size=kernel_size,
                       stride=stride, dilation=dilation,
                       negative_slope=negative_slope)
    out = jax.block_until_ready(out)

    ref = _reference(x, weight, bias, kernel_size=kernel_size, stride=stride,
                     dilation=dilation, negative_slope=negative_slope)
    assert out.shape == ref.shape, (out.shape, ref.shape)
    err = float(jnp.max(jnp.abs(out - ref)))
    assert err < 2e-4, err
    print("KERNEL_OK")
</pallas_src>

<mosaic_0001>
module attributes {stable_mosaic.version = 11 : i64} {
  func.func @_fused_kernel(%arg0: i32, %arg1: i32, %arg2: memref<8x108xf32, #tpu.memory_space<vmem>>, %arg3: memref<1x128xf32, #tpu.memory_space<vmem>>, %arg4: memref<2x10x4x256xf32, #tpu.memory_space<any>>, %arg5: memref<1x8x8x128xf32, #tpu.memory_space<vmem>>, %arg6: memref<2x10x4x256xf32, #tpu.memory_space<vmem>>, %arg7: memref<2x!tpu.dma_semaphore, #tpu.memory_space<semaphore_mem>>, %arg8: memref<108x128xf32, #tpu.memory_space<vmem>>, %arg9: memref<8x1xf32, #tpu.memory_space<vmem>>, %arg10: memref<8x1xf32, #tpu.memory_space<vmem>>) attributes {dimension_semantics = [#tpu.dimension_semantics<parallel>, #tpu.dimension_semantics<arbitrary>], iteration_bounds = array<i64: 2, 1>, scalar_prefetch = 0 : i64, scratch_operands = 5 : i64, tpu.core_type = #tpu.core_type<tc>, window_params = [{pipeline_mode = #tpu.pipeline_mode<synchronous>, transform_indices = @transform_0, window_bounds = array<i64: 8, 108>}, {pipeline_mode = #tpu.pipeline_mode<synchronous>, transform_indices = @transform_1, window_bounds = array<i64: 1, 128>}, {}, {transform_indices = @transform_3, window_bounds = array<i64: 1, 8, 8, 128>}]} {
    %c2_i32 = arith.constant 2 : i32
    %c0_i32 = arith.constant 0 : i32
    %0 = arith.cmpi eq, %c2_i32, %c0_i32 : i32
    %c1_i32 = arith.constant 1 : i32
    %1 = arith.select %0, %c1_i32, %c2_i32 : i32
    %2 = arith.remsi %arg1, %1 : i32
    %c0_i32_0 = arith.constant 0 : i32
    %3 = arith.cmpi ne, %2, %c0_i32_0 : i32
    %c0_i32_1 = arith.constant 0 : i32
    %4 = arith.cmpi slt, %2, %c0_i32_1 : i32
    %c0_i32_2 = arith.constant 0 : i32
    %5 = arith.cmpi slt, %1, %c0_i32_2 : i32
    %6 = arith.xori %4, %5 : i1
    %7 = arith.andi %6, %3 : i1
    %8 = arith.addi %2, %1 : i32
    %9 = arith.select %7, %8, %2 : i32
    %c0_i32_3 = arith.constant 0 : i32
    %10 = arith.cmpi eq, %arg1, %c0_i32_3 : i32
    %11 = arith.extui %10 : i1 to i32
    %c0_i32_4 = arith.constant 0 : i32
    %12 = arith.cmpi ne, %11, %c0_i32_4 : i32
    scf.if %12 {
      %c8_i32_1161 = arith.constant 8 : i32
      %1069 = arith.muli %arg1, %c8_i32_1161 : i32
      %c0_i32_1162 = arith.constant 0 : i32
      %c0_i32_1163 = arith.constant 0 : i32
      %c0_i32_1164 = arith.constant 0 : i32
      %c0_i32_1165 = arith.constant 0 : i32
      %1070 = tpu.memref_slice %arg4[%arg0, %1069, %c0_i32_1164, %c0_i32_1165] : memref<2x10x4x256xf32, #tpu.memory_space<any>> -> memref<1x10x4x256xf32, #tpu.memory_space<any>>
      %1071 = tpu.memref_squeeze %1070 : memref<1x10x4x256xf32, #tpu.memory_space<any>> -> memref<10x4x256xf32, #tpu.memory_space<any>>
      %c0_i32_1166 = arith.constant 0 : i32
      %c0_i32_1167 = arith.constant 0 : i32
      %c0_i32_1168 = arith.constant 0 : i32
      %1072 = tpu.memref_slice %arg6[%c0_i32_1162, %c0_i32_1166, %c0_i32_1167, %c0_i32_1168] : memref<2x10x4x256xf32, #tpu.memory_space<vmem>> -> memref<1x10x4x256xf32, #tpu.memory_space<vmem>>
      %1073 = tpu.memref_squeeze %1072 : memref<1x10x4x256xf32, #tpu.memory_space<vmem>> -> memref<10x4x256xf32, #tpu.memory_space<vmem>>
      %1074 = tpu.memref_slice %arg7[%c0_i32_1163] : memref<2x!tpu.dma_semaphore, #tpu.memory_space<semaphore_mem>> -> memref<1x!tpu.dma_semaphore, #tpu.memory_space<semaphore_mem>>
      %1075 = tpu.memref_squeeze %1074 : memref<1x!tpu.dma_semaphore, #tpu.memory_space<semaphore_mem>> -> memref<!tpu.dma_semaphore, #tpu.memory_space<semaphore_mem>>
      tpu.enqueue_dma source(%1071 : memref<10x4x256xf32, #tpu.memory_space<any>>) target(%1073 : memref<10x4x256xf32, #tpu.memory_space<vmem>>) target_semaphore(%1075 : memref<!tpu.dma_semaphore, #tpu.memory_space<semaphore_mem>>)
      %cst_1169 = arith.constant 0.000000e+00 : f32
      %1076 = vector.broadcast %cst_1169 : f32 to vector<8x1xf32>
      %c0_1170 = arith.constant 0 : index
      %c0_1171 = arith.constant 0 : index
      %1077 = vector.load %arg9[%c0_1170, %c0_1171] : memref<8x1xf32, #tpu.memory_space<vmem>>, vector<8x1xf32>
      tpu.vector_store %arg9[%c0_1170, %c0_1171], %1076 {strides = array<i32>} : memref<8x1xf32, #tpu.memory_space<vmem>>, vector<8x1xf32>,
      %cst_1172 = arith.constant 0.000000e+00 : f32
      %1078 = vector.broadcast %cst_1172 : f32 to vector<8x1xf32>
      %c0_1173 = arith.constant 0 : index
      %c0_1174 = arith.constant 0 : index
      %1079 = vector.load %arg10[%c0_1173, %c0_1174] : memref<8x1xf32, #tpu.memory_space<vmem>>, vector<8x1xf32>
      tpu.vector_store %arg10[%c0_1173, %c0_1174], %1078 {strides = array<i32>} : memref<8x1xf32, #tpu.memory_space<vmem>>, vector<8x1xf32>,
    } else {
    }
    %c8_i32 = arith.constant 8 : i32
    %13 = arith.muli %arg1, %c8_i32 : i32
    %c0_i32_5 = arith.constant 0 : i32
    %c0_i32_6 = arith.constant 0 : i32
    %14 = tpu.memref_slice %arg4[%arg0, %13, %c0_i32_5, %c0_i32_6] : memref<2x10x4x256xf32, #tpu.memory_space<any>> -> memref<1x10x4x256xf32, #tpu.memory_space<any>>
    %15 = tpu.memref_squeeze %14 : memref<1x10x4x256xf32, #tpu.memory_space<any>> -> memref<10x4x256xf32, #tpu.memory_space<any>>
    %c0_i32_7 = arith.constant 0 : i32
    %c0_i32_8 = arith.constant 0 : i32
    %c0_i32_9 = arith.constant 0 : i32
    %16 = tpu.memref_slice %arg6[%9, %c0_i32_7, %c0_i32_8, %c0_i32_9] : memref<2x10x4x256xf32, #tpu.memory_space<vmem>> -> memref<1x10x4x256xf32, #tpu.memory_space<vmem>>
    %17 = tpu.memref_squeeze %16 : memref<1x10x4x256xf32, #tpu.memory_space<vmem>> -> memref<10x4x256xf32, #tpu.memory_space<vmem>>
    %18 = tpu.memref_slice %arg7[%9] : memref<2x!tpu.dma_semaphore, #tpu.memory_space<semaphore_mem>> -> memref<1x!tpu.dma_semaphore, #tpu.memory_space<semaphore_mem>>
    %19 = tpu.memref_squeeze %18 : memref<1x!tpu.dma_semaphore, #tpu.memory_space<semaphore_mem>> -> memref<!tpu.dma_semaphore, #tpu.memory_space<semaphore_mem>>
    tpu.wait_dma2 semaphore(%19 : memref<!tpu.dma_semaphore, #tpu.memory_space<semaphore_mem>>) src(%15 : memref<10x4x256xf32, #tpu.memory_space<any>>) dst(%17 : memref<10x4x256xf32, #tpu.memory_space<vmem>>)
    %c1_i32_10 = arith.constant 1 : i32
    %20 = arith.addi %arg1, %c1_i32_10 : i32
    %c1_i32_11 = arith.constant 1 : i32
    %21 = arith.cmpi slt, %20, %c1_i32_11 : i32
    %22 = arith.extui %21 : i1 to i32
    %c0_i32_12 = arith.constant 0 : i32
    %23 = arith.cmpi ne, %22, %c0_i32_12 : i32
    scf.if %23 {
      %c1_i32_1161 = arith.constant 1 : i32
      %1069 = arith.subi %c1_i32_1161, %9 : i32
      %c1_i32_1162 = arith.constant 1 : i32
      %1070 = arith.addi %arg1, %c1_i32_1162 : i32
      %c8_i32_1163 = arith.constant 8 : i32
      %1071 = arith.muli %1070, %c8_i32_1163 : i32
      %c0_i32_1164 = arith.constant 0 : i32
      %c0_i32_1165 = arith.constant 0 : i32
      %1072 = tpu.memref_slice %arg4[%arg0, %1071, %c0_i32_1164, %c0_i32_1165] : memref<2x10x4x256xf32, #tpu.memory_space<any>> -> memref<1x10x4x256xf32, #tpu.memory_space<any>>
      %1073 = tpu.memref_squeeze %1072 : memref<1x10x4x256xf32, #tpu.memory_space<any>> -> memref<10x4x256xf32, #tpu.memory_space<any>>
      %c0_i32_1166 = arith.constant 0 : i32
      %c0_i32_1167 = arith.constant 0 : i32
      %c0_i32_1168 = arith.constant 0 : i32
      %1074 = tpu.memref_slice %arg6[%1069, %c0_i32_1166, %c0_i32_1167, %c0_i32_1168] : memref<2x10x4x256xf32, #tpu.memory_space<vmem>> -> memref<1x10x4x256xf32, #tpu.memory_space<vmem>>
      %1075 = tpu.memref_squeeze %1074 : memref<1x10x4x256xf32, #tpu.memory_space<vmem>> -> memref<10x4x256xf32, #tpu.memory_space<vmem>>
      %1076 = tpu.memref_slice %arg7[%1069] : memref<2x!tpu.dma_semaphore, #tpu.memory_space<semaphore_mem>> -> memref<1x!tpu.dma_semaphore, #tpu.memory_space<semaphore_mem>>
      %1077 = tpu.memref_squeeze %1076 : memref<1x!tpu.dma_semaphore, #tpu.memory_space<semaphore_mem>> -> memref<!tpu.dma_semaphore, #tpu.memory_space<semaphore_mem>>
      tpu.enqueue_dma source(%1073 : memref<10x4x256xf32, #tpu.memory_space<any>>) target(%1075 : memref<10x4x256xf32, #tpu.memory_space<vmem>>) target_semaphore(%1077 : memref<!tpu.dma_semaphore, #tpu.memory_space<semaphore_mem>>)
    } else {
    }
    %c0 = arith.constant 0 : index
    %c0_13 = arith.constant 0 : index
    %24 = vector.load %arg2[%c0, %c0_13] : memref<8x108xf32, #tpu.memory_space<vmem>>, vector<8x108xf32>
    %c0_14 = arith.constant 0 : index
    %c0_15 = arith.constant 0 : index
    %25 = vector.load %arg3[%c0_14, %c0_15] : memref<1x128xf32, #tpu.memory_space<vmem>>, vector<1x128xf32>
    %cst = arith.constant 0.000000e+00 : f32
    %26 = vector.broadcast %cst : f32 to vector<8x1xf32>
    %cst_16 = arith.constant 0.000000e+00 : f32
    %27 = vector.broadcast %cst_16 : f32 to vector<8x1xf32>
    %c8_i32_17 = arith.constant 8 : i32
    %28 = arith.muli %arg1, %c8_i32_17 : i32
    %c0_i32_18 = arith.constant 0 : i32
    %29 = arith.addi %28, %c0_i32_18 : i32
    %30 = arith.index_cast %9 : i32 to index
    %c0_19 = arith.constant 0 : index
    %c0_20 = arith.constant 0 : index
    %c0_21 = arith.constant 0 : index
    %31 = vector.load %arg6[%30, %c0_19, %c0_20, %c0_21] : memref<2x10x4x256xf32, #tpu.memory_space<vmem>>, vector<1x1x4x128xf32>
    %32 = vector.shape_cast %31 : vector<1x1x4x128xf32> to vector<4x128xf32>
    %c0_22 = arith.constant 0 : index
    %c0_23 = arith.constant 0 : index
    %33 = vector.load %arg8[%c0_22, %c0_23] : memref<108x128xf32, #tpu.memory_space<vmem>>, vector<4x128xf32>
    tpu.vector_store %arg8[%c0_22, %c0_23], %32 {strides = array<i32>} : memref<108x128xf32, #tpu.memory_space<vmem>>, vector<4x128xf32>,
    %34 = arith.index_cast %9 : i32 to index
    %c0_24 = arith.constant 0 : index
    %c0_25 = arith.constant 0 : index
    %c1 = arith.constant 1 : index
    %35 = vector.load %arg6[%34, %c0_24, %c0_25, %c1] : memref<2x10x4x256xf32, #tpu.memory_space<vmem>>, vector<1x1x4x128xf32>
    %36 = vector.shape_cast %35 : vector<1x1x4x128xf32> to vector<4x128xf32>
    %c4 = arith.constant 4 : index
    %c0_26 = arith.constant 0 : index
    %37 = vector.load %arg8[%c4, %c0_26] : memref<108x128xf32, #tpu.memory_space<vmem>>, vector<4x128xf32>
    tpu.vector_store %arg8[%c4, %c0_26], %36 {strides = array<i32>} : memref<108x128xf32, #tpu.memory_space<vmem>>, vector<4x128xf32>,
    %38 = arith.index_cast %9 : i32 to index
    %c0_27 = arith.constant 0 : index
    %c0_28 = arith.constant 0 : index
    %c2 = arith.constant 2 : index
    %39 = vector.load %arg6[%38, %c0_27, %c0_28, %c2] : memref<2x10x4x256xf32, #tpu.memory_space<vmem>>, vector<1x1x4x128xf32>
    %40 = vector.shape_cast %39 : vector<1x1x4x128xf32> to vector<4x128xf32>
    %c8 = arith.constant 8 : index
    %c0_29 = arith.constant 0 : index
    %41 = vector.load %arg8[%c8, %c0_29] : memref<108x128xf32, #tpu.memory_space<vmem>>, vector<4x128xf32>
    tpu.vector_store %arg8[%c8, %c0_29], %40 {strides = array<i32>} : memref<108x128xf32, #tpu.memory_space<vmem>>, vector<4x128xf32>,
    %42 = arith.index_cast %9 : i32 to index
    %c0_30 = arith.constant 0 : index
    %c0_31 = arith.constant 0 : index
    %c10 = arith.constant 10 : index
    %43 = vector.load %arg6[%42, %c0_30, %c0_31, %c10] : memref<2x10x4x256xf32, #tpu.memory_space<vmem>>, vector<1x1x4x128xf32>
    %44 = vector.shape_cast %43 : vector<1x1x4x128xf32> to vector<4x128xf32>
    %c12 = arith.constant 12 : index
    %c0_32 = arith.constant 0 : index
    %45 = vector.load %arg8[%c12, %c0_32] : memref<108x128xf32, #tpu.memory_space<vmem>>, vector<4x128xf32>
    tpu.vector_store %arg8[%c12, %c0_32], %44 {strides = array<i32>} : memref<108x128xf32, #tpu.memory_space<vmem>>, vector<4x128xf32>,
    %46 = arith.index_cast %9 : i32 to index
    %c0_33 = arith.constant 0 : index
    %c0_34 = arith.constant 0 : index
    %c11 = arith.constant 11 : index
    %47 = vector.load %arg6[%46, %c0_33, %c0_34, %c11] : memref<2x10x4x256xf32, #tpu.memory_space<vmem>>, vector<1x1x4x128xf32>
    %48 = vector.shape_cast %47 : vector<1x1x4x128xf32> to vector<4x128xf32>
    %c16 = arith.constant 16 : index
    %c0_35 = arith.constant 0 : index
    %49 = vector.load %arg8[%c16, %c0_35] : memref<108x128xf32, #tpu.memory_space<vmem>>, vector<4x128xf32>
    tpu.vector_store %arg8[%c16, %c0_35], %48 {strides = array<i32>} : memref<108x128xf32, #tpu.memory_space<vmem>>, vector<4x128xf32>,
    %50 = arith.index_cast %9 : i32 to index
    %c0_36 = arith.constant 0 : index
    %c0_37 = arith.constant 0 : index
    %c12_38 = arith.constant 12 : index
    %51 = vector.load %arg6[%50, %c0_36, %c0_37, %c12_38] : memref<2x10x4x256xf32, #tpu.memory_space<vmem>>, vector<1x1x4x128xf32>
    %52 = vector.shape_cast %51 : vector<1x1x4x128xf32> to vector<4x128xf32>
    %c20 = arith.constant 20 : index
    %c0_39 = arith.constant 0 : index
    %53 = vector.load %arg8[%c20, %c0_39] : memref<108x128xf32, #tpu.memory_space<vmem>>, vector<4x128xf32>
    tpu.vector_store %arg8[%c20, %c0_39], %52 {strides = array<i32>} : memref<108x128xf32, #tpu.memory_space<vmem>>, vector<4x128xf32>,
    %54 = arith.index_cast %9 : i32 to index
    %c0_40 = arith.constant 0 : index
    %c0_41 = arith.constant 0 : index
    %c20_42 = arith.constant 20 : index
    %55 = vector.load %arg6[%54, %c0_40, %c0_41, %c20_42] : memref<2x10x4x256xf32, #tpu.memory_space<vmem>>, vector<1x1x4x128xf32>
    %56 = vector.shape_cast %55 : vector<1x1x4x128xf32> to vector<4x128xf32>
    %c24 = arith.constant 24 : index
    %c0_43 = arith.constant 0 : index
    %57 = vector.load %arg8[%c24, %c0_43] : memref<108x128xf32, #tpu.memory_space<vmem>>, vector<4x128xf32>
    tpu.vector_store %arg8[%c24, %c0_43], %56 {strides = array<i32>} : memref<108x128xf32, #tpu.memory_space<vmem>>, vector<4x128xf32>,
    %58 = arith.index_cast %9 : i32 to index
    %c0_44 = arith.constant 0 : index
    %c0_45 = arith.constant 0 : index
    %c21 = arith.constant 21 : index
    %59 = vector.load %arg6[%58, %c0_44, %c0_45, %c21] : memref<2x10x4x256xf32, #tpu.memory_space<vmem>>, vector<1x1x4x128xf32>
    %60 = vector.shape_cast %59 : vector<1x1x4x128xf32> to vector<4x128xf32>
    %c28 = arith.constant 28 : index
    %c0_46 = arith.constant 0 : index
    %61 = vector.load %arg8[%c28, %c0_46] : memref<108x128xf32, #tpu.memory_space<vmem>>, vector<4x128xf32>
    tpu.vector_store %arg8[%c28, %c0_46], %60 {strides = array<i32>} : memref<108x128xf32, #tpu.memory_space<vmem>>, vector<4x128xf32>,
    %62 = arith.index_cast %9 : i32 to index
    %c0_47 = arith.constant 0 : index
    %c0_48 = arith.constant 0 : index
    %c22 = arith.constant 22 : index
    %63 = vector.load %arg6[%62, %c0_47, %c0_48, %c22] : memref<2x10x4x256xf32, #tpu.memory_space<vmem>>, vector<1x1x4x128xf32>
    %64 = vector.shape_cast %63 : vector<1x1x4x128xf32> to vector<4x128xf32>
    %c32 = arith.constant 32 : index
    %c0_49 = arith.constant 0 : index
    %65 = vector.load %arg8[%c32, %c0_49] : memref<108x128xf32, #tpu.memory_space<vmem>>, vector<4x128xf32>
    tpu.vector_store %arg8[%c32, %c0_49], %64 {strides = array<i32>} : memref<108x128xf32, #tpu.memory_space<vmem>>, vector<4x128xf32>,
    %66 = arith.index_cast %9 : i32 to index
    %c1_50 = arith.constant 1 : index
    %c0_51 = arith.constant 0 : index
    %c0_52 = arith.constant 0 : index
    %67 = vector.load %arg6[%66, %c1_50, %c0_51, %c0_52] : memref<2x10x4x256xf32, #tpu.memory_space<vmem>>, vector<1x1x4x128xf32>
    %68 = vector.shape_cast %67 : vector<1x1x4x128xf32> to vector<4x128xf32>
    %c36 = arith.constant 36 : index
    %c0_53 = arith.constant 0 : index
    %69 = vector.load %arg8[%c36, %c0_53] : memref<108x128xf32, #tpu.memory_space<vmem>>, vector<4x128xf32>
    tpu.vector_store %arg8[%c36, %c0_53], %68 {strides = array<i32>} : memref<108x128xf32, #tpu.memory_space<vmem>>, vector<4x128xf32>,
    %70 = arith.index_cast %9 : i32 to index
    %c1_54 = arith.constant 1 : index
    %c0_55 = arith.constant 0 : index
    %c1_56 = arith.constant 1 : index
    %71 = vector.load %arg6[%70, %c1_54, %c0_55, %c1_56] : memref<2x10x4x256xf32, #tpu.memory_space<vmem>>, vector<1x1x4x128xf32>
    %72 = vector.shape_cast %71 : vector<1x1x4x128xf32> to vector<4x128xf32>
    %c40 = arith.constant 40 : index
    %c0_57 = arith.constant 0 : index
    %73 = vector.load %arg8[%c40, %c0_57] : memref<108x128xf32, #tpu.memory_space<vmem>>, vector<4x128xf32>
    tpu.vector_store %arg8[%c40, %c0_57], %72 {strides = array<i32>} : memref<108x128xf32, #tpu.memory_space<vmem>>, vector<4x128xf32>,
    %74 = arith.index_cast %9 : i32 to index
    %c1_58 = arith.constant 1 : index
    %c0_59 = arith.constant 0 : index
    %c2_60 = arith.constant 2 : index
    %75 = vector.load %arg6[%74, %c1_58, %c0_59, %c2_60] : memref<2x10x4x256xf32, #tpu.memory_space<vmem>>, vector<1x1x4x128xf32>
    %76 = vector.shape_cast %75 : vector<1x1x4x128xf32> to vector<4x128xf32>
    %c44 = arith.constant 44 : index
    %c0_61 = arith.constant 0 : index
    %77 = vector.load %arg8[%c44, %c0_61] : memref<108x128xf32, #tpu.memory_space<vmem>>, vector<4x128xf32>
    tpu.vector_store %arg8[%c44, %c0_61], %76 {strides = array<i32>} : memref<108x128xf32, #tpu.memory_space<vmem>>, vector<4x128xf32>,
    %78 = arith.index_cast %9 : i32 to index
    %c1_62 = arith.constant 1 : index
    %c0_63 = arith.constant 0 : index
    %c10_64 = arith.constant 10 : index
    %79 = vector.load %arg6[%78, %c1_62, %c0_63, %c10_64] : memref<2x10x4x256xf32, #tpu.memory_space<vmem>>, vector<1x1x4x128xf32>
    %80 = vector.shape_cast %79 : vector<1x1x4x128xf32> to vector<4x128xf32>
    %c48 = arith.constant 48 : index
    %c0_65 = arith.constant 0 : index
    %81 = vector.load %arg8[%c48, %c0_65] : memref<108x128xf32, #tpu.memory_space<vmem>>, vector<4x128xf32>
    tpu.vector_store %arg8[%c48, %c0_65], %80 {strides = array<i32>} : memref<108x128xf32, #tpu.memory_space<vmem>>, vector<4x128xf32>,
    %82 = arith.index_cast %9 : i32 to index
    %c1_66 = arith.constant 1 : index
    %c0_67 = arith.constant 0 : index
    %c11_68 = arith.constant 11 : index
    %83 = vector.load %arg6[%82, %c1_66, %c0_67, %c11_68] : memref<2x10x4x256xf32, #tpu.memory_space<vmem>>, vector<1x1x4x128xf32>
    %84 = vector.shape_cast %83 : vector<1x1x4x128xf32> to vector<4x128xf32>
    %c52 = arith.constant 52 : index
    %c0_69 = arith.constant 0 : index
    %85 = vector.load %arg8[%c52, %c0_69] : memref<108x128xf32, #tpu.memory_space<vmem>>, vector<4x128xf32>
    tpu.vector_store %arg8[%c52, %c0_69], %84 {strides = array<i32>} : memref<108x128xf32, #tpu.memory_space<vmem>>, vector<4x128xf32>,
    %86 = arith.index_cast %9 : i32 to index
    %c1_70 = arith.constant 1 : index
    %c0_71 = arith.constant 0 : index
    %c12_72 = arith.constant 12 : index
    %87 = vector.load %arg6[%86, %c1_70, %c0_71, %c12_72] : memref<2x10x4x256xf32, #tpu.memory_space<vmem>>, vector<1x1x4x128xf32>
    %88 = vector.shape_cast %87 : vector<1x1x4x128xf32> to vector<4x128xf32>
    %c56 = arith.constant 56 : index
    %c0_73 = arith.constant 0 : index
    %89 = vector.load %arg8[%c56, %c0_73] : memref<108x128xf32, #tpu.memory_space<vmem>>, vector<4x128xf32>
    tpu.vector_store %arg8[%c56, %c0_73], %88 {strides = array<i32>} : memref<108x128xf32, #tpu.memory_space<vmem>>, vector<4x128xf32>,
    %90 = arith.index_cast %9 : i32 to index
    %c1_74 = arith.constant 1 : index
    %c0_75 = arith.constant 0 : index
    %c20_76 = arith.constant 20 : index
    %91 = vector.load %arg6[%90, %c1_74, %c0_75, %c20_76] : memref<2x10x4x256xf32, #tpu.memory_space<vmem>>, vector<1x1x4x128xf32>
    %92 = vector.shape_cast %91 : vector<1x1x4x128xf32> to vector<4x128xf32>
    %c60 = arith.constant 60 : index
    %c0_77 = arith.constant 0 : index
    %93 = vector.load %arg8[%c60, %c0_77] : memref<108x128xf32, #tpu.memory_space<vmem>>, vector<4x128xf32>
    tpu.vector_store %arg8[%c60, %c0_77], %92 {strides = array<i32>} : memref<108x128xf32, #tpu.memory_space<vmem>>, vector<4x128xf32>,
    %94 = arith.index_cast %9 : i32 to index
    %c1_78 = arith.constant 1 : index
    %c0_79 = arith.constant 0 : index
    %c21_80 = arith.constant 21 : index
    %95 = vector.load %arg6[%94, %c1_78, %c0_79, %c21_80] : memref<2x10x4x256xf32, #tpu.memory_space<vmem>>, vector<1x1x4x128xf32>
    %96 = vector.shape_cast %95 : vector<1x1x4x128xf32> to vector<4x128xf32>
    %c64 = arith.constant 64 : index
    %c0_81 = arith.constant 0 : index
    %97 = vector.load %arg8[%c64, %c0_81] : memref<108x128xf32, #tpu.memory_space<vmem>>, vector<4x128xf32>
    tpu.vector_store %arg8[%c64, %c0_81], %96 {strides = array<i32>} : memref<108x128xf32, #tpu.memory_space<vmem>>, vector<4x128xf32>,
    %98 = arith.index_cast %9 : i32 to index
    %c1_82 = arith.constant 1 : index
    %c0_83 = arith.constant 0 : index
    %c22_84 = arith.constant 22 : index
    %99 = vector.load %arg6[%98, %c1_82, %c0_83, %c22_84] : memref<2x10x4x256xf32, #tpu.memory_space<vmem>>, vector<1x1x4x128xf32>
    %100 = vector.shape_cast %99 : vector<1x1x4x128xf32> to vector<4x128xf32>
    %c68 = arith.constant 68 : index
    %c0_85 = arith.constant 0 : index
    %101 = vector.load %arg8[%c68, %c0_85] : memref<108x128xf32, #tpu.memory_space<vmem>>, vector<4x128xf32>
    tpu.vector_store %arg8[%c68, %c0_85], %100 {strides = array<i32>} : memref<108x128xf32, #tpu.memory_space<vmem>>, vector<4x128xf32>,
    %102 = arith.index_cast %9 : i32 to index
    %c2_86 = arith.constant 2 : index
    %c0_87 = arith.constant 0 : index
    %c0_88 = arith.constant 0 : index
    %103 = vector.load %arg6[%102, %c2_86, %c0_87, %c0_88] : memref<2x10x4x256xf32, #tpu.memory_space<vmem>>, vector<1x1x4x128xf32>
    %104 = vector.shape_cast %103 : vector<1x1x4x128xf32> to vector<4x128xf32>
    %c72 = arith.constant 72 : index
    %c0_89 = arith.constant 0 : index
    %105 = vector.load %arg8[%c72, %c0_89] : memref<108x128xf32, #tpu.memory_space<vmem>>, vector<4x128xf32>
    tpu.vector_store %arg8[%c72, %c0_89], %104 {strides = array<i32>} : memref<108x128xf32, #tpu.memory_space<vmem>>, vector<4x128xf32>,
    %106 = arith.index_cast %9 : i32 to index
    %c2_90 = arith.constant 2 : index
    %c0_91 = arith.constant 0 : index
    %c1_92 = arith.constant 1 : index
    %107 = vector.load %arg6[%106, %c2_90, %c0_91, %c1_92] : memref<2x10x4x256xf32, #tpu.memory_space<vmem>>, vector<1x1x4x128xf32>
    %108 = vector.shape_cast %107 : vector<1x1x4x128xf32> to vector<4x128xf32>
    %c76 = arith.constant 76 : index
    %c0_93 = arith.constant 0 : index
    %109 = vector.load %arg8[%c76, %c0_93] : memref<108x128xf32, #tpu.memory_space<vmem>>, vector<4x128xf32>
    tpu.vector_store %arg8[%c76, %c0_93], %108 {strides = array<i32>} : memref<108x128xf32, #tpu.memory_space<vmem>>, vector<4x128xf32>,
    %110 = arith.index_cast %9 : i32 to index
    %c2_94 = arith.constant 2 : index
    %c0_95 = arith.constant 0 : index
    %c2_96 = arith.constant 2 : index
    %111 = vector.load %arg6[%110, %c2_94, %c0_95, %c2_96] : memref<2x10x4x256xf32, #tpu.memory_space<vmem>>, vector<1x1x4x128xf32>
    %112 = vector.shape_cast %111 : vector<1x1x4x128xf32> to vector<4x128xf32>
    %c80 = arith.constant 80 : index
    %c0_97 = arith.constant 0 : index
    %113 = vector.load %arg8[%c80, %c0_97] : memref<108x128xf32, #tpu.memory_space<vmem>>, vector<4x128xf32>
    tpu.vector_store %arg8[%c80, %c0_97], %112 {strides = array<i32>} : memref<108x128xf32, #tpu.memory_space<vmem>>, vector<4x128xf32>,
    %114 = arith.index_cast %9 : i32 to index
    %c2_98 = arith.constant 2 : index
    %c0_99 = arith.constant 0 : index
    %c10_100 = arith.constant 10 : index
    %115 = vector.load %arg6[%114, %c2_98, %c0_99, %c10_100] : memref<2x10x4x256xf32, #tpu.memory_space<vmem>>, vector<1x1x4x128xf32>
    %116 = vector.shape_cast %115 : vector<1x1x4x128xf32> to vector<4x128xf32>
    %c84 = arith.constant 84 : index
    %c0_101 = arith.constant 0 : index
    %117 = vector.load %arg8[%c84, %c0_101] : memref<108x128xf32, #tpu.memory_space<vmem>>, vector<4x128xf32>
    tpu.vector_store %arg8[%c84, %c0_101], %116 {strides = array<i32>} : memref<108x128xf32, #tpu.memory_space<vmem>>, vector<4x128xf32>,
    %118 = arith.index_cast %9 : i32 to index
    %c2_102 = arith.constant 2 : index
    %c0_103 = arith.constant 0 : index
    %c11_104 = arith.constant 11 : index
    %119 = vector.load %arg6[%118, %c2_102, %c0_103, %c11_104] : memref<2x10x4x256xf32, #tpu.memory_space<vmem>>, vector<1x1x4x128xf32>
    %120 = vector.shape_cast %119 : vector<1x1x4x128xf32> to vector<4x128xf32>
    %c88 = arith.constant 88 : index
    %c0_105 = arith.constant 0 : index
    %121 = vector.load %arg8[%c88, %c0_105] : memref<108x128xf32, #tpu.memory_space<vmem>>, vector<4x128xf32>
    tpu.vector_store %arg8[%c88, %c0_105], %120 {strides = array<i32>} : memref<108x128xf32, #tpu.memory_space<vmem>>, vector<4x128xf32>,
    %122 = arith.index_cast %9 : i32 to index
    %c2_106 = arith.constant 2 : index
    %c0_107 = arith.constant 0 : index
    %c12_108 = arith.constant 12 : index
    %123 = vector.load %arg6[%122, %c2_106, %c0_107, %c12_108] : memref<2x10x4x256xf32, #tpu.memory_space<vmem>>, vector<1x1x4x128xf32>
    %124 = vector.shape_cast %123 : vector<1x1x4x128xf32> to vector<4x128xf32>
    %c92 = arith.constant 92 : index
    %c0_109 = arith.constant 0 : index
    %125 = vector.load %arg8[%c92, %c0_109] : memref<108x128xf32, #tpu.memory_space<vmem>>, vector<4x128xf32>
    tpu.vector_store %arg8[%c92, %c0_109], %124 {strides = array<i32>} : memref<108x128xf32, #tpu.memory_space<vmem>>, vector<4x128xf32>,
    %126 = arith.index_cast %9 : i32 to index
    %c2_110 = arith.constant 2 : index
    %c0_111 = arith.constant 0 : index
    %c20_112 = arith.constant 20 : index
    %127 = vector.load %arg6[%126, %c2_110, %c0_111, %c20_112] : memref<2x10x4x256xf32, #tpu.memory_space<vmem>>, vector<1x1x4x128xf32>
    %128 = vector.shape_cast %127 : vector<1x1x4x128xf32> to vector<4x128xf32>
    %c96 = arith.constant 96 : index
    %c0_113 = arith.constant 0 : index
    %129 = vector.load %arg8[%c96, %c0_113] : memref<108x128xf32, #tpu.memory_space<vmem>>, vector<4x128xf32>
    tpu.vector_store %arg8[%c96, %c0_113], %128 {strides = array<i32>} : memref<108x128xf32, #tpu.memory_space<vmem>>, vector<4x128xf32>,
    %130 = arith.index_cast %9 : i32 to index
    %c2_114 = arith.constant 2 : index
    %c0_115 = arith.constant 0 : index
    %c21_116 = arith.constant 21 : index
    %131 = vector.load %arg6[%130, %c2_114, %c0_115, %c21_116] : memref<2x10x4x256xf32, #tpu.memory_space<vmem>>, vector<1x1x4x128xf32>
    %132 = vector.shape_cast %131 : vector<1x1x4x128xf32> to vector<4x128xf32>
    %c100 = arith.constant 100 : index
    %c0_117 = arith.constant 0 : index
    %133 = vector.load %arg8[%c100, %c0_117] : memref<108x128xf32, #tpu.memory_space<vmem>>, vector<4x128xf32>
    tpu.vector_store %arg8[%c100, %c0_117], %132 {strides = array<i32>} : memref<108x128xf32, #tpu.memory_space<vmem>>, vector<4x128xf32>,
    %134 = arith.index_cast %9 : i32 to index
    %c2_118 = arith.constant 2 : index
    %c0_119 = arith.constant 0 : index
    %c22_120 = arith.constant 22 : index
    %135 = vector.load %arg6[%134, %c2_118, %c0_119, %c22_120] : memref<2x10x4x256xf32, #tpu.memory_space<vmem>>, vector<1x1x4x128xf32>
    %136 = vector.shape_cast %135 : vector<1x1x4x128xf32> to vector<4x128xf32>
    %c104 = arith.constant 104 : index
    %c0_121 = arith.constant 0 : index
    %137 = vector.load %arg8[%c104, %c0_121] : memref<108x128xf32, #tpu.memory_space<vmem>>, vector<4x128xf32>
    tpu.vector_store %arg8[%c104, %c0_121], %136 {strides = array<i32>} : memref<108x128xf32, #tpu.memory_space<vmem>>, vector<4x128xf32>,
    %c0_122 = arith.constant 0 : index
    %c0_123 = arith.constant 0 : index
    %138 = vector.load %arg8[%c0_122, %c0_123] : memref<108x128xf32, #tpu.memory_space<vmem>>, vector<108x128xf32>
    %cst_124 = arith.constant dense<0.000000e+00> : vector<8x128xf32>
    %139 = tpu.matmul %24, %138, %cst_124 {dimension_numbers = #tpu.dot_dimension_numbers<[1], [0], [0], [1], [0, 0, 1, 1], [], []>} : vector<8x108xf32>, vector<108x128xf32>, vector<8x128xf32> -> vector<8x128xf32>
    %140 = vector.broadcast %25 : vector<1x128xf32> to vector<8x128xf32>
    %141 = arith.mulf %139, %140 : vector<8x128xf32>
    %c0_125 = arith.constant 0 : index
    %142 = arith.index_cast %29 : i32 to index
    %c0_126 = arith.constant 0 : index
    %c0_127 = arith.constant 0 : index
    %143 = vector.load %arg5[%c0_125, %142, %c0_126, %c0_127] : memref<1x8x8x128xf32, #tpu.memory_space<vmem>>, vector<1x1x8x128xf32>
    %144 = vector.shape_cast %143 : vector<1x1x8x128xf32> to vector<8x128xf32>
    %145 = vector.shape_cast %141 : vector<8x128xf32> to vector<1x1x8x128xf32>
    tpu.vector_store %arg5[%c0_125, %142, %c0_126, %c0_127], %145 {strides = array<i32>} : memref<1x8x8x128xf32, #tpu.memory_space<vmem>>, vector<1x1x8x128xf32>,
    %cst_128 = arith.constant dense<0.000000e+00> : vector<8xf32>
    %146 = vector.multi_reduction <add>, %141, %cst_128 [1] : vector<8x128xf32> to vector<8xf32>
    %147 = vector.shape_cast %146 : vector<8xf32> to vector<8x1xf32>
    %cst_129 = arith.constant 1.000000e+00 : f32
    %148 = vector.broadcast %cst_129 : f32 to vector<8x1xf32>
    %149 = arith.mulf %148, %147 : vector<8x1xf32>
    %150 = arith.addf %26, %149 : vector<8x1xf32>
    %151 = arith.mulf %141, %141 : vector<8x128xf32>
    %cst_130 = arith.constant dense<0.000000e+00> : vector<8xf32>
    %152 = vector.multi_reduction <add>, %151, %cst_130 [1] : vector<8x128xf32> to vector<8xf32>
    %153 = vector.shape_cast %152 : vector<8xf32> to vector<8x1xf32>
    %cst_131 = arith.constant 1.000000e+00 : f32
    %154 = vector.broadcast %cst_131 : f32 to vector<8x1xf32>
    %155 = arith.mulf %154, %153 : vector<8x1xf32>
    %156 = arith.addf %27, %155 : vector<8x1xf32>
    %c8_i32_132 = arith.constant 8 : i32
    %157 = arith.muli %arg1, %c8_i32_132 : i32
    %c1_i32_133 = arith.constant 1 : i32
    %158 = arith.addi %157, %c1_i32_133 : i32
    %159 = arith.index_cast %9 : i32 to index
    %c1_134 = arith.constant 1 : index
    %c0_135 = arith.constant 0 : index
    %c0_136 = arith.constant 0 : index
    %160 = vector.load %arg6[%159, %c1_134, %c0_135, %c0_136] : memref<2x10x4x256xf32, #tpu.memory_space<vmem>>, vector<1x1x4x128xf32>
    %161 = vector.shape_cast %160 : vector<1x1x4x128xf32> to vector<4x128xf32>
    %c0_137 = arith.constant 0 : index
    %c0_138 = arith.constant 0 : index
    %162 = vector.load %arg8[%c0_137, %c0_138] : memref<108x128xf32, #tpu.memory_space<vmem>>, vector<4x128xf32>
    tpu.vector_store %arg8[%c0_137, %c0_138], %161 {strides = array<i32>} : memref<108x128xf32, #tpu.memory_space<vmem>>, vector<4x128xf32>,
    %163 = arith.index_cast %9 : i32 to index
    %c1_139 = arith.constant 1 : index
    %c0_140 = arith.constant 0 : index
    %c1_141 = arith.constant 1 : index
    %164 = vector.load %arg6[%163, %c1_139, %c0_140, %c1_141] : memref<2x10x4x256xf32, #tpu.memory_space<vmem>>, vector<1x1x4x128xf32>
    %165 = vector.shape_cast %164 : vector<1x1x4x128xf32> to vector<4x128xf32>
    %c4_142 = arith.constant 4 : index
    %c0_143 = arith.constant 0 : index
    %166 = vector.load %arg8[%c4_142, %c0_143] : memref<108x128xf32, #tpu.memory_space<vmem>>, vector<4x128xf32>
    tpu.vector_store %arg8[%c4_142, %c0_143], %165 {strides = array<i32>} : memref<108x128xf32, #tpu.memory_space<vmem>>, vector<4x128xf32>,
    %167 = arith.index_cast %9 : i32 to index
    %c1_144 = arith.constant 1 : index
    %c0_145 = arith.constant 0 : index
    %c2_146 = arith.constant 2 : index
    %168 = vector.load %arg6[%167, %c1_144, %c0_145, %c2_146] : memref<2x10x4x256xf32, #tpu.memory_space<vmem>>, vector<1x1x4x128xf32>
    %169 = vector.shape_cast %168 : vector<1x1x4x128xf32> to vector<4x128xf32>
    %c8_147 = arith.constant 8 : index
    %c0_148 = arith.constant 0 : index
    %170 = vector.load %arg8[%c8_147, %c0_148] : memref<108x128xf32, #tpu.memory_space<vmem>>, vector<4x128xf32>
    tpu.vector_store %arg8[%c8_147, %c0_148], %169 {strides = array<i32>} : memref<108x128xf32, #tpu.memory_space<vmem>>, vector<4x128xf32>,
    %171 = arith.index_cast %9 : i32 to index
    %c1_149 = arith.constant 1 : index
    %c0_150 = arith.constant 0 : index
    %c10_151 = arith.constant 10 : index
    %172 = vector.load %arg6[%171, %c1_149, %c0_150, %c10_151] : memref<2x10x4x256xf32, #tpu.memory_space<vmem>>, vector<1x1x4x128xf32>
    %173 = vector.shape_cast %172 : vector<1x1x4x128xf32> to vector<4x128xf32>
    %c12_152 = arith.constant 12 : index
    %c0_153 = arith.constant 0 : index
    %174 = vector.load %arg8[%c12_152, %c0_153] : memref<108x128xf32, #tpu.memory_space<vmem>>, vector<4x128xf32>
    tpu.vector_store %arg8[%c12_152, %c0_153], %173 {strides = array<i32>} : memref<108x128xf32, #tpu.memory_space<vmem>>, vector<4x128xf32>,
    %175 = arith.index_cast %9 : i32 to index
    %c1_154 = arith.constant 1 : index
    %c0_155 = arith.constant 0 : index
    %c11_156 = arith.constant 11 : index
    %176 = vector.load %arg6[%175, %c1_154, %c0_155, %c11_156] : memref<2x10x4x256xf32, #tpu.memory_space<vmem>>, vector<1x1x4x128xf32>
    %177 = vector.shape_cast %176 : vector<1x1x4x128xf32> to vector<4x128xf32>
    %c16_157 = arith.constant 16 : index
    %c0_158 = arith.constant 0 : index
    %178 = vector.load %arg8[%c16_157, %c0_158] : memref<108x128xf32, #tpu.memory_space<vmem>>, vector<4x128xf32>
    tpu.vector_store %arg8[%c16_157, %c0_158], %177 {strides = array<i32>} : memref<108x128xf32, #tpu.memory_space<vmem>>, vector<4x128xf32>,
    %179 = arith.index_cast %9 : i32 to index
    %c1_159 = arith.constant 1 : index
    %c0_160 = arith.constant 0 : index
    %c12_161 = arith.constant 12 : index
    %180 = vector.load %arg6[%179, %c1_159, %c0_160, %c12_161] : memref<2x10x4x256xf32, #tpu.memory_space<vmem>>, vector<1x1x4x128xf32>
    %181 = vector.shape_cast %180 : vector<1x1x4x128xf32> to vector<4x128xf32>
    %c20_162 = arith.constant 20 : index
    %c0_163 = arith.constant 0 : index
    %182 = vector.load %arg8[%c20_162, %c0_163] : memref<108x128xf32, #tpu.memory_space<vmem>>, vector<4x128xf32>
    tpu.vector_store %arg8[%c20_162, %c0_163], %181 {strides = array<i32>} : memref<108x128xf32, #tpu.memory_space<vmem>>, vector<4x128xf32>,
    %183 = arith.index_cast %9 : i32 to index
    %c1_164 = arith.constant 1 : index
    %c0_165 = arith.constant 0 : index
    %c20_166 = arith.constant 20 : index
    %184 = vector.load %arg6[%183, %c1_164, %c0_165, %c20_166] : memref<2x10x4x256xf32, #tpu.memory_space<vmem>>, vector<1x1x4x128xf32>
    %185 = vector.shape_cast %184 : vector<1x1x4x128xf32> to vector<4x128xf32>
    %c24_167 = arith.constant 24 : index
    %c0_168 = arith.constant 0 : index
    %186 = vector.load %arg8[%c24_167, %c0_168] : memref<108x128xf32, #tpu.memory_space<vmem>>, vector<4x128xf32>
    tpu.vector_store %arg8[%c24_167, %c0_168], %185 {strides = array<i32>} : memref<108x128xf32, #tpu.memory_space<vmem>>, vector<4x128xf32>,
    %187 = arith.index_cast %9 : i32 to index
    %c1_169 = arith.constant 1 : index
    %c0_170 = arith.constant 0 : index
    %c21_171 = arith.constant 21 : index
    %188 = vector.load %arg6[%187, %c1_169, %c0_170, %c21_171] : memref<2x10x4x256xf32, #tpu.memory_space<vmem>>, vector<1x1x4x128xf32>
    %189 = vector.shape_cast %188 : vector<1x1x4x128xf32> to vector<4x128xf32>
    %c28_172 = arith.constant 28 : index
    %c0_173 = arith.constant 0 : index
    %190 = vector.load %arg8[%c28_172, %c0_173] : memref<108x128xf32, #tpu.memory_space<vmem>>, vector<4x128xf32>
    tpu.vector_store %arg8[%c28_172, %c0_173], %189 {strides = array<i32>} : memref<108x128xf32, #tpu.memory_space<vmem>>, vector<4x128xf32>,
    %191 = arith.index_cast %9 : i32 to index
    %c1_174 = arith.constant 1 : index
    %c0_175 = arith.constant 0 : index
    %c22_176 = arith.constant 22 : index
    %192 = vector.load %arg6[%191, %c1_174, %c0_175, %c22_176] : memref<2x10x4x256xf32, #tpu.memory_space<vmem>>, vector<1x1x4x128xf32>
    %193 = vector.shape_cast %192 : vector<1x1x4x128xf32> to vector<4x128xf32>
    %c32_177 = arith.constant 32 : index
    %c0_178 = arith.constant 0 : index
    %194 = vector.load %arg8[%c32_177, %c0_178] : memref<108x128xf32, #tpu.memory_space<vmem>>, vector<4x128xf32>
    tpu.vector_store %arg8[%c32_177, %c0_178], %193 {strides = array<i32>} : memref<108x128xf32, #tpu.memory_space<vmem>>, vector<4x128xf32>,
    %195 = arith.index_cast %9 : i32 to index
    %c2_179 = arith.constant 2 : index
    %c0_180 = arith.constant 0 : index
    %c0_181 = arith.constant 0 : index
    %196 = vector.load %arg6[%195, %c2_179, %c0_180, %c0_181] : memref<2x10x4x256xf32, #tpu.memory_space<vmem>>, vector<1x1x4x128xf32>
    %197 = vector.shape_cast %196 : vector<1x1x4x128xf32> to vector<4x128xf32>
    %c36_182 = arith.constant 36 : index
    %c0_183 = arith.constant 0 : index
    %198 = vector.load %arg8[%c36_182, %c0_183] : memref<108x128xf32, #tpu.memory_space<vmem>>, vector<4x128xf32>
    tpu.vector_store %arg8[%c36_182, %c0_183], %197 {strides = array<i32>} : memref<108x128xf32, #tpu.memory_space<vmem>>, vector<4x128xf32>,
    %199 = arith.index_cast %9 : i32 to index
    %c2_184 = arith.constant 2 : index
    %c0_185 = arith.constant 0 : index
    %c1_186 = arith.constant 1 : index
    %200 = vector.load %arg6[%199, %c2_184, %c0_185, %c1_186] : memref<2x10x4x256xf32, #tpu.memory_space<vmem>>, vector<1x1x4x128xf32>
    %201 = vector.shape_cast %200 : vector<1x1x4x128xf32> to vector<4x128xf32>
    %c40_187 = arith.constant 40 : index
    %c0_188 = arith.constant 0 : index
    %202 = vector.load %arg8[%c40_187, %c0_188] : memref<108x128xf32, #tpu.memory_space<vmem>>, vector<4x128xf32>
    tpu.vector_store %arg8[%c40_187, %c0_188], %201 {strides = array<i32>} : memref<108x128xf32, #tpu.memory_space<vmem>>, vector<4x128xf32>,
    %203 = arith.index_cast %9 : i32 to index
    %c2_189 = arith.constant 2 : index
    %c0_190 = arith.constant 0 : index
    %c2_191 = arith.constant 2 : index
    %204 = vector.load %arg6[%203, %c2_189, %c0_190, %c2_191] : memref<2x10x4x256xf32, #tpu.memory_space<vmem>>, vector<1x1x4x128xf32>
    %205 = vector.shape_cast %204 : vector<1x1x4x128xf32> to vector<4x128xf32>
    %c44_192 = arith.constant 44 : index
    %c0_193 = arith.constant 0 : index
    %206 = vector.load %arg8[%c44_192, %c0_193] : memref<108x128xf32, #tpu.memory_space<vmem>>, vector<4x128xf32>
    tpu.vector_store %arg8[%c44_192, %c0_193], %205 {strides = array<i32>} : memref<108x128xf32, #tpu.memory_space<vmem>>, vector<4x128xf32>,
    %207 = arith.index_cast %9 : i32 to index
    %c2_194 = arith.constant 2 : index
    %c0_195 = arith.constant 0 : index
    %c10_196 = arith.constant 10 : index
    %208 = vector.load %arg6[%207, %c2_194, %c0_195, %c10_196] : memref<2x10x4x256xf32, #tpu.memory_space<vmem>>, vector<1x1x4x128xf32>
    %209 = vector.shape_cast %208 : vector<1x1x4x128xf32> to vector<4x128xf32>
    %c48_197 = arith.constant 48 : index
    %c0_198 = arith.constant 0 : index
    %210 = vector.load %arg8[%c48_197, %c0_198] : memref<108x128xf32, #tpu.memory_space<vmem>>, vector<4x128xf32>
    tpu.vector_store %arg8[%c48_197, %c0_198], %209 {strides = array<i32>} : memref<108x128xf32, #tpu.memory_space<vmem>>, vector<4x128xf32>,
    %211 = arith.index_cast %9 : i32 to index
    %c2_199 = arith.constant 2 : index
    %c0_200 = arith.constant 0 : index
    %c11_201 = arith.constant 11 : index
    %212 = vector.load %arg6[%211, %c2_199, %c0_200, %c11_201] : memref<2x10x4x256xf32, #tpu.memory_space<vmem>>, vector<1x1x4x128xf32>
    %213 = vector.shape_cast %212 : vector<1x1x4x128xf32> to vector<4x128xf32>
    %c52_202 = arith.constant 52 : index
    %c0_203 = arith.constant 0 : index
    %214 = vector.load %arg8[%c52_202, %c0_203] : memref<108x128xf32, #tpu.memory_space<vmem>>, vector<4x128xf32>
    tpu.vector_store %arg8[%c52_202, %c0_203], %213 {strides = array<i32>} : memref<108x128xf32, #tpu.memory_space<vmem>>, vector<4x128xf32>,
    %215 = arith.index_cast %9 : i32 to index
    %c2_204 = arith.constant 2 : index
    %c0_205 = arith.constant 0 : index
    %c12_206 = arith.constant 12 : index
    %216 = vector.load %arg6[%215, %c2_204, %c0_205, %c12_206] : memref<2x10x4x256xf32, #tpu.memory_space<vmem>>, vector<1x1x4x128xf32>
    %217 = vector.shape_cast %216 : vector<1x1x4x128xf32> to vector<4x128xf32>
    %c56_207 = arith.constant 56 : index
    %c0_208 = arith.constant 0 : index
    %218 = vector.load %arg8[%c56_207, %c0_208] : memref<108x128xf32, #tpu.memory_space<vmem>>, vector<4x128xf32>
    tpu.vector_store %arg8[%c56_207, %c0_208], %217 {strides = array<i32>} : memref<108x128xf32, #tpu.memory_space<vmem>>, vector<4x128xf32>,
    %219 = arith.index_cast %9 : i32 to index
    %c2_209 = arith.constant 2 : index
    %c0_210 = arith.constant 0 : index
    %c20_211 = arith.constant 20 : index
    %220 = vector.load %arg6[%219, %c2_209, %c0_210, %c20_211] : memref<2x10x4x256xf32, #tpu.memory_space<vmem>>, vector<1x1x4x128xf32>
    %221 = vector.shape_cast %220 : vector<1x1x4x128xf32> to vector<4x128xf32>
    %c60_212 = arith.constant 60 : index
    %c0_213 = arith.constant 0 : index
    %222 = vector.load %arg8[%c60_212, %c0_213] : memref<108x128xf32, #tpu.memory_space<vmem>>, vector<4x128xf32>
    tpu.vector_store %arg8[%c60_212, %c0_213], %221 {strides = array<i32>} : memref<108x128xf32, #tpu.memory_space<vmem>>, vector<4x128xf32>,
    %223 = arith.index_cast %9 : i32 to index
    %c2_214 = arith.constant 2 : index
    %c0_215 = arith.constant 0 : index
    %c21_216 = arith.constant 21 : index
    %224 = vector.load %arg6[%223, %c2_214, %c0_215, %c21_216] : memref<2x10x4x256xf32, #tpu.memory_space<vmem>>, vector<1x1x4x128xf32>
    %225 = vector.shape_cast %224 : vector<1x1x4x128xf32> to vector<4x128xf32>
    %c64_217 = arith.constant 64 : index
    %c0_218 = arith.constant 0 : index
    %226 = vector.load %arg8[%c64_217, %c0_218] : memref<108x128xf32, #tpu.memory_space<vmem>>, vector<4x128xf32>
    tpu.vector_store %arg8[%c64_217, %c0_218], %225 {strides = array<i32>} : memref<108x128xf32, #tpu.memory_space<vmem>>, vector<4x128xf32>,
    %227 = arith.index_cast %9 : i32 to index
    %c2_219 = arith.constant 2 : index
    %c0_220 = arith.constant 0 : index
    %c22_221 = arith.constant 22 : index
    %228 = vector.load %arg6[%227, %c2_219, %c0_220, %c22_221] : memref<2x10x4x256xf32, #tpu.memory_space<vmem>>, vector<1x1x4x128xf32>
    %229 = vector.shape_cast %228 : vector<1x1x4x128xf32> to vector<4x128xf32>
    %c68_222 = arith.constant 68 : index
    %c0_223 = arith.constant 0 : index
    %230 = vector.load %arg8[%c68_222, %c0_223] : memref<108x128xf32, #tpu.memory_space<vmem>>, vector<4x128xf32>
    tpu.vector_store %arg8[%c68_222, %c0_223], %229 {strides = array<i32>} : memref<108x128xf32, #tpu.memory_space<vmem>>, vector<4x128xf32>,
    %231 = arith.index_cast %9 : i32 to index
    %c3 = arith.constant 3 : index
    %c0_224 = arith.constant 0 : index
    %c0_225 = arith.constant 0 : index
    %232 = vector.load %arg6[%231, %c3, %c0_224, %c0_225] : memref<2x10x4x256xf32, #tpu.memory_space<vmem>>, vector<1x1x4x128xf32>
    %233 = vector.shape_cast %232 : vector<1x1x4x128xf32> to vector<4x128xf32>
    %c72_226 = arith.constant 72 : index
    %c0_227 = arith.constant 0 : index
    %234 = vector.load %arg8[%c72_226, %c0_227] : memref<108x128xf32, #tpu.memory_space<vmem>>, vector<4x128xf32>
    tpu.vector_store %arg8[%c72_226, %c0_227], %233 {strides = array<i32>} : memref<108x128xf32, #tpu.memory_space<vmem>>, vector<4x128xf32>,
    %235 = arith.index_cast %9 : i32 to index
    %c3_228 = arith.constant 3 : index
    %c0_229 = arith.constant 0 : index
    %c1_230 = arith.constant 1 : index
    %236 = vector.load %arg6[%235, %c3_228, %c0_229, %c1_230] : memref<2x10x4x256xf32, #tpu.memory_space<vmem>>, vector<1x1x4x128xf32>
    %237 = vector.shape_cast %236 : vector<1x1x4x128xf32> to vector<4x128xf32>
    %c76_231 = arith.constant 76 : index
    %c0_232 = arith.constant 0 : index
    %238 = vector.load %arg8[%c76_231, %c0_232] : memref<108x128xf32, #tpu.memory_space<vmem>>, vector<4x128xf32>
    tpu.vector_store %arg8[%c76_231, %c0_232], %237 {strides = array<i32>} : memref<108x128xf32, #tpu.memory_space<vmem>>, vector<4x128xf32>,
    %239 = arith.index_cast %9 : i32 to index
    %c3_233 = arith.constant 3 : index
    %c0_234 = arith.constant 0 : index
    %c2_235 = arith.constant 2 : index
    %240 = vector.load %arg6[%239, %c3_233, %c0_234, %c2_235] : memref<2x10x4x256xf32, #tpu.memory_space<vmem>>, vector<1x1x4x128xf32>
    %241 = vector.shape_cast %240 : vector<1x1x4x128xf32> to vector<4x128xf32>
    %c80_236 = arith.constant 80 : index
    %c0_237 = arith.constant 0 : index
    %242 = vector.load %arg8[%c80_236, %c0_237] : memref<108x128xf32, #tpu.memory_space<vmem>>, vector<4x128xf32>
    tpu.vector_store %arg8[%c80_236, %c0_237], %241 {strides = array<i32>} : memref<108x128xf32, #tpu.memory_space<vmem>>, vector<4x128xf32>,
    %243 = arith.index_cast %9 : i32 to index
    %c3_238 = arith.constant 3 : index
    %c0_239 = arith.constant 0 : index
    %c10_240 = arith.constant 10 : index
    %244 = vector.load %arg6[%243, %c3_238, %c0_239, %c10_240] : memref<2x10x4x256xf32, #tpu.memory_space<vmem>>, vector<1x1x4x128xf32>
    %245 = vector.shape_cast %244 : vector<1x1x4x128xf32> to vector<4x128xf32>
    %c84_241 = arith.constant 84 : index
    %c0_242 = arith.constant 0 : index
    %246 = vector.load %arg8[%c84_241, %c0_242] : memref<108x128xf32, #tpu.memory_space<vmem>>, vector<4x128xf32>
    tpu.vector_store %arg8[%c84_241, %c0_242], %245 {strides = array<i32>} : memref<108x128xf32, #tpu.memory_space<vmem>>, vector<4x128xf32>,
    %247 = arith.index_cast %9 : i32 to index
    %c3_243 = arith.constant 3 : index
    %c0_244 = arith.constant 0 : index
    %c11_245 = arith.constant 11 : index
    %248 = vector.load %arg6[%247, %c3_243, %c0_244, %c11_245] : memref<2x10x4x256xf32, #tpu.memory_space<vmem>>, vector<1x1x4x128xf32>
    %249 = vector.shape_cast %248 : vector<1x1x4x128xf32> to vector<4x128xf32>
    %c88_246 = arith.constant 88 : index
    %c0_247 = arith.constant 0 : index
    %250 = vector.load %arg8[%c88_246, %c0_247] : memref<108x128xf32, #tpu.memory_space<vmem>>, vector<4x128xf32>
    tpu.vector_store %arg8[%c88_246, %c0_247], %249 {strides = array<i32>} : memref<108x128xf32, #tpu.memory_space<vmem>>, vector<4x128xf32>,
    %251 = arith.index_cast %9 : i32 to index
    %c3_248 = arith.constant 3 : index
    %c0_249 = arith.constant 0 : index
    %c12_250 = arith.constant 12 : index
    %252 = vector.load %arg6[%251, %c3_248, %c0_249, %c12_250] : memref<2x10x4x256xf32, #tpu.memory_space<vmem>>, vector<1x1x4x128xf32>
    %253 = vector.shape_cast %252 : vector<1x1x4x128xf32> to vector<4x128xf32>
    %c92_251 = arith.constant 92 : index
    %c0_252 = arith.constant 0 : index
    %254 = vector.load %arg8[%c92_251, %c0_252] : memref<108x128xf32, #tpu.memory_space<vmem>>, vector<4x128xf32>
    tpu.vector_store %arg8[%c92_251, %c0_252], %253 {strides = array<i32>} : memref<108x128xf32, #tpu.memory_space<vmem>>, vector<4x128xf32>,
    %255 = arith.index_cast %9 : i32 to index
    %c3_253 = arith.constant 3 : index
    %c0_254 = arith.constant 0 : index
    %c20_255 = arith.constant 20 : index
    %256 = vector.load %arg6[%255, %c3_253, %c0_254, %c20_255] : memref<2x10x4x256xf32, #tpu.memory_space<vmem>>, vector<1x1x4x128xf32>
    %257 = vector.shape_cast %256 : vector<1x1x4x128xf32> to vector<4x128xf32>
    %c96_256 = arith.constant 96 : index
    %c0_257 = arith.constant 0 : index
    %258 = vector.load %arg8[%c96_256, %c0_257] : memref<108x128xf32, #tpu.memory_space<vmem>>, vector<4x128xf32>
    tpu.vector_store %arg8[%c96_256, %c0_257], %257 {strides = array<i32>} : memref<108x128xf32, #tpu.memory_space<vmem>>, vector<4x128xf32>,
    %259 = arith.index_cast %9 : i32 to index
    %c3_258 = arith.constant 3 : index
    %c0_259 = arith.constant 0 : index
    %c21_260 = arith.constant 21 : index
    %260 = vector.load %arg6[%259, %c3_258, %c0_259, %c21_260] : memref<2x10x4x256xf32, #tpu.memory_space<vmem>>, vector<1x1x4x128xf32>
    %261 = vector.shape_cast %260 : vector<1x1x4x128xf32> to vector<4x128xf32>
    %c100_261 = arith.constant 100 : index
    %c0_262 = arith.constant 0 : index
    %262 = vector.load %arg8[%c100_261, %c0_262] : memref<108x128xf32, #tpu.memory_space<vmem>>, vector<4x128xf32>
    tpu.vector_store %arg8[%c100_261, %c0_262], %261 {strides = array<i32>} : memref<108x128xf32, #tpu.memory_space<vmem>>, vector<4x128xf32>,
    %263 = arith.index_cast %9 : i32 to index
    %c3_263 = arith.constant 3 : index
    %c0_264 = arith.constant 0 : index
    %c22_265 = arith.constant 22 : index
    %264 = vector.load %arg6[%263, %c3_263, %c0_264, %c22_265] : memref<2x10x4x256xf32, #tpu.memory_space<vmem>>, vector<1x1x4x128xf32>
    %265 = vector.shape_cast %264 : vector<1x1x4x128xf32> to vector<4x128xf32>
    %c104_266 = arith.constant 104 : index
    %c0_267 = arith.constant 0 : index
    %266 = vector.load %arg8[%c104_266, %c0_267] : memref<108x128xf32, #tpu.memory_space<vmem>>, vector<4x128xf32>
    tpu.vector_store %arg8[%c104_266, %c0_267], %265 {strides = array<i32>} : memref<108x128xf32, #tpu.memory_space<vmem>>, vector<4x128xf32>,
    %c0_268 = arith.constant 0 : index
    %c0_269 = arith.constant 0 : index
    %267 = vector.load %arg8[%c0_268, %c0_269] : memref<108x128xf32, #tpu.memory_space<vmem>>, vector<108x128xf32>
    %cst_270 = arith.constant dense<0.000000e+00> : vector<8x128xf32>
    %268 = tpu.matmul %24, %267, %cst_270 {dimension_numbers = #tpu.dot_dimension_numbers<[1], [0], [0], [1], [0, 0, 1, 1], [], []>} : vector<8x108xf32>, vector<108x128xf32>, vector<8x128xf32> -> vector<8x128xf32>
    %269 = vector.broadcast %25 : vector<1x128xf32> to vector<8x128xf32>
    %270 = arith.mulf %268, %269 : vector<8x128xf32>
    %c0_271 = arith.constant 0 : index
    %271 = arith.index_cast %158 : i32 to index
    %c0_272 = arith.constant 0 : index
    %c0_273 = arith.constant 0 : index
    %272 = vector.load %arg5[%c0_271, %271, %c0_272, %c0_273] : memref<1x8x8x128xf32, #tpu.memory_space<vmem>>, vector<1x1x8x128xf32>
    %273 = vector.shape_cast %272 : vector<1x1x8x128xf32> to vector<8x128xf32>
    %274 = vector.shape_cast %270 : vector<8x128xf32> to vector<1x1x8x128xf32>
    tpu.vector_store %arg5[%c0_271, %271, %c0_272, %c0_273], %274 {strides = array<i32>} : memref<1x8x8x128xf32, #tpu.memory_space<vmem>>, vector<1x1x8x128xf32>,
    %cst_274 = arith.constant dense<0.000000e+00> : vector<8xf32>
    %275 = vector.multi_reduction <add>, %270, %cst_274 [1] : vector<8x128xf32> to vector<8xf32>
    %276 = vector.shape_cast %275 : vector<8xf32> to vector<8x1xf32>
    %cst_275 = arith.constant 1.000000e+00 : f32
    %277 = vector.broadcast %cst_275 : f32 to vector<8x1xf32>
    %278 = arith.mulf %277, %276 : vector<8x1xf32>
    %279 = arith.addf %150, %278 : vector<8x1xf32>
    %280 = arith.mulf %270, %270 : vector<8x128xf32>
    %cst_276 = arith.constant dense<0.000000e+00> : vector<8xf32>
    %281 = vector.multi_reduction <add>, %280, %cst_276 [1] : vector<8x128xf32> to vector<8xf32>
    %282 = vector.shape_cast %281 : vector<8xf32> to vector<8x1xf32>
    %cst_277 = arith.constant 1.000000e+00 : f32
    %283 = vector.broadcast %cst_277 : f32 to vector<8x1xf32>
    %284 = arith.mulf %283, %282 : vector<8x1xf32>
    %285 = arith.addf %156, %284 : vector<8x1xf32>
    %c8_i32_278 = arith.constant 8 : i32
    %286 = arith.muli %arg1, %c8_i32_278 : i32
    %c2_i32_279 = arith.constant 2 : i32
    %287 = arith.addi %286, %c2_i32_279 : i32
    %288 = arith.index_cast %9 : i32 to index
    %c2_280 = arith.constant 2 : index
    %c0_281 = arith.constant 0 : index
    %c0_282 = arith.constant 0 : index
    %289 = vector.load %arg6[%288, %c2_280, %c0_281, %c0_282] : memref<2x10x4x256xf32, #tpu.memory_space<vmem>>, vector<1x1x4x128xf32>
    %290 = vector.shape_cast %289 : vector<1x1x4x128xf32> to vector<4x128xf32>
    %c0_283 = arith.constant 0 : index
    %c0_284 = arith.constant 0 : index
    %291 = vector.load %arg8[%c0_283, %c0_284] : memref<108x128xf32, #tpu.memory_space<vmem>>, vector<4x128xf32>
    tpu.vector_store %arg8[%c0_283, %c0_284], %290 {strides = array<i32>} : memref<108x128xf32, #tpu.memory_space<vmem>>, vector<4x128xf32>,
    %292 = arith.index_cast %9 : i32 to index
    %c2_285 = arith.constant 2 : index
    %c0_286 = arith.constant 0 : index
    %c1_287 = arith.constant 1 : index
    %293 = vector.load %arg6[%292, %c2_285, %c0_286, %c1_287] : memref<2x10x4x256xf32, #tpu.memory_space<vmem>>, vector<1x1x4x128xf32>
    %294 = vector.shape_cast %293 : vector<1x1x4x128xf32> to vector<4x128xf32>
    %c4_288 = arith.constant 4 : index
    %c0_289 = arith.constant 0 : index
    %295 = vector.load %arg8[%c4_288, %c0_289] : memref<108x128xf32, #tpu.memory_space<vmem>>, vector<4x128xf32>
    tpu.vector_store %arg8[%c4_288, %c0_289], %294 {strides = array<i32>} : memref<108x128xf32, #tpu.memory_space<vmem>>, vector<4x128xf32>,
    %296 = arith.index_cast %9 : i32 to index
    %c2_290 = arith.constant 2 : index
    %c0_291 = arith.constant 0 : index
    %c2_292 = arith.constant 2 : index
    %297 = vector.load %arg6[%296, %c2_290, %c0_291, %c2_292] : memref<2x10x4x256xf32, #tpu.memory_space<vmem>>, vector<1x1x4x128xf32>
    %298 = vector.shape_cast %297 : vector<1x1x4x128xf32> to vector<4x128xf32>
    %c8_293 = arith.constant 8 : index
    %c0_294 = arith.constant 0 : index
    %299 = vector.load %arg8[%c8_293, %c0_294] : memref<108x128xf32, #tpu.memory_space<vmem>>, vector<4x128xf32>
    tpu.vector_store %arg8[%c8_293, %c0_294], %298 {strides = array<i32>} : memref<108x128xf32, #tpu.memory_space<vmem>>, vector<4x128xf32>,
    %300 = arith.index_cast %9 : i32 to index
    %c2_295 = arith.constant 2 : index
    %c0_296 = arith.constant 0 : index
    %c10_297 = arith.constant 10 : index
    %301 = vector.load %arg6[%300, %c2_295, %c0_296, %c10_297] : memref<2x10x4x256xf32, #tpu.memory_space<vmem>>, vector<1x1x4x128xf32>
    %302 = vector.shape_cast %301 : vector<1x1x4x128xf32> to vector<4x128xf32>
    %c12_298 = arith.constant 12 : index
    %c0_299 = arith.constant 0 : index
    %303 = vector.load %arg8[%c12_298, %c0_299] : memref<108x128xf32, #tpu.memory_space<vmem>>, vector<4x128xf32>
    tpu.vector_store %arg8[%c12_298, %c0_299], %302 {strides = array<i32>} : memref<108x128xf32, #tpu.memory_space<vmem>>, vector<4x128xf32>,
    %304 = arith.index_cast %9 : i32 to index
    %c2_300 = arith.constant 2 : index
    %c0_301 = arith.constant 0 : index
    %c11_302 = arith.constant 11 : index
    %305 = vector.load %arg6[%304, %c2_300, %c0_301, %c11_302] : memref<2x10x4x256xf32, #tpu.memory_space<vmem>>, vector<1x1x4x128xf32>
    %306 = vector.shape_cast %305 : vector<1x1x4x128xf32> to vector<4x128xf32>
    %c16_303 = arith.constant 16 : index
    %c0_304 = arith.constant 0 : index
    %307 = vector.load %arg8[%c16_303, %c0_304] : memref<108x128xf32, #tpu.memory_space<vmem>>, vector<4x128xf32>
    tpu.vector_store %arg8[%c16_303, %c0_304], %306 {strides = array<i32>} : memref<108x128xf32, #tpu.memory_space<vmem>>, vector<4x128xf32>,
    %308 = arith.index_cast %9 : i32 to index
    %c2_305 = arith.constant 2 : index
    %c0_306 = arith.constant 0 : index
    %c12_307 = arith.constant 12 : index
    %309 = vector.load %arg6[%308, %c2_305, %c0_306, %c12_307] : memref<2x10x4x256xf32, #tpu.memory_space<vmem>>, vector<1x1x4x128xf32>
    %310 = vector.shape_cast %309 : vector<1x1x4x128xf32> to vector<4x128xf32>
    %c20_308 = arith.constant 20 : index
    %c0_309 = arith.constant 0 : index
    %311 = vector.load %arg8[%c20_308, %c0_309] : memref<108x128xf32, #tpu.memory_space<vmem>>, vector<4x128xf32>
    tpu.vector_store %arg8[%c20_308, %c0_309], %310 {strides = array<i32>} : memref<108x128xf32, #tpu.memory_space<vmem>>, vector<4x128xf32>,
    %312 = arith.index_cast %9 : i32 to index
    %c2_310 = arith.constant 2 : index
    %c0_311 = arith.constant 0 : index
    %c20_312 = arith.constant 20 : index
    %313 = vector.load %arg6[%312, %c2_310, %c0_311, %c20_312] : memref<2x10x4x256xf32, #tpu.memory_space<vmem>>, vector<1x1x4x128xf32>
    %314 = vector.shape_cast %313 : vector<1x1x4x128xf32> to vector<4x128xf32>
    %c24_313 = arith.constant 24 : index
    %c0_314 = arith.constant 0 : index
    %315 = vector.load %arg8[%c24_313, %c0_314] : memref<108x128xf32, #tpu.memory_space<vmem>>, vector<4x128xf32>
    tpu.vector_store %arg8[%c24_313, %c0_314], %314 {strides = array<i32>} : memref<108x128xf32, #tpu.memory_space<vmem>>, vector<4x128xf32>,
    %316 = arith.index_cast %9 : i32 to index
    %c2_315 = arith.constant 2 : index
    %c0_316 = arith.constant 0 : index
    %c21_317 = arith.constant 21 : index
    %317 = vector.load %arg6[%316, %c2_315, %c0_316, %c21_317] : memref<2x10x4x256xf32, #tpu.memory_space<vmem>>, vector<1x1x4x128xf32>
    %318 = vector.shape_cast %317 : vector<1x1x4x128xf32> to vector<4x128xf32>
    %c28_318 = arith.constant 28 : index
    %c0_319 = arith.constant 0 : index
    %319 = vector.load %arg8[%c28_318, %c0_319] : memref<108x128xf32, #tpu.memory_space<vmem>>, vector<4x128xf32>
    tpu.vector_store %arg8[%c28_318, %c0_319], %318 {strides = array<i32>} : memref<108x128xf32, #tpu.memory_space<vmem>>, vector<4x128xf32>,
    %320 = arith.index_cast %9 : i32 to index
    %c2_320 = arith.constant 2 : index
    %c0_321 = arith.constant 0 : index
    %c22_322 = arith.constant 22 : index
    %321 = vector.load %arg6[%320, %c2_320, %c0_321, %c22_322] : memref<2x10x4x256xf32, #tpu.memory_space<vmem>>, vector<1x1x4x128xf32>
    %322 = vector.shape_cast %321 : vector<1x1x4x128xf32> to vector<4x128xf32>
    %c32_323 = arith.constant 32 : index
    %c0_324 = arith.constant 0 : index
    %323 = vector.load %arg8[%c32_323, %c0_324] : memref<108x128xf32, #tpu.memory_space<vmem>>, vector<4x128xf32>
    tpu.vector_store %arg8[%c32_323, %c0_324], %322 {strides = array<i32>} : memref<108x128xf32, #tpu.memory_space<vmem>>, vector<4x128xf32>,
    %324 = arith.index_cast %9 : i32 to index
    %c3_325 = arith.constant 3 : index
    %c0_326 = arith.constant 0 : index
    %c0_327 = arith.constant 0 : index
    %325 = vector.load %arg6[%324, %c3_325, %c0_326, %c0_327] : memref<2x10x4x256xf32, #tpu.memory_space<vmem>>, vector<1x1x4x128xf32>
    %326 = vector.shape_cast %325 : vector<1x1x4x128xf32> to vector<4x128xf32>
    %c36_328 = arith.constant 36 : index
    %c0_329 = arith.constant 0 : index
    %327 = vector.load %arg8[%c36_328, %c0_329] : memref<108x128xf32, #tpu.memory_space<vmem>>, vector<4x128xf32>
    tpu.vector_store %arg8[%c36_328, %c0_329], %326 {strides = array<i32>} : memref<108x128xf32, #tpu.memory_space<vmem>>, vector<4x128xf32>,
    %328 = arith.index_cast %9 : i32 to index
    %c3_330 = arith.constant 3 : index
    %c0_331 = arith.constant 0 : index
    %c1_332 = arith.constant 1 : index
    %329 = vector.load %arg6[%328, %c3_330, %c0_331, %c1_332] : memref<2x10x4x256xf32, #tpu.memory_space<vmem>>, vector<1x1x4x128xf32>
    %330 = vector.shape_cast %329 : vector<1x1x4x128xf32> to vector<4x128xf32>
    %c40_333 = arith.constant 40 : index
    %c0_334 = arith.constant 0 : index
    %331 = vector.load %arg8[%c40_333, %c0_334] : memref<108x128xf32, #tpu.memory_space<vmem>>, vector<4x128xf32>
    tpu.vector_store %arg8[%c40_333, %c0_334], %330 {strides = array<i32>} : memref<108x128xf32, #tpu.memory_space<vmem>>, vector<4x128xf32>,
    %332 = arith.index_cast %9 : i32 to index
    %c3_335 = arith.constant 3 : index
    %c0_336 = arith.constant 0 : index
    %c2_337 = arith.constant 2 : index
    %333 = vector.load %arg6[%332, %c3_335, %c0_336, %c2_337] : memref<2x10x4x256xf32, #tpu.memory_space<vmem>>, vector<1x1x4x128xf32>
    %334 = vector.shape_cast %333 : vector<1x1x4x128xf32> to vector<4x128xf32>
    %c44_338 = arith.constant 44 : index
    %c0_339 = arith.constant 0 : index
    %335 = vector.load %arg8[%c44_338, %c0_339] : memref<108x128xf32, #tpu.memory_space<vmem>>, vector<4x128xf32>
    tpu.vector_store %arg8[%c44_338, %c0_339], %334 {strides = array<i32>} : memref<108x128xf32, #tpu.memory_space<vmem>>, vector<4x128xf32>,
    %336 = arith.index_cast %9 : i32 to index
    %c3_340 = arith.constant 3 : index
    %c0_341 = arith.constant 0 : index
    %c10_342 = arith.constant 10 : index
    %337 = vector.load %arg6[%336, %c3_340, %c0_341, %c10_342] : memref<2x10x4x256xf32, #tpu.memory_space<vmem>>, vector<1x1x4x128xf32>
    %338 = vector.shape_cast %337 : vector<1x1x4x128xf32> to vector<4x128xf32>
    %c48_343 = arith.constant 48 : index
    %c0_344 = arith.constant 0 : index
    %339 = vector.load %arg8[%c48_343, %c0_344] : memref<108x128xf32, #tpu.memory_space<vmem>>, vector<4x128xf32>
    tpu.vector_store %arg8[%c48_343, %c0_344], %338 {strides = array<i32>} : memref<108x128xf32, #tpu.memory_space<vmem>>, vector<4x128xf32>,
    %340 = arith.index_cast %9 : i32 to index
    %c3_345 = arith.constant 3 : index
    %c0_346 = arith.constant 0 : index
    %c11_347 = arith.constant 11 : index
    %341 = vector.load %arg6[%340, %c3_345, %c0_346, %c11_347] : memref<2x10x4x256xf32, #tpu.memory_space<vmem>>, vector<1x1x4x128xf32>
    %342 = vector.shape_cast %341 : vector<1x1x4x128xf32> to vector<4x128xf32>
    %c52_348 = arith.constant 52 : index
    %c0_349 = arith.constant 0 : index
    %343 = vector.load %arg8[%c52_348, %c0_349] : memref<108x128xf32, #tpu.memory_space<vmem>>, vector<4x128xf32>
    tpu.vector_store %arg8[%c52_348, %c0_349], %342 {strides = array<i32>} : memref<108x128xf32, #tpu.memory_space<vmem>>, vector<4x128xf32>,
    %344 = arith.index_cast %9 : i32 to index
    %c3_350 = arith.constant 3 : index
    %c0_351 = arith.constant 0 : index
    %c12_352 = arith.constant 12 : index
    %345 = vector.load %arg6[%344, %c3_350, %c0_351, %c12_352] : memref<2x10x4x256xf32, #tpu.memory_space<vmem>>, vector<1x1x4x128xf32>
    %346 = vector.shape_cast %345 : vector<1x1x4x128xf32> to vector<4x128xf32>
    %c56_353 = arith.constant 56 : index
    %c0_354 = arith.constant 0 : index
    %347 = vector.load %arg8[%c56_353, %c0_354] : memref<108x128xf32, #tpu.memory_space<vmem>>, vector<4x128xf32>
    tpu.vector_store %arg8[%c56_353, %c0_354], %346 {strides = array<i32>} : memref<108x128xf32, #tpu.memory_space<vmem>>, vector<4x128xf32>,
    %348 = arith.index_cast %9 : i32 to index
    %c3_355 = arith.constant 3 : index
    %c0_356 = arith.constant 0 : index
    %c20_357 = arith.constant 20 : index
    %349 = vector.load %arg6[%348, %c3_355, %c0_356, %c20_357] : memref<2x10x4x256xf32, #tpu.memory_space<vmem>>, vector<1x1x4x128xf32>
    %350 = vector.shape_cast %349 : vector<1x1x4x128xf32> to vector<4x128xf32>
    %c60_358 = arith.constant 60 : index
    %c0_359 = arith.constant 0 : index
    %351 = vector.load %arg8[%c60_358, %c0_359] : memref<108x128xf32, #tpu.memory_space<vmem>>, vector<4x128xf32>
    tpu.vector_store %arg8[%c60_358, %c0_359], %350 {strides = array<i32>} : memref<108x128xf32, #tpu.memory_space<vmem>>, vector<4x128xf32>,
    %352 = arith.index_cast %9 : i32 to index
    %c3_360 = arith.constant 3 : index
    %c0_361 = arith.constant 0 : index
    %c21_362 = arith.constant 21 : index
    %353 = vector.load %arg6[%352, %c3_360, %c0_361, %c21_362] : memref<2x10x4x256xf32, #tpu.memory_space<vmem>>, vector<1x1x4x128xf32>
    %354 = vector.shape_cast %353 : vector<1x1x4x128xf32> to vector<4x128xf32>
    %c64_363 = arith.constant 64 : index
    %c0_364 = arith.constant 0 : index
    %355 = vector.load %arg8[%c64_363, %c0_364] : memref<108x128xf32, #tpu.memory_space<vmem>>, vector<4x128xf32>
    tpu.vector_store %arg8[%c64_363, %c0_364], %354 {strides = array<i32>} : memref<108x128xf32, #tpu.memory_space<vmem>>, vector<4x128xf32>,
    %356 = arith.index_cast %9 : i32 to index
    %c3_365 = arith.constant 3 : index
    %c0_366 = arith.constant 0 : index
    %c22_367 = arith.constant 22 : index
    %357 = vector.load %arg6[%356, %c3_365, %c0_366, %c22_367] : memref<2x10x4x256xf32, #tpu.memory_space<vmem>>, vector<1x1x4x128xf32>
    %358 = vector.shape_cast %357 : vector<1x1x4x128xf32> to vector<4x128xf32>
    %c68_368 = arith.constant 68 : index
    %c0_369 = arith.constant 0 : index
    %359 = vector.load %arg8[%c68_368, %c0_369] : memref<108x128xf32, #tpu.memory_space<vmem>>, vector<4x128xf32>
    tpu.vector_store %arg8[%c68_368, %c0_369], %358 {strides = array<i32>} : memref<108x128xf32, #tpu.memory_space<vmem>>, vector<4x128xf32>,
    %360 = arith.index_cast %9 : i32 to index
    %c4_370 = arith.constant 4 : index
    %c0_371 = arith.constant 0 : index
    %c0_372 = arith.constant 0 : index
    %361 = vector.load %arg6[%360, %c4_370, %c0_371, %c0_372] : memref<2x10x4x256xf32, #tpu.memory_space<vmem>>, vector<1x1x4x128xf32>
    %362 = vector.shape_cast %361 : vector<1x1x4x128xf32> to vector<4x128xf32>
    %c72_373 = arith.constant 72 : index
    %c0_374 = arith.constant 0 : index
    %363 = vector.load %arg8[%c72_373, %c0_374] : memref<108x128xf32, #tpu.memory_space<vmem>>, vector<4x128xf32>
    tpu.vector_store %arg8[%c72_373, %c0_374], %362 {strides = array<i32>} : memref<108x128xf32, #tpu.memory_space<vmem>>, vector<4x128xf32>,
    %364 = arith.index_cast %9 : i32 to index
    %c4_375 = arith.constant 4 : index
    %c0_376 = arith.constant 0 : index
    %c1_377 = arith.constant 1 : index
    %365 = vector.load %arg6[%364, %c4_375, %c0_376, %c1_377] : memref<2x10x4x256xf32, #tpu.memory_space<vmem>>, vector<1x1x4x128xf32>
    %366 = vector.shape_cast %365 : vector<1x1x4x128xf32> to vector<4x128xf32>
    %c76_378 = arith.constant 76 : index
    %c0_379 = arith.constant 0 : index
    %367 = vector.load %arg8[%c76_378, %c0_379] : memref<108x128xf32, #tpu.memory_space<vmem>>, vector<4x128xf32>
    tpu.vector_store %arg8[%c76_378, %c0_379], %366 {strides = array<i32>} : memref<108x128xf32, #tpu.memory_space<vmem>>, vector<4x128xf32>,
    %368 = arith.index_cast %9 : i32 to index
    %c4_380 = arith.constant 4 : index
    %c0_381 = arith.constant 0 : index
    %c2_382 = arith.constant 2 : index
    %369 = vector.load %arg6[%368, %c4_380, %c0_381, %c2_382] : memref<2x10x4x256xf32, #tpu.memory_space<vmem>>, vector<1x1x4x128xf32>
    %370 = vector.shape_cast %369 : vector<1x1x4x128xf32> to vector<4x128xf32>
    %c80_383 = arith.constant 80 : index
    %c0_384 = arith.constant 0 : index
    %371 = vector.load %arg8[%c80_383, %c0_384] : memref<108x128xf32, #tpu.memory_space<vmem>>, vector<4x128xf32>
    tpu.vector_store %arg8[%c80_383, %c0_384], %370 {strides = array<i32>} : memref<108x128xf32, #tpu.memory_space<vmem>>, vector<4x128xf32>,
    %372 = arith.index_cast %9 : i32 to index
    %c4_385 = arith.constant 4 : index
    %c0_386 = arith.constant 0 : index
    %c10_387 = arith.constant 10 : index
    %373 = vector.load %arg6[%372, %c4_385, %c0_386, %c10_387] : memref<2x10x4x256xf32, #tpu.memory_space<vmem>>, vector<1x1x4x128xf32>
    %374 = vector.shape_cast %373 : vector<1x1x4x128xf32> to vector<4x128xf32>
    %c84_388 = arith.constant 84 : index
    %c0_389 = arith.constant 0 : index
    %375 = vector.load %arg8[%c84_388, %c0_389] : memref<108x128xf32, #tpu.memory_space<vmem>>, vector<4x128xf32>
    tpu.vector_store %arg8[%c84_388, %c0_389], %374 {strides = array<i32>} : memref<108x128xf32, #tpu.memory_space<vmem>>, vector<4x128xf32>,
    %376 = arith.index_cast %9 : i32 to index
    %c4_390 = arith.constant 4 : index
    %c0_391 = arith.constant 0 : index
    %c11_392 = arith.constant 11 : index
    %377 = vector.load %arg6[%376, %c4_390, %c0_391, %c11_392] : memref<2x10x4x256xf32, #tpu.memory_space<vmem>>, vector<1x1x4x128xf32>
    %378 = vector.shape_cast %377 : vector<1x1x4x128xf32> to vector<4x128xf32>
    %c88_393 = arith.constant 88 : index
    %c0_394 = arith.constant 0 : index
    %379 = vector.load %arg8[%c88_393, %c0_394] : memref<108x128xf32, #tpu.memory_space<vmem>>, vector<4x128xf32>
    tpu.vector_store %arg8[%c88_393, %c0_394], %378 {strides = array<i32>} : memref<108x128xf32, #tpu.memory_space<vmem>>, vector<4x128xf32>,
    %380 = arith.index_cast %9 : i32 to index
    %c4_395 = arith.constant 4 : index
    %c0_396 = arith.constant 0 : index
    %c12_397 = arith.constant 12 : index
    %381 = vector.load %arg6[%380, %c4_395, %c0_396, %c12_397] : memref<2x10x4x256xf32, #tpu.memory_space<vmem>>, vector<1x1x4x128xf32>
    %382 = vector.shape_cast %381 : vector<1x1x4x128xf32> to vector<4x128xf32>
    %c92_398 = arith.constant 92 : index
    %c0_399 = arith.constant 0 : index
    %383 = vector.load %arg8[%c92_398, %c0_399] : memref<108x128xf32, #tpu.memory_space<vmem>>, vector<4x128xf32>
    tpu.vector_store %arg8[%c92_398, %c0_399], %382 {strides = array<i32>} : memref<108x128xf32, #tpu.memory_space<vmem>>, vector<4x128xf32>,
    %384 = arith.index_cast %9 : i32 to index
    %c4_400 = arith.constant 4 : index
    %c0_401 = arith.constant 0 : index
    %c20_402 = arith.constant 20 : index
    %385 = vector.load %arg6[%384, %c4_400, %c0_401, %c20_402] : memref<2x10x4x256xf32, #tpu.memory_space<vmem>>, vector<1x1x4x128xf32>
    %386 = vector.shape_cast %385 : vector<1x1x4x128xf32> to vector<4x128xf32>
    %c96_403 = arith.constant 96 : index
    %c0_404 = arith.constant 0 : index
    %387 = vector.load %arg8[%c96_403, %c0_404] : memref<108x128xf32, #tpu.memory_space<vmem>>, vector<4x128xf32>
    tpu.vector_store %arg8[%c96_403, %c0_404], %386 {strides = array<i32>} : memref<108x128xf32, #tpu.memory_space<vmem>>, vector<4x128xf32>,
    %388 = arith.index_cast %9 : i32 to index
    %c4_405 = arith.constant 4 : index
    %c0_406 = arith.constant 0 : index
    %c21_407 = arith.constant 21 : index
    %389 = vector.load %arg6[%388, %c4_405, %c0_406, %c21_407] : memref<2x10x4x256xf32, #tpu.memory_space<vmem>>, vector<1x1x4x128xf32>
    %390 = vector.shape_cast %389 : vector<1x1x4x128xf32> to vector<4x128xf32>
    %c100_408 = arith.constant 100 : index
    %c0_409 = arith.constant 0 : index
    %391 = vector.load %arg8[%c100_408, %c0_409] : memref<108x128xf32, #tpu.memory_space<vmem>>, vector<4x128xf32>
    tpu.vector_store %arg8[%c100_408, %c0_409], %390 {strides = array<i32>} : memref<108x128xf32, #tpu.memory_space<vmem>>, vector<4x128xf32>,
    %392 = arith.index_cast %9 : i32 to index
    %c4_410 = arith.constant 4 : index
    %c0_411 = arith.constant 0 : index
    %c22_412 = arith.constant 22 : index
    %393 = vector.load %arg6[%392, %c4_410, %c0_411, %c22_412] : memref<2x10x4x256xf32, #tpu.memory_space<vmem>>, vector<1x1x4x128xf32>
    %394 = vector.shape_cast %393 : vector<1x1x4x128xf32> to vector<4x128xf32>
    %c104_413 = arith.constant 104 : index
    %c0_414 = arith.constant 0 : index
    %395 = vector.load %arg8[%c104_413, %c0_414] : memref<108x128xf32, #tpu.memory_space<vmem>>, vector<4x128xf32>
    tpu.vector_store %arg8[%c104_413, %c0_414], %394 {strides = array<i32>} : memref<108x128xf32, #tpu.memory_space<vmem>>, vector<4x128xf32>,
    %c0_415 = arith.constant 0 : index
    %c0_416 = arith.constant 0 : index
    %396 = vector.load %arg8[%c0_415, %c0_416] : memref<108x128xf32, #tpu.memory_space<vmem>>, vector<108x128xf32>
    %cst_417 = arith.constant dense<0.000000e+00> : vector<8x128xf32>
    %397 = tpu.matmul %24, %396, %cst_417 {dimension_numbers = #tpu.dot_dimension_numbers<[1], [0], [0], [1], [0, 0, 1, 1], [], []>} : vector<8x108xf32>, vector<108x128xf32>, vector<8x128xf32> -> vector<8x128xf32>
    %398 = vector.broadcast %25 : vector<1x128xf32> to vector<8x128xf32>
    %399 = arith.mulf %397, %398 : vector<8x128xf32>
    %c0_418 = arith.constant 0 : index
    %400 = arith.index_cast %287 : i32 to index
    %c0_419 = arith.constant 0 : index
    %c0_420 = arith.constant 0 : index
    %401 = vector.load %arg5[%c0_418, %400, %c0_419, %c0_420] : memref<1x8x8x128xf32, #tpu.memory_space<vmem>>, vector<1x1x8x128xf32>
    %402 = vector.shape_cast %401 : vector<1x1x8x128xf32> to vector<8x128xf32>
    %403 = vector.shape_cast %399 : vector<8x128xf32> to vector<1x1x8x128xf32>
    tpu.vector_store %arg5[%c0_418, %400, %c0_419, %c0_420], %403 {strides = array<i32>} : memref<1x8x8x128xf32, #tpu.memory_space<vmem>>, vector<1x1x8x128xf32>,
    %cst_421 = arith.constant dense<0.000000e+00> : vector<8xf32>
    %404 = vector.multi_reduction <add>, %399, %cst_421 [1] : vector<8x128xf32> to vector<8xf32>
    %405 = vector.shape_cast %404 : vector<8xf32> to vector<8x1xf32>
    %cst_422 = arith.constant 1.000000e+00 : f32
    %406 = vector.broadcast %cst_422 : f32 to vector<8x1xf32>
    %407 = arith.mulf %406, %405 : vector<8x1xf32>
    %408 = arith.addf %279, %407 : vector<8x1xf32>
    %409 = arith.mulf %399, %399 : vector<8x128xf32>
    %cst_423 = arith.constant dense<0.000000e+00> : vector<8xf32>
    %410 = vector.multi_reduction <add>, %409, %cst_423 [1] : vector<8x128xf32> to vector<8xf32>
    %411 = vector.shape_cast %410 : vector<8xf32> to vector<8x1xf32>
    %cst_424 = arith.constant 1.000000e+00 : f32
    %412 = vector.broadcast %cst_424 : f32 to vector<8x1xf32>
    %413 = arith.mulf %412, %411 : vector<8x1xf32>
    %414 = arith.addf %285, %413 : vector<8x1xf32>
    %c8_i32_425 = arith.constant 8 : i32
    %415 = arith.muli %arg1, %c8_i32_425 : i32
    %c3_i32 = arith.constant 3 : i32
    %416 = arith.addi %415, %c3_i32 : i32
    %417 = arith.index_cast %9 : i32 to index
    %c3_426 = arith.constant 3 : index
    %c0_427 = arith.constant 0 : index
    %c0_428 = arith.constant 0 : index
    %418 = vector.load %arg6[%417, %c3_426, %c0_427, %c0_428] : memref<2x10x4x256xf32, #tpu.memory_space<vmem>>, vector<1x1x4x128xf32>
    %419 = vector.shape_cast %418 : vector<1x1x4x128xf32> to vector<4x128xf32>
    %c0_429 = arith.constant 0 : index
    %c0_430 = arith.constant 0 : index
    %420 = vector.load %arg8[%c0_429, %c0_430] : memref<108x128xf32, #tpu.memory_space<vmem>>, vector<4x128xf32>
    tpu.vector_store %arg8[%c0_429, %c0_430], %419 {strides = array<i32>} : memref<108x128xf32, #tpu.memory_space<vmem>>, vector<4x128xf32>,
    %421 = arith.index_cast %9 : i32 to index
    %c3_431 = arith.constant 3 : index
    %c0_432 = arith.constant 0 : index
    %c1_433 = arith.constant 1 : index
    %422 = vector.load %arg6[%421, %c3_431, %c0_432, %c1_433] : memref<2x10x4x256xf32, #tpu.memory_space<vmem>>, vector<1x1x4x128xf32>
    %423 = vector.shape_cast %422 : vector<1x1x4x128xf32> to vector<4x128xf32>
    %c4_434 = arith.constant 4 : index
    %c0_435 = arith.constant 0 : index
    %424 = vector.load %arg8[%c4_434, %c0_435] : memref<108x128xf32, #tpu.memory_space<vmem>>, vector<4x128xf32>
    tpu.vector_store %arg8[%c4_434, %c0_435], %423 {strides = array<i32>} : memref<108x128xf32, #tpu.memory_space<vmem>>, vector<4x128xf32>,
    %425 = arith.index_cast %9 : i32 to index
    %c3_436 = arith.constant 3 : index
    %c0_437 = arith.constant 0 : index
    %c2_438 = arith.constant 2 : index
    %426 = vector.load %arg6[%425, %c3_436, %c0_437, %c2_438] : memref<2x10x4x256xf32, #tpu.memory_space<vmem>>, vector<1x1x4x128xf32>
    %427 = vector.shape_cast %426 : vector<1x1x4x128xf32> to vector<4x128xf32>
    %c8_439 = arith.constant 8 : index
    %c0_440 = arith.constant 0 : index
    %428 = vector.load %arg8[%c8_439, %c0_440] : memref<108x128xf32, #tpu.memory_space<vmem>>, vector<4x128xf32>
    tpu.vector_store %arg8[%c8_439, %c0_440], %427 {strides = array<i32>} : memref<108x128xf32, #tpu.memory_space<vmem>>, vector<4x128xf32>,
    %429 = arith.index_cast %9 : i32 to index
    %c3_441 = arith.constant 3 : index
    %c0_442 = arith.constant 0 : index
    %c10_443 = arith.constant 10 : index
    %430 = vector.load %arg6[%429, %c3_441, %c0_442, %c10_443] : memref<2x10x4x256xf32, #tpu.memory_space<vmem>>, vector<1x1x4x128xf32>
    %431 = vector.shape_cast %430 : vector<1x1x4x128xf32> to vector<4x128xf32>
    %c12_444 = arith.constant 12 : index
    %c0_445 = arith.constant 0 : index
    %432 = vector.load %arg8[%c12_444, %c0_445] : memref<108x128xf32, #tpu.memory_space<vmem>>, vector<4x128xf32>
    tpu.vector_store %arg8[%c12_444, %c0_445], %431 {strides = array<i32>} : memref<108x128xf32, #tpu.memory_space<vmem>>, vector<4x128xf32>,
    %433 = arith.index_cast %9 : i32 to index
    %c3_446 = arith.constant 3 : index
    %c0_447 = arith.constant 0 : index
    %c11_448 = arith.constant 11 : index
    %434 = vector.load %arg6[%433, %c3_446, %c0_447, %c11_448] : memref<2x10x4x256xf32, #tpu.memory_space<vmem>>, vector<1x1x4x128xf32>
    %435 = vector.shape_cast %434 : vector<1x1x4x128xf32> to vector<4x128xf32>
    %c16_449 = arith.constant 16 : index
    %c0_450 = arith.constant 0 : index
    %436 = vector.load %arg8[%c16_449, %c0_450] : memref<108x128xf32, #tpu.memory_space<vmem>>, vector<4x128xf32>
    tpu.vector_store %arg8[%c16_449, %c0_450], %435 {strides = array<i32>} : memref<108x128xf32, #tpu.memory_space<vmem>>, vector<4x128xf32>,
    %437 = arith.index_cast %9 : i32 to index
    %c3_451 = arith.constant 3 : index
    %c0_452 = arith.constant 0 : index
    %c12_453 = arith.constant 12 : index
    %438 = vector.load %arg6[%437, %c3_451, %c0_452, %c12_453] : memref<2x10x4x256xf32, #tpu.memory_space<vmem>>, vector<1x1x4x128xf32>
    %439 = vector.shape_cast %438 : vector<1x1x4x128xf32> to vector<4x128xf32>
    %c20_454 = arith.constant 20 : index
    %c0_455 = arith.constant 0 : index
    %440 = vector.load %arg8[%c20_454, %c0_455] : memref<108x128xf32, #tpu.memory_space<vmem>>, vector<4x128xf32>
    tpu.vector_store %arg8[%c20_454, %c0_455], %439 {strides = array<i32>} : memref<108x128xf32, #tpu.memory_space<vmem>>, vector<4x128xf32>,
    %441 = arith.index_cast %9 : i32 to index
    %c3_456 = arith.constant 3 : index
    %c0_457 = arith.constant 0 : index
    %c20_458 = arith.constant 20 : index
    %442 = vector.load %arg6[%441, %c3_456, %c0_457, %c20_458] : memref<2x10x4x256xf32, #tpu.memory_space<vmem>>, vector<1x1x4x128xf32>
    %443 = vector.shape_cast %442 : vector<1x1x4x128xf32> to vector<4x128xf32>
    %c24_459 = arith.constant 24 : index
    %c0_460 = arith.constant 0 : index
    %444 = vector.load %arg8[%c24_459, %c0_460] : memref<108x128xf32, #tpu.memory_space<vmem>>, vector<4x128xf32>
    tpu.vector_store %arg8[%c24_459, %c0_460], %443 {strides = array<i32>} : memref<108x128xf32, #tpu.memory_space<vmem>>, vector<4x128xf32>,
    %445 = arith.index_cast %9 : i32 to index
    %c3_461 = arith.constant 3 : index
    %c0_462 = arith.constant 0 : index
    %c21_463 = arith.constant 21 : index
    %446 = vector.load %arg6[%445, %c3_461, %c0_462, %c21_463] : memref<2x10x4x256xf32, #tpu.memory_space<vmem>>, vector<1x1x4x128xf32>
    %447 = vector.shape_cast %446 : vector<1x1x4x128xf32> to vector<4x128xf32>
    %c28_464 = arith.constant 28 : index
    %c0_465 = arith.constant 0 : index
    %448 = vector.load %arg8[%c28_464, %c0_465] : memref<108x128xf32, #tpu.memory_space<vmem>>, vector<4x128xf32>
    tpu.vector_store %arg8[%c28_464, %c0_465], %447 {strides = array<i32>} : memref<108x128xf32, #tpu.memory_space<vmem>>, vector<4x128xf32>,
    %449 = arith.index_cast %9 : i32 to index
    %c3_466 = arith.constant 3 : index
    %c0_467 = arith.constant 0 : index
    %c22_468 = arith.constant 22 : index
    %450 = vector.load %arg6[%449, %c3_466, %c0_467, %c22_468] : memref<2x10x4x256xf32, #tpu.memory_space<vmem>>, vector<1x1x4x128xf32>
    %451 = vector.shape_cast %450 : vector<1x1x4x128xf32> to vector<4x128xf32>
    %c32_469 = arith.constant 32 : index
    %c0_470 = arith.constant 0 : index
    %452 = vector.load %arg8[%c32_469, %c0_470] : memref<108x128xf32, #tpu.memory_space<vmem>>, vector<4x128xf32>
    tpu.vector_store %arg8[%c32_469, %c0_470], %451 {strides = array<i32>} : memref<108x128xf32, #tpu.memory_space<vmem>>, vector<4x128xf32>,
    %453 = arith.index_cast %9 : i32 to index
    %c4_471 = arith.constant 4 : index
    %c0_472 = arith.constant 0 : index
    %c0_473 = arith.constant 0 : index
    %454 = vector.load %arg6[%453, %c4_471, %c0_472, %c0_473] : memref<2x10x4x256xf32, #tpu.memory_space<vmem>>, vector<1x1x4x128xf32>
    %455 = vector.shape_cast %454 : vector<1x1x4x128xf32> to vector<4x128xf32>
    %c36_474 = arith.constant 36 : index
    %c0_475 = arith.constant 0 : index
    %456 = vector.load %arg8[%c36_474, %c0_475] : memref<108x128xf32, #tpu.memory_space<vmem>>, vector<4x128xf32>
    tpu.vector_store %arg8[%c36_474, %c0_475], %455 {strides = array<i32>} : memref<108x128xf32, #tpu.memory_space<vmem>>, vector<4x128xf32>,
    %457 = arith.index_cast %9 : i32 to index
    %c4_476 = arith.constant 4 : index
    %c0_477 = arith.constant 0 : index
    %c1_478 = arith.constant 1 : index
    %458 = vector.load %arg6[%457, %c4_476, %c0_477, %c1_478] : memref<2x10x4x256xf32, #tpu.memory_space<vmem>>, vector<1x1x4x128xf32>
    %459 = vector.shape_cast %458 : vector<1x1x4x128xf32> to vector<4x128xf32>
    %c40_479 = arith.constant 40 : index
    %c0_480 = arith.constant 0 : index
    %460 = vector.load %arg8[%c40_479, %c0_480] : memref<108x128xf32, #tpu.memory_space<vmem>>, vector<4x128xf32>
    tpu.vector_store %arg8[%c40_479, %c0_480], %459 {strides = array<i32>} : memref<108x128xf32, #tpu.memory_space<vmem>>, vector<4x128xf32>,
    %461 = arith.index_cast %9 : i32 to index
    %c4_481 = arith.constant 4 : index
    %c0_482 = arith.constant 0 : index
    %c2_483 = arith.constant 2 : index
    %462 = vector.load %arg6[%461, %c4_481, %c0_482, %c2_483] : memref<2x10x4x256xf32, #tpu.memory_space<vmem>>, vector<1x1x4x128xf32>
    %463 = vector.shape_cast %462 : vector<1x1x4x128xf32> to vector<4x128xf32>
    %c44_484 = arith.constant 44 : index
    %c0_485 = arith.constant 0 : index
    %464 = vector.load %arg8[%c44_484, %c0_485] : memref<108x128xf32, #tpu.memory_space<vmem>>, vector<4x128xf32>
    tpu.vector_store %arg8[%c44_484, %c0_485], %463 {strides = array<i32>} : memref<108x128xf32, #tpu.memory_space<vmem>>, vector<4x128xf32>,
    %465 = arith.index_cast %9 : i32 to index
    %c4_486 = arith.constant 4 : index
    %c0_487 = arith.constant 0 : index
    %c10_488 = arith.constant 10 : index
    %466 = vector.load %arg6[%465, %c4_486, %c0_487, %c10_488] : memref<2x10x4x256xf32, #tpu.memory_space<vmem>>, vector<1x1x4x128xf32>
    %467 = vector.shape_cast %466 : vector<1x1x4x128xf32> to vector<4x128xf32>
    %c48_489 = arith.constant 48 : index
    %c0_490 = arith.constant 0 : index
    %468 = vector.load %arg8[%c48_489, %c0_490] : memref<108x128xf32, #tpu.memory_space<vmem>>, vector<4x128xf32>
    tpu.vector_store %arg8[%c48_489, %c0_490], %467 {strides = array<i32>} : memref<108x128xf32, #tpu.memory_space<vmem>>, vector<4x128xf32>,
    %469 = arith.index_cast %9 : i32 to index
    %c4_491 = arith.constant 4 : index
    %c0_492 = arith.constant 0 : index
    %c11_493 = arith.constant 11 : index
    %470 = vector.load %arg6[%469, %c4_491, %c0_492, %c11_493] : memref<2x10x4x256xf32, #tpu.memory_space<vmem>>, vector<1x1x4x128xf32>
    %471 = vector.shape_cast %470 : vector<1x1x4x128xf32> to vector<4x128xf32>
    %c52_494 = arith.constant 52 : index
    %c0_495 = arith.constant 0 : index
    %472 = vector.load %arg8[%c52_494, %c0_495] : memref<108x128xf32, #tpu.memory_space<vmem>>, vector<4x128xf32>
    tpu.vector_store %arg8[%c52_494, %c0_495], %471 {strides = array<i32>} : memref<108x128xf32, #tpu.memory_space<vmem>>, vector<4x128xf32>,
    %473 = arith.index_cast %9 : i32 to index
    %c4_496 = arith.constant 4 : index
    %c0_497 = arith.constant 0 : index
    %c12_498 = arith.constant 12 : index
    %474 = vector.load %arg6[%473, %c4_496, %c0_497, %c12_498] : memref<2x10x4x256xf32, #tpu.memory_space<vmem>>, vector<1x1x4x128xf32>
    %475 = vector.shape_cast %474 : vector<1x1x4x128xf32> to vector<4x128xf32>
    %c56_499 = arith.constant 56 : index
    %c0_500 = arith.constant 0 : index
    %476 = vector.load %arg8[%c56_499, %c0_500] : memref<108x128xf32, #tpu.memory_space<vmem>>, vector<4x128xf32>
    tpu.vector_store %arg8[%c56_499, %c0_500], %475 {strides = array<i32>} : memref<108x128xf32, #tpu.memory_space<vmem>>, vector<4x128xf32>,
    %477 = arith.index_cast %9 : i32 to index
    %c4_501 = arith.constant 4 : index
    %c0_502 = arith.constant 0 : index
    %c20_503 = arith.constant 20 : index
    %478 = vector.load %arg6[%477, %c4_501, %c0_502, %c20_503] : memref<2x10x4x256xf32, #tpu.memory_space<vmem>>, vector<1x1x4x128xf32>
    %479 = vector.shape_cast %478 : vector<1x1x4x128xf32> to vector<4x128xf32>
    %c60_504 = arith.constant 60 : index
    %c0_505 = arith.constant 0 : index
    %480 = vector.load %arg8[%c60_504, %c0_505] : memref<108x128xf32, #tpu.memory_space<vmem>>, vector<4x128xf32>
    tpu.vector_store %arg8[%c60_504, %c0_505], %479 {strides = array<i32>} : memref<108x128xf32, #tpu.memory_space<vmem>>, vector<4x128xf32>,
    %481 = arith.index_cast %9 : i32 to index
    %c4_506 = arith.constant 4 : index
    %c0_507 = arith.constant 0 : index
    %c21_508 = arith.constant 21 : index
    %482 = vector.load %arg6[%481, %c4_506, %c0_507, %c21_508] : memref<2x10x4x256xf32, #tpu.memory_space<vmem>>, vector<1x1x4x128xf32>
    %483 = vector.shape_cast %482 : vector<1x1x4x128xf32> to vector<4x128xf32>
    %c64_509 = arith.constant 64 : index
    %c0_510 = arith.constant 0 : index
    %484 = vector.load %arg8[%c64_509, %c0_510] : memref<108x128xf32, #tpu.memory_space<vmem>>, vector<4x128xf32>
    tpu.vector_store %arg8[%c64_509, %c0_510], %483 {strides = array<i32>} : memref<108x128xf32, #tpu.memory_space<vmem>>, vector<4x128xf32>,
    %485 = arith.index_cast %9 : i32 to index
    %c4_511 = arith.constant 4 : index
    %c0_512 = arith.constant 0 : index
    %c22_513 = arith.constant 22 : index
    %486 = vector.load %arg6[%485, %c4_511, %c0_512, %c22_513] : memref<2x10x4x256xf32, #tpu.memory_space<vmem>>, vector<1x1x4x128xf32>
    %487 = vector.shape_cast %486 : vector<1x1x4x128xf32> to vector<4x128xf32>
    %c68_514 = arith.constant 68 : index
    %c0_515 = arith.constant 0 : index
    %488 = vector.load %arg8[%c68_514, %c0_515] : memref<108x128xf32, #tpu.memory_space<vmem>>, vector<4x128xf32>
    tpu.vector_store %arg8[%c68_514, %c0_515], %487 {strides = array<i32>} : memref<108x128xf32, #tpu.memory_space<vmem>>, vector<4x128xf32>,
    %489 = arith.index_cast %9 : i32 to index
    %c5 = arith.constant 5 : index
    %c0_516 = arith.constant 0 : index
    %c0_517 = arith.constant 0 : index
    %490 = vector.load %arg6[%489, %c5, %c0_516, %c0_517] : memref<2x10x4x256xf32, #tpu.memory_space<vmem>>, vector<1x1x4x128xf32>
    %491 = vector.shape_cast %490 : vector<1x1x4x128xf32> to vector<4x128xf32>
    %c72_518 = arith.constant 72 : index
    %c0_519 = arith.constant 0 : index
    %492 = vector.load %arg8[%c72_518, %c0_519] : memref<108x128xf32, #tpu.memory_space<vmem>>, vector<4x128xf32>
    tpu.vector_store %arg8[%c72_518, %c0_519], %491 {strides = array<i32>} : memref<108x128xf32, #tpu.memory_space<vmem>>, vector<4x128xf32>,
    %493 = arith.index_cast %9 : i32 to index
    %c5_520 = arith.constant 5 : index
    %c0_521 = arith.constant 0 : index
    %c1_522 = arith.constant 1 : index
    %494 = vector.load %arg6[%493, %c5_520, %c0_521, %c1_522] : memref<2x10x4x256xf32, #tpu.memory_space<vmem>>, vector<1x1x4x128xf32>
    %495 = vector.shape_cast %494 : vector<1x1x4x128xf32> to vector<4x128xf32>
    %c76_523 = arith.constant 76 : index
    %c0_524 = arith.constant 0 : index
    %496 = vector.load %arg8[%c76_523, %c0_524] : memref<108x128xf32, #tpu.memory_space<vmem>>, vector<4x128xf32>
    tpu.vector_store %arg8[%c76_523, %c0_524], %495 {strides = array<i32>} : memref<108x128xf32, #tpu.memory_space<vmem>>, vector<4x128xf32>,
    %497 = arith.index_cast %9 : i32 to index
    %c5_525 = arith.constant 5 : index
    %c0_526 = arith.constant 0 : index
    %c2_527 = arith.constant 2 : index
    %498 = vector.load %arg6[%497, %c5_525, %c0_526, %c2_527] : memref<2x10x4x256xf32, #tpu.memory_space<vmem>>, vector<1x1x4x128xf32>
    %499 = vector.shape_cast %498 : vector<1x1x4x128xf32> to vector<4x128xf32>
    %c80_528 = arith.constant 80 : index
    %c0_529 = arith.constant 0 : index
    %500 = vector.load %arg8[%c80_528, %c0_529] : memref<108x128xf32, #tpu.memory_space<vmem>>, vector<4x128xf32>
    tpu.vector_store %arg8[%c80_528, %c0_529], %499 {strides = array<i32>} : memref<108x128xf32, #tpu.memory_space<vmem>>, vector<4x128xf32>,
    %501 = arith.index_cast %9 : i32 to index
    %c5_530 = arith.constant 5 : index
    %c0_531 = arith.constant 0 : index
    %c10_532 = arith.constant 10 : index
    %502 = vector.load %arg6[%501, %c5_530, %c0_531, %c10_532] : memref<2x10x4x256xf32, #tpu.memory_space<vmem>>, vector<1x1x4x128xf32>
    %503 = vector.shape_cast %502 : vector<1x1x4x128xf32> to vector<4x128xf32>
    %c84_533 = arith.constant 84 : index
    %c0_534 = arith.constant 0 : index
    %504 = vector.load %arg8[%c84_533, %c0_534] : memref<108x128xf32, #tpu.memory_space<vmem>>, vector<4x128xf32>
    tpu.vector_store %arg8[%c84_533, %c0_534], %503 {strides = array<i32>} : memref<108x128xf32, #tpu.memory_space<vmem>>, vector<4x128xf32>,
    %505 = arith.index_cast %9 : i32 to index
    %c5_535 = arith.constant 5 : index
    %c0_536 = arith.constant 0 : index
    %c11_537 = arith.constant 11 : index
    %506 = vector.load %arg6[%505, %c5_535, %c0_536, %c11_537] : memref<2x10x4x256xf32, #tpu.memory_space<vmem>>, vector<1x1x4x128xf32>
    %507 = vector.shape_cast %506 : vector<1x1x4x128xf32> to vector<4x128xf32>
    %c88_538 = arith.constant 88 : index
    %c0_539 = arith.constant 0 : index
    %508 = vector.load %arg8[%c88_538, %c0_539] : memref<108x128xf32, #tpu.memory_space<vmem>>, vector<4x128xf32>
    tpu.vector_store %arg8[%c88_538, %c0_539], %507 {strides = array<i32>} : memref<108x128xf32, #tpu.memory_space<vmem>>, vector<4x128xf32>,
    %509 = arith.index_cast %9 : i32 to index
    %c5_540 = arith.constant 5 : index
    %c0_541 = arith.constant 0 : index
    %c12_542 = arith.constant 12 : index
    %510 = vector.load %arg6[%509, %c5_540, %c0_541, %c12_542] : memref<2x10x4x256xf32, #tpu.memory_space<vmem>>, vector<1x1x4x128xf32>
    %511 = vector.shape_cast %510 : vector<1x1x4x128xf32> to vector<4x128xf32>
    %c92_543 = arith.constant 92 : index
    %c0_544 = arith.constant 0 : index
    %512 = vector.load %arg8[%c92_543, %c0_544] : memref<108x128xf32, #tpu.memory_space<vmem>>, vector<4x128xf32>
    tpu.vector_store %arg8[%c92_543, %c0_544], %511 {strides = array<i32>} : memref<108x128xf32, #tpu.memory_space<vmem>>, vector<4x128xf32>,
    %513 = arith.index_cast %9 : i32 to index
    %c5_545 = arith.constant 5 : index
    %c0_546 = arith.constant 0 : index
    %c20_547 = arith.constant 20 : index
    %514 = vector.load %arg6[%513, %c5_545, %c0_546, %c20_547] : memref<2x10x4x256xf32, #tpu.memory_space<vmem>>, vector<1x1x4x128xf32>
    %515 = vector.shape_cast %514 : vector<1x1x4x128xf32> to vector<4x128xf32>
    %c96_548 = arith.constant 96 : index
    %c0_549 = arith.constant 0 : index
    %516 = vector.load %arg8[%c96_548, %c0_549] : memref<108x128xf32, #tpu.memory_space<vmem>>, vector<4x128xf32>
    tpu.vector_store %arg8[%c96_548, %c0_549], %515 {strides = array<i32>} : memref<108x128xf32, #tpu.memory_space<vmem>>, vector<4x128xf32>,
    %517 = arith.index_cast %9 : i32 to index
    %c5_550 = arith.constant 5 : index
    %c0_551 = arith.constant 0 : index
    %c21_552 = arith.constant 21 : index
    %518 = vector.load %arg6[%517, %c5_550, %c0_551, %c21_552] : memref<2x10x4x256xf32, #tpu.memory_space<vmem>>, vector<1x1x4x128xf32>
    %519 = vector.shape_cast %518 : vector<1x1x4x128xf32> to vector<4x128xf32>
    %c100_553 = arith.constant 100 : index
    %c0_554 = arith.constant 0 : index
    %520 = vector.load %arg8[%c100_553, %c0_554] : memref<108x128xf32, #tpu.memory_space<vmem>>, vector<4x128xf32>
    tpu.vector_store %arg8[%c100_553, %c0_554], %519 {strides = array<i32>} : memref<108x128xf32, #tpu.memory_space<vmem>>, vector<4x128xf32>,
    %521 = arith.index_cast %9 : i32 to index
    %c5_555 = arith.constant 5 : index
    %c0_556 = arith.constant 0 : index
    %c22_557 = arith.constant 22 : index
    %522 = vector.load %arg6[%521, %c5_555, %c0_556, %c22_557] : memref<2x10x4x256xf32, #tpu.memory_space<vmem>>, vector<1x1x4x128xf32>
    %523 = vector.shape_cast %522 : vector<1x1x4x128xf32> to vector<4x128xf32>
    %c104_558 = arith.constant 104 : index
    %c0_559 = arith.constant 0 : index
    %524 = vector.load %arg8[%c104_558, %c0_559] : memref<108x128xf32, #tpu.memory_space<vmem>>, vector<4x128xf32>
    tpu.vector_store %arg8[%c104_558, %c0_559], %523 {strides = array<i32>} : memref<108x128xf32, #tpu.memory_space<vmem>>, vector<4x128xf32>,
    %c0_560 = arith.constant 0 : index
    %c0_561 = arith.constant 0 : index
    %525 = vector.load %arg8[%c0_560, %c0_561] : memref<108x128xf32, #tpu.memory_space<vmem>>, vector<108x128xf32>
    %cst_562 = arith.constant dense<0.000000e+00> : vector<8x128xf32>
    %526 = tpu.matmul %24, %525, %cst_562 {dimension_numbers = #tpu.dot_dimension_numbers<[1], [0], [0], [1], [0, 0, 1, 1], [], []>} : vector<8x108xf32>, vector<108x128xf32>, vector<8x128xf32> -> vector<8x128xf32>
    %527 = vector.broadcast %25 : vector<1x128xf32> to vector<8x128xf32>
    %528 = arith.mulf %526, %527 : vector<8x128xf32>
    %c0_563 = arith.constant 0 : index
    %529 = arith.index_cast %416 : i32 to index
    %c0_564 = arith.constant 0 : index
    %c0_565 = arith.constant 0 : index
    %530 = vector.load %arg5[%c0_563, %529, %c0_564, %c0_565] : memref<1x8x8x128xf32, #tpu.memory_space<vmem>>, vector<1x1x8x128xf32>
    %531 = vector.shape_cast %530 : vector<1x1x8x128xf32> to vector<8x128xf32>
    %532 = vector.shape_cast %528 : vector<8x128xf32> to vector<1x1x8x128xf32>
    tpu.vector_store %arg5[%c0_563, %529, %c0_564, %c0_565], %532 {strides = array<i32>} : memref<1x8x8x128xf32, #tpu.memory_space<vmem>>, vector<1x1x8x128xf32>,
    %cst_566 = arith.constant dense<0.000000e+00> : vector<8xf32>
    %533 = vector.multi_reduction <add>, %528, %cst_566 [1] : vector<8x128xf32> to vector<8xf32>
    %534 = vector.shape_cast %533 : vector<8xf32> to vector<8x1xf32>
    %cst_567 = arith.constant 1.000000e+00 : f32
    %535 = vector.broadcast %cst_567 : f32 to vector<8x1xf32>
    %536 = arith.mulf %535, %534 : vector<8x1xf32>
    %537 = arith.addf %408, %536 : vector<8x1xf32>
    %538 = arith.mulf %528, %528 : vector<8x128xf32>
    %cst_568 = arith.constant dense<0.000000e+00> : vector<8xf32>
    %539 = vector.multi_reduction <add>, %538, %cst_568 [1] : vector<8x128xf32> to vector<8xf32>
    %540 = vector.shape_cast %539 : vector<8xf32> to vector<8x1xf32>
    %cst_569 = arith.constant 1.000000e+00 : f32
    %541 = vector.broadcast %cst_569 : f32 to vector<8x1xf32>
    %542 = arith.mulf %541, %540 : vector<8x1xf32>
    %543 = arith.addf %414, %542 : vector<8x1xf32>
    %c8_i32_570 = arith.constant 8 : i32
    %544 = arith.muli %arg1, %c8_i32_570 : i32
    %c4_i32 = arith.constant 4 : i32
    %545 = arith.addi %544, %c4_i32 : i32
    %546 = arith.index_cast %9 : i32 to index
    %c4_571 = arith.constant 4 : index
    %c0_572 = arith.constant 0 : index
    %c0_573 = arith.constant 0 : index
    %547 = vector.load %arg6[%546, %c4_571, %c0_572, %c0_573] : memref<2x10x4x256xf32, #tpu.memory_space<vmem>>, vector<1x1x4x128xf32>
    %548 = vector.shape_cast %547 : vector<1x1x4x128xf32> to vector<4x128xf32>
    %c0_574 = arith.constant 0 : index
    %c0_575 = arith.constant 0 : index
    %549 = vector.load %arg8[%c0_574, %c0_575] : memref<108x128xf32, #tpu.memory_space<vmem>>, vector<4x128xf32>
    tpu.vector_store %arg8[%c0_574, %c0_575], %548 {strides = array<i32>} : memref<108x128xf32, #tpu.memory_space<vmem>>, vector<4x128xf32>,
    %550 = arith.index_cast %9 : i32 to index
    %c4_576 = arith.constant 4 : index
    %c0_577 = arith.constant 0 : index
    %c1_578 = arith.constant 1 : index
    %551 = vector.load %arg6[%550, %c4_576, %c0_577, %c1_578] : memref<2x10x4x256xf32, #tpu.memory_space<vmem>>, vector<1x1x4x128xf32>
    %552 = vector.shape_cast %551 : vector<1x1x4x128xf32> to vector<4x128xf32>
    %c4_579 = arith.constant 4 : index
    %c0_580 = arith.constant 0 : index
    %553 = vector.load %arg8[%c4_579, %c0_580] : memref<108x128xf32, #tpu.memory_space<vmem>>, vector<4x128xf32>
    tpu.vector_store %arg8[%c4_579, %c0_580], %552 {strides = array<i32>} : memref<108x128xf32, #tpu.memory_space<vmem>>, vector<4x128xf32>,
    %554 = arith.index_cast %9 : i32 to index
    %c4_581 = arith.constant 4 : index
    %c0_582 = arith.constant 0 : index
    %c2_583 = arith.constant 2 : index
    %555 = vector.load %arg6[%554, %c4_581, %c0_582, %c2_583] : memref<2x10x4x256xf32, #tpu.memory_space<vmem>>, vector<1x1x4x128xf32>
    %556 = vector.shape_cast %555 : vector<1x1x4x128xf32> to vector<4x128xf32>
    %c8_584 = arith.constant 8 : index
    %c0_585 = arith.constant 0 : index
    %557 = vector.load %arg8[%c8_584, %c0_585] : memref<108x128xf32, #tpu.memory_space<vmem>>, vector<4x128xf32>
    tpu.vector_store %arg8[%c8_584, %c0_585], %556 {strides = array<i32>} : memref<108x128xf32, #tpu.memory_space<vmem>>, vector<4x128xf32>,
    %558 = arith.index_cast %9 : i32 to index
    %c4_586 = arith.constant 4 : index
    %c0_587 = arith.constant 0 : index
    %c10_588 = arith.constant 10 : index
    %559 = vector.load %arg6[%558, %c4_586, %c0_587, %c10_588] : memref<2x10x4x256xf32, #tpu.memory_space<vmem>>, vector<1x1x4x128xf32>
    %560 = vector.shape_cast %559 : vector<1x1x4x128xf32> to vector<4x128xf32>
    %c12_589 = arith.constant 12 : index
    %c0_590 = arith.constant 0 : index
    %561 = vector.load %arg8[%c12_589, %c0_590] : memref<108x128xf32, #tpu.memory_space<vmem>>, vector<4x128xf32>
    tpu.vector_store %arg8[%c12_589, %c0_590], %560 {strides = array<i32>} : memref<108x128xf32, #tpu.memory_space<vmem>>, vector<4x128xf32>,
    %562 = arith.index_cast %9 : i32 to index
    %c4_591 = arith.constant 4 : index
    %c0_592 = arith.constant 0 : index
    %c11_593 = arith.constant 11 : index
    %563 = vector.load %arg6[%562, %c4_591, %c0_592, %c11_593] : memref<2x10x4x256xf32, #tpu.memory_space<vmem>>, vector<1x1x4x128xf32>
    %564 = vector.shape_cast %563 : vector<1x1x4x128xf32> to vector<4x128xf32>
    %c16_594 = arith.constant 16 : index
    %c0_595 = arith.constant 0 : index
    %565 = vector.load %arg8[%c16_594, %c0_595] : memref<108x128xf32, #tpu.memory_space<vmem>>, vector<4x128xf32>
    tpu.vector_store %arg8[%c16_594, %c0_595], %564 {strides = array<i32>} : memref<108x128xf32, #tpu.memory_space<vmem>>, vector<4x128xf32>,
    %566 = arith.index_cast %9 : i32 to index
    %c4_596 = arith.constant 4 : index
    %c0_597 = arith.constant 0 : index
    %c12_598 = arith.constant 12 : index
    %567 = vector.load %arg6[%566, %c4_596, %c0_597, %c12_598] : memref<2x10x4x256xf32, #tpu.memory_space<vmem>>, vector<1x1x4x128xf32>
    %568 = vector.shape_cast %567 : vector<1x1x4x128xf32> to vector<4x128xf32>
    %c20_599 = arith.constant 20 : index
    %c0_600 = arith.constant 0 : index
    %569 = vector.load %arg8[%c20_599, %c0_600] : memref<108x128xf32, #tpu.memory_space<vmem>>, vector<4x128xf32>
    tpu.vector_store %arg8[%c20_599, %c0_600], %568 {strides = array<i32>} : memref<108x128xf32, #tpu.memory_space<vmem>>, vector<4x128xf32>,
    %570 = arith.index_cast %9 : i32 to index
    %c4_601 = arith.constant 4 : index
    %c0_602 = arith.constant 0 : index
    %c20_603 = arith.constant 20 : index
    %571 = vector.load %arg6[%570, %c4_601, %c0_602, %c20_603] : memref<2x10x4x256xf32, #tpu.memory_space<vmem>>, vector<1x1x4x128xf32>
    %572 = vector.shape_cast %571 : vector<1x1x4x128xf32> to vector<4x128xf32>
    %c24_604 = arith.constant 24 : index
    %c0_605 = arith.constant 0 : index
    %573 = vector.load %arg8[%c24_604, %c0_605] : memref<108x128xf32, #tpu.memory_space<vmem>>, vector<4x128xf32>
    tpu.vector_store %arg8[%c24_604, %c0_605], %572 {strides = array<i32>} : memref<108x128xf32, #tpu.memory_space<vmem>>, vector<4x128xf32>,
    %574 = arith.index_cast %9 : i32 to index
    %c4_606 = arith.constant 4 : index
    %c0_607 = arith.constant 0 : index
    %c21_608 = arith.constant 21 : index
    %575 = vector.load %arg6[%574, %c4_606, %c0_607, %c21_608] : memref<2x10x4x256xf32, #tpu.memory_space<vmem>>, vector<1x1x4x128xf32>
    %576 = vector.shape_cast %575 : vector<1x1x4x128xf32> to vector<4x128xf32>
    %c28_609 = arith.constant 28 : index
    %c0_610 = arith.constant 0 : index
    %577 = vector.load %arg8[%c28_609, %c0_610] : memref<108x128xf32, #tpu.memory_space<vmem>>, vector<4x128xf32>
    tpu.vector_store %arg8[%c28_609, %c0_610], %576 {strides = array<i32>} : memref<108x128xf32, #tpu.memory_space<vmem>>, vector<4x128xf32>,
    %578 = arith.index_cast %9 : i32 to index
    %c4_611 = arith.constant 4 : index
    %c0_612 = arith.constant 0 : index
    %c22_613 = arith.constant 22 : index
    %579 = vector.load %arg6[%578, %c4_611, %c0_612, %c22_613] : memref<2x10x4x256xf32, #tpu.memory_space<vmem>>, vector<1x1x4x128xf32>
    %580 = vector.shape_cast %579 : vector<1x1x4x128xf32> to vector<4x128xf32>
    %c32_614 = arith.constant 32 : index
    %c0_615 = arith.constant 0 : index
    %581 = vector.load %arg8[%c32_614, %c0_615] : memref<108x128xf32, #tpu.memory_space<vmem>>, vector<4x128xf32>
    tpu.vector_store %arg8[%c32_614, %c0_615], %580 {strides = array<i32>} : memref<108x128xf32, #tpu.memory_space<vmem>>, vector<4x128xf32>,
    %582 = arith.index_cast %9 : i32 to index
    %c5_616 = arith.constant 5 : index
    %c0_617 = arith.constant 0 : index
    %c0_618 = arith.constant 0 : index
    %583 = vector.load %arg6[%582, %c5_616, %c0_617, %c0_618] : memref<2x10x4x256xf32, #tpu.memory_space<vmem>>, vector<1x1x4x128xf32>
    %584 = vector.shape_cast %583 : vector<1x1x4x128xf32> to vector<4x128xf32>
    %c36_619 = arith.constant 36 : index
    %c0_620 = arith.constant 0 : index
    %585 = vector.load %arg8[%c36_619, %c0_620] : memref<108x128xf32, #tpu.memory_space<vmem>>, vector<4x128xf32>
    tpu.vector_store %arg8[%c36_619, %c0_620], %584 {strides = array<i32>} : memref<108x128xf32, #tpu.memory_space<vmem>>, vector<4x128xf32>,
    %586 = arith.index_cast %9 : i32 to index
    %c5_621 = arith.constant 5 : index
    %c0_622 = arith.constant 0 : index
    %c1_623 = arith.constant 1 : index
    %587 = vector.load %arg6[%586, %c5_621, %c0_622, %c1_623] : memref<2x10x4x256xf32, #tpu.memory_space<vmem>>, vector<1x1x4x128xf32>
    %588 = vector.shape_cast %587 : vector<1x1x4x128xf32> to vector<4x128xf32>
    %c40_624 = arith.constant 40 : index
    %c0_625 = arith.constant 0 : index
    %589 = vector.load %arg8[%c40_624, %c0_625] : memref<108x128xf32, #tpu.memory_space<vmem>>, vector<4x128xf32>
    tpu.vector_store %arg8[%c40_624, %c0_625], %588 {strides = array<i32>} : memref<108x128xf32, #tpu.memory_space<vmem>>, vector<4x128xf32>,
    %590 = arith.index_cast %9 : i32 to index
    %c5_626 = arith.constant 5 : index
    %c0_627 = arith.constant 0 : index
    %c2_628 = arith.constant 2 : index
    %591 = vector.load %arg6[%590, %c5_626, %c0_627, %c2_628] : memref<2x10x4x256xf32, #tpu.memory_space<vmem>>, vector<1x1x4x128xf32>
    %592 = vector.shape_cast %591 : vector<1x1x4x128xf32> to vector<4x128xf32>
    %c44_629 = arith.constant 44 : index
    %c0_630 = arith.constant 0 : index
    %593 = vector.load %arg8[%c44_629, %c0_630] : memref<108x128xf32, #tpu.memory_space<vmem>>, vector<4x128xf32>
    tpu.vector_store %arg8[%c44_629, %c0_630], %592 {strides = array<i32>} : memref<108x128xf32, #tpu.memory_space<vmem>>, vector<4x128xf32>,
    %594 = arith.index_cast %9 : i32 to index
    %c5_631 = arith.constant 5 : index
    %c0_632 = arith.constant 0 : index
    %c10_633 = arith.constant 10 : index
    %595 = vector.load %arg6[%594, %c5_631, %c0_632, %c10_633] : memref<2x10x4x256xf32, #tpu.memory_space<vmem>>, vector<1x1x4x128xf32>
    %596 = vector.shape_cast %595 : vector<1x1x4x128xf32> to vector<4x128xf32>
    %c48_634 = arith.constant 48 : index
    %c0_635 = arith.constant 0 : index
    %597 = vector.load %arg8[%c48_634, %c0_635] : memref<108x128xf32, #tpu.memory_space<vmem>>, vector<4x128xf32>
    tpu.vector_store %arg8[%c48_634, %c0_635], %596 {strides = array<i32>} : memref<108x128xf32, #tpu.memory_space<vmem>>, vector<4x128xf32>,
    %598 = arith.index_cast %9 : i32 to index
    %c5_636 = arith.constant 5 : index
    %c0_637 = arith.constant 0 : index
    %c11_638 = arith.constant 11 : index
    %599 = vector.load %arg6[%598, %c5_636, %c0_637, %c11_638] : memref<2x10x4x256xf32, #tpu.memory_space<vmem>>, vector<1x1x4x128xf32>
    %600 = vector.shape_cast %599 : vector<1x1x4x128xf32> to vector<4x128xf32>
    %c52_639 = arith.constant 52 : index
    %c0_640 = arith.constant 0 : index
    %601 = vector.load %arg8[%c52_639, %c0_640] : memref<108x128xf32, #tpu.memory_space<vmem>>, vector<4x128xf32>
    tpu.vector_store %arg8[%c52_639, %c0_640], %600 {strides = array<i32>} : memref<108x128xf32, #tpu.memory_space<vmem>>, vector<4x128xf32>,
    %602 = arith.index_cast %9 : i32 to index
    %c5_641 = arith.constant 5 : index
    %c0_642 = arith.constant 0 : index
    %c12_643 = arith.constant 12 : index
    %603 = vector.load %arg6[%602, %c5_641, %c0_642, %c12_643] : memref<2x10x4x256xf32, #tpu.memory_space<vmem>>, vector<1x1x4x128xf32>
    %604 = vector.shape_cast %603 : vector<1x1x4x128xf32> to vector<4x128xf32>
    %c56_644 = arith.constant 56 : index
    %c0_645 = arith.constant 0 : index
    %605 = vector.load %arg8[%c56_644, %c0_645] : memref<108x128xf32, #tpu.memory_space<vmem>>, vector<4x128xf32>
    tpu.vector_store %arg8[%c56_644, %c0_645], %604 {strides = array<i32>} : memref<108x128xf32, #tpu.memory_space<vmem>>, vector<4x128xf32>,
    %606 = arith.index_cast %9 : i32 to index
    %c5_646 = arith.constant 5 : index
    %c0_647 = arith.constant 0 : index
    %c20_648 = arith.constant 20 : index
    %607 = vector.load %arg6[%606, %c5_646, %c0_647, %c20_648] : memref<2x10x4x256xf32, #tpu.memory_space<vmem>>, vector<1x1x4x128xf32>
    %608 = vector.shape_cast %607 : vector<1x1x4x128xf32> to vector<4x128xf32>
    %c60_649 = arith.constant 60 : index
    %c0_650 = arith.constant 0 : index
    %609 = vector.load %arg8[%c60_649, %c0_650] : memref<108x128xf32, #tpu.memory_space<vmem>>, vector<4x128xf32>
    tpu.vector_store %arg8[%c60_649, %c0_650], %608 {strides = array<i32>} : memref<108x128xf32, #tpu.memory_space<vmem>>, vector<4x128xf32>,
    %610 = arith.index_cast %9 : i32 to index
    %c5_651 = arith.constant 5 : index
    %c0_652 = arith.constant 0 : index
    %c21_653 = arith.constant 21 : index
    %611 = vector.load %arg6[%610, %c5_651, %c0_652, %c21_653] : memref<2x10x4x256xf32, #tpu.memory_space<vmem>>, vector<1x1x4x128xf32>
    %612 = vector.shape_cast %611 : vector<1x1x4x128xf32> to vector<4x128xf32>
    %c64_654 = arith.constant 64 : index
    %c0_655 = arith.constant 0 : index
    %613 = vector.load %arg8[%c64_654, %c0_655] : memref<108x128xf32, #tpu.memory_space<vmem>>, vector<4x128xf32>
    tpu.vector_store %arg8[%c64_654, %c0_655], %612 {strides = array<i32>} : memref<108x128xf32, #tpu.memory_space<vmem>>, vector<4x128xf32>,
    %614 = arith.index_cast %9 : i32 to index
    %c5_656 = arith.constant 5 : index
    %c0_657 = arith.constant 0 : index
    %c22_658 = arith.constant 22 : index
    %615 = vector.load %arg6[%614, %c5_656, %c0_657, %c22_658] : memref<2x10x4x256xf32, #tpu.memory_space<vmem>>, vector<1x1x4x128xf32>
    %616 = vector.shape_cast %615 : vector<1x1x4x128xf32> to vector<4x128xf32>
    %c68_659 = arith.constant 68 : index
    %c0_660 = arith.constant 0 : index
    %617 = vector.load %arg8[%c68_659, %c0_660] : memref<108x128xf32, #tpu.memory_space<vmem>>, vector<4x128xf32>
    tpu.vector_store %arg8[%c68_659, %c0_660], %616 {strides = array<i32>} : memref<108x128xf32, #tpu.memory_space<vmem>>, vector<4x128xf32>,
    %618 = arith.index_cast %9 : i32 to index
    %c6 = arith.constant 6 : index
    %c0_661 = arith.constant 0 : index
    %c0_662 = arith.constant 0 : index
    %619 = vector.load %arg6[%618, %c6, %c0_661, %c0_662] : memref<2x10x4x256xf32, #tpu.memory_space<vmem>>, vector<1x1x4x128xf32>
    %620 = vector.shape_cast %619 : vector<1x1x4x128xf32> to vector<4x128xf32>
    %c72_663 = arith.constant 72 : index
    %c0_664 = arith.constant 0 : index
    %621 = vector.load %arg8[%c72_663, %c0_664] : memref<108x128xf32, #tpu.memory_space<vmem>>, vector<4x128xf32>
    tpu.vector_store %arg8[%c72_663, %c0_664], %620 {strides = array<i32>} : memref<108x128xf32, #tpu.memory_space<vmem>>, vector<4x128xf32>,
    %622 = arith.index_cast %9 : i32 to index
    %c6_665 = arith.constant 6 : index
    %c0_666 = arith.constant 0 : index
    %c1_667 = arith.constant 1 : index
    %623 = vector.load %arg6[%622, %c6_665, %c0_666, %c1_667] : memref<2x10x4x256xf32, #tpu.memory_space<vmem>>, vector<1x1x4x128xf32>
    %624 = vector.shape_cast %623 : vector<1x1x4x128xf32> to vector<4x128xf32>
    %c76_668 = arith.constant 76 : index
    %c0_669 = arith.constant 0 : index
    %625 = vector.load %arg8[%c76_668, %c0_669] : memref<108x128xf32, #tpu.memory_space<vmem>>, vector<4x128xf32>
    tpu.vector_store %arg8[%c76_668, %c0_669], %624 {strides = array<i32>} : memref<108x128xf32, #tpu.memory_space<vmem>>, vector<4x128xf32>,
    %626 = arith.index_cast %9 : i32 to index
    %c6_670 = arith.constant 6 : index
    %c0_671 = arith.constant 0 : index
    %c2_672 = arith.constant 2 : index
    %627 = vector.load %arg6[%626, %c6_670, %c0_671, %c2_672] : memref<2x10x4x256xf32, #tpu.memory_space<vmem>>, vector<1x1x4x128xf32>
    %628 = vector.shape_cast %627 : vector<1x1x4x128xf32> to vector<4x128xf32>
    %c80_673 = arith.constant 80 : index
    %c0_674 = arith.constant 0 : index
    %629 = vector.load %arg8[%c80_673, %c0_674] : memref<108x128xf32, #tpu.memory_space<vmem>>, vector<4x128xf32>
    tpu.vector_store %arg8[%c80_673, %c0_674], %628 {strides = array<i32>} : memref<108x128xf32, #tpu.memory_space<vmem>>, vector<4x128xf32>,
    %630 = arith.index_cast %9 : i32 to index
    %c6_675 = arith.constant 6 : index
    %c0_676 = arith.constant 0 : index
    %c10_677 = arith.constant 10 : index
    %631 = vector.load %arg6[%630, %c6_675, %c0_676, %c10_677] : memref<2x10x4x256xf32, #tpu.memory_space<vmem>>, vector<1x1x4x128xf32>
    %632 = vector.shape_cast %631 : vector<1x1x4x128xf32> to vector<4x128xf32>
    %c84_678 = arith.constant 84 : index
    %c0_679 = arith.constant 0 : index
    %633 = vector.load %arg8[%c84_678, %c0_679] : memref<108x128xf32, #tpu.memory_space<vmem>>, vector<4x128xf32>
    tpu.vector_store %arg8[%c84_678, %c0_679], %632 {strides = array<i32>} : memref<108x128xf32, #tpu.memory_space<vmem>>, vector<4x128xf32>,
    %634 = arith.index_cast %9 : i32 to index
    %c6_680 = arith.constant 6 : index
    %c0_681 = arith.constant 0 : index
    %c11_682 = arith.constant 11 : index
    %635 = vector.load %arg6[%634, %c6_680, %c0_681, %c11_682] : memref<2x10x4x256xf32, #tpu.memory_space<vmem>>, vector<1x1x4x128xf32>
    %636 = vector.shape_cast %635 : vector<1x1x4x128xf32> to vector<4x128xf32>
    %c88_683 = arith.constant 88 : index
    %c0_684 = arith.constant 0 : index
    %637 = vector.load %arg8[%c88_683, %c0_684] : memref<108x128xf32, #tpu.memory_space<vmem>>, vector<4x128xf32>
    tpu.vector_store %arg8[%c88_683, %c0_684], %636 {strides = array<i32>} : memref<108x128xf32, #tpu.memory_space<vmem>>, vector<4x128xf32>,
    %638 = arith.index_cast %9 : i32 to index
    %c6_685 = arith.constant 6 : index
    %c0_686 = arith.constant 0 : index
    %c12_687 = arith.constant 12 : index
    %639 = vector.load %arg6[%638, %c6_685, %c0_686, %c12_687] : memref<2x10x4x256xf32, #tpu.memory_space<vmem>>, vector<1x1x4x128xf32>
    %640 = vector.shape_cast %639 : vector<1x1x4x128xf32> to vector<4x128xf32>
    %c92_688 = arith.constant 92 : index
    %c0_689 = arith.constant 0 : index
    %641 = vector.load %arg8[%c92_688, %c0_689] : memref<108x128xf32, #tpu.memory_space<vmem>>, vector<4x128xf32>
    tpu.vector_store %arg8[%c92_688, %c0_689], %640 {strides = array<i32>} : memref<108x128xf32, #tpu.memory_space<vmem>>, vector<4x128xf32>,
    %642 = arith.index_cast %9 : i32 to index
    %c6_690 = arith.constant 6 : index
    %c0_691 = arith.constant 0 : index
    %c20_692 = arith.constant 20 : index
    %643 = vector.load %arg6[%642, %c6_690, %c0_691, %c20_692] : memref<2x10x4x256xf32, #tpu.memory_space<vmem>>, vector<1x1x4x128xf32>
    %644 = vector.shape_cast %643 : vector<1x1x4x128xf32> to vector<4x128xf32>
    %c96_693 = arith.constant 96 : index
    %c0_694 = arith.constant 0 : index
    %645 = vector.load %arg8[%c96_693, %c0_694] : memref<108x128xf32, #tpu.memory_space<vmem>>, vector<4x128xf32>
    tpu.vector_store %arg8[%c96_693, %c0_694], %644 {strides = array<i32>} : memref<108x128xf32, #tpu.memory_space<vmem>>, vector<4x128xf32>,
    %646 = arith.index_cast %9 : i32 to index
    %c6_695 = arith.constant 6 : index
    %c0_696 = arith.constant 0 : index
    %c21_697 = arith.constant 21 : index
    %647 = vector.load %arg6[%646, %c6_695, %c0_696, %c21_697] : memref<2x10x4x256xf32, #tpu.memory_space<vmem>>, vector<1x1x4x128xf32>
    %648 = vector.shape_cast %647 : vector<1x1x4x128xf32> to vector<4x128xf32>
    %c100_698 = arith.constant 100 : index
    %c0_699 = arith.constant 0 : index
    %649 = vector.load %arg8[%c100_698, %c0_699] : memref<108x128xf32, #tpu.memory_space<vmem>>, vector<4x128xf32>
    tpu.vector_store %arg8[%c100_698, %c0_699], %648 {strides = array<i32>} : memref<108x128xf32, #tpu.memory_space<vmem>>, vector<4x128xf32>,
    %650 = arith.index_cast %9 : i32 to index
    %c6_700 = arith.constant 6 : index
    %c0_701 = arith.constant 0 : index
    %c22_702 = arith.constant 22 : index
    %651 = vector.load %arg6[%650, %c6_700, %c0_701, %c22_702] : memref<2x10x4x256xf32, #tpu.memory_space<vmem>>, vector<1x1x4x128xf32>
    %652 = vector.shape_cast %651 : vector<1x1x4x128xf32> to vector<4x128xf32>
    %c104_703 = arith.constant 104 : index
    %c0_704 = arith.constant 0 : index
    %653 = vector.load %arg8[%c104_703, %c0_704] : memref<108x128xf32, #tpu.memory_space<vmem>>, vector<4x128xf32>
    tpu.vector_store %arg8[%c104_703, %c0_704], %652 {strides = array<i32>} : memref<108x128xf32, #tpu.memory_space<vmem>>, vector<4x128xf32>,
    %c0_705 = arith.constant 0 : index
    %c0_706 = arith.constant 0 : index
    %654 = vector.load %arg8[%c0_705, %c0_706] : memref<108x128xf32, #tpu.memory_space<vmem>>, vector<108x128xf32>
    %cst_707 = arith.constant dense<0.000000e+00> : vector<8x128xf32>
    %655 = tpu.matmul %24, %654, %cst_707 {dimension_numbers = #tpu.dot_dimension_numbers<[1], [0], [0], [1], [0, 0, 1, 1], [], []>} : vector<8x108xf32>, vector<108x128xf32>, vector<8x128xf32> -> vector<8x128xf32>
    %656 = vector.broadcast %25 : vector<1x128xf32> to vector<8x128xf32>
    %657 = arith.mulf %655, %656 : vector<8x128xf32>
    %c0_708 = arith.constant 0 : index
    %658 = arith.index_cast %545 : i32 to index
    %c0_709 = arith.constant 0 : index
    %c0_710 = arith.constant 0 : index
    %659 = vector.load %arg5[%c0_708, %658, %c0_709, %c0_710] : memref<1x8x8x128xf32, #tpu.memory_space<vmem>>, vector<1x1x8x128xf32>
    %660 = vector.shape_cast %659 : vector<1x1x8x128xf32> to vector<8x128xf32>
    %661 = vector.shape_cast %657 : vector<8x128xf32> to vector<1x1x8x128xf32>
    tpu.vector_store %arg5[%c0_708, %658, %c0_709, %c0_710], %661 {strides = array<i32>} : memref<1x8x8x128xf32, #tpu.memory_space<vmem>>, vector<1x1x8x128xf32>,
    %cst_711 = arith.constant dense<0.000000e+00> : vector<8xf32>
    %662 = vector.multi_reduction <add>, %657, %cst_711 [1] : vector<8x128xf32> to vector<8xf32>
    %663 = vector.shape_cast %662 : vector<8xf32> to vector<8x1xf32>
    %cst_712 = arith.constant 1.000000e+00 : f32
    %664 = vector.broadcast %cst_712 : f32 to vector<8x1xf32>
    %665 = arith.mulf %664, %663 : vector<8x1xf32>
    %666 = arith.addf %537, %665 : vector<8x1xf32>
    %667 = arith.mulf %657, %657 : vector<8x128xf32>
    %cst_713 = arith.constant dense<0.000000e+00> : vector<8xf32>
    %668 = vector.multi_reduction <add>, %667, %cst_713 [1] : vector<8x128xf32> to vector<8xf32>
    %669 = vector.shape_cast %668 : vector<8xf32> to vector<8x1xf32>
    %cst_714 = arith.constant 1.000000e+00 : f32
    %670 = vector.broadcast %cst_714 : f32 to vector<8x1xf32>
    %671 = arith.mulf %670, %669 : vector<8x1xf32>
    %672 = arith.addf %543, %671 : vector<8x1xf32>
    %c8_i32_715 = arith.constant 8 : i32
    %673 = arith.muli %arg1, %c8_i32_715 : i32
    %c5_i32 = arith.constant 5 : i32
    %674 = arith.addi %673, %c5_i32 : i32
    %675 = arith.index_cast %9 : i32 to index
    %c5_716 = arith.constant 5 : index
    %c0_717 = arith.constant 0 : index
    %c0_718 = arith.constant 0 : index
    %676 = vector.load %arg6[%675, %c5_716, %c0_717, %c0_718] : memref<2x10x4x256xf32, #tpu.memory_space<vmem>>, vector<1x1x4x128xf32>
    %677 = vector.shape_cast %676 : vector<1x1x4x128xf32> to vector<4x128xf32>
    %c0_719 = arith.constant 0 : index
    %c0_720 = arith.constant 0 : index
    %678 = vector.load %arg8[%c0_719, %c0_720] : memref<108x128xf32, #tpu.memory_space<vmem>>, vector<4x128xf32>
    tpu.vector_store %arg8[%c0_719, %c0_720], %677 {strides = array<i32>} : memref<108x128xf32, #tpu.memory_space<vmem>>, vector<4x128xf32>,
    %679 = arith.index_cast %9 : i32 to index
    %c5_721 = arith.constant 5 : index
    %c0_722 = arith.constant 0 : index
    %c1_723 = arith.constant 1 : index
    %680 = vector.load %arg6[%679, %c5_721, %c0_722, %c1_723] : memref<2x10x4x256xf32, #tpu.memory_space<vmem>>, vector<1x1x4x128xf32>
    %681 = vector.shape_cast %680 : vector<1x1x4x128xf32> to vector<4x128xf32>
    %c4_724 = arith.constant 4 : index
    %c0_725 = arith.constant 0 : index
    %682 = vector.load %arg8[%c4_724, %c0_725] : memref<108x128xf32, #tpu.memory_space<vmem>>, vector<4x128xf32>
    tpu.vector_store %arg8[%c4_724, %c0_725], %681 {strides = array<i32>} : memref<108x128xf32, #tpu.memory_space<vmem>>, vector<4x128xf32>,
    %683 = arith.index_cast %9 : i32 to index
    %c5_726 = arith.constant 5 : index
    %c0_727 = arith.constant 0 : index
    %c2_728 = arith.constant 2 : index
    %684 = vector.load %arg6[%683, %c5_726, %c0_727, %c2_728] : memref<2x10x4x256xf32, #tpu.memory_space<vmem>>, vector<1x1x4x128xf32>
    %685 = vector.shape_cast %684 : vector<1x1x4x128xf32> to vector<4x128xf32>
    %c8_729 = arith.constant 8 : index
    %c0_730 = arith.constant 0 : index
    %686 = vector.load %arg8[%c8_729, %c0_730] : memref<108x128xf32, #tpu.memory_space<vmem>>, vector<4x128xf32>
    tpu.vector_store %arg8[%c8_729, %c0_730], %685 {strides = array<i32>} : memref<108x128xf32, #tpu.memory_space<vmem>>, vector<4x128xf32>,
    %687 = arith.index_cast %9 : i32 to index
    %c5_731 = arith.constant 5 : index
    %c0_732 = arith.constant 0 : index
    %c10_733 = arith.constant 10 : index
    %688 = vector.load %arg6[%687, %c5_731, %c0_732, %c10_733] : memref<2x10x4x256xf32, #tpu.memory_space<vmem>>, vector<1x1x4x128xf32>
    %689 = vector.shape_cast %688 : vector<1x1x4x128xf32> to vector<4x128xf32>
    %c12_734 = arith.constant 12 : index
    %c0_735 = arith.constant 0 : index
    %690 = vector.load %arg8[%c12_734, %c0_735] : memref<108x128xf32, #tpu.memory_space<vmem>>, vector<4x128xf32>
    tpu.vector_store %arg8[%c12_734, %c0_735], %689 {strides = array<i32>} : memref<108x128xf32, #tpu.memory_space<vmem>>, vector<4x128xf32>,
    %691 = arith.index_cast %9 : i32 to index
    %c5_736 = arith.constant 5 : index
    %c0_737 = arith.constant 0 : index
    %c11_738 = arith.constant 11 : index
    %692 = vector.load %arg6[%691, %c5_736, %c0_737, %c11_738] : memref<2x10x4x256xf32, #tpu.memory_space<vmem>>, vector<1x1x4x128xf32>
    %693 = vector.shape_cast %692 : vector<1x1x4x128xf32> to vector<4x128xf32>
    %c16_739 = arith.constant 16 : index
    %c0_740 = arith.constant 0 : index
    %694 = vector.load %arg8[%c16_739, %c0_740] : memref<108x128xf32, #tpu.memory_space<vmem>>, vector<4x128xf32>
    tpu.vector_store %arg8[%c16_739, %c0_740], %693 {strides = array<i32>} : memref<108x128xf32, #tpu.memory_space<vmem>>, vector<4x128xf32>,
    %695 = arith.index_cast %9 : i32 to index
    %c5_741 = arith.constant 5 : index
    %c0_742 = arith.constant 0 : index
    %c12_743 = arith.constant 12 : index
    %696 = vector.load %arg6[%695, %c5_741, %c0_742, %c12_743] : memref<2x10x4x256xf32, #tpu.memory_space<vmem>>, vector<1x1x4x128xf32>
    %697 = vector.shape_cast %696 : vector<1x1x4x128xf32> to vector<4x128xf32>
    %c20_744 = arith.constant 20 : index
    %c0_745 = arith.constant 0 : index
    %698 = vector.load %arg8[%c20_744, %c0_745] : memref<108x128xf32, #tpu.memory_space<vmem>>, vector<4x128xf32>
    tpu.vector_store %arg8[%c20_744, %c0_745], %697 {strides = array<i32>} : memref<108x128xf32, #tpu.memory_space<vmem>>, vector<4x128xf32>,
    %699 = arith.index_cast %9 : i32 to index
    %c5_746 = arith.constant 5 : index
    %c0_747 = arith.constant 0 : index
    %c20_748 = arith.constant 20 : index
    %700 = vector.load %arg6[%699, %c5_746, %c0_747, %c20_748] : memref<2x10x4x256xf32, #tpu.memory_space<vmem>>, vector<1x1x4x128xf32>
    %701 = vector.shape_cast %700 : vector<1x1x4x128xf32> to vector<4x128xf32>
    %c24_749 = arith.constant 24 : index
    %c0_750 = arith.constant 0 : index
    %702 = vector.load %arg8[%c24_749, %c0_750] : memref<108x128xf32, #tpu.memory_space<vmem>>, vector<4x128xf32>
    tpu.vector_store %arg8[%c24_749, %c0_750], %701 {strides = array<i32>} : memref<108x128xf32, #tpu.memory_space<vmem>>, vector<4x128xf32>,
    %703 = arith.index_cast %9 : i32 to index
    %c5_751 = arith.constant 5 : index
    %c0_752 = arith.constant 0 : index
    %c21_753 = arith.constant 21 : index
    %704 = vector.load %arg6[%703, %c5_751, %c0_752, %c21_753] : memref<2x10x4x256xf32, #tpu.memory_space<vmem>>, vector<1x1x4x128xf32>
    %705 = vector.shape_cast %704 : vector<1x1x4x128xf32> to vector<4x128xf32>
    %c28_754 = arith.constant 28 : index
    %c0_755 = arith.constant 0 : index
    %706 = vector.load %arg8[%c28_754, %c0_755] : memref<108x128xf32, #tpu.memory_space<vmem>>, vector<4x128xf32>
    tpu.vector_store %arg8[%c28_754, %c0_755], %705 {strides = array<i32>} : memref<108x128xf32, #tpu.memory_space<vmem>>, vector<4x128xf32>,
    %707 = arith.index_cast %9 : i32 to index
    %c5_756 = arith.constant 5 : index
    %c0_757 = arith.constant 0 : index
    %c22_758 = arith.constant 22 : index
    %708 = vector.load %arg6[%707, %c5_756, %c0_757, %c22_758] : memref<2x10x4x256xf32, #tpu.memory_space<vmem>>, vector<1x1x4x128xf32>
    %709 = vector.shape_cast %708 : vector<1x1x4x128xf32> to vector<4x128xf32>
    %c32_759 = arith.constant 32 : index
    %c0_760 = arith.constant 0 : index
    %710 = vector.load %arg8[%c32_759, %c0_760] : memref<108x128xf32, #tpu.memory_space<vmem>>, vector<4x128xf32>
    tpu.vector_store %arg8[%c32_759, %c0_760], %709 {strides = array<i32>} : memref<108x128xf32, #tpu.memory_space<vmem>>, vector<4x128xf32>,
    %711 = arith.index_cast %9 : i32 to index
    %c6_761 = arith.constant 6 : index
    %c0_762 = arith.constant 0 : index
    %c0_763 = arith.constant 0 : index
    %712 = vector.load %arg6[%711, %c6_761, %c0_762, %c0_763] : memref<2x10x4x256xf32, #tpu.memory_space<vmem>>, vector<1x1x4x128xf32>
    %713 = vector.shape_cast %712 : vector<1x1x4x128xf32> to vector<4x128xf32>
    %c36_764 = arith.constant 36 : index
    %c0_765 = arith.constant 0 : index
    %714 = vector.load %arg8[%c36_764, %c0_765] : memref<108x128xf32, #tpu.memory_space<vmem>>, vector<4x128xf32>
    tpu.vector_store %arg8[%c36_764, %c0_765], %713 {strides = array<i32>} : memref<108x128xf32, #tpu.memory_space<vmem>>, vector<4x128xf32>,
    %715 = arith.index_cast %9 : i32 to index
    %c6_766 = arith.constant 6 : index
    %c0_767 = arith.constant 0 : index
    %c1_768 = arith.constant 1 : index
    %716 = vector.load %arg6[%715, %c6_766, %c0_767, %c1_768] : memref<2x10x4x256xf32, #tpu.memory_space<vmem>>, vector<1x1x4x128xf32>
    %717 = vector.shape_cast %716 : vector<1x1x4x128xf32> to vector<4x128xf32>
    %c40_769 = arith.constant 40 : index
    %c0_770 = arith.constant 0 : index
    %718 = vector.load %arg8[%c40_769, %c0_770] : memref<108x128xf32, #tpu.memory_space<vmem>>, vector<4x128xf32>
    tpu.vector_store %arg8[%c40_769, %c0_770], %717 {strides = array<i32>} : memref<108x128xf32, #tpu.memory_space<vmem>>, vector<4x128xf32>,
    %719 = arith.index_cast %9 : i32 to index
    %c6_771 = arith.constant 6 : index
    %c0_772 = arith.constant 0 : index
    %c2_773 = arith.constant 2 : index
    %720 = vector.load %arg6[%719, %c6_771, %c0_772, %c2_773] : memref<2x10x4x256xf32, #tpu.memory_space<vmem>>, vector<1x1x4x128xf32>
    %721 = vector.shape_cast %720 : vector<1x1x4x128xf32> to vector<4x128xf32>
    %c44_774 = arith.constant 44 : index
    %c0_775 = arith.constant 0 : index
    %722 = vector.load %arg8[%c44_774, %c0_775] : memref<108x128xf32, #tpu.memory_space<vmem>>, vector<4x128xf32>
    tpu.vector_store %arg8[%c44_774, %c0_775], %721 {strides = array<i32>} : memref<108x128xf32, #tpu.memory_space<vmem>>, vector<4x128xf32>,
    %723 = arith.index_cast %9 : i32 to index
    %c6_776 = arith.constant 6 : index
    %c0_777 = arith.constant 0 : index
    %c10_778 = arith.constant 10 : index
    %724 = vector.load %arg6[%723, %c6_776, %c0_777, %c10_778] : memref<2x10x4x256xf32, #tpu.memory_space<vmem>>, vector<1x1x4x128xf32>
    %725 = vector.shape_cast %724 : vector<1x1x4x128xf32> to vector<4x128xf32>
    %c48_779 = arith.constant 48 : index
    %c0_780 = arith.constant 0 : index
    %726 = vector.load %arg8[%c48_779, %c0_780] : memref<108x128xf32, #tpu.memory_space<vmem>>, vector<4x128xf32>
    tpu.vector_store %arg8[%c48_779, %c0_780], %725 {strides = array<i32>} : memref<108x128xf32, #tpu.memory_space<vmem>>, vector<4x128xf32>,
    %727 = arith.index_cast %9 : i32 to index
    %c6_781 = arith.constant 6 : index
    %c0_782 = arith.constant 0 : index
    %c11_783 = arith.constant 11 : index
    %728 = vector.load %arg6[%727, %c6_781, %c0_782, %c11_783] : memref<2x10x4x256xf32, #tpu.memory_space<vmem>>, vector<1x1x4x128xf32>
    %729 = vector.shape_cast %728 : vector<1x1x4x128xf32> to vector<4x128xf32>
    %c52_784 = arith.constant 52 : index
    %c0_785 = arith.constant 0 : index
    %730 = vector.load %arg8[%c52_784, %c0_785] : memref<108x128xf32, #tpu.memory_space<vmem>>, vector<4x128xf32>
    tpu.vector_store %arg8[%c52_784, %c0_785], %729 {strides = array<i32>} : memref<108x128xf32, #tpu.memory_space<vmem>>, vector<4x128xf32>,
    %731 = arith.index_cast %9 : i32 to index
    %c6_786 = arith.constant 6 : index
    %c0_787 = arith.constant 0 : index
    %c12_788 = arith.constant 12 : index
    %732 = vector.load %arg6[%731, %c6_786, %c0_787, %c12_788] : memref<2x10x4x256xf32, #tpu.memory_space<vmem>>, vector<1x1x4x128xf32>
    %733 = vector.shape_cast %732 : vector<1x1x4x128xf32> to vector<4x128xf32>
    %c56_789 = arith.constant 56 : index
    %c0_790 = arith.constant 0 : index
    %734 = vector.load %arg8[%c56_789, %c0_790] : memref<108x128xf32, #tpu.memory_space<vmem>>, vector<4x128xf32>
    tpu.vector_store %arg8[%c56_789, %c0_790], %733 {strides = array<i32>} : memref<108x128xf32, #tpu.memory_space<vmem>>, vector<4x128xf32>,
    %735 = arith.index_cast %9 : i32 to index
    %c6_791 = arith.constant 6 : index
    %c0_792 = arith.constant 0 : index
    %c20_793 = arith.constant 20 : index
    %736 = vector.load %arg6[%735, %c6_791, %c0_792, %c20_793] : memref<2x10x4x256xf32, #tpu.memory_space<vmem>>, vector<1x1x4x128xf32>
    %737 = vector.shape_cast %736 : vector<1x1x4x128xf32> to vector<4x128xf32>
    %c60_794 = arith.constant 60 : index
    %c0_795 = arith.constant 0 : index
    %738 = vector.load %arg8[%c60_794, %c0_795] : memref<108x128xf32, #tpu.memory_space<vmem>>, vector<4x128xf32>
    tpu.vector_store %arg8[%c60_794, %c0_795], %737 {strides = array<i32>} : memref<108x128xf32, #tpu.memory_space<vmem>>, vector<4x128xf32>,
    %739 = arith.index_cast %9 : i32 to index
    %c6_796 = arith.constant 6 : index
    %c0_797 = arith.constant 0 : index
    %c21_798 = arith.constant 21 : index
    %740 = vector.load %arg6[%739, %c6_796, %c0_797, %c21_798] : memref<2x10x4x256xf32, #tpu.memory_space<vmem>>, vector<1x1x4x128xf32>
    %741 = vector.shape_cast %740 : vector<1x1x4x128xf32> to vector<4x128xf32>
    %c64_799 = arith.constant 64 : index
    %c0_800 = arith.constant 0 : index
    %742 = vector.load %arg8[%c64_799, %c0_800] : memref<108x128xf32, #tpu.memory_space<vmem>>, vector<4x128xf32>
    tpu.vector_store %arg8[%c64_799, %c0_800], %741 {strides = array<i32>} : memref<108x128xf32, #tpu.memory_space<vmem>>, vector<4x128xf32>,
    %743 = arith.index_cast %9 : i32 to index
    %c6_801 = arith.constant 6 : index
    %c0_802 = arith.constant 0 : index
    %c22_803 = arith.constant 22 : index
    %744 = vector.load %arg6[%743, %c6_801, %c0_802, %c22_803] : memref<2x10x4x256xf32, #tpu.memory_space<vmem>>, vector<1x1x4x128xf32>
    %745 = vector.shape_cast %744 : vector<1x1x4x128xf32> to vector<4x128xf32>
    %c68_804 = arith.constant 68 : index
    %c0_805 = arith.constant 0 : index
    %746 = vector.load %arg8[%c68_804, %c0_805] : memref<108x128xf32, #tpu.memory_space<vmem>>, vector<4x128xf32>
    tpu.vector_store %arg8[%c68_804, %c0_805], %745 {strides = array<i32>} : memref<108x128xf32, #tpu.memory_space<vmem>>, vector<4x128xf32>,
    %747 = arith.index_cast %9 : i32 to index
    %c7 = arith.constant 7 : index
    %c0_806 = arith.constant 0 : index
    %c0_807 = arith.constant 0 : index
    %748 = vector.load %arg6[%747, %c7, %c0_806, %c0_807] : memref<2x10x4x256xf32, #tpu.memory_space<vmem>>, vector<1x1x4x128xf32>
    %749 = vector.shape_cast %748 : vector<1x1x4x128xf32> to vector<4x128xf32>
    %c72_808 = arith.constant 72 : index
    %c0_809 = arith.constant 0 : index
    %750 = vector.load %arg8[%c72_808, %c0_809] : memref<108x128xf32, #tpu.memory_space<vmem>>, vector<4x128xf32>
    tpu.vector_store %arg8[%c72_808, %c0_809], %749 {strides = array<i32>} : memref<108x128xf32, #tpu.memory_space<vmem>>, vector<4x128xf32>,
    %751 = arith.index_cast %9 : i32 to index
    %c7_810 = arith.constant 7 : index
    %c0_811 = arith.constant 0 : index
    %c1_812 = arith.constant 1 : index
    %752 = vector.load %arg6[%751, %c7_810, %c0_811, %c1_812] : memref<2x10x4x256xf32, #tpu.memory_space<vmem>>, vector<1x1x4x128xf32>
    %753 = vector.shape_cast %752 : vector<1x1x4x128xf32> to vector<4x128xf32>
    %c76_813 = arith.constant 76 : index
    %c0_814 = arith.constant 0 : index
    %754 = vector.load %arg8[%c76_813, %c0_814] : memref<108x128xf32, #tpu.memory_space<vmem>>, vector<4x128xf32>
    tpu.vector_store %arg8[%c76_813, %c0_814], %753 {strides = array<i32>} : memref<108x128xf32, #tpu.memory_space<vmem>>, vector<4x128xf32>,
    %755 = arith.index_cast %9 : i32 to index
    %c7_815 = arith.constant 7 : index
    %c0_816 = arith.constant 0 : index
    %c2_817 = arith.constant 2 : index
    %756 = vector.load %arg6[%755, %c7_815, %c0_816, %c2_817] : memref<2x10x4x256xf32, #tpu.memory_space<vmem>>, vector<1x1x4x128xf32>
    %757 = vector.shape_cast %756 : vector<1x1x4x128xf32> to vector<4x128xf32>
    %c80_818 = arith.constant 80 : index
    %c0_819 = arith.constant 0 : index
    %758 = vector.load %arg8[%c80_818, %c0_819] : memref<108x128xf32, #tpu.memory_space<vmem>>, vector<4x128xf32>
    tpu.vector_store %arg8[%c80_818, %c0_819], %757 {strides = array<i32>} : memref<108x128xf32, #tpu.memory_space<vmem>>, vector<4x128xf32>,
    %759 = arith.index_cast %9 : i32 to index
    %c7_820 = arith.constant 7 : index
    %c0_821 = arith.constant 0 : index
    %c10_822 = arith.constant 10 : index
    %760 = vector.load %arg6[%759, %c7_820, %c0_821, %c10_822] : memref<2x10x4x256xf32, #tpu.memory_space<vmem>>, vector<1x1x4x128xf32>
    %761 = vector.shape_cast %760 : vector<1x1x4x128xf32> to vector<4x128xf32>
    %c84_823 = arith.constant 84 : index
    %c0_824 = arith.constant 0 : index
    %762 = vector.load %arg8[%c84_823, %c0_824] : memref<108x128xf32, #tpu.memory_space<vmem>>, vector<4x128xf32>
    tpu.vector_store %arg8[%c84_823, %c0_824], %761 {strides = array<i32>} : memref<108x128xf32, #tpu.memory_space<vmem>>, vector<4x128xf32>,
    %763 = arith.index_cast %9 : i32 to index
    %c7_825 = arith.constant 7 : index
    %c0_826 = arith.constant 0 : index
    %c11_827 = arith.constant 11 : index
    %764 = vector.load %arg6[%763, %c7_825, %c0_826, %c11_827] : memref<2x10x4x256xf32, #tpu.memory_space<vmem>>, vector<1x1x4x128xf32>
    %765 = vector.shape_cast %764 : vector<1x1x4x128xf32> to vector<4x128xf32>
    %c88_828 = arith.constant 88 : index
    %c0_829 = arith.constant 0 : index
    %766 = vector.load %arg8[%c88_828, %c0_829] : memref<108x128xf32, #tpu.memory_space<vmem>>, vector<4x128xf32>
    tpu.vector_store %arg8[%c88_828, %c0_829], %765 {strides = array<i32>} : memref<108x128xf32, #tpu.memory_space<vmem>>, vector<4x128xf32>,
    %767 = arith.index_cast %9 : i32 to index
    %c7_830 = arith.constant 7 : index
    %c0_831 = arith.constant 0 : index
    %c12_832 = arith.constant 12 : index
    %768 = vector.load %arg6[%767, %c7_830, %c0_831, %c12_832] : memref<2x10x4x256xf32, #tpu.memory_space<vmem>>, vector<1x1x4x128xf32>
    %769 = vector.shape_cast %768 : vector<1x1x4x128xf32> to vector<4x128xf32>
    %c92_833 = arith.constant 92 : index
    %c0_834 = arith.constant 0 : index
    %770 = vector.load %arg8[%c92_833, %c0_834] : memref<108x128xf32, #tpu.memory_space<vmem>>, vector<4x128xf32>
    tpu.vector_store %arg8[%c92_833, %c0_834], %769 {strides = array<i32>} : memref<108x128xf32, #tpu.memory_space<vmem>>, vector<4x128xf32>,
    %771 = arith.index_cast %9 : i32 to index
    %c7_835 = arith.constant 7 : index
    %c0_836 = arith.constant 0 : index
    %c20_837 = arith.constant 20 : index
    %772 = vector.load %arg6[%771, %c7_835, %c0_836, %c20_837] : memref<2x10x4x256xf32, #tpu.memory_space<vmem>>, vector<1x1x4x128xf32>
    %773 = vector.shape_cast %772 : vector<1x1x4x128xf32> to vector<4x128xf32>
    %c96_838 = arith.constant 96 : index
    %c0_839 = arith.constant 0 : index
    %774 = vector.load %arg8[%c96_838, %c0_839] : memref<108x128xf32, #tpu.memory_space<vmem>>, vector<4x128xf32>
    tpu.vector_store %arg8[%c96_838, %c0_839], %773 {strides = array<i32>} : memref<108x128xf32, #tpu.memory_space<vmem>>, vector<4x128xf32>,
    %775 = arith.index_cast %9 : i32 to index
    %c7_840 = arith.constant 7 : index
    %c0_841 = arith.constant 0 : index
    %c21_842 = arith.constant 21 : index
    %776 = vector.load %arg6[%775, %c7_840, %c0_841, %c21_842] : memref<2x10x4x256xf32, #tpu.memory_space<vmem>>, vector<1x1x4x128xf32>
    %777 = vector.shape_cast %776 : vector<1x1x4x128xf32> to vector<4x128xf32>
    %c100_843 = arith.constant 100 : index
    %c0_844 = arith.constant 0 : index
    %778 = vector.load %arg8[%c100_843, %c0_844] : memref<108x128xf32, #tpu.memory_space<vmem>>, vector<4x128xf32>
    tpu.vector_store %arg8[%c100_843, %c0_844], %777 {strides = array<i32>} : memref<108x128xf32, #tpu.memory_space<vmem>>, vector<4x128xf32>,
    %779 = arith.index_cast %9 : i32 to index
    %c7_845 = arith.constant 7 : index
    %c0_846 = arith.constant 0 : index
    %c22_847 = arith.constant 22 : index
    %780 = vector.load %arg6[%779, %c7_845, %c0_846, %c22_847] : memref<2x10x4x256xf32, #tpu.memory_space<vmem>>, vector<1x1x4x128xf32>
    %781 = vector.shape_cast %780 : vector<1x1x4x128xf32> to vector<4x128xf32>
    %c104_848 = arith.constant 104 : index
    %c0_849 = arith.constant 0 : index
    %782 = vector.load %arg8[%c104_848, %c0_849] : memref<108x128xf32, #tpu.memory_space<vmem>>, vector<4x128xf32>
    tpu.vector_store %arg8[%c104_848, %c0_849], %781 {strides = array<i32>} : memref<108x128xf32, #tpu.memory_space<vmem>>, vector<4x128xf32>,
    %c0_850 = arith.constant 0 : index
    %c0_851 = arith.constant 0 : index
    %783 = vector.load %arg8[%c0_850, %c0_851] : memref<108x128xf32, #tpu.memory_space<vmem>>, vector<108x128xf32>
    %cst_852 = arith.constant dense<0.000000e+00> : vector<8x128xf32>
    %784 = tpu.matmul %24, %783, %cst_852 {dimension_numbers = #tpu.dot_dimension_numbers<[1], [0], [0], [1], [0, 0, 1, 1], [], []>} : vector<8x108xf32>, vector<108x128xf32>, vector<8x128xf32> -> vector<8x128xf32>
    %785 = vector.broadcast %25 : vector<1x128xf32> to vector<8x128xf32>
    %786 = arith.mulf %784, %785 : vector<8x128xf32>
    %c0_853 = arith.constant 0 : index
    %787 = arith.index_cast %674 : i32 to index
    %c0_854 = arith.constant 0 : index
    %c0_855 = arith.constant 0 : index
    %788 = vector.load %arg5[%c0_853, %787, %c0_854, %c0_855] : memref<1x8x8x128xf32, #tpu.memory_space<vmem>>, vector<1x1x8x128xf32>
    %789 = vector.shape_cast %788 : vector<1x1x8x128xf32> to vector<8x128xf32>
    %790 = vector.shape_cast %786 : vector<8x128xf32> to vector<1x1x8x128xf32>
    tpu.vector_store %arg5[%c0_853, %787, %c0_854, %c0_855], %790 {strides = array<i32>} : memref<1x8x8x128xf32, #tpu.memory_space<vmem>>, vector<1x1x8x128xf32>,
    %cst_856 = arith.constant dense<0.000000e+00> : vector<8xf32>
    %791 = vector.multi_reduction <add>, %786, %cst_856 [1] : vector<8x128xf32> to vector<8xf32>
    %792 = vector.shape_cast %791 : vector<8xf32> to vector<8x1xf32>
    %cst_857 = arith.constant 1.000000e+00 : f32
    %793 = vector.broadcast %cst_857 : f32 to vector<8x1xf32>
    %794 = arith.mulf %793, %792 : vector<8x1xf32>
    %795 = arith.addf %666, %794 : vector<8x1xf32>
    %796 = arith.mulf %786, %786 : vector<8x128xf32>
    %cst_858 = arith.constant dense<0.000000e+00> : vector<8xf32>
    %797 = vector.multi_reduction <add>, %796, %cst_858 [1] : vector<8x128xf32> to vector<8xf32>
    %798 = vector.shape_cast %797 : vector<8xf32> to vector<8x1xf32>
    %cst_859 = arith.constant 1.000000e+00 : f32
    %799 = vector.broadcast %cst_859 : f32 to vector<8x1xf32>
    %800 = arith.mulf %799, %798 : vector<8x1xf32>
    %801 = arith.addf %672, %800 : vector<8x1xf32>
    %c8_i32_860 = arith.constant 8 : i32
    %802 = arith.muli %arg1, %c8_i32_860 : i32
    %c6_i32 = arith.constant 6 : i32
    %803 = arith.addi %802, %c6_i32 : i32
    %804 = arith.index_cast %9 : i32 to index
    %c6_861 = arith.constant 6 : index
    %c0_862 = arith.constant 0 : index
    %c0_863 = arith.constant 0 : index
    %805 = vector.load %arg6[%804, %c6_861, %c0_862, %c0_863] : memref<2x10x4x256xf32, #tpu.memory_space<vmem>>, vector<1x1x4x128xf32>
    %806 = vector.shape_cast %805 : vector<1x1x4x128xf32> to vector<4x128xf32>
    %c0_864 = arith.constant 0 : index
    %c0_865 = arith.constant 0 : index
    %807 = vector.load %arg8[%c0_864, %c0_865] : memref<108x128xf32, #tpu.memory_space<vmem>>, vector<4x128xf32>
    tpu.vector_store %arg8[%c0_864, %c0_865], %806 {strides = array<i32>} : memref<108x128xf32, #tpu.memory_space<vmem>>, vector<4x128xf32>,
    %808 = arith.index_cast %9 : i32 to index
    %c6_866 = arith.constant 6 : index
    %c0_867 = arith.constant 0 : index
    %c1_868 = arith.constant 1 : index
    %809 = vector.load %arg6[%808, %c6_866, %c0_867, %c1_868] : memref<2x10x4x256xf32, #tpu.memory_space<vmem>>, vector<1x1x4x128xf32>
    %810 = vector.shape_cast %809 : vector<1x1x4x128xf32> to vector<4x128xf32>
    %c4_869 = arith.constant 4 : index
    %c0_870 = arith.constant 0 : index
    %811 = vector.load %arg8[%c4_869, %c0_870] : memref<108x128xf32, #tpu.memory_space<vmem>>, vector<4x128xf32>
    tpu.vector_store %arg8[%c4_869, %c0_870], %810 {strides = array<i32>} : memref<108x128xf32, #tpu.memory_space<vmem>>, vector<4x128xf32>,
    %812 = arith.index_cast %9 : i32 to index
    %c6_871 = arith.constant 6 : index
    %c0_872 = arith.constant 0 : index
    %c2_873 = arith.constant 2 : index
    %813 = vector.load %arg6[%812, %c6_871, %c0_872, %c2_873] : memref<2x10x4x256xf32, #tpu.memory_space<vmem>>, vector<1x1x4x128xf32>
    %814 = vector.shape_cast %813 : vector<1x1x4x128xf32> to vector<4x128xf32>
    %c8_874 = arith.constant 8 : index
    %c0_875 = arith.constant 0 : index
    %815 = vector.load %arg8[%c8_874, %c0_875] : memref<108x128xf32, #tpu.memory_space<vmem>>, vector<4x128xf32>
    tpu.vector_store %arg8[%c8_874, %c0_875], %814 {strides = array<i32>} : memref<108x128xf32, #tpu.memory_space<vmem>>, vector<4x128xf32>,
    %816 = arith.index_cast %9 : i32 to index
    %c6_876 = arith.constant 6 : index
    %c0_877 = arith.constant 0 : index
    %c10_878 = arith.constant 10 : index
    %817 = vector.load %arg6[%816, %c6_876, %c0_877, %c10_878] : memref<2x10x4x256xf32, #tpu.memory_space<vmem>>, vector<1x1x4x128xf32>
    %818 = vector.shape_cast %817 : vector<1x1x4x128xf32> to vector<4x128xf32>
    %c12_879 = arith.constant 12 : index
    %c0_880 = arith.constant 0 : index
    %819 = vector.load %arg8[%c12_879, %c0_880] : memref<108x128xf32, #tpu.memory_space<vmem>>, vector<4x128xf32>
    tpu.vector_store %arg8[%c12_879, %c0_880], %818 {strides = array<i32>} : memref<108x128xf32, #tpu.memory_space<vmem>>, vector<4x128xf32>,
    %820 = arith.index_cast %9 : i32 to index
    %c6_881 = arith.constant 6 : index
    %c0_882 = arith.constant 0 : index
    %c11_883 = arith.constant 11 : index
    %821 = vector.load %arg6[%820, %c6_881, %c0_882, %c11_883] : memref<2x10x4x256xf32, #tpu.memory_space<vmem>>, vector<1x1x4x128xf32>
    %822 = vector.shape_cast %821 : vector<1x1x4x128xf32> to vector<4x128xf32>
    %c16_884 = arith.constant 16 : index
    %c0_885 = arith.constant 0 : index
    %823 = vector.load %arg8[%c16_884, %c0_885] : memref<108x128xf32, #tpu.memory_space<vmem>>, vector<4x128xf32>
    tpu.vector_store %arg8[%c16_884, %c0_885], %822 {strides = array<i32>} : memref<108x128xf32, #tpu.memory_space<vmem>>, vector<4x128xf32>,
    %824 = arith.index_cast %9 : i32 to index
    %c6_886 = arith.constant 6 : index
    %c0_887 = arith.constant 0 : index
    %c12_888 = arith.constant 12 : index
    %825 = vector.load %arg6[%824, %c6_886, %c0_887, %c12_888] : memref<2x10x4x256xf32, #tpu.memory_space<vmem>>, vector<1x1x4x128xf32>
    %826 = vector.shape_cast %825 : vector<1x1x4x128xf32> to vector<4x128xf32>
    %c20_889 = arith.constant 20 : index
    %c0_890 = arith.constant 0 : index
    %827 = vector.load %arg8[%c20_889, %c0_890] : memref<108x128xf32, #tpu.memory_space<vmem>>, vector<4x128xf32>
    tpu.vector_store %arg8[%c20_889, %c0_890], %826 {strides = array<i32>} : memref<108x128xf32, #tpu.memory_space<vmem>>, vector<4x128xf32>,
    %828 = arith.index_cast %9 : i32 to index
    %c6_891 = arith.constant 6 : index
    %c0_892 = arith.constant 0 : index
    %c20_893 = arith.constant 20 : index
    %829 = vector.load %arg6[%828, %c6_891, %c0_892, %c20_893] : memref<2x10x4x256xf32, #tpu.memory_space<vmem>>, vector<1x1x4x128xf32>
    %830 = vector.shape_cast %829 : vector<1x1x4x128xf32> to vector<4x128xf32>
    %c24_894 = arith.constant 24 : index
    %c0_895 = arith.constant 0 : index
    %831 = vector.load %arg8[%c24_894, %c0_895] : memref<108x128xf32, #tpu.memory_space<vmem>>, vector<4x128xf32>
    tpu.vector_store %arg8[%c24_894, %c0_895], %830 {strides = array<i32>} : memref<108x128xf32, #tpu.memory_space<vmem>>, vector<4x128xf32>,
    %832 = arith.index_cast %9 : i32 to index
    %c6_896 = arith.constant 6 : index
    %c0_897 = arith.constant 0 : index
    %c21_898 = arith.constant 21 : index
    %833 = vector.load %arg6[%832, %c6_896, %c0_897, %c21_898] : memref<2x10x4x256xf32, #tpu.memory_space<vmem>>, vector<1x1x4x128xf32>
    %834 = vector.shape_cast %833 : vector<1x1x4x128xf32> to vector<4x128xf32>
    %c28_899 = arith.constant 28 : index
    %c0_900 = arith.constant 0 : index
    %835 = vector.load %arg8[%c28_899, %c0_900] : memref<108x128xf32, #tpu.memory_space<vmem>>, vector<4x128xf32>
    tpu.vector_store %arg8[%c28_899, %c0_900], %834 {strides = array<i32>} : memref<108x128xf32, #tpu.memory_space<vmem>>, vector<4x128xf32>,
    %836 = arith.index_cast %9 : i32 to index
    %c6_901 = arith.constant 6 : index
    %c0_902 = arith.constant 0 : index
    %c22_903 = arith.constant 22 : index
    %837 = vector.load %arg6[%836, %c6_901, %c0_902, %c22_903] : memref<2x10x4x256xf32, #tpu.memory_space<vmem>>, vector<1x1x4x128xf32>
    %838 = vector.shape_cast %837 : vector<1x1x4x128xf32> to vector<4x128xf32>
    %c32_904 = arith.constant 32 : index
    %c0_905 = arith.constant 0 : index
    %839 = vector.load %arg8[%c32_904, %c0_905] : memref<108x128xf32, #tpu.memory_space<vmem>>, vector<4x128xf32>
    tpu.vector_store %arg8[%c32_904, %c0_905], %838 {strides = array<i32>} : memref<108x128xf32, #tpu.memory_space<vmem>>, vector<4x128xf32>,
    %840 = arith.index_cast %9 : i32 to index
    %c7_906 = arith.constant 7 : index
    %c0_907 = arith.constant 0 : index
    %c0_908 = arith.constant 0 : index
    %841 = vector.load %arg6[%840, %c7_906, %c0_907, %c0_908] : memref<2x10x4x256xf32, #tpu.memory_space<vmem>>, vector<1x1x4x128xf32>
    %842 = vector.shape_cast %841 : vector<1x1x4x128xf32> to vector<4x128xf32>
    %c36_909 = arith.constant 36 : index
    %c0_910 = arith.constant 0 : index
    %843 = vector.load %arg8[%c36_909, %c0_910] : memref<108x128xf32, #tpu.memory_space<vmem>>, vector<4x128xf32>
    tpu.vector_store %arg8[%c36_909, %c0_910], %842 {strides = array<i32>} : memref<108x128xf32, #tpu.memory_space<vmem>>, vector<4x128xf32>,
    %844 = arith.index_cast %9 : i32 to index
    %c7_911 = arith.constant 7 : index
    %c0_912 = arith.constant 0 : index
    %c1_913 = arith.constant 1 : index
    %845 = vector.load %arg6[%844, %c7_911, %c0_912, %c1_913] : memref<2x10x4x256xf32, #tpu.memory_space<vmem>>, vector<1x1x4x128xf32>
    %846 = vector.shape_cast %845 : vector<1x1x4x128xf32> to vector<4x128xf32>
    %c40_914 = arith.constant 40 : index
    %c0_915 = arith.constant 0 : index
    %847 = vector.load %arg8[%c40_914, %c0_915] : memref<108x128xf32, #tpu.memory_space<vmem>>, vector<4x128xf32>
    tpu.vector_store %arg8[%c40_914, %c0_915], %846 {strides = array<i32>} : memref<108x128xf32, #tpu.memory_space<vmem>>, vector<4x128xf32>,
    %848 = arith.index_cast %9 : i32 to index
    %c7_916 = arith.constant 7 : index
    %c0_917 = arith.constant 0 : index
    %c2_918 = arith.constant 2 : index
    %849 = vector.load %arg6[%848, %c7_916, %c0_917, %c2_918] : memref<2x10x4x256xf32, #tpu.memory_space<vmem>>, vector<1x1x4x128xf32>
    %850 = vector.shape_cast %849 : vector<1x1x4x128xf32> to vector<4x128xf32>
    %c44_919 = arith.constant 44 : index
    %c0_920 = arith.constant 0 : index
    %851 = vector.load %arg8[%c44_919, %c0_920] : memref<108x128xf32, #tpu.memory_space<vmem>>, vector<4x128xf32>
    tpu.vector_store %arg8[%c44_919, %c0_920], %850 {strides = array<i32>} : memref<108x128xf32, #tpu.memory_space<vmem>>, vector<4x128xf32>,
    %852 = arith.index_cast %9 : i32 to index
    %c7_921 = arith.constant 7 : index
    %c0_922 = arith.constant 0 : index
    %c10_923 = arith.constant 10 : index
    %853 = vector.load %arg6[%852, %c7_921, %c0_922, %c10_923] : memref<2x10x4x256xf32, #tpu.memory_space<vmem>>, vector<1x1x4x128xf32>
    %854 = vector.shape_cast %853 : vector<1x1x4x128xf32> to vector<4x128xf32>
    %c48_924 = arith.constant 48 : index
    %c0_925 = arith.constant 0 : index
    %855 = vector.load %arg8[%c48_924, %c0_925] : memref<108x128xf32, #tpu.memory_space<vmem>>, vector<4x128xf32>
    tpu.vector_store %arg8[%c48_924, %c0_925], %854 {strides = array<i32>} : memref<108x128xf32, #tpu.memory_space<vmem>>, vector<4x128xf32>,
    %856 = arith.index_cast %9 : i32 to index
    %c7_926 = arith.constant 7 : index
    %c0_927 = arith.constant 0 : index
    %c11_928 = arith.constant 11 : index
    %857 = vector.load %arg6[%856, %c7_926, %c0_927, %c11_928] : memref<2x10x4x256xf32, #tpu.memory_space<vmem>>, vector<1x1x4x128xf32>
    %858 = vector.shape_cast %857 : vector<1x1x4x128xf32> to vector<4x128xf32>
    %c52_929 = arith.constant 52 : index
    %c0_930 = arith.constant 0 : index
    %859 = vector.load %arg8[%c52_929, %c0_930] : memref<108x128xf32, #tpu.memory_space<vmem>>, vector<4x128xf32>
    tpu.vector_store %arg8[%c52_929, %c0_930], %858 {strides = array<i32>} : memref<108x128xf32, #tpu.memory_space<vmem>>, vector<4x128xf32>,
    %860 = arith.index_cast %9 : i32 to index
    %c7_931 = arith.constant 7 : index
    %c0_932 = arith.constant 0 : index
    %c12_933 = arith.constant 12 : index
    %861 = vector.load %arg6[%860, %c7_931, %c0_932, %c12_933] : memref<2x10x4x256xf32, #tpu.memory_space<vmem>>, vector<1x1x4x128xf32>
    %862 = vector.shape_cast %861 : vector<1x1x4x128xf32> to vector<4x128xf32>
    %c56_934 = arith.constant 56 : index
    %c0_935 = arith.constant 0 : index
    %863 = vector.load %arg8[%c56_934, %c0_935] : memref<108x128xf32, #tpu.memory_space<vmem>>, vector<4x128xf32>
    tpu.vector_store %arg8[%c56_934, %c0_935], %862 {strides = array<i32>} : memref<108x128xf32, #tpu.memory_space<vmem>>, vector<4x128xf32>,
    %864 = arith.index_cast %9 : i32 to index
    %c7_936 = arith.constant 7 : index
    %c0_937 = arith.constant 0 : index
    %c20_938 = arith.constant 20 : index
    %865 = vector.load %arg6[%864, %c7_936, %c0_937, %c20_938] : memref<2x10x4x256xf32, #tpu.memory_space<vmem>>, vector<1x1x4x128xf32>
    %866 = vector.shape_cast %865 : vector<1x1x4x128xf32> to vector<4x128xf32>
    %c60_939 = arith.constant 60 : index
    %c0_940 = arith.constant 0 : index
    %867 = vector.load %arg8[%c60_939, %c0_940] : memref<108x128xf32, #tpu.memory_space<vmem>>, vector<4x128xf32>
    tpu.vector_store %arg8[%c60_939, %c0_940], %866 {strides = array<i32>} : memref<108x128xf32, #tpu.memory_space<vmem>>, vector<4x128xf32>,
    %868 = arith.index_cast %9 : i32 to index
    %c7_941 = arith.constant 7 : index
    %c0_942 = arith.constant 0 : index
    %c21_943 = arith.constant 21 : index
    %869 = vector.load %arg6[%868, %c7_941, %c0_942, %c21_943] : memref<2x10x4x256xf32, #tpu.memory_space<vmem>>, vector<1x1x4x128xf32>
    %870 = vector.shape_cast %869 : vector<1x1x4x128xf32> to vector<4x128xf32>
    %c64_944 = arith.constant 64 : index
    %c0_945 = arith.constant 0 : index
    %871 = vector.load %arg8[%c64_944, %c0_945] : memref<108x128xf32, #tpu.memory_space<vmem>>, vector<4x128xf32>
    tpu.vector_store %arg8[%c64_944, %c0_945], %870 {strides = array<i32>} : memref<108x128xf32, #tpu.memory_space<vmem>>, vector<4x128xf32>,
    %872 = arith.index_cast %9 : i32 to index
    %c7_946 = arith.constant 7 : index
    %c0_947 = arith.constant 0 : index
    %c22_948 = arith.constant 22 : index
    %873 = vector.load %arg6[%872, %c7_946, %c0_947, %c22_948] : memref<2x10x4x256xf32, #tpu.memory_space<vmem>>, vector<1x1x4x128xf32>
    %874 = vector.shape_cast %873 : vector<1x1x4x128xf32> to vector<4x128xf32>
    %c68_949 = arith.constant 68 : index
    %c0_950 = arith.constant 0 : index
    %875 = vector.load %arg8[%c68_949, %c0_950] : memref<108x128xf32, #tpu.memory_space<vmem>>, vector<4x128xf32>
    tpu.vector_store %arg8[%c68_949, %c0_950], %874 {strides = array<i32>} : memref<108x128xf32, #tpu.memory_space<vmem>>, vector<4x128xf32>,
    %876 = arith.index_cast %9 : i32 to index
    %c8_951 = arith.constant 8 : index
    %c0_952 = arith.constant 0 : index
    %c0_953 = arith.constant 0 : index
    %877 = vector.load %arg6[%876, %c8_951, %c0_952, %c0_953] : memref<2x10x4x256xf32, #tpu.memory_space<vmem>>, vector<1x1x4x128xf32>
    %878 = vector.shape_cast %877 : vector<1x1x4x128xf32> to vector<4x128xf32>
    %c72_954 = arith.constant 72 : index
    %c0_955 = arith.constant 0 : index
    %879 = vector.load %arg8[%c72_954, %c0_955] : memref<108x128xf32, #tpu.memory_space<vmem>>, vector<4x128xf32>
    tpu.vector_store %arg8[%c72_954, %c0_955], %878 {strides = array<i32>} : memref<108x128xf32, #tpu.memory_space<vmem>>, vector<4x128xf32>,
    %880 = arith.index_cast %9 : i32 to index
    %c8_956 = arith.constant 8 : index
    %c0_957 = arith.constant 0 : index
    %c1_958 = arith.constant 1 : index
    %881 = vector.load %arg6[%880, %c8_956, %c0_957, %c1_958] : memref<2x10x4x256xf32, #tpu.memory_space<vmem>>, vector<1x1x4x128xf32>
    %882 = vector.shape_cast %881 : vector<1x1x4x128xf32> to vector<4x128xf32>
    %c76_959 = arith.constant 76 : index
    %c0_960 = arith.constant 0 : index
    %883 = vector.load %arg8[%c76_959, %c0_960] : memref<108x128xf32, #tpu.memory_space<vmem>>, vector<4x128xf32>
    tpu.vector_store %arg8[%c76_959, %c0_960], %882 {strides = array<i32>} : memref<108x128xf32, #tpu.memory_space<vmem>>, vector<4x128xf32>,
    %884 = arith.index_cast %9 : i32 to index
    %c8_961 = arith.constant 8 : index
    %c0_962 = arith.constant 0 : index
    %c2_963 = arith.constant 2 : index
    %885 = vector.load %arg6[%884, %c8_961, %c0_962, %c2_963] : memref<2x10x4x256xf32, #tpu.memory_space<vmem>>, vector<1x1x4x128xf32>
    %886 = vector.shape_cast %885 : vector<1x1x4x128xf32> to vector<4x128xf32>
    %c80_964 = arith.constant 80 : index
    %c0_965 = arith.constant 0 : index
    %887 = vector.load %arg8[%c80_964, %c0_965] : memref<108x128xf32, #tpu.memory_space<vmem>>, vector<4x128xf32>
    tpu.vector_store %arg8[%c80_964, %c0_965], %886 {strides = array<i32>} : memref<108x128xf32, #tpu.memory_space<vmem>>, vector<4x128xf32>,
    %888 = arith.index_cast %9 : i32 to index
    %c8_966 = arith.constant 8 : index
    %c0_967 = arith.constant 0 : index
    %c10_968 = arith.constant 10 : index
    %889 = vector.load %arg6[%888, %c8_966, %c0_967, %c10_968] : memref<2x10x4x256xf32, #tpu.memory_space<vmem>>, vector<1x1x4x128xf32>
    %890 = vector.shape_cast %889 : vector<1x1x4x128xf32> to vector<4x128xf32>
    %c84_969 = arith.constant 84 : index
    %c0_970 = arith.constant 0 : index
    %891 = vector.load %arg8[%c84_969, %c0_970] : memref<108x128xf32, #tpu.memory_space<vmem>>, vector<4x128xf32>
    tpu.vector_store %arg8[%c84_969, %c0_970], %890 {strides = array<i32>} : memref<108x128xf32, #tpu.memory_space<vmem>>, vector<4x128xf32>,
    %892 = arith.index_cast %9 : i32 to index
    %c8_971 = arith.constant 8 : index
    %c0_972 = arith.constant 0 : index
    %c11_973 = arith.constant 11 : index
    %893 = vector.load %arg6[%892, %c8_971, %c0_972, %c11_973] : memref<2x10x4x256xf32, #tpu.memory_space<vmem>>, vector<1x1x4x128xf32>
    %894 = vector.shape_cast %893 : vector<1x1x4x128xf32> to vector<4x128xf32>
    %c88_974 = arith.constant 88 : index
    %c0_975 = arith.constant 0 : index
    %895 = vector.load %arg8[%c88_974, %c0_975] : memref<108x128xf32, #tpu.memory_space<vmem>>, vector<4x128xf32>
    tpu.vector_store %arg8[%c88_974, %c0_975], %894 {strides = array<i32>} : memref<108x128xf32, #tpu.memory_space<vmem>>, vector<4x128xf32>,
    %896 = arith.index_cast %9 : i32 to index
    %c8_976 = arith.constant 8 : index
    %c0_977 = arith.constant 0 : index
    %c12_978 = arith.constant 12 : index
    %897 = vector.load %arg6[%896, %c8_976, %c0_977, %c12_978] : memref<2x10x4x256xf32, #tpu.memory_space<vmem>>, vector<1x1x4x128xf32>
    %898 = vector.shape_cast %897 : vector<1x1x4x128xf32> to vector<4x128xf32>
    %c92_979 = arith.constant 92 : index
    %c0_980 = arith.constant 0 : index
    %899 = vector.load %arg8[%c92_979, %c0_980] : memref<108x128xf32, #tpu.memory_space<vmem>>, vector<4x128xf32>
    tpu.vector_store %arg8[%c92_979, %c0_980], %898 {strides = array<i32>} : memref<108x128xf32, #tpu.memory_space<vmem>>, vector<4x128xf32>,
    %900 = arith.index_cast %9 : i32 to index
    %c8_981 = arith.constant 8 : index
    %c0_982 = arith.constant 0 : index
    %c20_983 = arith.constant 20 : index
    %901 = vector.load %arg6[%900, %c8_981, %c0_982, %c20_983] : memref<2x10x4x256xf32, #tpu.memory_space<vmem>>, vector<1x1x4x128xf32>
    %902 = vector.shape_cast %901 : vector<1x1x4x128xf32> to vector<4x128xf32>
    %c96_984 = arith.constant 96 : index
    %c0_985 = arith.constant 0 : index
    %903 = vector.load %arg8[%c96_984, %c0_985] : memref<108x128xf32, #tpu.memory_space<vmem>>, vector<4x128xf32>
    tpu.vector_store %arg8[%c96_984, %c0_985], %902 {strides = array<i32>} : memref<108x128xf32, #tpu.memory_space<vmem>>, vector<4x128xf32>,
    %904 = arith.index_cast %9 : i32 to index
    %c8_986 = arith.constant 8 : index
    %c0_987 = arith.constant 0 : index
    %c21_988 = arith.constant 21 : index
    %905 = vector.load %arg6[%904, %c8_986, %c0_987, %c21_988] : memref<2x10x4x256xf32, #tpu.memory_space<vmem>>, vector<1x1x4x128xf32>
    %906 = vector.shape_cast %905 : vector<1x1x4x128xf32> to vector<4x128xf32>
    %c100_989 = arith.constant 100 : index
    %c0_990 = arith.constant 0 : index
    %907 = vector.load %arg8[%c100_989, %c0_990] : memref<108x128xf32, #tpu.memory_space<vmem>>, vector<4x128xf32>
    tpu.vector_store %arg8[%c100_989, %c0_990], %906 {strides = array<i32>} : memref<108x128xf32, #tpu.memory_space<vmem>>, vector<4x128xf32>,
    %908 = arith.index_cast %9 : i32 to index
    %c8_991 = arith.constant 8 : index
    %c0_992 = arith.constant 0 : index
    %c22_993 = arith.constant 22 : index
    %909 = vector.load %arg6[%908, %c8_991, %c0_992, %c22_993] : memref<2x10x4x256xf32, #tpu.memory_space<vmem>>, vector<1x1x4x128xf32>
    %910 = vector.shape_cast %909 : vector<1x1x4x128xf32> to vector<4x128xf32>
    %c104_994 = arith.constant 104 : index
    %c0_995 = arith.constant 0 : index
    %911 = vector.load %arg8[%c104_994, %c0_995] : memref<108x128xf32, #tpu.memory_space<vmem>>, vector<4x128xf32>
    tpu.vector_store %arg8[%c104_994, %c0_995], %910 {strides = array<i32>} : memref<108x128xf32, #tpu.memory_space<vmem>>, vector<4x128xf32>,
    %c0_996 = arith.constant 0 : index
    %c0_997 = arith.constant 0 : index
    %912 = vector.load %arg8[%c0_996, %c0_997] : memref<108x128xf32, #tpu.memory_space<vmem>>, vector<108x128xf32>
    %cst_998 = arith.constant dense<0.000000e+00> : vector<8x128xf32>
    %913 = tpu.matmul %24, %912, %cst_998 {dimension_numbers = #tpu.dot_dimension_numbers<[1], [0], [0], [1], [0, 0, 1, 1], [], []>} : vector<8x108xf32>, vector<108x128xf32>, vector<8x128xf32> -> vector<8x128xf32>
    %914 = vector.broadcast %25 : vector<1x128xf32> to vector<8x128xf32>
    %915 = arith.mulf %913, %914 : vector<8x128xf32>
    %c0_999 = arith.constant 0 : index
    %916 = arith.index_cast %803 : i32 to index
    %c0_1000 = arith.constant 0 : index
    %c0_1001 = arith.constant 0 : index
    %917 = vector.load %arg5[%c0_999, %916, %c0_1000, %c0_1001] : memref<1x8x8x128xf32, #tpu.memory_space<vmem>>, vector<1x1x8x128xf32>
    %918 = vector.shape_cast %917 : vector<1x1x8x128xf32> to vector<8x128xf32>
    %919 = vector.shape_cast %915 : vector<8x128xf32> to vector<1x1x8x128xf32>
    tpu.vector_store %arg5[%c0_999, %916, %c0_1000, %c0_1001], %919 {strides = array<i32>} : memref<1x8x8x128xf32, #tpu.memory_space<vmem>>, vector<1x1x8x128xf32>,
    %cst_1002 = arith.constant dense<0.000000e+00> : vector<8xf32>
    %920 = vector.multi_reduction <add>, %915, %cst_1002 [1] : vector<8x128xf32> to vector<8xf32>
    %921 = vector.shape_cast %920 : vector<8xf32> to vector<8x1xf32>
    %cst_1003 = arith.constant 1.000000e+00 : f32
    %922 = vector.broadcast %cst_1003 : f32 to vector<8x1xf32>
    %923 = arith.mulf %922, %921 : vector<8x1xf32>
    %924 = arith.addf %795, %923 : vector<8x1xf32>
    %925 = arith.mulf %915, %915 : vector<8x128xf32>
    %cst_1004 = arith.constant dense<0.000000e+00> : vector<8xf32>
    %926 = vector.multi_reduction <add>, %925, %cst_1004 [1] : vector<8x128xf32> to vector<8xf32>
    %927 = vector.shape_cast %926 : vector<8xf32> to vector<8x1xf32>
    %cst_1005 = arith.constant 1.000000e+00 : f32
    %928 = vector.broadcast %cst_1005 : f32 to vector<8x1xf32>
    %929 = arith.mulf %928, %927 : vector<8x1xf32>
    %930 = arith.addf %801, %929 : vector<8x1xf32>
    %c8_i32_1006 = arith.constant 8 : i32
    %931 = arith.muli %arg1, %c8_i32_1006 : i32
    %c7_i32 = arith.constant 7 : i32
    %932 = arith.addi %931, %c7_i32 : i32
    %933 = arith.index_cast %9 : i32 to index
    %c7_1007 = arith.constant 7 : index
    %c0_1008 = arith.constant 0 : index
    %c0_1009 = arith.constant 0 : index
    %934 = vector.load %arg6[%933, %c7_1007, %c0_1008, %c0_1009] : memref<2x10x4x256xf32, #tpu.memory_space<vmem>>, vector<1x1x4x128xf32>
    %935 = vector.shape_cast %934 : vector<1x1x4x128xf32> to vector<4x128xf32>
    %c0_1010 = arith.constant 0 : index
    %c0_1011 = arith.constant 0 : index
    %936 = vector.load %arg8[%c0_1010, %c0_1011] : memref<108x128xf32, #tpu.memory_space<vmem>>, vector<4x128xf32>
    tpu.vector_store %arg8[%c0_1010, %c0_1011], %935 {strides = array<i32>} : memref<108x128xf32, #tpu.memory_space<vmem>>, vector<4x128xf32>,
    %937 = arith.index_cast %9 : i32 to index
    %c7_1012 = arith.constant 7 : index
    %c0_1013 = arith.constant 0 : index
    %c1_1014 = arith.constant 1 : index
    %938 = vector.load %arg6[%937, %c7_1012, %c0_1013, %c1_1014] : memref<2x10x4x256xf32, #tpu.memory_space<vmem>>, vector<1x1x4x128xf32>
    %939 = vector.shape_cast %938 : vector<1x1x4x128xf32> to vector<4x128xf32>
    %c4_1015 = arith.constant 4 : index
    %c0_1016 = arith.constant 0 : index
    %940 = vector.load %arg8[%c4_1015, %c0_1016] : memref<108x128xf32, #tpu.memory_space<vmem>>, vector<4x128xf32>
    tpu.vector_store %arg8[%c4_1015, %c0_1016], %939 {strides = array<i32>} : memref<108x128xf32, #tpu.memory_space<vmem>>, vector<4x128xf32>,
    %941 = arith.index_cast %9 : i32 to index
    %c7_1017 = arith.constant 7 : index
    %c0_1018 = arith.constant 0 : index
    %c2_1019 = arith.constant 2 : index
    %942 = vector.load %arg6[%941, %c7_1017, %c0_1018, %c2_1019] : memref<2x10x4x256xf32, #tpu.memory_space<vmem>>, vector<1x1x4x128xf32>
    %943 = vector.shape_cast %942 : vector<1x1x4x128xf32> to vector<4x128xf32>
    %c8_1020 = arith.constant 8 : index
    %c0_1021 = arith.constant 0 : index
    %944 = vector.load %arg8[%c8_1020, %c0_1021] : memref<108x128xf32, #tpu.memory_space<vmem>>, vector<4x128xf32>
    tpu.vector_store %arg8[%c8_1020, %c0_1021], %943 {strides = array<i32>} : memref<108x128xf32, #tpu.memory_space<vmem>>, vector<4x128xf32>,
    %945 = arith.index_cast %9 : i32 to index
    %c7_1022 = arith.constant 7 : index
    %c0_1023 = arith.constant 0 : index
    %c10_1024 = arith.constant 10 : index
    %946 = vector.load %arg6[%945, %c7_1022, %c0_1023, %c10_1024] : memref<2x10x4x256xf32, #tpu.memory_space<vmem>>, vector<1x1x4x128xf32>
    %947 = vector.shape_cast %946 : vector<1x1x4x128xf32> to vector<4x128xf32>
    %c12_1025 = arith.constant 12 : index
    %c0_1026 = arith.constant 0 : index
    %948 = vector.load %arg8[%c12_1025, %c0_1026] : memref<108x128xf32, #tpu.memory_space<vmem>>, vector<4x128xf32>
    tpu.vector_store %arg8[%c12_1025, %c0_1026], %947 {strides = array<i32>} : memref<108x128xf32, #tpu.memory_space<vmem>>, vector<4x128xf32>,
    %949 = arith.index_cast %9 : i32 to index
    %c7_1027 = arith.constant 7 : index
    %c0_1028 = arith.constant 0 : index
    %c11_1029 = arith.constant 11 : index
    %950 = vector.load %arg6[%949, %c7_1027, %c0_1028, %c11_1029] : memref<2x10x4x256xf32, #tpu.memory_space<vmem>>, vector<1x1x4x128xf32>
    %951 = vector.shape_cast %950 : vector<1x1x4x128xf32> to vector<4x128xf32>
    %c16_1030 = arith.constant 16 : index
    %c0_1031 = arith.constant 0 : index
    %952 = vector.load %arg8[%c16_1030, %c0_1031] : memref<108x128xf32, #tpu.memory_space<vmem>>, vector<4x128xf32>
    tpu.vector_store %arg8[%c16_1030, %c0_1031], %951 {strides = array<i32>} : memref<108x128xf32, #tpu.memory_space<vmem>>, vector<4x128xf32>,
    %953 = arith.index_cast %9 : i32 to index
    %c7_1032 = arith.constant 7 : index
    %c0_1033 = arith.constant 0 : index
    %c12_1034 = arith.constant 12 : index
    %954 = vector.load %arg6[%953, %c7_1032, %c0_1033, %c12_1034] : memref<2x10x4x256xf32, #tpu.memory_space<vmem>>, vector<1x1x4x128xf32>
    %955 = vector.shape_cast %954 : vector<1x1x4x128xf32> to vector<4x128xf32>
    %c20_1035 = arith.constant 20 : index
    %c0_1036 = arith.constant 0 : index
    %956 = vector.load %arg8[%c20_1035, %c0_1036] : memref<108x128xf32, #tpu.memory_space<vmem>>, vector<4x128xf32>
    tpu.vector_store %arg8[%c20_1035, %c0_1036], %955 {strides = array<i32>} : memref<108x128xf32, #tpu.memory_space<vmem>>, vector<4x128xf32>,
    %957 = arith.index_cast %9 : i32 to index
    %c7_1037 = arith.constant 7 : index
    %c0_1038 = arith.constant 0 : index
    %c20_1039 = arith.constant 20 : index
    %958 = vector.load %arg6[%957, %c7_1037, %c0_1038, %c20_1039] : memref<2x10x4x256xf32, #tpu.memory_space<vmem>>, vector<1x1x4x128xf32>
    %959 = vector.shape_cast %958 : vector<1x1x4x128xf32> to vector<4x128xf32>
    %c24_1040 = arith.constant 24 : index
    %c0_1041 = arith.constant 0 : index
    %960 = vector.load %arg8[%c24_1040, %c0_1041] : memref<108x128xf32, #tpu.memory_space<vmem>>, vector<4x128xf32>
    tpu.vector_store %arg8[%c24_1040, %c0_1041], %959 {strides = array<i32>} : memref<108x128xf32, #tpu.memory_space<vmem>>, vector<4x128xf32>,
    %961 = arith.index_cast %9 : i32 to index
    %c7_1042 = arith.constant 7 : index
    %c0_1043 = arith.constant 0 : index
    %c21_1044 = arith.constant 21 : index
    %962 = vector.load %arg6[%961, %c7_1042, %c0_1043, %c21_1044] : memref<2x10x4x256xf32, #tpu.memory_space<vmem>>, vector<1x1x4x128xf32>
    %963 = vector.shape_cast %962 : vector<1x1x4x128xf32> to vector<4x128xf32>
    %c28_1045 = arith.constant 28 : index
    %c0_1046 = arith.constant 0 : index
    %964 = vector.load %arg8[%c28_1045, %c0_1046] : memref<108x128xf32, #tpu.memory_space<vmem>>, vector<4x128xf32>
    tpu.vector_store %arg8[%c28_1045, %c0_1046], %963 {strides = array<i32>} : memref<108x128xf32, #tpu.memory_space<vmem>>, vector<4x128xf32>,
    %965 = arith.index_cast %9 : i32 to index
    %c7_1047 = arith.constant 7 : index
    %c0_1048 = arith.constant 0 : index
    %c22_1049 = arith.constant 22 : index
    %966 = vector.load %arg6[%965, %c7_1047, %c0_1048, %c22_1049] : memref<2x10x4x256xf32, #tpu.memory_space<vmem>>, vector<1x1x4x128xf32>
    %967 = vector.shape_cast %966 : vector<1x1x4x128xf32> to vector<4x128xf32>
    %c32_1050 = arith.constant 32 : index
    %c0_1051 = arith.constant 0 : index
    %968 = vector.load %arg8[%c32_1050, %c0_1051] : memref<108x128xf32, #tpu.memory_space<vmem>>, vector<4x128xf32>
    tpu.vector_store %arg8[%c32_1050, %c0_1051], %967 {strides = array<i32>} : memref<108x128xf32, #tpu.memory_space<vmem>>, vector<4x128xf32>,
    %969 = arith.index_cast %9 : i32 to index
    %c8_1052 = arith.constant 8 : index
    %c0_1053 = arith.constant 0 : index
    %c0_1054 = arith.constant 0 : index
    %970 = vector.load %arg6[%969, %c8_1052, %c0_1053, %c0_1054] : memref<2x10x4x256xf32, #tpu.memory_space<vmem>>, vector<1x1x4x128xf32>
    %971 = vector.shape_cast %970 : vector<1x1x4x128xf32> to vector<4x128xf32>
    %c36_1055 = arith.constant 36 : index
    %c0_1056 = arith.constant 0 : index
    %972 = vector.load %arg8[%c36_1055, %c0_1056] : memref<108x128xf32, #tpu.memory_space<vmem>>, vector<4x128xf32>
    tpu.vector_store %arg8[%c36_1055, %c0_1056], %971 {strides = array<i32>} : memref<108x128xf32, #tpu.memory_space<vmem>>, vector<4x128xf32>,
    %973 = arith.index_cast %9 : i32 to index
    %c8_1057 = arith.constant 8 : index
    %c0_1058 = arith.constant 0 : index
    %c1_1059 = arith.constant 1 : index
    %974 = vector.load %arg6[%973, %c8_1057, %c0_1058, %c1_1059] : memref<2x10x4x256xf32, #tpu.memory_space<vmem>>, vector<1x1x4x128xf32>
    %975 = vector.shape_cast %974 : vector<1x1x4x128xf32> to vector<4x128xf32>
    %c40_1060 = arith.constant 40 : index
    %c0_1061 = arith.constant 0 : index
    %976 = vector.load %arg8[%c40_1060, %c0_1061] : memref<108x128xf32, #tpu.memory_space<vmem>>, vector<4x128xf32>
    tpu.vector_store %arg8[%c40_1060, %c0_1061], %975 {strides = array<i32>} : memref<108x128xf32, #tpu.memory_space<vmem>>, vector<4x128xf32>,
    %977 = arith.index_cast %9 : i32 to index
    %c8_1062 = arith.constant 8 : index
    %c0_1063 = arith.constant 0 : index
    %c2_1064 = arith.constant 2 : index
    %978 = vector.load %arg6[%977, %c8_1062, %c0_1063, %c2_1064] : memref<2x10x4x256xf32, #tpu.memory_space<vmem>>, vector<1x1x4x128xf32>
    %979 = vector.shape_cast %978 : vector<1x1x4x128xf32> to vector<4x128xf32>
    %c44_1065 = arith.constant 44 : index
    %c0_1066 = arith.constant 0 : index
    %980 = vector.load %arg8[%c44_1065, %c0_1066] : memref<108x128xf32, #tpu.memory_space<vmem>>, vector<4x128xf32>
    tpu.vector_store %arg8[%c44_1065, %c0_1066], %979 {strides = array<i32>} : memref<108x128xf32, #tpu.memory_space<vmem>>, vector<4x128xf32>,
    %981 = arith.index_cast %9 : i32 to index
    %c8_1067 = arith.constant 8 : index
    %c0_1068 = arith.constant 0 : index
    %c10_1069 = arith.constant 10 : index
    %982 = vector.load %arg6[%981, %c8_1067, %c0_1068, %c10_1069] : memref<2x10x4x256xf32, #tpu.memory_space<vmem>>, vector<1x1x4x128xf32>
    %983 = vector.shape_cast %982 : vector<1x1x4x128xf32> to vector<4x128xf32>
    %c48_1070 = arith.constant 48 : index
    %c0_1071 = arith.constant 0 : index
    %984 = vector.load %arg8[%c48_1070, %c0_1071] : memref<108x128xf32, #tpu.memory_space<vmem>>, vector<4x128xf32>
    tpu.vector_store %arg8[%c48_1070, %c0_1071], %983 {strides = array<i32>} : memref<108x128xf32, #tpu.memory_space<vmem>>, vector<4x128xf32>,
    %985 = arith.index_cast %9 : i32 to index
    %c8_1072 = arith.constant 8 : index
    %c0_1073 = arith.constant 0 : index
    %c11_1074 = arith.constant 11 : index
    %986 = vector.load %arg6[%985, %c8_1072, %c0_1073, %c11_1074] : memref<2x10x4x256xf32, #tpu.memory_space<vmem>>, vector<1x1x4x128xf32>
    %987 = vector.shape_cast %986 : vector<1x1x4x128xf32> to vector<4x128xf32>
    %c52_1075 = arith.constant 52 : index
    %c0_1076 = arith.constant 0 : index
    %988 = vector.load %arg8[%c52_1075, %c0_1076] : memref<108x128xf32, #tpu.memory_space<vmem>>, vector<4x128xf32>
    tpu.vector_store %arg8[%c52_1075, %c0_1076], %987 {strides = array<i32>} : memref<108x128xf32, #tpu.memory_space<vmem>>, vector<4x128xf32>,
    %989 = arith.index_cast %9 : i32 to index
    %c8_1077 = arith.constant 8 : index
    %c0_1078 = arith.constant 0 : index
    %c12_1079 = arith.constant 12 : index
    %990 = vector.load %arg6[%989, %c8_1077, %c0_1078, %c12_1079] : memref<2x10x4x256xf32, #tpu.memory_space<vmem>>, vector<1x1x4x128xf32>
    %991 = vector.shape_cast %990 : vector<1x1x4x128xf32> to vector<4x128xf32>
    %c56_1080 = arith.constant 56 : index
    %c0_1081 = arith.constant 0 : index
    %992 = vector.load %arg8[%c56_1080, %c0_1081] : memref<108x128xf32, #tpu.memory_space<vmem>>, vector<4x128xf32>
    tpu.vector_store %arg8[%c56_1080, %c0_1081], %991 {strides = array<i32>} : memref<108x128xf32, #tpu.memory_space<vmem>>, vector<4x128xf32>,
    %993 = arith.index_cast %9 : i32 to index
    %c8_1082 = arith.constant 8 : index
    %c0_1083 = arith.constant 0 : index
    %c20_1084 = arith.constant 20 : index
    %994 = vector.load %arg6[%993, %c8_1082, %c0_1083, %c20_1084] : memref<2x10x4x256xf32, #tpu.memory_space<vmem>>, vector<1x1x4x128xf32>
    %995 = vector.shape_cast %994 : vector<1x1x4x128xf32> to vector<4x128xf32>
    %c60_1085 = arith.constant 60 : index
    %c0_1086 = arith.constant 0 : index
    %996 = vector.load %arg8[%c60_1085, %c0_1086] : memref<108x128xf32, #tpu.memory_space<vmem>>, vector<4x128xf32>
    tpu.vector_store %arg8[%c60_1085, %c0_1086], %995 {strides = array<i32>} : memref<108x128xf32, #tpu.memory_space<vmem>>, vector<4x128xf32>,
    %997 = arith.index_cast %9 : i32 to index
    %c8_1087 = arith.constant 8 : index
    %c0_1088 = arith.constant 0 : index
    %c21_1089 = arith.constant 21 : index
    %998 = vector.load %arg6[%997, %c8_1087, %c0_1088, %c21_1089] : memref<2x10x4x256xf32, #tpu.memory_space<vmem>>, vector<1x1x4x128xf32>
    %999 = vector.shape_cast %998 : vector<1x1x4x128xf32> to vector<4x128xf32>
    %c64_1090 = arith.constant 64 : index
    %c0_1091 = arith.constant 0 : index
    %1000 = vector.load %arg8[%c64_1090, %c0_1091] : memref<108x128xf32, #tpu.memory_space<vmem>>, vector<4x128xf32>
    tpu.vector_store %arg8[%c64_1090, %c0_1091], %999 {strides = array<i32>} : memref<108x128xf32, #tpu.memory_space<vmem>>, vector<4x128xf32>,
    %1001 = arith.index_cast %9 : i32 to index
    %c8_1092 = arith.constant 8 : index
    %c0_1093 = arith.constant 0 : index
    %c22_1094 = arith.constant 22 : index
    %1002 = vector.load %arg6[%1001, %c8_1092, %c0_1093, %c22_1094] : memref<2x10x4x256xf32, #tpu.memory_space<vmem>>, vector<1x1x4x128xf32>
    %1003 = vector.shape_cast %1002 : vector<1x1x4x128xf32> to vector<4x128xf32>
    %c68_1095 = arith.constant 68 : index
    %c0_1096 = arith.constant 0 : index
    %1004 = vector.load %arg8[%c68_1095, %c0_1096] : memref<108x128xf32, #tpu.memory_space<vmem>>, vector<4x128xf32>
    tpu.vector_store %arg8[%c68_1095, %c0_1096], %1003 {strides = array<i32>} : memref<108x128xf32, #tpu.memory_space<vmem>>, vector<4x128xf32>,
    %1005 = arith.index_cast %9 : i32 to index
    %c9 = arith.constant 9 : index
    %c0_1097 = arith.constant 0 : index
    %c0_1098 = arith.constant 0 : index
    %1006 = vector.load %arg6[%1005, %c9, %c0_1097, %c0_1098] : memref<2x10x4x256xf32, #tpu.memory_space<vmem>>, vector<1x1x4x128xf32>
    %1007 = vector.shape_cast %1006 : vector<1x1x4x128xf32> to vector<4x128xf32>
    %c72_1099 = arith.constant 72 : index
    %c0_1100 = arith.constant 0 : index
    %1008 = vector.load %arg8[%c72_1099, %c0_1100] : memref<108x128xf32, #tpu.memory_space<vmem>>, vector<4x128xf32>
    tpu.vector_store %arg8[%c72_1099, %c0_1100], %1007 {strides = array<i32>} : memref<108x128xf32, #tpu.memory_space<vmem>>, vector<4x128xf32>,
    %1009 = arith.index_cast %9 : i32 to index
    %c9_1101 = arith.constant 9 : index
    %c0_1102 = arith.constant 0 : index
    %c1_1103 = arith.constant 1 : index
    %1010 = vector.load %arg6[%1009, %c9_1101, %c0_1102, %c1_1103] : memref<2x10x4x256xf32, #tpu.memory_space<vmem>>, vector<1x1x4x128xf32>
    %1011 = vector.shape_cast %1010 : vector<1x1x4x128xf32> to vector<4x128xf32>
    %c76_1104 = arith.constant 76 : index
    %c0_1105 = arith.constant 0 : index
    %1012 = vector.load %arg8[%c76_1104, %c0_1105] : memref<108x128xf32, #tpu.memory_space<vmem>>, vector<4x128xf32>
    tpu.vector_store %arg8[%c76_1104, %c0_1105], %1011 {strides = array<i32>} : memref<108x128xf32, #tpu.memory_space<vmem>>, vector<4x128xf32>,
    %1013 = arith.index_cast %9 : i32 to index
    %c9_1106 = arith.constant 9 : index
    %c0_1107 = arith.constant 0 : index
    %c2_1108 = arith.constant 2 : index
    %1014 = vector.load %arg6[%1013, %c9_1106, %c0_1107, %c2_1108] : memref<2x10x4x256xf32, #tpu.memory_space<vmem>>, vector<1x1x4x128xf32>
    %1015 = vector.shape_cast %1014 : vector<1x1x4x128xf32> to vector<4x128xf32>
    %c80_1109 = arith.constant 80 : index
    %c0_1110 = arith.constant 0 : index
    %1016 = vector.load %arg8[%c80_1109, %c0_1110] : memref<108x128xf32, #tpu.memory_space<vmem>>, vector<4x128xf32>
    tpu.vector_store %arg8[%c80_1109, %c0_1110], %1015 {strides = array<i32>} : memref<108x128xf32, #tpu.memory_space<vmem>>, vector<4x128xf32>,
    %1017 = arith.index_cast %9 : i32 to index
    %c9_1111 = arith.constant 9 : index
    %c0_1112 = arith.constant 0 : index
    %c10_1113 = arith.constant 10 : index
    %1018 = vector.load %arg6[%1017, %c9_1111, %c0_1112, %c10_1113] : memref<2x10x4x256xf32, #tpu.memory_space<vmem>>, vector<1x1x4x128xf32>
    %1019 = vector.shape_cast %1018 : vector<1x1x4x128xf32> to vector<4x128xf32>
    %c84_1114 = arith.constant 84 : index
    %c0_1115 = arith.constant 0 : index
    %1020 = vector.load %arg8[%c84_1114, %c0_1115] : memref<108x128xf32, #tpu.memory_space<vmem>>, vector<4x128xf32>
    tpu.vector_store %arg8[%c84_1114, %c0_1115], %1019 {strides = array<i32>} : memref<108x128xf32, #tpu.memory_space<vmem>>, vector<4x128xf32>,
    %1021 = arith.index_cast %9 : i32 to index
    %c9_1116 = arith.constant 9 : index
    %c0_1117 = arith.constant 0 : index
    %c11_1118 = arith.constant 11 : index
    %1022 = vector.load %arg6[%1021, %c9_1116, %c0_1117, %c11_1118] : memref<2x10x4x256xf32, #tpu.memory_space<vmem>>, vector<1x1x4x128xf32>
    %1023 = vector.shape_cast %1022 : vector<1x1x4x128xf32> to vector<4x128xf32>
    %c88_1119 = arith.constant 88 : index
    %c0_1120 = arith.constant 0 : index
    %1024 = vector.load %arg8[%c88_1119, %c0_1120] : memref<108x128xf32, #tpu.memory_space<vmem>>, vector<4x128xf32>
    tpu.vector_store %arg8[%c88_1119, %c0_1120], %1023 {strides = array<i32>} : memref<108x128xf32, #tpu.memory_space<vmem>>, vector<4x128xf32>,
    %1025 = arith.index_cast %9 : i32 to index
    %c9_1121 = arith.constant 9 : index
    %c0_1122 = arith.constant 0 : index
    %c12_1123 = arith.constant 12 : index
    %1026 = vector.load %arg6[%1025, %c9_1121, %c0_1122, %c12_1123] : memref<2x10x4x256xf32, #tpu.memory_space<vmem>>, vector<1x1x4x128xf32>
    %1027 = vector.shape_cast %1026 : vector<1x1x4x128xf32> to vector<4x128xf32>
    %c92_1124 = arith.constant 92 : index
    %c0_1125 = arith.constant 0 : index
    %1028 = vector.load %arg8[%c92_1124, %c0_1125] : memref<108x128xf32, #tpu.memory_space<vmem>>, vector<4x128xf32>
    tpu.vector_store %arg8[%c92_1124, %c0_1125], %1027 {strides = array<i32>} : memref<108x128xf32, #tpu.memory_space<vmem>>, vector<4x128xf32>,
    %1029 = arith.index_cast %9 : i32 to index
    %c9_1126 = arith.constant 9 : index
    %c0_1127 = arith.constant 0 : index
    %c20_1128 = arith.constant 20 : index
    %1030 = vector.load %arg6[%1029, %c9_1126, %c0_1127, %c20_1128] : memref<2x10x4x256xf32, #tpu.memory_space<vmem>>, vector<1x1x4x128xf32>
    %1031 = vector.shape_cast %1030 : vector<1x1x4x128xf32> to vector<4x128xf32>
    %c96_1129 = arith.constant 96 : index
    %c0_1130 = arith.constant 0 : index
    %1032 = vector.load %arg8[%c96_1129, %c0_1130] : memref<108x128xf32, #tpu.memory_space<vmem>>, vector<4x128xf32>
    tpu.vector_store %arg8[%c96_1129, %c0_1130], %1031 {strides = array<i32>} : memref<108x128xf32, #tpu.memory_space<vmem>>, vector<4x128xf32>,
    %1033 = arith.index_cast %9 : i32 to index
    %c9_1131 = arith.constant 9 : index
    %c0_1132 = arith.constant 0 : index
    %c21_1133 = arith.constant 21 : index
    %1034 = vector.load %arg6[%1033, %c9_1131, %c0_1132, %c21_1133] : memref<2x10x4x256xf32, #tpu.memory_space<vmem>>, vector<1x1x4x128xf32>
    %1035 = vector.shape_cast %1034 : vector<1x1x4x128xf32> to vector<4x128xf32>
    %c100_1134 = arith.constant 100 : index
    %c0_1135 = arith.constant 0 : index
    %1036 = vector.load %arg8[%c100_1134, %c0_1135] : memref<108x128xf32, #tpu.memory_space<vmem>>, vector<4x128xf32>
    tpu.vector_store %arg8[%c100_1134, %c0_1135], %1035 {strides = array<i32>} : memref<108x128xf32, #tpu.memory_space<vmem>>, vector<4x128xf32>,
    %1037 = arith.index_cast %9 : i32 to index
    %c9_1136 = arith.constant 9 : index
    %c0_1137 = arith.constant 0 : index
    %c22_1138 = arith.constant 22 : index
    %1038 = vector.load %arg6[%1037, %c9_1136, %c0_1137, %c22_1138] : memref<2x10x4x256xf32, #tpu.memory_space<vmem>>, vector<1x1x4x128xf32>
    %1039 = vector.shape_cast %1038 : vector<1x1x4x128xf32> to vector<4x128xf32>
    %c104_1139 = arith.constant 104 : index
    %c0_1140 = arith.constant 0 : index
    %1040 = vector.load %arg8[%c104_1139, %c0_1140] : memref<108x128xf32, #tpu.memory_space<vmem>>, vector<4x128xf32>
    tpu.vector_store %arg8[%c104_1139, %c0_1140], %1039 {strides = array<i32>} : memref<108x128xf32, #tpu.memory_space<vmem>>, vector<4x128xf32>,
    %c0_1141 = arith.constant 0 : index
    %c0_1142 = arith.constant 0 : index
    %1041 = vector.load %arg8[%c0_1141, %c0_1142] : memref<108x128xf32, #tpu.memory_space<vmem>>, vector<108x128xf32>
    %cst_1143 = arith.constant dense<0.000000e+00> : vector<8x128xf32>
    %1042 = tpu.matmul %24, %1041, %cst_1143 {dimension_numbers = #tpu.dot_dimension_numbers<[1], [0], [0], [1], [0, 0, 1, 1], [], []>} : vector<8x108xf32>, vector<108x128xf32>, vector<8x128xf32> -> vector<8x128xf32>
    %1043 = vector.broadcast %25 : vector<1x128xf32> to vector<8x128xf32>
    %1044 = arith.mulf %1042, %1043 : vector<8x128xf32>
    %c0_1144 = arith.constant 0 : index
    %1045 = arith.index_cast %932 : i32 to index
    %c0_1145 = arith.constant 0 : index
    %c0_1146 = arith.constant 0 : index
    %1046 = vector.load %arg5[%c0_1144, %1045, %c0_1145, %c0_1146] : memref<1x8x8x128xf32, #tpu.memory_space<vmem>>, vector<1x1x8x128xf32>
    %1047 = vector.shape_cast %1046 : vector<1x1x8x128xf32> to vector<8x128xf32>
    %1048 = vector.shape_cast %1044 : vector<8x128xf32> to vector<1x1x8x128xf32>
    tpu.vector_store %arg5[%c0_1144, %1045, %c0_1145, %c0_1146], %1048 {strides = array<i32>} : memref<1x8x8x128xf32, #tpu.memory_space<vmem>>, vector<1x1x8x128xf32>,
    %cst_1147 = arith.constant dense<0.000000e+00> : vector<8xf32>
    %1049 = vector.multi_reduction <add>, %1044, %cst_1147 [1] : vector<8x128xf32> to vector<8xf32>
    %1050 = vector.shape_cast %1049 : vector<8xf32> to vector<8x1xf32>
    %cst_1148 = arith.constant 1.000000e+00 : f32
    %1051 = vector.broadcast %cst_1148 : f32 to vector<8x1xf32>
    %1052 = arith.mulf %1051, %1050 : vector<8x1xf32>
    %1053 = arith.addf %924, %1052 : vector<8x1xf32>
    %1054 = arith.mulf %1044, %1044 : vector<8x128xf32>
    %cst_1149 = arith.constant dense<0.000000e+00> : vector<8xf32>
    %1055 = vector.multi_reduction <add>, %1054, %cst_1149 [1] : vector<8x128xf32> to vector<8xf32>
    %1056 = vector.shape_cast %1055 : vector<8xf32> to vector<8x1xf32>
    %cst_1150 = arith.constant 1.000000e+00 : f32
    %1057 = vector.broadcast %cst_1150 : f32 to vector<8x1xf32>
    %1058 = arith.mulf %1057, %1056 : vector<8x1xf32>
    %1059 = arith.addf %930, %1058 : vector<8x1xf32>
    %c0_1151 = arith.constant 0 : index
    %c0_1152 = arith.constant 0 : index
    %1060 = vector.load %arg9[%c0_1151, %c0_1152] : memref<8x1xf32, #tpu.memory_space<vmem>>, vector<8x1xf32>
    %1061 = arith.addf %1060, %1053 : vector<8x1xf32>
    %c0_1153 = arith.constant 0 : index
    %c0_1154 = arith.constant 0 : index
    %1062 = vector.load %arg9[%c0_1153, %c0_1154] : memref<8x1xf32, #tpu.memory_space<vmem>>, vector<8x1xf32>
    tpu.vector_store %arg9[%c0_1153, %c0_1154], %1061 {strides = array<i32>} : memref<8x1xf32, #tpu.memory_space<vmem>>, vector<8x1xf32>,
    %c0_1155 = arith.constant 0 : index
    %c0_1156 = arith.constant 0 : index
    %1063 = vector.load %arg10[%c0_1155, %c0_1156] : memref<8x1xf32, #tpu.memory_space<vmem>>, vector<8x1xf32>
    %1064 = arith.addf %1063, %1059 : vector<8x1xf32>
    %c0_1157 = arith.constant 0 : index
    %c0_1158 = arith.constant 0 : index
    %1065 = vector.load %arg10[%c0_1157, %c0_1158] : memref<8x1xf32, #tpu.memory_space<vmem>>, vector<8x1xf32>
    tpu.vector_store %arg10[%c0_1157, %c0_1158], %1064 {strides = array<i32>} : memref<8x1xf32, #tpu.memory_space<vmem>>, vector<8x1xf32>,
    %c0_i32_1159 = arith.constant 0 : i32
    %1066 = arith.cmpi eq, %arg1, %c0_i32_1159 : i32
    %1067 = arith.extui %1066 : i1 to i32
    %c0_i32_1160 = arith.constant 0 : i32
    %1068 = arith.cmpi ne, %1067, %c0_i32_1160 : i32
    scf.if %1068 {
      %c0_1161 = arith.constant 0 : index
      %c0_1162 = arith.constant 0 : index
      %1069 = vector.load %arg9[%c0_1161, %c0_1162] : memref<8x1xf32, #tpu.memory_space<vmem>>, vector<8x1xf32>
      %cst_1163 = arith.constant 0.001953125 : f32
      %1070 = vector.broadcast %cst_1163 : f32 to vector<8x1xf32>
      %1071 = arith.mulf %1069, %1070 : vector<8x1xf32>
      %c0_1164 = arith.constant 0 : index
      %c0_1165 = arith.constant 0 : index
      %1072 = vector.load %arg10[%c0_1164, %c0_1165] : memref<8x1xf32, #tpu.memory_space<vmem>>, vector<8x1xf32>
      %cst_1166 = arith.constant 0.001953125 : f32
      %1073 = vector.broadcast %cst_1166 : f32 to vector<8x1xf32>
      %1074 = arith.mulf %1072, %1073 : vector<8x1xf32>
      %1075 = arith.mulf %1071, %1071 : vector<8x1xf32>
      %1076 = arith.subf %1074, %1075 : vector<8x1xf32>
      %cst_1167 = arith.constant 0.000000e+00 : f32
      %1077 = vector.broadcast %cst_1167 : f32 to vector<8x1xf32>
      %1078 = arith.maximumf %1076, %1077 : vector<8x1xf32>
      %cst_1168 = arith.constant 9.99999974E-6 : f32
      %1079 = vector.broadcast %cst_1168 : f32 to vector<8x1xf32>
      %1080 = arith.addf %1078, %1079 : vector<8x1xf32>
      %1081 = math.rsqrt %1080 : vector<8x1xf32>
      %1082 = vector.shape_cast %1081 : vector<8x1xf32> to vector<1x8x1xf32>
      %cst_1169 = arith.constant 0.000000e+00 : f32
      %1083 = vector.broadcast %cst_1169 : f32 to vector<8x1xf32>
      %1084 = arith.subf %1083, %1071 : vector<8x1xf32>
      %1085 = arith.mulf %1084, %1081 : vector<8x1xf32>
      %1086 = vector.shape_cast %1085 : vector<8x1xf32> to vector<1x8x1xf32>
      %c0_1170 = arith.constant 0 : index
      %c0_1171 = arith.constant 0 : index
      %c0_1172 = arith.constant 0 : index
      %c0_1173 = arith.constant 0 : index
      %1087 = vector.load %arg5[%c0_1170, %c0_1171, %c0_1172, %c0_1173] : memref<1x8x8x128xf32, #tpu.memory_space<vmem>>, vector<1x8x8x128xf32>
      %1088 = vector.shape_cast %1087 : vector<1x8x8x128xf32> to vector<8x8x128xf32>
      %1089 = vector.broadcast %1082 : vector<1x8x1xf32> to vector<8x8x128xf32>
      %1090 = arith.mulf %1088, %1089 : vector<8x8x128xf32>
      %1091 = vector.broadcast %1086 : vector<1x8x1xf32> to vector<8x8x128xf32>
      %1092 = arith.addf %1090, %1091 : vector<8x8x128xf32>
      %cst_1174 = arith.constant 0.000000e+00 : f32
      %1093 = vector.broadcast %cst_1174 : f32 to vector<8x8x128xf32>
      %1094 = arith.cmpf oge, %1092, %1093 : vector<8x8x128xf32>
      %cst_1175 = arith.constant 2.000000e-01 : f32
      %1095 = vector.broadcast %cst_1175 : f32 to vector<8x8x128xf32>
      %1096 = arith.mulf %1095, %1092 : vector<8x8x128xf32>
      %1097 = arith.select %1094, %1092, %1096 : vector<8x8x128xi1>, vector<8x8x128xf32>
      %c0_1176 = arith.constant 0 : index
      %c0_1177 = arith.constant 0 : index
      %c0_1178 = arith.constant 0 : index
      %c0_1179 = arith.constant 0 : index
      %1098 = vector.load %arg5[%c0_1176, %c0_1177, %c0_1178, %c0_1179] : memref<1x8x8x128xf32, #tpu.memory_space<vmem>>, vector<1x8x8x128xf32>
      %1099 = vector.shape_cast %1098 : vector<1x8x8x128xf32> to vector<8x8x128xf32>
      %1100 = vector.shape_cast %1097 : vector<8x8x128xf32> to vector<1x8x8x128xf32>
      tpu.vector_store %arg5[%c0_1176, %c0_1177, %c0_1178, %c0_1179], %1100 {strides = array<i32>} : memref<1x8x8x128xf32, #tpu.memory_space<vmem>>, vector<1x8x8x128xf32>,
    } else {
    }
    return
  }
  func.func @transform_0(%arg0: i32, %arg1: i32) -> (i32, i32) {
    %c0_i32 = arith.constant 0 : i32
    %c0_i32_0 = arith.constant 0 : i32
    %c0_i32_1 = arith.constant 0 : i32
    return %c0_i32, %c0_i32_0 : i32, i32
  }
  func.func @transform_1(%arg0: i32, %arg1: i32) -> (i32, i32) {
    %c0_i32 = arith.constant 0 : i32
    %c0_i32_0 = arith.constant 0 : i32
    %c0_i32_1 = arith.constant 0 : i32
    return %c0_i32, %c0_i32_0 : i32, i32
  }
  func.func @transform_3(%arg0: i32, %arg1: i32) -> (i32, i32, i32, i32) {
    %c0_i32 = arith.constant 0 : i32
    %c0_i32_0 = arith.constant 0 : i32
    %c0_i32_1 = arith.constant 0 : i32
    %c0_i32_2 = arith.constant 0 : i32
    return %arg0, %c0_i32, %c0_i32_0, %c0_i32_1 : i32, i32, i32, i32
  }
}

</mosaic_0001>

<bundles_post_ra>
// kernel: tpu_custom_call.1
= control target key start
LH: loop header
LB: loop body
LE: loop exit
PB: predicated region body
PF: predicated region fallthrough
CT: control target
= control target key end

     0   :  { %8 = vsyncpa [#allocation8], 0  ;;  %s5207_s0 = inlined_call_operand.hbm [shape: f32[8,108], index: 0, kind: input, shape index: {}]   ;;  %s5208_s1 = inlined_call_operand.hbm [shape: f32[1,128], index: 1, kind: input, shape index: {}]   ;;  %s5209_s2 = inlined_call_operand.hbm [shape: f32[2,10,4,256], index: 2, kind: input, shape index: {}]   ;;  %s5210_s3 = inlined_call_operand.hbm [shape: f32[2,8,8,128], index: 3, kind: output, shape index: {}]  }
   0x1   :  { %9 = vsyncpa [#allocation11], 0 }
   0x2   :  { %10 = vsyncpa [#allocation9], 0 }
   0x3   :  { %12 = vsyncpa [#allocation9 + $0x1], 0  ;;  %s3876_s12 = smov 0   ;;  %s3878_s13 = smov 0  }
   0x4   :  { %s3880_s14 = smov 0   ;;  %s3882_s15 = smov 0  }
   0x5   :  { %s3884_s16 = smov 0   ;;  %s3886_s17 = smov 0  }
   0x6 LB: > { %s3317_s18 = sadd.s32 4294967295, %s3839_s17   ;;  %s3318_s19 = sadd.s32 4294967294, %s3839_s17   ;;  %s3839_s17 = sphi %s3886_s17, %s18_s17   ;;  %s3835_s16 = sphi %s3884_s16, %s5219_s16   ;;  %s3831_s15 = sphi %s3882_s15, %s5218_s15   ;;  %s3827_s14 = sphi %s3880_s14, %s5217_s14   ;;  %s3823_s13 = sphi %s3878_s13, %s5216_s13   ;;  %s3819_s12 = sphi %s3876_s12, %s5215_s12  }
   0x7   : > { %s30_s20 = sadd.s32 1, %s3835_s16  ;;  %s79_s21 = sadd.s32 1, %s3827_s14 }
   0x8   : > { %p32_p0 = scmp.ge.s32.totalorder %s30_s20, 2  ;;  %p89_p1 = scmp.ne.s32.totalorder %s3827_s14, %s3823_s13 }
   0x9   : > { %p90_p2 = scmp.eq.s32.totalorder %s3317_s18, 1  ;;  %p95_p3 = scmp.ne.s32.totalorder %s3823_s13, %s3819_s12 }
   0xa   : > { %s5221_s20 = smov (%p32_p0, %s30_s20), 0  ;;  %p96_p5 = scmp.eq.s32.totalorder %s3318_s19, 1 }
   0xb   : > { %p3916_p4 = por %p90_p2, %p89_p1  ;;  %s76_s23 = ssub.s32 %s3835_s16, %s5221_s20 }
   0xc   : > { %p3319_p6 = scmp.ge.s32.totalorder %s3839_s17, 1  ;;  %p77_p7 = scmp.eq.s32.totalorder %s76_s23, 0 }
   0xd   : > { %p3923_p8 = por %p96_p5, %p95_p3  ;;  %p103_p9 = scmp.lt.s32.totalorder %s3839_s17, 3 }
   0xe   : > { %s3929_s25 = scalar_select %p77_p7, %s3827_s14, %s79_s21  }
   0xf   : > { %p3931_p10 = pnand %p3319_p6, %p103_p9  ;;  %p3935_p11 = scmp.eq.s32.totalorder %s3317_s18, 0 }
  0x10   : > { %s115_s30 = sshll.u32 %s5207_s0, 4  ;;  %s3841_s4 = smov [#allocation7]   ;;  %s116_s30 = int_to_ptr.hbm [resolvable:$true] %s115_s30 }
  0x11   : > { %p3577_p12 = pneg %p3931_p10  ;;  %s117_s5 = sshll.u32 %s3841_s4, 4  ;;  %s118_s5 = int_to_ptr.vmem [resolvable:$true] %s117_s5 }
  0x12   : > { %s127_s8 = sshll.u32 %s5208_s1, 4  ;;  %s3842_s9 = smov [#allocation10]   ;;  %s128_s8 = int_to_ptr.hbm [resolvable:$true] %s127_s8 }
  0x13   : > { %p3578_p13 = pnand %p3935_p11, %p3577_p12  ;;  %s129_s10 = sshll.u32 %s3842_s9, 4  ;;  %s130_s10 = int_to_ptr.vmem [resolvable:$true] %s129_s10 }
  0x14   : > { %142 = sbr.rel (%p3931_p10) target bundleno = 2197 (0x895), region = 28 }
  0x15   : > { %3580 = dma.hbm_to_vmem [thread:$0]  (!%p3578_p13), %s116_s30, 128, %s118_s5, [#allocation8]  }
  0x16   : > { %3583 = dma.hbm_to_vmem [thread:$0]  (!%p3578_p13), %s128_s8, 16, %s130_s10, [#allocation11]  }
  0x19   : > { %3804 = dma.done.wait (%p3935_p11), [#allocation8], 128  }
  0x1a   : > { %3806 = vsyncadd (%p3935_p11), [#allocation8], 4294967168 }
  0x1b   : > { %3808 = dma.done.wait (%p3935_p11), [#allocation11], 16  }
  0x1c   : > { %3810 = vsyncadd (%p3935_p11), [#allocation11], 4294967280  ;;  %s162_s11 = sand.u32 1, %s3823_s13   ;;  %s3565_s18 = smul.u32 80, %s3831_s15  ;;  %vm200_vm0 = vcmask 7168   ;;  %v3843_v0 = vmov 0.0  }
  0x1d   : > { %s3325_s19 = sshll.u32 %s162_s11, 6  ;;  %201 = vst.msk [vmem:[#allocation5] sm:$0xff] %vm200_vm0, %v3843_v0  ;;  %s3844_s27 = smov [#allocation2]  }
  0x1e   : > { %s186_s26 = scalar_lea.hbm %s5209_s2, %s3565_s18  ;;  %202 = vst.msk [vmem:[#allocation6] sm:$0xff] %vm200_vm0, %v3843_v0  ;;  %s196_s29 = sshll.u32 %s3844_s27, 4  ;;  %s197_s29 = int_to_ptr.vmem [resolvable:$true] %s196_s29 }
  0x1f   : > { %s194_s28 = sshll.u32 %s186_s26, 4  ;;  %s3731_s7 = scalar_lea.hbm %s5209_s2, 160  ;;  %s195_s28 = int_to_ptr.hbm [resolvable:$true] %s194_s28 }
  0x20   : > { %s3727_s30 = sshra.s32 %s195_s28, 4  ;;  %s3728_s30 = int_to_ptr.hbm [resolvable:$true] %s3727_s30 }
  0x21   : > { %s3729_s4 = scalar_lea.hbm %s3728_s30, 80  ;;  %p3732_p1 = scmp.lt.s32.totalorder %s3728_s30, %s5209_s2 }
  0x22   : > { %p3730_p0 = scmp.ne.s32.totalorder %s3728_s30, %s3729_s4  ;;  %p3733_p2 = scmp.lt.s32.totalorder %s3731_s7, %s3729_s4 }
  0x24   : > { %p3734_p3 = por %p3733_p2, %p3732_p1 }
  0x26   : > { %p3735_p5 = pnand %p3734_p3, %p3730_p0 }
  0x28   : > { %3738 = shalt.err (!%p3735_p5)  }
  0x29   : > { %199 = dma.hbm_to_vmem [thread:$0]  %s195_s28, 1280, %s197_s29, [#allocation3] }
  0x2a   : > { %s3974_s10 = scalar_lea.vmem [#allocation12], %s3325_s19 }
  0x2b   : > { %3811 = dma.done.wait [#allocation3], 1280 }
  0x2c   : > { %3812 = vsyncadd [#allocation3], 4294966016  ;;  %v246_v1 = vld [vmem:[#allocation2] sm:$0xff]  ;;  %s3845_s18 = smov 127   ;;  %s3846_s21 = smov 126   ;;  %v3990_v16 = vld [vmem:[#allocation2 + $0x8] sm:$0xff] }
  0x2d   : > { %248 = vst [vmem:[#allocation1] ss:$2 sm:$0xff] %v246_v1  ;;  %s3847_s19 = smov 118   ;;  %s3848_s23 = smov 117   ;;  %v4016_v33 = vld [vmem:[#allocation2 + $0x10] sm:$0xff]  ;;  %vm268_vm1 = vcmask 1031168  }
  0x2e   : > { %s3849_s26 = smov 116   ;;  %s3850_s28 = smov 108   ;;  %vm281_vm2 = vcmask 965632   ;;  %vm255_vm3 = vcmask 1039360   ;;  %v244_v52 = vld [vmem:[#allocation2] sm:$0xf] }
  0x2f   : > { %s3851_s27 = smov 107   ;;  %s3852_s29 = smov 106   ;;  %v3328_v54 = vld [vmem:[#allocation2 + $0x8] sm:$0xf]  ;;  %245 = vst [vmem:[#allocation4] sm:$0xf] %v244_v52 }
  0x30   : > { %vm294_vm4 = vcmask 957440   ;;  %354 = vst [vmem:[#allocation4 + $0x24] sm:$0xf] %v3328_v54  ;;  %vm320_vm5 = vcmask 883712   ;;  %vm307_vm6 = vcmask 949248   ;;  %vm333_vm7 = vcmask 875520  }
  0x31   : > { %vm346_vm8 = vcmask 867328   ;;  %vm569_vm9 = vcmask 1043456   ;;  %s3566_s30 = sshll.u32 %s3831_s15, 6  ;;  %s3138_s15 = sshll.u32 %s3974_s10, 4  ;;  %s3139_s15 = int_to_ptr.vmem [resolvable:$true] %s3138_s15 }
  0x32   : > { %s3137_s6 = scalar_lea.hbm %s5210_s3, %s3566_s30  ;;  %s3126_s8 = scalar_lea.sflag [#allocation9], %s162_s11 }
  0x33   : > { %s3140_s7 = sshll.u32 %s3137_s6, 4  ;;  %s3141_s7 = int_to_ptr.hbm [resolvable:$true] %s3140_s7 }
  0x34   : > { %v249_v2 = vld.sshfl [vmem:[#allocation1] sm:$0xff pattern:$0x75316420]  ;;  %v250_v3 = vld.sshfl [vmem:[#allocation1 + $0x8] sm:$0xff pattern:$0x75316420] }
  0x35   : > { %261 = vst [vmem:[#allocation1] ss:$2 sm:$0xff] %v246_v1  ;;  %251 = vrot.lane.b32.xlu0 %v249_v2, %s3845_s18  ;;  %s3765_s9 = sshra.s32 %s3141_s7, 4  ;;  %s3766_s9 = int_to_ptr.hbm [resolvable:$true] %s3765_s9 }
  0x36   : > { %p3772_p10 = scmp.lt.s32.totalorder %s3766_s9, %s5210_s3 }
  0x3c   : > { %v262_v4 = vld.sshfl [vmem:[#allocation1] sm:$0xff pattern:$0x75316420]  ;;  %v263_v5 = vld.sshfl [vmem:[#allocation1 + $0x8] sm:$0xff pattern:$0x75316420] }
  0x3d   : > { %264 = vrot.lane.b32.xlu1 %v262_v4, %s3846_s21  ;;  %253 = vrot.lane.b32.xlu0 %v250_v3, %s3845_s18  ;;  %274 = vst [vmem:[#allocation1] ss:$2 sm:$0xff] %v246_v1 }
  0x44   : > { %v275_v6 = vld.sshfl [vmem:[#allocation1] sm:$0xff pattern:$0x75316420]  ;;  %v276_v7 = vld.sshfl [vmem:[#allocation1 + $0x8] sm:$0xff pattern:$0x75316420] }
  0x45   : > { %266 = vrot.lane.b32.xlu1 %v263_v5, %s3846_s21  ;;  %287 = vst [vmem:[#allocation1] ss:$2 sm:$0xff] %v246_v1  ;;  %277 = vrot.lane.b32.xlu2 %v275_v6, %s3847_s19 }
  0x4c   : > { %v289_v8 = vld.sshfl [vmem:[#allocation1 + $0x8] sm:$0xff pattern:$0x75316420]  ;;  %v288_v9 = vld.sshfl [vmem:[#allocation1] sm:$0xff pattern:$0x75316420] }
  0x4d   : > { %292 = vrot.lane.b32.xlu1 %v289_v8, %s3848_s23  ;;  %290 = vrot.lane.b32.xlu0 %v288_v9, %s3848_s23  ;;  %300 = vst [vmem:[#allocation1] ss:$2 sm:$0xff] %v246_v1 }
  0x4e   : > { %279 = vrot.lane.b32.xlu2 %v276_v7, %s3847_s19 }
  0x54   : > { %v301_v10 = vld.sshfl [vmem:[#allocation1] sm:$0xff pattern:$0x75316420]  ;;  %v302_v11 = vld.sshfl [vmem:[#allocation1 + $0x8] sm:$0xff pattern:$0x75316420] }
  0x55   : > { %313 = vst [vmem:[#allocation1] ss:$2 sm:$0xff] %v246_v1  ;;  %305 = vrot.lane.b32.xlu0 %v302_v11, %s3849_s26 }
  0x56   : > { %303 = vrot.lane.b32.xlu2 %v301_v10, %s3849_s26 }
  0x5c   : > { %v314_v12 = vld.sshfl [vmem:[#allocation1] sm:$0xff pattern:$0x75316420]  ;;  %v315_v13 = vld.sshfl [vmem:[#allocation1 + $0x8] sm:$0xff pattern:$0x75316420] }
  0x5d   : > { %316 = vrot.lane.b32.xlu1 %v314_v12, %s3850_s28  ;;  %326 = vst [vmem:[#allocation1] ss:$2 sm:$0xff] %v246_v1 }
  0x5e   : > { %318 = vrot.lane.b32.xlu2 %v315_v13, %s3850_s28 }
  0x64   : > { %v328_v14 = vld.sshfl [vmem:[#allocation1 + $0x8] sm:$0xff pattern:$0x75316420]  ;;  %v327_v15 = vld.sshfl [vmem:[#allocation1] sm:$0xff pattern:$0x75316420] }
  0x65   : > { %331 = vrot.lane.b32.xlu1 %v328_v14, %s3851_s27  ;;  %329 = vrot.lane.b32.xlu0 %v327_v15, %s3851_s27  ;;  %339 = vst [vmem:[#allocation1] ss:$2 sm:$0xff] %v246_v1 }
  0x6c   : > { %v340_v17 = vld.sshfl [vmem:[#allocation1] sm:$0xff pattern:$0x75316420]  ;;  %v341_v18 = vld.sshfl [vmem:[#allocation1 + $0x8] sm:$0xff pattern:$0x75316420] }
  0x6d   : > { %357 = vst [vmem:[#allocation1] ss:$2 sm:$0xff] %v3990_v16  ;;  %344 = vrot.lane.b32.xlu0 %v341_v18, %s3852_s29  ;;  %342 = vrot.lane.b32.xlu2 %v340_v17, %s3852_s29 }
  0x74   : > { %v358_v19 = vld.sshfl [vmem:[#allocation1] sm:$0xff pattern:$0x75316420]  ;;  %v359_v20 = vld.sshfl [vmem:[#allocation1 + $0x8] sm:$0xff pattern:$0x75316420] }
  0x75   : > { %360 = vrot.lane.b32.xlu1 %v358_v19, %s3845_s18  ;;  %369 = vst [vmem:[#allocation1] ss:$2 sm:$0xff] %v3990_v16  ;;  %362 = vrot.lane.b32.xlu2 %v359_v20, %s3845_s18 }
  0x7c   : > { %v371_v21 = vld.sshfl [vmem:[#allocation1 + $0x8] sm:$0xff pattern:$0x75316420]  ;;  %v370_v22 = vld.sshfl [vmem:[#allocation1] sm:$0xff pattern:$0x75316420] }
  0x7d   : > { %374 = vrot.lane.b32.xlu1 %v371_v21, %s3846_s21  ;;  %372 = vrot.lane.b32.xlu0 %v370_v22, %s3846_s21  ;;  %381 = vst [vmem:[#allocation1] ss:$2 sm:$0xff] %v3990_v16 }
  0x84   : > { %v382_v23 = vld.sshfl [vmem:[#allocation1] sm:$0xff pattern:$0x75316420]  ;;  %v383_v24 = vld.sshfl [vmem:[#allocation1 + $0x8] sm:$0xff pattern:$0x75316420] }
  0x85   : > { %393 = vst [vmem:[#allocation1] ss:$2 sm:$0xff] %v3990_v16  ;;  %386 = vrot.lane.b32.xlu0 %v383_v24, %s3847_s19  ;;  %384 = vrot.lane.b32.xlu2 %v382_v23, %s3847_s19 }
  0x8c   : > { %v394_v25 = vld.sshfl [vmem:[#allocation1] sm:$0xff pattern:$0x75316420]  ;;  %v395_v26 = vld.sshfl [vmem:[#allocation1 + $0x8] sm:$0xff pattern:$0x75316420] }
  0x8d   : > { %396 = vrot.lane.b32.xlu1 %v394_v25, %s3848_s23  ;;  %405 = vst [vmem:[#allocation1] ss:$2 sm:$0xff] %v3990_v16  ;;  %398 = vrot.lane.b32.xlu2 %v395_v26, %s3848_s23 }
  0x94   : > { %v407_v27 = vld.sshfl [vmem:[#allocation1 + $0x8] sm:$0xff pattern:$0x75316420]  ;;  %v406_v28 = vld.sshfl [vmem:[#allocation1] sm:$0xff pattern:$0x75316420] }
  0x95   : > { %410 = vrot.lane.b32.xlu1 %v407_v27, %s3849_s26  ;;  %408 = vrot.lane.b32.xlu0 %v406_v28, %s3849_s26  ;;  %417 = vst [vmem:[#allocation1] ss:$2 sm:$0xff] %v3990_v16 }
  0x9c   : > { %v418_v29 = vld.sshfl [vmem:[#allocation1] sm:$0xff pattern:$0x75316420]  ;;  %v419_v30 = vld.sshfl [vmem:[#allocation1 + $0x8] sm:$0xff pattern:$0x75316420] }
  0x9d   : > { %429 = vst [vmem:[#allocation1] ss:$2 sm:$0xff] %v3990_v16  ;;  %422 = vrot.lane.b32.xlu0 %v419_v30, %s3850_s28  ;;  %420 = vrot.lane.b32.xlu2 %v418_v29, %s3850_s28 }
  0x9f   : > { %v278_v41 = vpop.permute.xlu2 %277 }
  0xa4   : > { %v430_v31 = vld.sshfl [vmem:[#allocation1] sm:$0xff pattern:$0x75316420]  ;;  %v431_v32 = vld.sshfl [vmem:[#allocation1 + $0x8] sm:$0xff pattern:$0x75316420] }
  0xa5   : > { %432 = vrot.lane.b32.xlu1 %v430_v31, %s3851_s27  ;;  %441 = vst [vmem:[#allocation1] ss:$2 sm:$0xff] %v3990_v16  ;;  %434 = vrot.lane.b32.xlu2 %v431_v32, %s3851_s27 }
  0xa7   : > { %v252_v44 = vpop.permute.xlu0 %251 }
  0xa8   : > { %v280_v48 = vpop.permute.xlu2 %279 }
  0xa9   : > { %v282_v50 = vsel %vm281_vm2, %v278_v41, %v280_v48 }
  0xaa   : > { %284 = vst [vmem:[#allocation4 + $0xc] sm:$0xf] %v282_v50 }
  0xac   : > { %v443_v34 = vld.sshfl [vmem:[#allocation1 + $0x8] sm:$0xff pattern:$0x75316420]  ;;  %v442_v35 = vld.sshfl [vmem:[#allocation1] sm:$0xff pattern:$0x75316420] }
  0xad   : > { %446 = vrot.lane.b32.xlu1 %v443_v34, %s3852_s29  ;;  %444 = vrot.lane.b32.xlu0 %v442_v35, %s3852_s29  ;;  %458 = vst [vmem:[#allocation1] ss:$2 sm:$0xff] %v4016_v33 }
  0xaf   : > { %v265_v40 = vpop.permute.xlu1 %264  ;;  %v254_v51 = vpop.permute.xlu0 %253 }
  0xb0   : > { %v256_v53 = vsel %vm255_vm3, %v252_v44, %v254_v51  ;;  %v304_v58 = vpop.permute.xlu2 %303 }
  0xb1   : > { %258 = vst [vmem:[#allocation4 + $0x4] sm:$0xf] %v256_v53 }
  0xb4   : > { %v459_v36 = vld.sshfl [vmem:[#allocation1] sm:$0xff pattern:$0x75316420]  ;;  %v460_v37 = vld.sshfl [vmem:[#allocation1 + $0x8] sm:$0xff pattern:$0x75316420] }
  0xb5   : > { %470 = vst [vmem:[#allocation1] ss:$2 sm:$0xff] %v4016_v33  ;;  %463 = vrot.lane.b32.xlu0 %v460_v37, %s3845_s18  ;;  %461 = vrot.lane.b32.xlu2 %v459_v36, %s3845_s18 }
  0xb7   : > { %v267_v47 = vpop.permute.xlu1 %266 }
  0xb8   : > { %v269_v49 = vsel %vm268_vm1, %v265_v40, %v267_v47  ;;  %v319_v63 = vpop.permute.xlu2 %318 }
  0xb9   : > { %271 = vst [vmem:[#allocation4 + $0x8] sm:$0xf] %v269_v49 }
  0xbc   : > { %v471_v38 = vld.sshfl [vmem:[#allocation1] sm:$0xff pattern:$0x75316420]  ;;  %v472_v39 = vld.sshfl [vmem:[#allocation1 + $0x8] sm:$0xff pattern:$0x75316420] }
  0xbd   : > { %473 = vrot.lane.b32.xlu1 %v471_v38, %s3846_s21  ;;  %482 = vst [vmem:[#allocation1] ss:$2 sm:$0xff] %v4016_v33  ;;  %475 = vrot.lane.b32.xlu2 %v472_v39, %s3846_s21 }
  0xbf   : > { %v293_v57 = vpop.permute.xlu1 %292  ;;  %v291_v59 = vpop.permute.xlu0 %290 }
  0xc0   : > { %v295_v60 = vsel %vm294_vm4, %v291_v59, %v293_v57 }
  0xc1   : > { %297 = vst [vmem:[#allocation4 + $0x10] sm:$0xf] %v295_v60 }
  0xc4   : > { %v484_v42 = vld.sshfl [vmem:[#allocation1 + $0x8] sm:$0xff pattern:$0x75316420]  ;;  %v483_v43 = vld.sshfl [vmem:[#allocation1] sm:$0xff pattern:$0x75316420] }
  0xc5   : > { %487 = vrot.lane.b32.xlu1 %v484_v42, %s3847_s19  ;;  %485 = vrot.lane.b32.xlu0 %v483_v43, %s3847_s19  ;;  %494 = vst [vmem:[#allocation1] ss:$2 sm:$0xff] %v4016_v33  ;;  %v3337_v42 = vld [vmem:[#allocation2 + $0x10] sm:$0xf] }
  0xc6   : > { %455 = vst [vmem:[#allocation4 + $0x48] sm:$0xf] %v3337_v42 }
  0xc7   : > { %v306_v2 = vpop.permute.xlu0 %305  ;;  %v343_v7 = vpop.permute.xlu2 %342 }
  0xc8   : > { %v308_v3 = vsel %vm307_vm6, %v304_v58, %v306_v2 }
  0xc9   : > { %310 = vst [vmem:[#allocation4 + $0x14] sm:$0xf] %v308_v3 }
  0xcc   : > { %v495_v45 = vld.sshfl [vmem:[#allocation1] sm:$0xff pattern:$0x75316420]  ;;  %v496_v46 = vld.sshfl [vmem:[#allocation1 + $0x8] sm:$0xff pattern:$0x75316420] }
  0xcd   : > { %506 = vst [vmem:[#allocation1] ss:$2 sm:$0xff] %v4016_v33  ;;  %499 = vrot.lane.b32.xlu0 %v496_v46, %s3848_s23  ;;  %497 = vrot.lane.b32.xlu2 %v495_v45, %s3848_s23 }
  0xcf   : > { %v317_v0 = vpop.permute.xlu1 %316  ;;  %v363_v12 = vpop.permute.xlu2 %362 }
  0xd0   : > { %v321_v1 = vsel %vm320_vm5, %v317_v0, %v319_v63 }
  0xd1   : > { %323 = vst [vmem:[#allocation4 + $0x18] sm:$0xf] %v321_v1 }
  0xd4   : > { %v507_v55 = vld.sshfl [vmem:[#allocation1] sm:$0xff pattern:$0x75316420]  ;;  %v508_v56 = vld.sshfl [vmem:[#allocation1 + $0x8] sm:$0xff pattern:$0x75316420] }
  0xd5   : > { %509 = vrot.lane.b32.xlu1 %v507_v55, %s3849_s26  ;;  %518 = vst [vmem:[#allocation1] ss:$2 sm:$0xff] %v4016_v33  ;;  %511 = vrot.lane.b32.xlu2 %v508_v56, %s3849_s26 }
  0xd7   : > { %v332_v6 = vpop.permute.xlu1 %331  ;;  %v330_v8 = vpop.permute.xlu0 %329 }
  0xd8   : > { %v334_v9 = vsel %vm333_vm7, %v330_v8, %v332_v6 }
  0xd9   : > { %336 = vst [vmem:[#allocation4 + $0x1c] sm:$0xf] %v334_v9 }
  0xdc   : > { %v520_v61 = vld.sshfl [vmem:[#allocation1 + $0x8] sm:$0xff pattern:$0x75316420]  ;;  %v519_v62 = vld.sshfl [vmem:[#allocation1] sm:$0xff pattern:$0x75316420] }
  0xdd   : > { %523 = vrot.lane.b32.xlu1 %v520_v61, %s3850_s28  ;;  %521 = vrot.lane.b32.xlu0 %v519_v62, %s3850_s28  ;;  %530 = vst [vmem:[#allocation1] ss:$2 sm:$0xff] %v4016_v33 }
  0xdf   : > { %v345_v15 = vpop.permute.xlu0 %344  ;;  %v385_v21 = vpop.permute.xlu2 %384 }
  0xe0   : > { %v347_v17 = vsel %vm346_vm8, %v343_v7, %v345_v15 }
  0xe1   : > { %349 = vst [vmem:[#allocation4 + $0x20] sm:$0xf] %v347_v17 }
  0xe4   : > { %v531_v4 = vld.sshfl [vmem:[#allocation1] sm:$0xff pattern:$0x75316420]  ;;  %v532_v5 = vld.sshfl [vmem:[#allocation1 + $0x8] sm:$0xff pattern:$0x75316420] }
  0xe5   : > { %542 = vst [vmem:[#allocation1] ss:$2 sm:$0xff] %v4016_v33  ;;  %535 = vrot.lane.b32.xlu0 %v532_v5, %s3851_s27  ;;  %533 = vrot.lane.b32.xlu2 %v531_v4, %s3851_s27 }
  0xe7   : > { %v361_v13 = vpop.permute.xlu1 %360  ;;  %v399_v26 = vpop.permute.xlu2 %398 }
  0xe8   : > { %v364_v14 = vsel %vm255_vm3, %v361_v13, %v363_v12 }
  0xe9   : > { %366 = vst [vmem:[#allocation4 + $0x28] sm:$0xf] %v364_v14 }
  0xec   : > { %v543_v10 = vld.sshfl [vmem:[#allocation1] sm:$0xff pattern:$0x75316420]  ;;  %v544_v11 = vld.sshfl [vmem:[#allocation1 + $0x8] sm:$0xff pattern:$0x75316420] }
  0xed   : > { %545 = vrot.lane.b32.xlu1 %v543_v10, %s3852_s29  ;;  %547 = vrot.lane.b32.xlu2 %v544_v11, %s3852_s29  ;;  %612 = vst [vmem:[#allocation1] ss:$2 sm:$0xff] %v3990_v16 }
  0xef   : > { %v375_v20 = vpop.permute.xlu1 %374  ;;  %v373_v22 = vpop.permute.xlu0 %372 }
  0xf0   : > { %v376_v23 = vsel %vm268_vm1, %v373_v22, %v375_v20 }
  0xf1   : > { %378 = vst [vmem:[#allocation4 + $0x2c] sm:$0xf] %v376_v23 }
  0xf4   : > { %v613_v18 = vld.sshfl [vmem:[#allocation1] sm:$0xff pattern:$0x75316420]  ;;  %v614_v19 = vld.sshfl [vmem:[#allocation1 + $0x8] sm:$0xff pattern:$0x75316420] }
  0xf5   : > { %615 = vrot.lane.b32.xlu2 %v613_v18, %s3845_s18  ;;  %624 = vst [vmem:[#allocation1] ss:$2 sm:$0xff] %v3990_v16 }
  0xf7   : > { %v387_v27 = vpop.permute.xlu0 %386  ;;  %v421_v36 = vpop.permute.xlu2 %420 }
  0xf8   : > { %v388_v29 = vsel %vm281_vm2, %v385_v21, %v387_v27 }
  0xf9   : > { %390 = vst [vmem:[#allocation4 + $0x30] sm:$0xf] %v388_v29 }
  0xfc   : > { %v625_v24 = vld.sshfl [vmem:[#allocation1] sm:$0xff pattern:$0x75316420]  ;;  %v626_v25 = vld.sshfl [vmem:[#allocation1 + $0x8] sm:$0xff pattern:$0x75316420] }
  0xfd   : > { %617 = vrot.lane.b32.xlu2 %v614_v19, %s3845_s18  ;;  %636 = vst [vmem:[#allocation1] ss:$2 sm:$0xff] %v3990_v16 }
  0xff   : > { %v397_v28 = vpop.permute.xlu1 %396  ;;  %v435_v43 = vpop.permute.xlu2 %434 }
 0x100   : > { %v400_v30 = vsel %vm294_vm4, %v397_v28, %v399_v26  ;;  %v4110_v28 = vld [vmem:[#allocation4] sm:$0xff] }
 0x101   : > { %402 = vst [vmem:[#allocation4 + $0x34] sm:$0xf] %v400_v30  ;;  %v3348_v30 = vld [vmem:[#allocation2 + $0x8] sm:$0xf] }
 0x102   : > { %609 = vst [vmem:[#allocation4] sm:$0xf] %v3348_v30 }
 0x104   : > { %v637_v31 = vld.sshfl [vmem:[#allocation1] sm:$0xff pattern:$0x75316420]  ;;  %v638_v32 = vld.sshfl [vmem:[#allocation1 + $0x8] sm:$0xff pattern:$0x75316420] }
 0x105   : > { %627 = vrot.lane.b32.xlu2 %v625_v24, %s3846_s21  ;;  %648 = vst [vmem:[#allocation1] ss:$2 sm:$0xff] %v3990_v16 }
 0x107   : > { %v411_v34 = vpop.permute.xlu1 %410  ;;  %v409_v35 = vpop.permute.xlu0 %408 }
 0x108   : > { %v412_v37 = vsel %vm307_vm6, %v409_v35, %v411_v34 }
 0x109   : > { %414 = vst [vmem:[#allocation4 + $0x38] sm:$0xf] %v412_v37 }
 0x10c   : > { %v649_v38 = vld.sshfl [vmem:[#allocation1] sm:$0xff pattern:$0x75316420]  ;;  %v650_v39 = vld.sshfl [vmem:[#allocation1 + $0x8] sm:$0xff pattern:$0x75316420] }
 0x10d   : > { %629 = vrot.lane.b32.xlu2 %v626_v25, %s3846_s21  ;;  %651 = vrot.lane.b32.xlu0 %v649_v38, %s3848_s23  ;;  %660 = vst [vmem:[#allocation1] ss:$2 sm:$0xff] %v3990_v16 }
 0x10e   : > { %653 = vrot.lane.b32.xlu1 %v650_v39, %s3848_s23 }
 0x10f   : > { %v423_v40 = vpop.permute.xlu0 %422  ;;  %v462_v48 = vpop.permute.xlu2 %461 }
 0x110   : > { %v424_v41 = vsel %vm320_vm5, %v421_v36, %v423_v40 }
 0x111   : > { %426 = vst [vmem:[#allocation4 + $0x3c] sm:$0xf] %v424_v41  ;;  %v4118_v41 = vld [vmem:[#allocation2 + $0x18] sm:$0xff] }
 0x114   : > { %v661_v44 = vld.sshfl [vmem:[#allocation1] sm:$0xff pattern:$0x75316420]  ;;  %v662_v45 = vld.sshfl [vmem:[#allocation1 + $0x8] sm:$0xff pattern:$0x75316420] }
 0x115   : > { %639 = vrot.lane.b32.xlu2 %v637_v31, %s3847_s19  ;;  %672 = vst [vmem:[#allocation1] ss:$2 sm:$0xff] %v3990_v16 }
 0x117   : > { %v433_v46 = vpop.permute.xlu1 %432  ;;  %v476_v56 = vpop.permute.xlu2 %475 }
 0x118   : > { %v436_v47 = vsel %vm333_vm7, %v433_v46, %v435_v43  ;;  %v553_v46 = vld [vmem:[#allocation4 + $0x8] sm:$0xff] }
 0x119   : > { %438 = vst [vmem:[#allocation4 + $0x40] sm:$0xf] %v436_v47 }
 0x11c   : > { %v673_v49 = vld.sshfl [vmem:[#allocation1] sm:$0xff pattern:$0x75316420]  ;;  %v674_v50 = vld.sshfl [vmem:[#allocation1 + $0x8] sm:$0xff pattern:$0x75316420] }
 0x11d   : > { %641 = vrot.lane.b32.xlu2 %v638_v32, %s3847_s19  ;;  %675 = vrot.lane.b32.xlu0 %v673_v49, %s3850_s28  ;;  %684 = vst [vmem:[#allocation1] ss:$2 sm:$0xff] %v3990_v16 }
 0x11f   : > { %v447_v51 = vpop.permute.xlu1 %446  ;;  %v445_v52 = vpop.permute.xlu0 %444 }
 0x120   : > { %v448_v53 = vsel %vm346_vm8, %v445_v52, %v447_v51 }
 0x121   : > { %450 = vst [vmem:[#allocation4 + $0x44] sm:$0xf] %v448_v53  ;;  %v558_v53 = vld [vmem:[#allocation4 + $0x30] sm:$0xff] }
 0x124   : > { %v686_v54 = vld.sshfl [vmem:[#allocation1 + $0x8] sm:$0xff pattern:$0x75316420]  ;;  %v685_v55 = vld.sshfl [vmem:[#allocation1] sm:$0xff pattern:$0x75316420] }
 0x125   : > { %663 = vrot.lane.b32.xlu2 %v661_v44, %s3849_s26  ;;  %689 = vrot.lane.b32.xlu0 %v686_v54, %s3851_s27  ;;  %696 = vst [vmem:[#allocation1] ss:$2 sm:$0xff] %v3990_v16 }
 0x126   : > { %687 = vrot.lane.b32.xlu1 %v685_v55, %s3851_s27  ;;  %v557_v55 = vld [vmem:[#allocation4 + $0x28] sm:$0xff] }
 0x127   : > { %v464_v57 = vpop.permute.xlu0 %463  ;;  %v498_v63 = vpop.permute.xlu2 %497 }
 0x128   : > { %v465_v58 = vsel %vm255_vm3, %v462_v48, %v464_v57  ;;  %v560_v49 = vld [vmem:[#allocation4 + $0x40] sm:$0xff]  ;;  %v555_v57 = vld [vmem:[#allocation4 + $0x18] sm:$0xff] }
 0x129   : > { %467 = vst [vmem:[#allocation4 + $0x4c] sm:$0xf] %v465_v58 }
 0x12c   : > { %v697_v59 = vld.sshfl [vmem:[#allocation1] sm:$0xff pattern:$0x75316420]  ;;  %v698_v60 = vld.sshfl [vmem:[#allocation1 + $0x8] sm:$0xff pattern:$0x75316420] }
 0x12d   : > { %665 = vrot.lane.b32.xlu2 %v662_v45, %s3849_s26  ;;  %710 = vst [vmem:[#allocation1] ss:$2 sm:$0xff] %v4016_v33 }
 0x12e   : > { %701 = vrot.lane.b32.xlu1 %v698_v60, %s3852_s29  ;;  %v554_v60 = vld [vmem:[#allocation4 + $0x10] sm:$0xff] }
 0x12f   : > { %v474_v61 = vpop.permute.xlu1 %473  ;;  %v512_v4 = vpop.permute.xlu2 %511 }
 0x130   : > { %v477_v62 = vsel %vm268_vm1, %v474_v61, %v476_v56  ;;  %v561_v47 = vld [vmem:[#allocation4 + $0x48] sm:$0xff]  ;;  %v556_v56 = vld [vmem:[#allocation4 + $0x20] sm:$0xff] }
 0x131   : > { %479 = vst [vmem:[#allocation4 + $0x50] sm:$0xf] %v477_v62 }
 0x134   : > { %v711_v16 = vld.sshfl [vmem:[#allocation1] sm:$0xff pattern:$0x75316420]  ;;  %v712_v0 = vld.sshfl [vmem:[#allocation1 + $0x8] sm:$0xff pattern:$0x75316420] }
 0x135   : > { %677 = vrot.lane.b32.xlu2 %v674_v50, %s3850_s28  ;;  %713 = vrot.lane.b32.xlu0 %v711_v16, %s3845_s18  ;;  %722 = vst [vmem:[#allocation1] ss:$2 sm:$0xff] %v4016_v33  ;;  %v559_v50 = vld [vmem:[#allocation4 + $0x38] sm:$0xff] }
 0x137   : > { %v488_v1 = vpop.permute.xlu1 %487  ;;  %v486_v2 = vpop.permute.xlu0 %485 }
 0x138   : > { %v489_v3 = vsel %vm281_vm2, %v486_v2, %v488_v1 }
 0x139   : > { %491 = vst [vmem:[#allocation4 + $0x54] sm:$0xf] %v489_v3 }
 0x13c   : > { %v724_v5 = vld.sshfl [vmem:[#allocation1 + $0x8] sm:$0xff pattern:$0x75316420]  ;;  %v723_v6 = vld.sshfl [vmem:[#allocation1] sm:$0xff pattern:$0x75316420] }
 0x13d   : > { %699 = vrot.lane.b32.xlu2 %v697_v59, %s3852_s29  ;;  %727 = vrot.lane.b32.xlu0 %v724_v5, %s3846_s21  ;;  %734 = vst [vmem:[#allocation1] ss:$2 sm:$0xff] %v4016_v33 }
 0x13e   : > { %725 = vrot.lane.b32.xlu1 %v723_v6, %s3846_s21 }
 0x13f   : > { %v500_v7 = vpop.permute.xlu0 %499  ;;  %v534_v9 = vpop.permute.xlu2 %533 }
 0x140   : > { %v501_v8 = vsel %vm294_vm4, %v498_v63, %v500_v7  ;;  %v562_v42 = vld [vmem:[#allocation4 + $0x50] sm:$0xff]  ;;  %v4131_v63 = vld [vmem:[#allocation7] sm:$0xff] }
 0x141   : > { %503 = vst [vmem:[#allocation4 + $0x58] sm:$0xf] %v501_v8 }
 0x144   : > { %v735_v10 = vld.sshfl [vmem:[#allocation1] sm:$0xff pattern:$0x75316420]  ;;  %v736_v11 = vld.sshfl [vmem:[#allocation1 + $0x8] sm:$0xff pattern:$0x75316420] }
 0x145   : > { %715 = vrot.lane.b32.xlu2 %v712_v0, %s3845_s18  ;;  %746 = vst [vmem:[#allocation1] ss:$2 sm:$0xff] %v4016_v33 }
 0x146   : > { %739 = vrot.lane.b32.xlu1 %v736_v11, %s3847_s19 }
 0x147   : > { %v510_v12 = vpop.permute.xlu1 %509  ;;  %v548_v17 = vpop.permute.xlu2 %547 }
 0x148   : > { %v513_v13 = vsel %vm307_vm6, %v510_v12, %v512_v4 }
 0x149   : > { %515 = vst [vmem:[#allocation4 + $0x5c] sm:$0xf] %v513_v13 }
 0x14c   : > { %v747_v14 = vld.sshfl [vmem:[#allocation1] sm:$0xff pattern:$0x75316420]  ;;  %v748_v15 = vld.sshfl [vmem:[#allocation1 + $0x8] sm:$0xff pattern:$0x75316420] }
 0x14d   : > { %749 = vrot.lane.b32.xlu0 %v747_v14, %s3848_s23  ;;  %737 = vrot.lane.b32.xlu2 %v735_v10, %s3847_s19  ;;  %758 = vst [vmem:[#allocation1] ss:$2 sm:$0xff] %v4016_v33 }
 0x14f   : > { %v524_v18 = vpop.permute.xlu1 %523  ;;  %v522_v19 = vpop.permute.xlu0 %521 }
 0x150   : > { %v525_v20 = vsel %vm320_vm5, %v522_v19, %v524_v18  ;;  %v616_v24 = vpop.permute.xlu2 %615  ;;  %v563_v40 = vld [vmem:[#allocation4 + $0x58] sm:$0xff]  ;;  %v3357_v19 = vld [vmem:[#allocation2 + $0x10] sm:$0xf] }
 0x151   : > { %527 = vst [vmem:[#allocation4 + $0x60] sm:$0xf] %v525_v20 }
 0x152   : > { %707 = vst [vmem:[#allocation4 + $0x24] sm:$0xf] %v3357_v19 }
 0x154   : > { %v760_v21 = vld.sshfl [vmem:[#allocation1 + $0x8] sm:$0xff pattern:$0x75316420]  ;;  %v759_v22 = vld.sshfl [vmem:[#allocation1] sm:$0xff pattern:$0x75316420] }
 0x155   : > { %763 = vrot.lane.b32.xlu0 %v760_v21, %s3849_s26  ;;  %761 = vrot.lane.b32.xlu1 %v759_v22, %s3849_s26  ;;  %770 = vst [vmem:[#allocation1] ss:$2 sm:$0xff] %v4016_v33 }
 0x156   : > { %751 = vrot.lane.b32.xlu2 %v748_v15, %s3848_s23 }
 0x157   : > { %v536_v23 = vpop.permute.xlu0 %535 }
 0x158   : > { %v537_v25 = vsel %vm333_vm7, %v534_v9, %v536_v23  ;;  %v618_v31 = vpop.permute.xlu2 %617 }
 0x159   : > { %539 = vst [vmem:[#allocation4 + $0x64] sm:$0xf] %v537_v25  ;;  %v619_v34 = vsel %vm255_vm3, %v616_v24, %v618_v31 }
 0x15a   : > { %621 = vst [vmem:[#allocation4 + $0x4] sm:$0xf] %v619_v34 }
 0x15c   : > { %v771_v26 = vld.sshfl [vmem:[#allocation1] sm:$0xff pattern:$0x75316420]  ;;  %v772_v27 = vld.sshfl [vmem:[#allocation1 + $0x8] sm:$0xff pattern:$0x75316420] }
 0x15d   : > { %782 = vst [vmem:[#allocation1] ss:$2 sm:$0xff] %v4016_v33  ;;  %775 = vrot.lane.b32.xlu1 %v772_v27, %s3850_s28 }
 0x15e   : > { %773 = vrot.lane.b32.xlu2 %v771_v26, %s3850_s28 }
 0x15f   : > { %v546_v29 = vpop.permute.xlu1 %545 }
 0x160   : > { %v549_v32 = vsel %vm346_vm8, %v546_v29, %v548_v17  ;;  %v628_v37 = vpop.permute.xlu2 %627  ;;  %v564_v38 = vld [vmem:[#allocation4 + $0x60] sm:$0xff] }
 0x161   : > { %551 = vst [vmem:[#allocation4 + $0x68] sm:$0xf] %v549_v32 }
 0x164   : > { %v783_v35 = vld.sshfl [vmem:[#allocation1] sm:$0xff pattern:$0x75316420]  ;;  %v784_v36 = vld.sshfl [vmem:[#allocation1 + $0x8] sm:$0xff pattern:$0x75316420] }
 0x165   : > { %785 = vrot.lane.b32.xlu0 %v783_v35, %s3851_s27  ;;  %794 = vst [vmem:[#allocation1] ss:$2 sm:$0xff] %v4016_v33 }
 0x166   : > { %787 = vrot.lane.b32.xlu2 %v784_v36, %s3851_s27 }
 0x168   : > { %v565_v39 = vld [vmem:[#allocation4 + $0x68] sm:$0xf]  ;;  %v630_v45 = vpop.permute.xlu2 %629 }
 0x169   : > { %3346 = vmatpush.msk.msra.mxu0 %vm569_vm9, %v565_v39  ;;  %v631_v48 = vsel %vm268_vm1, %v628_v37, %v630_v45 }
 0x16a   : > { %633 = vst [vmem:[#allocation4 + $0x8] sm:$0xf] %v631_v48 }
 0x16b   : > { %576 = vmatpush.msra.mxu0 %v564_v38 }
 0x16c   : > { %v796_v43 = vld.sshfl [vmem:[#allocation1 + $0x8] sm:$0xff pattern:$0x75316420]  ;;  %v795_v44 = vld.sshfl [vmem:[#allocation1] sm:$0xff pattern:$0x75316420] }
 0x16d   : > { %577 = vmatpush.msra.mxu0 %v563_v40  ;;  %799 = vrot.lane.b32.xlu0 %v796_v43, %s3852_s29  ;;  %811 = vst [vmem:[#allocation1] ss:$2 sm:$0xff] %v4118_v41 }
 0x16e   : > { %797 = vrot.lane.b32.xlu1 %v795_v44, %s3852_s29 }
 0x16f   : > { %578 = vmatpush.msra.mxu0 %v562_v42 }
 0x170   : > { %v640_v54 = vpop.permute.xlu2 %639 }
 0x171   : > { %579 = vmatpush.msra.mxu0 %v561_v47 }
 0x173   : > { %580 = vmatpush.msra.mxu0 %v560_v49 }
 0x174   : > { %v812_v51 = vld.sshfl [vmem:[#allocation1] sm:$0xff pattern:$0x75316420]  ;;  %v813_v52 = vld.sshfl [vmem:[#allocation1 + $0x8] sm:$0xff pattern:$0x75316420] }
 0x175   : > { %581 = vmatpush.msra.mxu0 %v559_v50  ;;  %823 = vst [vmem:[#allocation1] ss:$2 sm:$0xff] %v4118_v41  ;;  %814 = vrot.lane.b32.xlu2 %v812_v51, %s3845_s18 }
 0x176   : > { %816 = vrot.lane.b32.xlu1 %v813_v52, %s3845_s18 }
 0x177   : > { %582 = vmatpush.msra.mxu0 %v558_v53 }
 0x178   : > { %v642_v61 = vpop.permute.xlu2 %641 }
 0x179   : > { %583 = vmatpush.msra.mxu0 %v557_v55  ;;  %v643_v62 = vsel %vm281_vm2, %v640_v54, %v642_v61 }
 0x17a   : > { %645 = vst [vmem:[#allocation4 + $0xc] sm:$0xf] %v643_v62 }
 0x17b   : > { %584 = vmatpush.msra.mxu0 %v556_v56 }
 0x17c   : > { %v824_v58 = vld.sshfl [vmem:[#allocation1] sm:$0xff pattern:$0x75316420]  ;;  %v825_v59 = vld.sshfl [vmem:[#allocation1 + $0x8] sm:$0xff pattern:$0x75316420] }
 0x17d   : > { %585 = vmatpush.msra.mxu0 %v555_v57  ;;  %826 = vrot.lane.b32.xlu0 %v824_v58, %s3846_s21  ;;  %835 = vst [vmem:[#allocation1] ss:$2 sm:$0xff] %v4118_v41 }
 0x17e   : > { %828 = vrot.lane.b32.xlu2 %v825_v59, %s3846_s21 }
 0x17f   : > { %586 = vmatpush.msra.mxu0 %v554_v60  ;;  %v652_v4 = vpop.permute.xlu0 %651 }
 0x180   : > { %v664_v1 = vpop.permute.xlu2 %663  ;;  %v654_v5 = vpop.permute.xlu1 %653 }
 0x181   : > { %587 = vmatpush.msra.mxu0 %v553_v46  ;;  %v655_v6 = vsel %vm294_vm4, %v652_v4, %v654_v5 }
 0x182   : > { %657 = vst [vmem:[#allocation4 + $0x10] sm:$0xf] %v655_v6 }
 0x183   : > { %588 = vmatpush.msra.mxu0 %v4110_v28 }
 0x184   : > { %v837_v16 = vld.sshfl [vmem:[#allocation1 + $0x8] sm:$0xff pattern:$0x75316420]  ;;  %v836_v0 = vld.sshfl [vmem:[#allocation1] sm:$0xff pattern:$0x75316420]  ;;  %3347 = vmatmul.msk.f32.vlgmr.msra.gmra.mxu0 %vm320_vm5, %v4131_v63 }
 0x185   : > { %840 = vrot.lane.b32.xlu0 %v837_v16, %s3847_s19  ;;  %838 = vrot.lane.b32.xlu1 %v836_v0, %s3847_s19  ;;  %847 = vst [vmem:[#allocation1] ss:$2 sm:$0xff] %v4118_v41  ;;  %v3366_v0 = vld [vmem:[#allocation2 + $0x18] sm:$0xf] }
 0x186   : > { %808 = vst [vmem:[#allocation4 + $0x48] sm:$0xf] %v3366_v0 }
 0x188   : > { %v666_v7 = vpop.permute.xlu2 %665 }
 0x189   : > { %v667_v8 = vsel %vm307_vm6, %v664_v1, %v666_v7 }
 0x18a   : > { %669 = vst [vmem:[#allocation4 + $0x14] sm:$0xf] %v667_v8 }
 0x18c   : > { %v848_v2 = vld.sshfl [vmem:[#allocation1] sm:$0xff pattern:$0x75316420]  ;;  %v849_v3 = vld.sshfl [vmem:[#allocation1 + $0x8] sm:$0xff pattern:$0x75316420] }
 0x18d   : > { %859 = vst [vmem:[#allocation1] ss:$2 sm:$0xff] %v4118_v41  ;;  %852 = vrot.lane.b32.xlu1 %v849_v3, %s3848_s23  ;;  %850 = vrot.lane.b32.xlu2 %v848_v2, %s3848_s23 }
 0x18f   : > { %v676_v11 = vpop.permute.xlu0 %675 }
 0x190   : > { %v678_v12 = vpop.permute.xlu2 %677 }
 0x191   : > { %v679_v13 = vsel %vm320_vm5, %v676_v11, %v678_v12 }
 0x192   : > { %681 = vst [vmem:[#allocation4 + $0x18] sm:$0xf] %v679_v13 }
 0x194   : > { %v860_v9 = vld.sshfl [vmem:[#allocation1] sm:$0xff pattern:$0x75316420]  ;;  %v861_v10 = vld.sshfl [vmem:[#allocation1 + $0x8] sm:$0xff pattern:$0x75316420] }
 0x195   : > { %862 = vrot.lane.b32.xlu0 %v860_v9, %s3849_s26  ;;  %871 = vst [vmem:[#allocation1] ss:$2 sm:$0xff] %v4118_v41  ;;  %864 = vrot.lane.b32.xlu2 %v861_v10, %s3849_s26 }
 0x197   : > { %v690_v18 = vpop.permute.xlu0 %689 }
 0x198   : > { %v688_v14 = vpop.permute.xlu1 %687  ;;  %v700_v21 = vpop.permute.xlu2 %699 }
 0x199   : > { %v691_v20 = vsel %vm333_vm7, %v688_v14, %v690_v18 }
 0x19a   : > { %693 = vst [vmem:[#allocation4 + $0x1c] sm:$0xf] %v691_v20 }
 0x19c   : > { %v873_v15 = vld.sshfl [vmem:[#allocation1 + $0x8] sm:$0xff pattern:$0x75316420]  ;;  %v872_v17 = vld.sshfl [vmem:[#allocation1] sm:$0xff pattern:$0x75316420] }
 0x19d   : > { %876 = vrot.lane.b32.xlu0 %v873_v15, %s3850_s28  ;;  %874 = vrot.lane.b32.xlu1 %v872_v17, %s3850_s28  ;;  %883 = vst [vmem:[#allocation1] ss:$2 sm:$0xff] %v4118_v41 }
 0x1a0   : > { %v702_v22 = vpop.permute.xlu1 %701  ;;  %v716_v26 = vpop.permute.xlu2 %715 }
 0x1a1   : > { %v703_v23 = vsel %vm346_vm8, %v700_v21, %v702_v22 }
 0x1a2   : > { %705 = vst [vmem:[#allocation4 + $0x20] sm:$0xf] %v703_v23 }
 0x1a4   : > { %v884_v24 = vld.sshfl [vmem:[#allocation1] sm:$0xff pattern:$0x75316420]  ;;  %v885_v25 = vld.sshfl [vmem:[#allocation1 + $0x8] sm:$0xff pattern:$0x75316420] }
 0x1a5   : > { %895 = vst [vmem:[#allocation1] ss:$2 sm:$0xff] %v4118_v41  ;;  %888 = vrot.lane.b32.xlu1 %v885_v25, %s3851_s27  ;;  %886 = vrot.lane.b32.xlu2 %v884_v24, %s3851_s27  ;;  %v4199_v24 = vld [vmem:[#allocation4] sm:$0xff] }
 0x1a7   : > { %v714_v27 = vpop.permute.xlu0 %713 }
 0x1a8   : > { %v717_v28 = vsel %vm255_vm3, %v714_v27, %v716_v26  ;;  %v738_v31 = vpop.permute.xlu2 %737  ;;  %v3378_v26 = vld [vmem:[#allocation2 + $0x10] sm:$0xf] }
 0x1a9   : > { %719 = vst [vmem:[#allocation4 + $0x28] sm:$0xf] %v717_v28  ;;  %v4202_v28 = vld [vmem:[#allocation10] ss:$0 sm:$0xff] }
 0x1aa   : > { %955 = vst [vmem:[#allocation4] sm:$0xf] %v3378_v26 }
 0x1ac   : > { %v896_v29 = vld.sshfl [vmem:[#allocation1] sm:$0xff pattern:$0x75316420]  ;;  %v897_v30 = vld.sshfl [vmem:[#allocation1 + $0x8] sm:$0xff pattern:$0x75316420] }
 0x1ad   : > { %898 = vrot.lane.b32.xlu0 %v896_v29, %s3852_s29  ;;  %900 = vrot.lane.b32.xlu2 %v897_v30, %s3852_s29  ;;  %958 = vst [vmem:[#allocation1] ss:$2 sm:$0xff] %v4016_v33 }
 0x1af   : > { %v728_v32 = vpop.permute.xlu0 %727 }
 0x1b0   : > { %v726_v34 = vpop.permute.xlu1 %725  ;;  %v752_v39 = vpop.permute.xlu2 %751 }
 0x1b1   : > { %v729_v35 = vsel %vm268_vm1, %v726_v34, %v728_v32 }
 0x1b2   : > { %731 = vst [vmem:[#allocation4 + $0x2c] sm:$0xf] %v729_v35 }
 0x1b4   : > { %v959_v36 = vld.sshfl [vmem:[#allocation1] sm:$0xff pattern:$0x75316420]  ;;  %v960_v37 = vld.sshfl [vmem:[#allocation1 + $0x8] sm:$0xff pattern:$0x75316420] }
 0x1b5   : > { %961 = vrot.lane.b32.xlu2 %v959_v36, %s3845_s18  ;;  %970 = vst [vmem:[#allocation1] ss:$2 sm:$0xff] %v4016_v33 }
 0x1b8   : > { %v740_v38 = vpop.permute.xlu1 %739  ;;  %v774_v46 = vpop.permute.xlu2 %773 }
 0x1b9   : > { %v741_v40 = vsel %vm281_vm2, %v738_v31, %v740_v38 }
 0x1ba   : > { %743 = vst [vmem:[#allocation4 + $0x30] sm:$0xf] %v741_v40 }
 0x1bc   : > { %v971_v42 = vld.sshfl [vmem:[#allocation1] sm:$0xff pattern:$0x75316420]  ;;  %v972_v43 = vld.sshfl [vmem:[#allocation1 + $0x8] sm:$0xff pattern:$0x75316420] }
 0x1bd   : > { %963 = vrot.lane.b32.xlu2 %v960_v37, %s3845_s18  ;;  %982 = vst [vmem:[#allocation1] ss:$2 sm:$0xff] %v4016_v33 }
 0x1bf   : > { %v750_v44 = vpop.permute.xlu0 %749 }
 0x1c0   : > { %v753_v45 = vsel %vm294_vm4, %v750_v44, %v752_v39  ;;  %v788_v54 = vpop.permute.xlu2 %787 }
 0x1c1   : > { %755 = vst [vmem:[#allocation4 + $0x34] sm:$0xf] %v753_v45 }
 0x1c4   : > { %v983_v47 = vld.sshfl [vmem:[#allocation1] sm:$0xff pattern:$0x75316420]  ;;  %v984_v48 = vld.sshfl [vmem:[#allocation1 + $0x8] sm:$0xff pattern:$0x75316420] }
 0x1c5   : > { %973 = vrot.lane.b32.xlu2 %v971_v42, %s3846_s21  ;;  %994 = vst [vmem:[#allocation1] ss:$2 sm:$0xff] %v4016_v33  ;;  %987 = vrot.lane.b32.xlu1 %v984_v48, %s3847_s19 }
 0x1c7   : > { %v764_v49 = vpop.permute.xlu0 %763  ;;  %v762_v50 = vpop.permute.xlu1 %761 }
 0x1c8   : > { %v765_v51 = vsel %vm307_vm6, %v762_v50, %v764_v49 }
 0x1c9   : > { %767 = vst [vmem:[#allocation4 + $0x38] sm:$0xf] %v765_v51 }
 0x1cc   : > { %v995_v52 = vld.sshfl [vmem:[#allocation1] sm:$0xff pattern:$0x75316420]  ;;  %v996_v53 = vld.sshfl [vmem:[#allocation1 + $0x8] sm:$0xff pattern:$0x75316420] }
 0x1cd   : > { %975 = vrot.lane.b32.xlu2 %v972_v43, %s3846_s21  ;;  %997 = vrot.lane.b32.xlu0 %v995_v52, %s3848_s23  ;;  %1006 = vst [vmem:[#allocation1] ss:$2 sm:$0xff] %v4016_v33 }
 0x1cf   : > { %v776_v55 = vpop.permute.xlu1 %775  ;;  %v815_v60 = vpop.permute.xlu2 %814 }
 0x1d0   : > { %v777_v56 = vsel %vm320_vm5, %v774_v46, %v776_v55 }
 0x1d1   : > { %779 = vst [vmem:[#allocation4 + $0x3c] sm:$0xf] %v777_v56 }
 0x1d4   : > { %v1007_v57 = vld.sshfl [vmem:[#allocation1] sm:$0xff pattern:$0x75316420]  ;;  %v1008_v58 = vld.sshfl [vmem:[#allocation1 + $0x8] sm:$0xff pattern:$0x75316420] }
 0x1d5   : > { %985 = vrot.lane.b32.xlu2 %v983_v47, %s3847_s19  ;;  %1018 = vst [vmem:[#allocation1] ss:$2 sm:$0xff] %v4016_v33 }
 0x1d7   : > { %v786_v59 = vpop.permute.xlu0 %785 }
 0x1d8   : > { %v789_v61 = vsel %vm333_vm7, %v786_v59, %v788_v54  ;;  %v829_v3 = vpop.permute.xlu2 %828  ;;  %v906_v59 = vld [vmem:[#allocation4 + $0x8] sm:$0xff] }
 0x1d9   : > { %791 = vst [vmem:[#allocation4 + $0x40] sm:$0xf] %v789_v61 }
 0x1dc   : > { %v1019_v62 = vld.sshfl [vmem:[#allocation1] sm:$0xff pattern:$0x75316420]  ;;  %v1020_v16 = vld.sshfl [vmem:[#allocation1 + $0x8] sm:$0xff pattern:$0x75316420] }
 0x1dd   : > { %1021 = vrot.lane.b32.xlu0 %v1019_v62, %s3850_s28  ;;  %999 = vrot.lane.b32.xlu2 %v996_v53, %s3848_s23  ;;  %1030 = vst [vmem:[#allocation1] ss:$2 sm:$0xff] %v4016_v33 }
 0x1de   : > { %1023 = vrot.lane.b32.xlu1 %v1020_v16, %s3850_s28  ;;  %v4235_v16 = vld [vmem:[#allocation2 + $0x20] sm:$0xff] }
 0x1df   : > { %v800_v1 = vpop.permute.xlu0 %799 }
 0x1e0   : > { %v798_v2 = vpop.permute.xlu1 %797 }
 0x1e1   : > { %v801_v4 = vsel %vm346_vm8, %v798_v2, %v800_v1 }
 0x1e2   : > { %803 = vst [vmem:[#allocation4 + $0x44] sm:$0xf] %v801_v4 }
 0x1e4   : > { %v1032_v5 = vld.sshfl [vmem:[#allocation1 + $0x8] sm:$0xff pattern:$0x75316420]  ;;  %v1031_v6 = vld.sshfl [vmem:[#allocation1] sm:$0xff pattern:$0x75316420] }
 0x1e5   : > { %1035 = vrot.lane.b32.xlu0 %v1032_v5, %s3851_s27  ;;  %1009 = vrot.lane.b32.xlu2 %v1007_v57, %s3849_s26  ;;  %1042 = vst [vmem:[#allocation1] ss:$2 sm:$0xff] %v4016_v33 }
 0x1e7   : > { %v851_v9 = vpop.permute.xlu2 %850 }
 0x1e8   : > { %v817_v7 = vpop.permute.xlu1 %816 }
 0x1e9   : > { %v818_v8 = vsel %vm255_vm3, %v815_v60, %v817_v7  ;;  %v913_v5 = vld [vmem:[#allocation4 + $0x40] sm:$0xff] }
 0x1ea   : > { %820 = vst [vmem:[#allocation4 + $0x4c] sm:$0xf] %v818_v8 }
 0x1ec   : > { %v1043_v10 = vld.sshfl [vmem:[#allocation1] sm:$0xff pattern:$0x75316420]  ;;  %v1044_v11 = vld.sshfl [vmem:[#allocation1 + $0x8] sm:$0xff pattern:$0x75316420] }
 0x1ed   : > { %1045 = vrot.lane.b32.xlu1 %v1043_v10, %s3852_s29  ;;  %1056 = vst [vmem:[#allocation1] ss:$2 sm:$0xff] %v4118_v41  ;;  %1011 = vrot.lane.b32.xlu2 %v1008_v58, %s3849_s26 }
 0x1ef   : > { %v827_v12 = vpop.permute.xlu0 %826  ;;  %v865_v33 = vpop.permute.xlu2 %864 }
 0x1f0   : > { %v830_v13 = vsel %vm268_vm1, %v827_v12, %v829_v3 }
 0x1f1   : > { %832 = vst [vmem:[#allocation4 + $0x50] sm:$0xf] %v830_v13  ;;  %v914_v3 = vld [vmem:[#allocation4 + $0x48] sm:$0xff] }
 0x1f4   : > { %v1057_v14 = vld.sshfl [vmem:[#allocation1] sm:$0xff pattern:$0x75316420]  ;;  %v1058_v15 = vld.sshfl [vmem:[#allocation1 + $0x8] sm:$0xff pattern:$0x75316420] }
 0x1f5   : > { %1059 = vrot.lane.b32.xlu0 %v1057_v14, %s3845_s18  ;;  %1061 = vrot.lane.b32.xlu1 %v1058_v15, %s3845_s18  ;;  %1068 = vst [vmem:[#allocation1] ss:$2 sm:$0xff] %v4118_v41  ;;  %v909_v14 = vld [vmem:[#allocation4 + $0x20] sm:$0xff]  ;;  %v908_v15 = vld [vmem:[#allocation4 + $0x18] sm:$0xff] }
 0x1f6   : > { %1033 = vrot.lane.b32.xlu2 %v1031_v6, %s3851_s27  ;;  %v912_v6 = vld [vmem:[#allocation4 + $0x38] sm:$0xff] }
 0x1f7   : > { %v841_v17 = vpop.permute.xlu0 %840  ;;  %v839_v18 = vpop.permute.xlu1 %838 }
 0x1f8   : > { %v842_v19 = vsel %vm281_vm2, %v839_v18, %v841_v17  ;;  %v907_v18 = vld [vmem:[#allocation4 + $0x10] sm:$0xff] }
 0x1f9   : > { %844 = vst [vmem:[#allocation4 + $0x54] sm:$0xf] %v842_v19 }
 0x1fc   : > { %v1070_v20 = vld.sshfl [vmem:[#allocation1 + $0x8] sm:$0xff pattern:$0x75316420]  ;;  %v1069_v21 = vld.sshfl [vmem:[#allocation1] sm:$0xff pattern:$0x75316420] }
 0x1fd   : > { %1073 = vrot.lane.b32.xlu0 %v1070_v20, %s3846_s21  ;;  %1080 = vst [vmem:[#allocation1] ss:$2 sm:$0xff] %v4118_v41 }
 0x1fe   : > { %1047 = vrot.lane.b32.xlu2 %v1044_v11, %s3852_s29  ;;  %v910_v11 = vld [vmem:[#allocation4 + $0x28] sm:$0xff] }
 0x1ff   : > { %v887_v22 = vpop.permute.xlu2 %886  ;;  %v853_v23 = vpop.permute.xlu1 %852 }
 0x200   : > { %v854_v25 = vsel %vm294_vm4, %v851_v9, %v853_v23  ;;  %v915_v0 = vld [vmem:[#allocation4 + $0x50] sm:$0xff] }
 0x201   : > { %856 = vst [vmem:[#allocation4 + $0x58] sm:$0xf] %v854_v25  ;;  %v590_v27 = vpop.f32.mrf.mxu0  ;;  %v911_v9 = vld [vmem:[#allocation4 + $0x30] sm:$0xff] }
 0x202   : > { %v596_v29 = vmul.f32 %v4202_v28, %v590_v27  ;;  %v3387_v27 = vld [vmem:[#allocation2 + $0x18] sm:$0xf] }
 0x203   : > { %1053 = vst [vmem:[#allocation4 + $0x24] sm:$0xf] %v3387_v27 }
 0x204   : > { %v1081_v30 = vld.sshfl [vmem:[#allocation1] sm:$0xff pattern:$0x75316420]  ;;  %v1082_v31 = vld.sshfl [vmem:[#allocation1 + $0x8] sm:$0xff pattern:$0x75316420]  ;;  %599 = vst [vmem:[%s3974_s10] sm:$0xff] %v596_v29  ;;  %v603_v62 = vmul.f32 %v596_v29, %v596_v29 }
 0x205   : > { %1083 = vrot.lane.b32.xlu1 %v1081_v30, %s3847_s19  ;;  %1092 = vst [vmem:[#allocation1] ss:$2 sm:$0xff] %v4118_v41 }
 0x206   : > { %1071 = vrot.lane.b32.xlu2 %v1069_v21, %s3846_s21 }
 0x207   : > { %v863_v32 = vpop.permute.xlu0 %862  ;;  %v901_v34 = vpop.permute.xlu2 %900 }
 0x208   : > { %v866_v35 = vsel %vm307_vm6, %v863_v32, %v865_v33 }
 0x209   : > { %868 = vst [vmem:[#allocation4 + $0x5c] sm:$0xf] %v866_v35 }
 0x20c   : > { %v4210_v36 = vld.sshfl [vmem:[#allocation1] sm:$0xff pattern:$0x75316420]  ;;  %v4212_v37 = vld.sshfl [vmem:[#allocation1 + $0x8] sm:$0xff pattern:$0x75316420] }
 0x20d   : > { %1104 = vst [vmem:[#allocation1] ss:$2 sm:$0xff] %v4118_v41 }
 0x20e   : > { %1085 = vrot.lane.b32.xlu2 %v1082_v31, %s3847_s19 }
 0x20f   : > { %v877_v38 = vpop.permute.xlu0 %876  ;;  %v875_v39 = vpop.permute.xlu1 %874 }
 0x210   : > { %v878_v40 = vsel %vm320_vm5, %v875_v39, %v877_v38  ;;  %v962_v42 = vpop.permute.xlu2 %961  ;;  %v916_v61 = vld [vmem:[#allocation4 + $0x58] sm:$0xff] }
 0x211   : > { %880 = vst [vmem:[#allocation4 + $0x60] sm:$0xf] %v878_v40 }
 0x214   : > { %v1105_v43 = vld.sshfl [vmem:[#allocation1] sm:$0xff pattern:$0x75316420]  ;;  %v4217_v44 = vld.sshfl [vmem:[#allocation1 + $0x8] sm:$0xff pattern:$0x75316420] }
 0x215   : > { %1116 = vst [vmem:[#allocation1] ss:$2 sm:$0xff] %v4118_v41 }
 0x216   : > { %1107 = vrot.lane.b32.xlu2 %v1105_v43, %s3849_s26 }
 0x217   : > { %v889_v45 = vpop.permute.xlu1 %888 }
 0x218   : > { %v890_v46 = vsel %vm333_vm7, %v887_v22, %v889_v45  ;;  %v964_v47 = vpop.permute.xlu2 %963 }
 0x219   : > { %892 = vst [vmem:[#allocation4 + $0x64] sm:$0xf] %v890_v46  ;;  %v965_v48 = vsel %vm255_vm3, %v962_v42, %v964_v47 }
 0x21a   : > { %967 = vst [vmem:[#allocation4 + $0x4] sm:$0xf] %v965_v48 }
 0x21c   : > { %v4223_v49 = vld.sshfl [vmem:[#allocation1] sm:$0xff pattern:$0x75316420]  ;;  %v1118_v50 = vld.sshfl [vmem:[#allocation1 + $0x8] sm:$0xff pattern:$0x75316420] }
 0x21d   : > { %1128 = vst [vmem:[#allocation1] ss:$2 sm:$0xff] %v4118_v41 }
 0x21e   : > { %1121 = vrot.lane.b32.xlu2 %v1118_v50, %s3850_s28 }
 0x21f   : > { %v899_v51 = vpop.permute.xlu0 %898 }
 0x220   : > { %v902_v52 = vsel %vm346_vm8, %v899_v51, %v901_v34  ;;  %v974_v53 = vpop.permute.xlu2 %973  ;;  %v917_v56 = vld [vmem:[#allocation4 + $0x60] sm:$0xff] }
 0x221   : > { %904 = vst [vmem:[#allocation4 + $0x68] sm:$0xf] %v902_v52 }
 0x224   : > { %v4228_v54 = vld.sshfl [vmem:[#allocation1] sm:$0xff pattern:$0x75316420]  ;;  %v4230_v55 = vld.sshfl [vmem:[#allocation1 + $0x8] sm:$0xff pattern:$0x75316420] }
 0x225   : > { %1140 = vst [vmem:[#allocation1] ss:$2 sm:$0xff] %v4118_v41 }
 0x227   : > { %600 = vadd.xlane.f32.xlu0 %v596_v29 }
 0x228   : > { %v918_v57 = vld [vmem:[#allocation4 + $0x68] sm:$0xf]  ;;  %v976_v58 = vpop.permute.xlu2 %975 }
 0x229   : > { %3375 = vmatpush.msk.msra.mxu1 %vm569_vm9, %v918_v57  ;;  %v977_v60 = vsel %vm268_vm1, %v974_v53, %v976_v58 }
 0x22a   : > { %979 = vst [vmem:[#allocation4 + $0x8] sm:$0xf] %v977_v60 }
 0x22b   : > { %925 = vmatpush.msra.mxu1 %v917_v56 }
 0x22c   : > { %v1141_v1 = vld.sshfl [vmem:[#allocation1] sm:$0xff pattern:$0x75316420]  ;;  %v1142_v2 = vld.sshfl [vmem:[#allocation1 + $0x8] sm:$0xff pattern:$0x75316420] }
 0x22d   : > { %926 = vmatpush.msra.mxu1 %v916_v61  ;;  %1157 = vst [vmem:[#allocation1] ss:$2 sm:$0xff] %v4235_v16  ;;  %1143 = vrot.lane.b32.xlu2 %v1141_v1, %s3852_s29 }
 0x22f   : > { %927 = vmatpush.msra.mxu1 %v915_v0  ;;  %604 = vadd.xlane.f32.xlu1 %v603_v62 }
 0x230   : > { %v986_v4 = vpop.permute.xlu2 %985 }
 0x231   : > { %928 = vmatpush.msra.mxu1 %v914_v3 }
 0x233   : > { %929 = vmatpush.msra.mxu1 %v913_v5 }
 0x234   : > { %v4239_v7 = vld.sshfl [vmem:[#allocation1] sm:$0xff pattern:$0x75316420]  ;;  %v1159_v8 = vld.sshfl [vmem:[#allocation1 + $0x8] sm:$0xff pattern:$0x75316420] }
 0x235   : > { %930 = vmatpush.msra.mxu1 %v912_v6  ;;  %1169 = vst [vmem:[#allocation1] ss:$2 sm:$0xff] %v4235_v16  ;;  %1162 = vrot.lane.b32.xlu2 %v1159_v8, %s3845_s18 }
 0x237   : > { %931 = vmatpush.msra.mxu1 %v911_v9  ;;  %v988_v10 = vpop.permute.xlu1 %987 }
 0x238   : > { %v1000_v12 = vpop.permute.xlu2 %999  ;;  %v989_v13 = vsel %vm281_vm2, %v986_v4, %v988_v10 }
 0x239   : > { %932 = vmatpush.msra.mxu1 %v910_v11  ;;  %991 = vst [vmem:[#allocation4 + $0xc] sm:$0xf] %v989_v13 }
 0x23b   : > { %933 = vmatpush.msra.mxu1 %v909_v14  ;;  %1095 = vrot.lane.b32.xlu0 %v4210_v36, %s3848_s23 }
 0x23c   : > { %v1170_v33 = vld.sshfl [vmem:[#allocation1] sm:$0xff pattern:$0x75316420]  ;;  %v1171_v17 = vld.sshfl [vmem:[#allocation1 + $0x8] sm:$0xff pattern:$0x75316420] }
 0x23d   : > { %934 = vmatpush.msra.mxu1 %v908_v15  ;;  %1181 = vst [vmem:[#allocation1] ss:$2 sm:$0xff] %v4235_v16  ;;  %v3396_v15 = vld [vmem:[#allocation2 + $0x20] sm:$0xf] }
 0x23e   : > { %1154 = vst [vmem:[#allocation4 + $0x48] sm:$0xf] %v3396_v15 }
 0x23f   : > { %935 = vmatpush.msra.mxu1 %v907_v18  ;;  %v998_v19 = vpop.permute.xlu0 %997 }
 0x240   : > { %v1001_v20 = vsel %vm294_vm4, %v998_v19, %v1000_v12  ;;  %v1010_v21 = vpop.permute.xlu2 %1009 }
 0x241   : > { %936 = vmatpush.msra.mxu1 %v906_v59  ;;  %1003 = vst [vmem:[#allocation4 + $0x10] sm:$0xf] %v1001_v20 }
 0x243   : > { %937 = vmatpush.msra.mxu1 %v4199_v24  ;;  %1109 = vrot.lane.b32.xlu0 %v4217_v44, %s3849_s26 }
 0x244   : > { %3376 = vmatmul.msk.f32.vlgmr.msra.gmra.mxu1 %vm320_vm5, %v4131_v63  ;;  %v1182_v22 = vld.sshfl [vmem:[#allocation1] sm:$0xff pattern:$0x75316420]  ;;  %v1183_v23 = vld.sshfl [vmem:[#allocation1 + $0x8] sm:$0xff pattern:$0x75316420] }
 0x245   : > { %1193 = vst [vmem:[#allocation1] ss:$2 sm:$0xff] %v4235_v16  ;;  %1184 = vrot.lane.b32.xlu2 %v1182_v22, %s3847_s19 }
 0x248   : > { %1097 = vrot.lane.b32.xlu1 %v4212_v37, %s3848_s23  ;;  %v1012_v25 = vpop.permute.xlu2 %1011 }
 0x249   : > { %v1013_v26 = vsel %vm307_vm6, %v1010_v21, %v1012_v25 }
 0x24a   : > { %1015 = vst [vmem:[#allocation4 + $0x14] sm:$0xf] %v1013_v26 }
 0x24b   : > { %1131 = vrot.lane.b32.xlu0 %v4228_v54, %s3851_s27 }
 0x24c   : > { %v1194_v24 = vld.sshfl [vmem:[#allocation1] sm:$0xff pattern:$0x75316420]  ;;  %v1195_v63 = vld.sshfl [vmem:[#allocation1 + $0x8] sm:$0xff pattern:$0x75316420] }
 0x24d   : > { %1205 = vst [vmem:[#allocation1] ss:$2 sm:$0xff] %v4235_v16  ;;  %1198 = vrot.lane.b32.xlu2 %v1195_v63, %s3848_s23 }
 0x24f   : > { %v1022_v29 = vpop.permute.xlu0 %1021 }
 0x250   : > { %1119 = vrot.lane.b32.xlu1 %v4223_v49, %s3850_s28  ;;  %v1024_v30 = vpop.permute.xlu1 %1023  ;;  %v1034_v32 = vpop.permute.xlu2 %1033 }
 0x251   : > { %v1025_v31 = vsel %vm320_vm5, %v1022_v29, %v1024_v30 }
 0x252   : > { %1027 = vst [vmem:[#allocation4 + $0x18] sm:$0xf] %v1025_v31 }
 0x253   : > { %1145 = vrot.lane.b32.xlu0 %v1142_v2, %s3852_s29 }
 0x254   : > { %v1206_v34 = vld.sshfl [vmem:[#allocation1] sm:$0xff pattern:$0x75316420]  ;;  %v1207_v35 = vld.sshfl [vmem:[#allocation1 + $0x8] sm:$0xff pattern:$0x75316420] }
 0x255   : > { %1217 = vst [vmem:[#allocation1] ss:$2 sm:$0xff] %v4235_v16 }
 0x257   : > { %v1036_v36 = vpop.permute.xlu0 %1035 }
 0x258   : > { %1133 = vrot.lane.b32.xlu1 %v4230_v55, %s3851_s27  ;;  %v1037_v37 = vsel %vm333_vm7, %v1034_v32, %v1036_v36  ;;  %v1048_v38 = vpop.permute.xlu2 %1047 }
 0x259   : > { %1039 = vst [vmem:[#allocation4 + $0x1c] sm:$0xf] %v1037_v37 }
 0x25b   : > { %1172 = vrot.lane.b32.xlu0 %v1170_v33, %s3846_s21 }
 0x25c   : > { %v1218_v39 = vld.sshfl [vmem:[#allocation1] sm:$0xff pattern:$0x75316420]  ;;  %v1219_v40 = vld.sshfl [vmem:[#allocation1 + $0x8] sm:$0xff pattern:$0x75316420] }
 0x25d   : > { %1229 = vst [vmem:[#allocation1] ss:$2 sm:$0xff] %v4235_v16  ;;  %1220 = vrot.lane.b32.xlu2 %v1218_v39, %s3850_s28 }
 0x25f   : > { %v1046_v42 = vpop.permute.xlu1 %1045 }
 0x260   : > { %1160 = vrot.lane.b32.xlu1 %v4239_v7, %s3845_s18  ;;  %v1049_v43 = vsel %vm346_vm8, %v1046_v42, %v1048_v38  ;;  %v1072_v49 = vpop.permute.xlu2 %1071 }
 0x261   : > { %1051 = vst [vmem:[#allocation4 + $0x20] sm:$0xf] %v1049_v43 }
 0x263   : > { %1186 = vrot.lane.b32.xlu0 %v1183_v23, %s3847_s19 }
 0x264   : > { %v1230_v44 = vld.sshfl [vmem:[#allocation1] sm:$0xff pattern:$0x75316420]  ;;  %v1231_v45 = vld.sshfl [vmem:[#allocation1 + $0x8] sm:$0xff pattern:$0x75316420] }
 0x265   : > { %1241 = vst [vmem:[#allocation1] ss:$2 sm:$0xff] %v4235_v16  ;;  %1234 = vrot.lane.b32.xlu2 %v1231_v45, %s3851_s27 }
 0x267   : > { %v1060_v46 = vpop.permute.xlu0 %1059  ;;  %v1062_v47 = vpop.permute.xlu1 %1061 }
 0x268   : > { %1174 = vrot.lane.b32.xlu1 %v1171_v17, %s3846_s21  ;;  %v1063_v48 = vsel %vm255_vm3, %v1060_v46, %v1062_v47  ;;  %v1086_v54 = vpop.permute.xlu2 %1085 }
 0x269   : > { %1065 = vst [vmem:[#allocation4 + $0x28] sm:$0xf] %v1063_v48 }
 0x26b   : > { %1208 = vrot.lane.b32.xlu0 %v1206_v34, %s3849_s26 }
 0x26c   : > { %v1242_v50 = vld.sshfl [vmem:[#allocation1] sm:$0xff pattern:$0x75316420]  ;;  %v1243_v51 = vld.sshfl [vmem:[#allocation1 + $0x8] sm:$0xff pattern:$0x75316420] }
 0x26d   : > { %1304 = vst [vmem:[#allocation1] ss:$2 sm:$0xff] %v4118_v41 }
 0x26f   : > { %v1074_v52 = vpop.permute.xlu0 %1073 }
 0x270   : > { %v1075_v53 = vsel %vm268_vm1, %v1072_v49, %v1074_v52  ;;  %1196 = vrot.lane.b32.xlu1 %v1194_v24, %s3848_s23  ;;  %v1108_v9 = vpop.permute.xlu2 %1107 }
 0x271   : > { %1077 = vst [vmem:[#allocation4 + $0x2c] sm:$0xf] %v1075_v53 }
 0x273   : > { %1222 = vrot.lane.b32.xlu0 %v1219_v40, %s3850_s28 }
 0x274   : > { %v1305_v55 = vld.sshfl [vmem:[#allocation1] sm:$0xff pattern:$0x75316420]  ;;  %v1306_v56 = vld.sshfl [vmem:[#allocation1 + $0x8] sm:$0xff pattern:$0x75316420] }
 0x275   : > { %1316 = vst [vmem:[#allocation1] ss:$2 sm:$0xff] %v4118_v41 }
 0x277   : > { %v1084_v57 = vpop.permute.xlu1 %1083 }
 0x278   : > { %v1087_v58 = vsel %vm281_vm2, %v1084_v57, %v1086_v54  ;;  %1210 = vrot.lane.b32.xlu1 %v1207_v35, %s3849_s26  ;;  %v1122_v14 = vpop.permute.xlu2 %1121 }
 0x279   : > { %1089 = vst [vmem:[#allocation4 + $0x30] sm:$0xf] %v1087_v58 }
 0x27b   : > { %1244 = vrot.lane.b32.xlu0 %v1242_v50, %s3852_s29 }
 0x27c   : > { %v1317_v59 = vld.sshfl [vmem:[#allocation1] sm:$0xff pattern:$0x75316420]  ;;  %v1318_v60 = vld.sshfl [vmem:[#allocation1 + $0x8] sm:$0xff pattern:$0x75316420] }
 0x27d   : > { %1328 = vst [vmem:[#allocation1] ss:$2 sm:$0xff] %v4118_v41 }
 0x280   : > { %1232 = vrot.lane.b32.xlu1 %v1230_v44, %s3851_s27 }
 0x284   : > { %v1329_v61 = vld.sshfl [vmem:[#allocation1] sm:$0xff pattern:$0x75316420]  ;;  %v1330_v62 = vld.sshfl [vmem:[#allocation1 + $0x8] sm:$0xff pattern:$0x75316420] }
 0x285   : > { %1340 = vst [vmem:[#allocation1] ss:$2 sm:$0xff] %v4118_v41  ;;  %1333 = vrot.lane.b32.xlu2 %v1330_v62, %s3847_s19  ;;  %v4362_v62 = vld [vmem:[#allocation2 + $0x28] sm:$0xff] }
 0x287   : > { %v1144_v25 = vpop.permute.xlu2 %1143 }
 0x288   : > { %1246 = vrot.lane.b32.xlu1 %v1243_v51, %s3852_s29 }
 0x28c   : > { %v1341_v0 = vld.sshfl [vmem:[#allocation1] sm:$0xff pattern:$0x75316420]  ;;  %v1342_v1 = vld.sshfl [vmem:[#allocation1 + $0x8] sm:$0xff pattern:$0x75316420] }
 0x28d   : > { %1352 = vst [vmem:[#allocation1] ss:$2 sm:$0xff] %v4118_v41  ;;  %1343 = vrot.lane.b32.xlu0 %v1341_v0, %s3848_s23 }
 0x28f   : > { %v1163_v34 = vpop.permute.xlu2 %1162 }
 0x290   : > { %1307 = vrot.lane.b32.xlu1 %v1305_v55, %s3845_s18 }
 0x294   : > { %v1353_v2 = vld.sshfl [vmem:[#allocation1] sm:$0xff pattern:$0x75316420]  ;;  %v1354_v3 = vld.sshfl [vmem:[#allocation1 + $0x8] sm:$0xff pattern:$0x75316420] }
 0x295   : > { %1364 = vst [vmem:[#allocation1] ss:$2 sm:$0xff] %v4118_v41 }
 0x298   : > { %1309 = vrot.lane.b32.xlu1 %v1306_v56, %s3845_s18 }
 0x29a   : > { %v4304_v6 = vpop.xlane.xlu0 %600 }
 0x29c   : > { %v1365_v4 = vld.sshfl [vmem:[#allocation1] sm:$0xff pattern:$0x75316420]  ;;  %v1366_v5 = vld.sshfl [vmem:[#allocation1 + $0x8] sm:$0xff pattern:$0x75316420] }
 0x29d   : > { %1376 = vst [vmem:[#allocation1] ss:$2 sm:$0xff] %v4118_v41  ;;  %1369 = vrot.lane.b32.xlu0 %v1366_v5, %s3850_s28  ;;  %1367 = vrot.lane.b32.xlu2 %v1365_v4, %s3850_s28  ;;  %v4368_v4 = vld [vmem:[#allocation4] sm:$0xff] }
 0x2a0   : > { %1319 = vrot.lane.b32.xlu1 %v1317_v59, %s3846_s21 }
 0x2a2   : > { %v4312_v13 = vpop.xlane.xlu1 %604 }
 0x2a4   : > { %v1377_v7 = vld.sshfl [vmem:[#allocation1] sm:$0xff pattern:$0x75316420]  ;;  %v1378_v8 = vld.sshfl [vmem:[#allocation1 + $0x8] sm:$0xff pattern:$0x75316420] }
 0x2a5   : > { %1388 = vst [vmem:[#allocation1] ss:$2 sm:$0xff] %v4118_v41  ;;  %1381 = vrot.lane.b32.xlu2 %v1378_v8, %s3851_s27 }
 0x2a8   : > { %1321 = vrot.lane.b32.xlu1 %v1318_v60, %s3846_s21 }
 0x2ac   : > { %v1389_v11 = vld.sshfl [vmem:[#allocation1] sm:$0xff pattern:$0x75316420]  ;;  %v1390_v12 = vld.sshfl [vmem:[#allocation1 + $0x8] sm:$0xff pattern:$0x75316420] }
 0x2ad   : > { %v1096_v10 = vpop.permute.xlu0 %1095  ;;  %1391 = vrot.lane.b32.xlu0 %v1389_v11, %s3852_s29  ;;  %1402 = vst [vmem:[#allocation1] ss:$2 sm:$0xff] %v4235_v16 }
 0x2b0   : > { %1331 = vrot.lane.b32.xlu1 %v1329_v61, %s3847_s19 }
 0x2b4   : > { %v1403_v41 = vld.sshfl [vmem:[#allocation1] sm:$0xff pattern:$0x75316420]  ;;  %v1404_v17 = vld.sshfl [vmem:[#allocation1 + $0x8] sm:$0xff pattern:$0x75316420] }
 0x2b5   : > { %v1110_v33 = vpop.permute.xlu0 %1109  ;;  %1414 = vst [vmem:[#allocation1] ss:$2 sm:$0xff] %v4235_v16  ;;  %1407 = vrot.lane.b32.xlu0 %v1404_v17, %s3845_s18  ;;  %1405 = vrot.lane.b32.xlu2 %v1403_v41, %s3845_s18 }
 0x2b6   : > { %v1111_v18 = vsel %vm307_vm6, %v1108_v9, %v1110_v33 }
 0x2b7   : > { %1113 = vst [vmem:[#allocation4 + $0x38] sm:$0xf] %v1111_v18 }
 0x2b8   : > { %1345 = vrot.lane.b32.xlu1 %v1342_v1, %s3848_s23  ;;  %v3408_v1 = vld [vmem:[#allocation2 + $0x18] sm:$0xf] }
 0x2b9   : > { %1301 = vst [vmem:[#allocation4] sm:$0xf] %v3408_v1 }
 0x2ba   : > { %v1098_v19 = vpop.permute.xlu1 %1097 }
 0x2bb   : > { %v1099_v20 = vsel %vm294_vm4, %v1096_v10, %v1098_v19 }
 0x2bc   : > { %1101 = vst [vmem:[#allocation4 + $0x34] sm:$0xf] %v1099_v20  ;;  %v1415_v21 = vld.sshfl [vmem:[#allocation1] sm:$0xff pattern:$0x75316420] }
 0x2bd   : > { %v1416_v22 = vld.sshfl [vmem:[#allocation1 + $0x8] sm:$0xff pattern:$0x75316420]  ;;  %v1132_v23 = vpop.permute.xlu0 %1131 }
 0x2be   : > { %1426 = vst [vmem:[#allocation1] ss:$2 sm:$0xff] %v4235_v16  ;;  %1419 = vrot.lane.b32.xlu2 %v1416_v22, %s3846_s21 }
 0x2c0   : > { %1355 = vrot.lane.b32.xlu1 %v1353_v2, %s3849_s26 }
 0x2c1   : > { %v939_v24 = vpop.f32.mrf.mxu1 }
 0x2c2   : > { %v1120_v26 = vpop.permute.xlu1 %1119  ;;  %v4329_v32 = vmul.f32 %v4202_v28, %v939_v24  ;;  %v1185_v28 = vpop.permute.xlu2 %1184 }
 0x2c3   : > { %v1123_v27 = vsel %vm320_vm5, %v1120_v26, %v1122_v14 }
 0x2c4   : > { %1125 = vst [vmem:[#allocation4 + $0x3c] sm:$0xf] %v1123_v27  ;;  %v949_v0 = vmul.f32 %v4329_v32, %v4329_v32 }
 0x2c5   : > { %v1427_v63 = vld.sshfl [vmem:[#allocation1] sm:$0xff pattern:$0x75316420]  ;;  %v4324_v29 = vld.sshfl [vmem:[#allocation1 + $0x8] sm:$0xff pattern:$0x75316420]  ;;  %v1146_v30 = vpop.permute.xlu0 %1145 }
 0x2c6   : > { %1429 = vrot.lane.b32.xlu0 %v1427_v63, %s3847_s19  ;;  %v1147_v31 = vsel %vm346_vm8, %v1144_v25, %v1146_v30  ;;  %1438 = vst [vmem:[#allocation1] ss:$2 sm:$0xff] %v4235_v16 }
 0x2c7   : > { %1149 = vst [vmem:[#allocation4 + $0x44] sm:$0xf] %v1147_v31 }
 0x2c8   : > { %1357 = vrot.lane.b32.xlu1 %v1354_v3, %s3849_s26  ;;  %3377 = vst [vmem:[%s3974_s10 + $0x8] sm:$0xff] %v4329_v32 }
 0x2ca   : > { %v1134_v35 = vpop.permute.xlu1 %1133  ;;  %v1199_v49 = vpop.permute.xlu2 %1198 }
 0x2cb   : > { %v1135_v36 = vsel %vm333_vm7, %v1132_v23, %v1134_v35  ;;  %v1258_v35 = vld [vmem:[#allocation4 + $0x38] sm:$0xff] }
 0x2cc   : > { %1137 = vst [vmem:[#allocation4 + $0x40] sm:$0xf] %v1135_v36  ;;  %v1257_v36 = vld [vmem:[#allocation4 + $0x30] sm:$0xff] }
 0x2cd   : > { %v1173_v37 = vpop.permute.xlu0 %1172  ;;  %v1439_v38 = vld.sshfl [vmem:[#allocation1] sm:$0xff pattern:$0x75316420]  ;;  %v4336_v39 = vld.sshfl [vmem:[#allocation1 + $0x8] sm:$0xff pattern:$0x75316420] }
 0x2ce   : > { %1450 = vst [vmem:[#allocation1] ss:$2 sm:$0xff] %v4235_v16  ;;  %1441 = vrot.lane.b32.xlu2 %v1439_v38, %s3848_s23 }
 0x2d0   : > { %1379 = vrot.lane.b32.xlu1 %v1377_v7, %s3851_s27 }
 0x2d2   : > { %v1161_v40 = vpop.permute.xlu1 %1160  ;;  %v1221_v55 = vpop.permute.xlu2 %1220 }
 0x2d3   : > { %v1164_v42 = vsel %vm255_vm3, %v1161_v40, %v1163_v34  ;;  %v1259_v63 = vld [vmem:[#allocation4 + $0x40] sm:$0xff] }
 0x2d4   : > { %1166 = vst [vmem:[#allocation4 + $0x4c] sm:$0xf] %v1164_v42  ;;  %v1255_v40 = vld [vmem:[#allocation4 + $0x20] sm:$0xff] }
 0x2d5   : > { %v1187_v43 = vpop.permute.xlu0 %1186  ;;  %v4342_v44 = vld.sshfl [vmem:[#allocation1] sm:$0xff pattern:$0x75316420]  ;;  %v1452_v45 = vld.sshfl [vmem:[#allocation1 + $0x8] sm:$0xff pattern:$0x75316420] }
 0x2d6   : > { %v1188_v46 = vsel %vm281_vm2, %v1185_v28, %v1187_v43  ;;  %1462 = vst [vmem:[#allocation1] ss:$2 sm:$0xff] %v4235_v16  ;;  %1455 = vrot.lane.b32.xlu2 %v1452_v45, %s3849_s26  ;;  %v1256_v28 = vld [vmem:[#allocation4 + $0x28] sm:$0xff]  ;;  %v1253_v45 = vld [vmem:[#allocation4 + $0x10] sm:$0xff] }
 0x2d7   : > { %1190 = vst [vmem:[#allocation4 + $0x54] sm:$0xf] %v1188_v46 }
 0x2d8   : > { %1393 = vrot.lane.b32.xlu1 %v1390_v12, %s3852_s29 }
 0x2da   : > { %v1175_v47 = vpop.permute.xlu1 %1174  ;;  %v1235_v5 = vpop.permute.xlu2 %1234 }
 0x2db   : > { %v1176_v48 = vsel %vm268_vm1, %v1173_v37, %v1175_v47  ;;  %v1260_v24 = vld [vmem:[#allocation4 + $0x48] sm:$0xff]  ;;  %v1254_v37 = vld [vmem:[#allocation4 + $0x18] sm:$0xff] }
 0x2dc   : > { %1178 = vst [vmem:[#allocation4 + $0x50] sm:$0xf] %v1176_v48  ;;  %v1252_v47 = vld [vmem:[#allocation4 + $0x8] sm:$0xff] }
 0x2dd   : > { %v1209_v50 = vpop.permute.xlu0 %1208  ;;  %v4349_v51 = vld.sshfl [vmem:[#allocation1] sm:$0xff pattern:$0x75316420]  ;;  %v4351_v52 = vld.sshfl [vmem:[#allocation1 + $0x8] sm:$0xff pattern:$0x75316420] }
 0x2de   : > { %1474 = vst [vmem:[#allocation1] ss:$2 sm:$0xff] %v4235_v16 }
 0x2e0   : > { %1417 = vrot.lane.b32.xlu1 %v1415_v21, %s3846_s21 }
 0x2e2   : > { %v1197_v53 = vpop.permute.xlu1 %1196  ;;  %v1334_v21 = vpop.permute.xlu2 %1333 }
 0x2e3   : > { %v1200_v54 = vsel %vm294_vm4, %v1197_v53, %v1199_v49  ;;  %v1261_v25 = vld [vmem:[#allocation4 + $0x50] sm:$0xff]  ;;  %v4412_v53 = vld [vmem:[#allocation7] sm:$0xff] }
 0x2e4   : > { %1202 = vst [vmem:[#allocation4 + $0x58] sm:$0xf] %v1200_v54 }
 0x2e5   : > { %v1223_v56 = vpop.permute.xlu0 %1222  ;;  %v1475_v57 = vld.sshfl [vmem:[#allocation1] sm:$0xff pattern:$0x75316420]  ;;  %v4356_v58 = vld.sshfl [vmem:[#allocation1 + $0x8] sm:$0xff pattern:$0x75316420] }
 0x2e6   : > { %v1224_v59 = vsel %vm320_vm5, %v1221_v55, %v1223_v56  ;;  %1486 = vst [vmem:[#allocation1] ss:$2 sm:$0xff] %v4235_v16  ;;  %1477 = vrot.lane.b32.xlu2 %v1475_v57, %s3851_s27 }
 0x2e7   : > { %1226 = vst [vmem:[#allocation4 + $0x60] sm:$0xf] %v1224_v59 }
 0x2ea   : > { %v1211_v60 = vpop.permute.xlu1 %1210 }
 0x2eb   : > { %v1212_v61 = vsel %vm307_vm6, %v1209_v50, %v1211_v60 }
 0x2ec   : > { %1214 = vst [vmem:[#allocation4 + $0x5c] sm:$0xf] %v1212_v61 }
 0x2ed   : > { %v4366_v2 = vld.sshfl [vmem:[#allocation1] sm:$0xff pattern:$0x75316420]  ;;  %v1488_v3 = vld.sshfl [vmem:[#allocation1 + $0x8] sm:$0xff pattern:$0x75316420]  ;;  %v1245_v11 = vpop.permute.xlu0 %1244 }
 0x2ee   : > { %1503 = vst [vmem:[#allocation1] ss:$2 sm:$0xff] %v4362_v62  ;;  %1491 = vrot.lane.b32.xlu2 %v1488_v3, %s3852_s29 }
 0x2f0   : > { %950 = vadd.xlane.f32.xlu0 %v949_v0 }
 0x2f2   : > { %v1233_v7 = vpop.permute.xlu1 %1232 }
 0x2f3   : > { %v1236_v8 = vsel %vm333_vm7, %v1233_v7, %v1235_v5  ;;  %v1262_v23 = vld [vmem:[#allocation4 + $0x58] sm:$0xff] }
 0x2f4   : > { %1238 = vst [vmem:[#allocation4 + $0x64] sm:$0xf] %v1236_v8 }
 0x2f5   : > { %v4373_v9 = vld.sshfl [vmem:[#allocation1] sm:$0xff pattern:$0x75316420]  ;;  %v4375_v10 = vld.sshfl [vmem:[#allocation1 + $0x8] sm:$0xff pattern:$0x75316420] }
 0x2f6   : > { %1515 = vst [vmem:[#allocation1] ss:$2 sm:$0xff] %v4362_v62 }
 0x2f7   : > { %v1368_v34 = vpop.permute.xlu2 %1367 }
 0x2fa   : > { %v1247_v12 = vpop.permute.xlu1 %1246 }
 0x2fb   : > { %v1248_v14 = vsel %vm346_vm8, %v1245_v11, %v1247_v12  ;;  %v1263_v18 = vld [vmem:[#allocation4 + $0x60] sm:$0xff] }
 0x2fc   : > { %1250 = vst [vmem:[#allocation4 + $0x68] sm:$0xf] %v1248_v14 }
 0x2fd   : > { %v1516_v15 = vld.sshfl [vmem:[#allocation1] sm:$0xff pattern:$0x75316420]  ;;  %v4379_v33 = vld.sshfl [vmem:[#allocation1 + $0x8] sm:$0xff pattern:$0x75316420] }
 0x2fe   : > { %1527 = vst [vmem:[#allocation1] ss:$2 sm:$0xff] %v4362_v62  ;;  %1518 = vrot.lane.b32.xlu2 %v1516_v15, %s3846_s21 }
 0x2ff   : > { %v4388_v22 = vpop.permute.xlu0 %1343  ;;  %v1382_v49 = vpop.permute.xlu2 %1381 }
 0x302   : > { %v1308_v41 = vpop.permute.xlu1 %1307 }
 0x303   : > { %v1264_v17 = vld [vmem:[#allocation4 + $0x68] sm:$0xf] }
 0x304   : > { %1443 = vrot.lane.b32.xlu0 %v4336_v39, %s3848_s23  ;;  %3405 = vmatpush.msk.msra.mxu2 %vm569_vm9, %v1264_v17 }
 0x305   : > { %v4386_v19 = vld.sshfl [vmem:[#allocation1] sm:$0xff pattern:$0x75316420]  ;;  %v1529_v20 = vld.sshfl [vmem:[#allocation1 + $0x8] sm:$0xff pattern:$0x75316420] }
 0x306   : > { %1271 = vmatpush.msra.mxu2 %v1263_v18  ;;  %1539 = vst [vmem:[#allocation1] ss:$2 sm:$0xff] %v4362_v62  ;;  %1532 = vrot.lane.b32.xlu2 %v1529_v20, %s3847_s19 }
 0x308   : > { %1272 = vmatpush.msra.mxu2 %v1262_v23 }
 0x30a   : > { %946 = vadd.xlane.f32.xlu1 %v4329_v32  ;;  %1273 = vmatpush.msra.mxu2 %v1261_v25  ;;  %v1310_v26 = vpop.permute.xlu1 %1309 }
 0x30b   : > { %v1311_v27 = vsel %vm255_vm3, %v1308_v41, %v1310_v26 }
 0x30c   : > { %1313 = vst [vmem:[#allocation4 + $0x4] sm:$0xf] %v1311_v27  ;;  %1465 = vrot.lane.b32.xlu0 %v4349_v51, %s3850_s28  ;;  %1274 = vmatpush.msra.mxu2 %v1260_v24 }
 0x30d   : > { %v1540_v30 = vld.sshfl [vmem:[#allocation1] sm:$0xff pattern:$0x75316420]  ;;  %v4396_v31 = vld.sshfl [vmem:[#allocation1 + $0x8] sm:$0xff pattern:$0x75316420] }
 0x30e   : > { %1275 = vmatpush.msra.mxu2 %v1259_v63  ;;  %1551 = vst [vmem:[#allocation1] ss:$2 sm:$0xff] %v4362_v62 }
 0x30f   : > { %v1370_v32 = vpop.permute.xlu0 %1369  ;;  %v1406_v59 = vpop.permute.xlu2 %1405 }
 0x310   : > { %1276 = vmatpush.msra.mxu2 %v1258_v35  ;;  %v1371_v38 = vsel %vm320_vm5, %v1368_v34, %v1370_v32 }
 0x311   : > { %1373 = vst [vmem:[#allocation4 + $0x18] sm:$0xf] %v1371_v38 }
 0x312   : > { %1277 = vmatpush.msra.mxu2 %v1257_v36  ;;  %v1320_v39 = vpop.permute.xlu1 %1319 }
 0x314   : > { %1479 = vrot.lane.b32.xlu0 %v4356_v58, %s3851_s27  ;;  %1278 = vmatpush.msra.mxu2 %v1256_v28 }
 0x315   : > { %v1552_v42 = vld.sshfl [vmem:[#allocation1] sm:$0xff pattern:$0x75316420]  ;;  %v1553_v43 = vld.sshfl [vmem:[#allocation1 + $0x8] sm:$0xff pattern:$0x75316420] }
 0x316   : > { %1279 = vmatpush.msra.mxu2 %v1255_v40  ;;  %1563 = vst [vmem:[#allocation1] ss:$2 sm:$0xff] %v4362_v62  ;;  %1554 = vrot.lane.b32.xlu2 %v1552_v42, %s3849_s26 }
 0x318   : > { %1280 = vmatpush.msra.mxu2 %v1254_v37 }
 0x31a   : > { %1281 = vmatpush.msra.mxu2 %v1253_v45  ;;  %v1322_v46 = vpop.permute.xlu1 %1321 }
 0x31b   : > { %v1323_v48 = vsel %vm268_vm1, %v1320_v39, %v1322_v46 }
 0x31c   : > { %1325 = vst [vmem:[#allocation4 + $0x8] sm:$0xf] %v1323_v48  ;;  %1506 = vrot.lane.b32.xlu0 %v4373_v9, %s3845_s18  ;;  %1282 = vmatpush.msra.mxu2 %v1252_v47 }
 0x31d   : > { %v4407_v50 = vld.sshfl [vmem:[#allocation1] sm:$0xff pattern:$0x75316420]  ;;  %v1565_v51 = vld.sshfl [vmem:[#allocation1 + $0x8] sm:$0xff pattern:$0x75316420] }
 0x31e   : > { %1283 = vmatpush.msra.mxu2 %v4368_v4  ;;  %1575 = vst [vmem:[#allocation1] ss:$2 sm:$0xff] %v4362_v62  ;;  %1568 = vrot.lane.b32.xlu2 %v1565_v51, %s3850_s28 }
 0x31f   : > { %3406 = vmatmul.msk.f32.vlgmr.msra.gmra.mxu2 %vm320_vm5, %v4412_v53  ;;  %v1392_v54 = vpop.permute.xlu0 %1391 }
 0x322   : > { %v1332_v55 = vpop.permute.xlu1 %1331 }
 0x323   : > { %v1335_v56 = vsel %vm281_vm2, %v1332_v55, %v1334_v21  ;;  %1431 = vrot.lane.b32.xlu1 %v4324_v29, %s3847_s19  ;;  %v3417_v29 = vld [vmem:[#allocation2 + $0x20] sm:$0xf] }
 0x324   : > { %1337 = vst [vmem:[#allocation4 + $0xc] sm:$0xf] %v1335_v56  ;;  %1520 = vrot.lane.b32.xlu0 %v4379_v33, %s3846_s21 }
 0x325   : > { %v1576_v57 = vld.sshfl [vmem:[#allocation1] sm:$0xff pattern:$0x75316420]  ;;  %v1577_v58 = vld.sshfl [vmem:[#allocation1 + $0x8] sm:$0xff pattern:$0x75316420] }
 0x326   : > { %1587 = vst [vmem:[#allocation1] ss:$2 sm:$0xff] %v4362_v62 }
 0x327   : > { %v1408_v60 = vpop.permute.xlu0 %1407  ;;  %1399 = vst [vmem:[#allocation4 + $0x24] sm:$0xf] %v3417_v29 }
 0x328   : > { %v1409_v61 = vsel %vm255_vm3, %v1406_v59, %v1408_v60 }
 0x329   : > { %1411 = vst [vmem:[#allocation4 + $0x28] sm:$0xf] %v1409_v61 }
 0x32a   : > { %v1346_v0 = vpop.permute.xlu1 %1345 }
 0x32b   : > { %v1347_v1 = vsel %vm294_vm4, %v4388_v22, %v1346_v0  ;;  %1453 = vrot.lane.b32.xlu1 %v4342_v44, %s3849_s26  ;;  %v3426_v0 = vld [vmem:[#allocation2 + $0x28] sm:$0xf] }
 0x32c   : > { %1349 = vst [vmem:[#allocation4 + $0x10] sm:$0xf] %v1347_v1  ;;  %1542 = vrot.lane.b32.xlu0 %v1540_v30, %s3848_s23 }
 0x32d   : > { %v1588_v3 = vld.sshfl [vmem:[#allocation1] sm:$0xff pattern:$0x75316420]  ;;  %v1589_v4 = vld.sshfl [vmem:[#allocation1 + $0x8] sm:$0xff pattern:$0x75316420] }
 0x32e   : > { %1650 = vst [vmem:[#allocation1] ss:$2 sm:$0xff] %v4235_v16  ;;  %1590 = vrot.lane.b32.xlu2 %v1588_v3, %s3852_s29 }
 0x32f   : > { %1500 = vst [vmem:[#allocation4 + $0x48] sm:$0xf] %v3426_v0  ;;  %v1598_v0 = vld [vmem:[#allocation4 + $0x8] sm:$0xff] }
 0x332   : > { %v1356_v5 = vpop.permute.xlu1 %1355 }
 0x333   : > { %1467 = vrot.lane.b32.xlu1 %v4351_v52, %s3850_s28 }
 0x334   : > { %1556 = vrot.lane.b32.xlu0 %v1553_v43, %s3849_s26 }
 0x335   : > { %v1651_v7 = vld.sshfl [vmem:[#allocation1] sm:$0xff pattern:$0x75316420]  ;;  %v1652_v8 = vld.sshfl [vmem:[#allocation1 + $0x8] sm:$0xff pattern:$0x75316420] }
 0x336   : > { %1662 = vst [vmem:[#allocation1] ss:$2 sm:$0xff] %v4235_v16 }
 0x338   : > { %v1430_v63 = vpop.permute.xlu0 %1429 }
 0x33a   : > { %v1358_v44 = vpop.permute.xlu1 %1357 }
 0x33b   : > { %v1359_v9 = vsel %vm307_vm6, %v1356_v5, %v1358_v44  ;;  %1489 = vrot.lane.b32.xlu1 %v4366_v2, %s3852_s29  ;;  %v4504_v44 = vld [vmem:[#allocation10] ss:$0 sm:$0xff] }
 0x33c   : > { %1361 = vst [vmem:[#allocation4 + $0x14] sm:$0xf] %v1359_v9  ;;  %1578 = vrot.lane.b32.xlu0 %v1576_v57, %s3851_s27 }
 0x33d   : > { %v1663_v11 = vld.sshfl [vmem:[#allocation1] sm:$0xff pattern:$0x75316420]  ;;  %v1664_v12 = vld.sshfl [vmem:[#allocation1 + $0x8] sm:$0xff pattern:$0x75316420] }
 0x33e   : > { %1674 = vst [vmem:[#allocation1] ss:$2 sm:$0xff] %v4235_v16 }
 0x342   : > { %v1380_v52 = vpop.permute.xlu1 %1379 }
 0x343   : > { %v1383_v14 = vsel %vm333_vm7, %v1380_v52, %v1382_v49  ;;  %1508 = vrot.lane.b32.xlu1 %v4375_v10, %s3845_s18  ;;  %v1420_v10 = vpop.permute.xlu2 %1419 }
 0x344   : > { %1385 = vst [vmem:[#allocation4 + $0x1c] sm:$0xf] %v1383_v14  ;;  %1592 = vrot.lane.b32.xlu0 %v1589_v4, %s3852_s29 }
 0x345   : > { %v1675_v15 = vld.sshfl [vmem:[#allocation1] sm:$0xff pattern:$0x75316420]  ;;  %v1676_v33 = vld.sshfl [vmem:[#allocation1 + $0x8] sm:$0xff pattern:$0x75316420] }
 0x346   : > { %1686 = vst [vmem:[#allocation1] ss:$2 sm:$0xff] %v4235_v16 }
 0x34a   : > { %v1394_v2 = vpop.permute.xlu1 %1393 }
 0x34b   : > { %v1395_v41 = vsel %vm346_vm8, %v1392_v54, %v1394_v2  ;;  %1530 = vrot.lane.b32.xlu1 %v4386_v19, %s3847_s19  ;;  %v1442_v26 = vpop.permute.xlu2 %1441 }
 0x34c   : > { %1397 = vst [vmem:[#allocation4 + $0x20] sm:$0xf] %v1395_v41  ;;  %1653 = vrot.lane.b32.xlu0 %v1651_v7, %s3845_s18 }
 0x34d   : > { %v1688_v17 = vld.sshfl [vmem:[#allocation1 + $0x8] sm:$0xff pattern:$0x75316420]  ;;  %v1687_v18 = vld.sshfl [vmem:[#allocation1] sm:$0xff pattern:$0x75316420] }
 0x34e   : > { %1691 = vrot.lane.b32.xlu2 %v1688_v17, %s3848_s23  ;;  %1698 = vst [vmem:[#allocation1] ss:$2 sm:$0xff] %v4235_v16 }
 0x352   : > { %v1418_v20 = vpop.permute.xlu1 %1417 }
 0x353   : > { %v1421_v21 = vsel %vm268_vm1, %v1418_v20, %v1420_v10  ;;  %1544 = vrot.lane.b32.xlu1 %v4396_v31, %s3848_s23  ;;  %v1456_v35 = vpop.permute.xlu2 %1455  ;;  %v4516_v10 = vld [vmem:[#allocation2 + $0x30] sm:$0xff] }
 0x354   : > { %1423 = vst [vmem:[#allocation4 + $0x2c] sm:$0xf] %v1421_v21  ;;  %1655 = vrot.lane.b32.xlu0 %v1652_v8, %s3845_s18 }
 0x355   : > { %v1699_v19 = vld.sshfl [vmem:[#allocation1] sm:$0xff pattern:$0x75316420]  ;;  %v1700_v22 = vld.sshfl [vmem:[#allocation1 + $0x8] sm:$0xff pattern:$0x75316420] }
 0x356   : > { %1710 = vst [vmem:[#allocation1] ss:$2 sm:$0xff] %v4235_v16 }
 0x35b   : > { %1566 = vrot.lane.b32.xlu1 %v4407_v50, %s3850_s28  ;;  %v1478_v38 = vpop.permute.xlu2 %1477 }
 0x35c   : > { %1665 = vrot.lane.b32.xlu0 %v1663_v11, %s3846_s21 }
 0x35d   : > { %v1711_v23 = vld.sshfl [vmem:[#allocation1] sm:$0xff pattern:$0x75316420]  ;;  %v1712_v25 = vld.sshfl [vmem:[#allocation1 + $0x8] sm:$0xff pattern:$0x75316420] }
 0x35e   : > { %1722 = vst [vmem:[#allocation1] ss:$2 sm:$0xff] %v4235_v16 }
 0x363   : > { %1580 = vrot.lane.b32.xlu1 %v1577_v58, %s3851_s27  ;;  %v4465_v34 = vpop.xlane.xlu0 %950  ;;  %v1492_v42 = vpop.permute.xlu2 %1491 }
 0x364   : > { %1667 = vrot.lane.b32.xlu0 %v1664_v12, %s3846_s21 }
 0x365   : > { %v1723_v27 = vld.sshfl [vmem:[#allocation1] sm:$0xff pattern:$0x75316420]  ;;  %v1724_v24 = vld.sshfl [vmem:[#allocation1 + $0x8] sm:$0xff pattern:$0x75316420] }
 0x366   : > { %1725 = vrot.lane.b32.xlu2 %v1723_v27, %s3851_s27  ;;  %1734 = vst [vmem:[#allocation1] ss:$2 sm:$0xff] %v4235_v16 }
 0x36b   : > { %1679 = vrot.lane.b32.xlu1 %v1676_v33, %s3847_s19  ;;  %v1519_v48 = vpop.permute.xlu2 %1518 }
 0x36c   : > { %1677 = vrot.lane.b32.xlu0 %v1675_v15, %s3847_s19 }
 0x36d   : > { %v1736_v30 = vld.sshfl [vmem:[#allocation1 + $0x8] sm:$0xff pattern:$0x75316420]  ;;  %v1735_v31 = vld.sshfl [vmem:[#allocation1] sm:$0xff pattern:$0x75316420] }
 0x36e   : > { %1739 = vrot.lane.b32.xlu2 %v1736_v30, %s3852_s29  ;;  %1748 = vst [vmem:[#allocation1] ss:$2 sm:$0xff] %v4362_v62 }
 0x373   : > { %1713 = vrot.lane.b32.xlu1 %v1711_v23, %s3850_s28  ;;  %v1533_v60 = vpop.permute.xlu2 %1532 }
 0x374   : > { %1689 = vrot.lane.b32.xlu0 %v1687_v18, %s3848_s23 }
 0x375   : > { %v1749_v32 = vld.sshfl [vmem:[#allocation1] sm:$0xff pattern:$0x75316420]  ;;  %v1750_v36 = vld.sshfl [vmem:[#allocation1 + $0x8] sm:$0xff pattern:$0x75316420] }
 0x376   : > { %v1444_v16 = vpop.permute.xlu0 %1443  ;;  %1760 = vst [vmem:[#allocation1] ss:$2 sm:$0xff] %v4362_v62 }
 0x377   : > { %v1445_v37 = vsel %vm294_vm4, %v1442_v26, %v1444_v16 }
 0x378   : > { %1447 = vst [vmem:[#allocation4 + $0x34] sm:$0xf] %v1445_v37 }
 0x37b   : > { %1727 = vrot.lane.b32.xlu1 %v1724_v24, %s3851_s27  ;;  %v1555_v7 = vpop.permute.xlu2 %1554 }
 0x37c   : > { %1701 = vrot.lane.b32.xlu0 %v1699_v19, %s3849_s26  ;;  %v4520_v19 = vld [vmem:[#allocation4] sm:$0xff] }
 0x37d   : > { %v1761_v39 = vld.sshfl [vmem:[#allocation1] sm:$0xff pattern:$0x75316420]  ;;  %v1762_v28 = vld.sshfl [vmem:[#allocation1 + $0x8] sm:$0xff pattern:$0x75316420]  ;;  %v4484_v49 = vpop.xlane.xlu1 %946 }
 0x37e   : > { %1763 = vrot.lane.b32.xlu2 %v1761_v39, %s3846_s21  ;;  %v1466_v40 = vpop.permute.xlu0 %1465  ;;  %1772 = vst [vmem:[#allocation1] ss:$2 sm:$0xff] %v4362_v62 }
 0x383   : > { %1751 = vrot.lane.b32.xlu1 %v1749_v32, %s3845_s18  ;;  %v1569_v2 = vpop.permute.xlu2 %1568 }
 0x384   : > { %1703 = vrot.lane.b32.xlu0 %v1700_v22, %s3849_s26  ;;  %v3438_v22 = vld [vmem:[#allocation2 + $0x20] sm:$0xf] }
 0x385   : > { %v1774_v43 = vld.sshfl [vmem:[#allocation1 + $0x8] sm:$0xff pattern:$0x75316420]  ;;  %v1773_v45 = vld.sshfl [vmem:[#allocation1] sm:$0xff pattern:$0x75316420] }
 0x386   : > { %1777 = vrot.lane.b32.xlu2 %v1774_v43, %s3847_s19  ;;  %v1480_v46 = vpop.permute.xlu0 %1479  ;;  %1784 = vst [vmem:[#allocation1] ss:$2 sm:$0xff] %v4362_v62 }
 0x387   : > { %v1481_v47 = vsel %vm333_vm7, %v1478_v38, %v1480_v46  ;;  %1647 = vst [vmem:[#allocation4] sm:$0xf] %v3438_v22 }
 0x388   : > { %1483 = vst [vmem:[#allocation4 + $0x40] sm:$0xf] %v1481_v47 }
 0x38b   : > { %1765 = vrot.lane.b32.xlu1 %v1762_v28, %s3846_s21  ;;  %v1591_v23 = vpop.permute.xlu2 %1590 }
 0x38c   : > { %1715 = vrot.lane.b32.xlu0 %v1712_v25, %s3850_s28 }
 0x38d   : > { %v1785_v50 = vld.sshfl [vmem:[#allocation1] sm:$0xff pattern:$0x75316420]  ;;  %v4486_v51 = vld.sshfl [vmem:[#allocation1 + $0x8] sm:$0xff pattern:$0x75316420] }
 0x38e   : > { %v1507_v54 = vpop.permute.xlu0 %1506  ;;  %1796 = vst [vmem:[#allocation1] ss:$2 sm:$0xff] %v4362_v62 }
 0x393   : > { %1787 = vrot.lane.b32.xlu1 %v1785_v50, %s3848_s23 }
 0x394   : > { %1737 = vrot.lane.b32.xlu0 %v1735_v31, %s3852_s29 }
 0x395   : > { %v1432_v55 = vpop.permute.xlu1 %1431  ;;  %v4491_v56 = vld.sshfl [vmem:[#allocation1] sm:$0xff pattern:$0x75316420]  ;;  %v1798_v57 = vld.sshfl [vmem:[#allocation1 + $0x8] sm:$0xff pattern:$0x75316420] }
 0x396   : > { %v1521_v58 = vpop.permute.xlu0 %1520  ;;  %v1433_v59 = vsel %vm281_vm2, %v1430_v63, %v1432_v55  ;;  %1808 = vst [vmem:[#allocation1] ss:$2 sm:$0xff] %v4362_v62  ;;  %v1601_v55 = vld [vmem:[#allocation4 + $0x20] sm:$0xff] }
 0x397   : > { %1435 = vst [vmem:[#allocation4 + $0x30] sm:$0xf] %v1433_v59  ;;  %v1522_v61 = vsel %vm268_vm1, %v1519_v48, %v1521_v58 }
 0x398   : > { %1524 = vst [vmem:[#allocation4 + $0x50] sm:$0xf] %v1522_v61 }
 0x39b   : > { %1801 = vrot.lane.b32.xlu1 %v1798_v57, %s3849_s26  ;;  %v3447_v57 = vld [vmem:[#allocation2 + $0x28] sm:$0xf] }
 0x39c   : > { %1753 = vrot.lane.b32.xlu0 %v1750_v36, %s3845_s18  ;;  %1745 = vst [vmem:[#allocation4 + $0x24] sm:$0xf] %v3447_v57 }
 0x39d   : > { %v1454_v1 = vpop.permute.xlu1 %1453  ;;  %v4498_v29 = vld.sshfl [vmem:[#allocation1] sm:$0xff pattern:$0x75316420]  ;;  %v4500_v3 = vld.sshfl [vmem:[#allocation1 + $0x8] sm:$0xff pattern:$0x75316420] }
 0x39e   : > { %v1543_v4 = vpop.permute.xlu0 %1542  ;;  %v1457_v5 = vsel %vm307_vm6, %v1454_v1, %v1456_v35  ;;  %1820 = vst [vmem:[#allocation1] ss:$2 sm:$0xff] %v4362_v62 }
 0x39f   : > { %1459 = vst [vmem:[#allocation4 + $0x38] sm:$0xf] %v1457_v5 }
 0x3a2   : > { %v1285_v8 = vpop.f32.mrf.mxu2 }
 0x3a3   : > { %v1288_v9 = vmul.f32 %v4504_v44, %v1285_v8 }
 0x3a4   : > { %1775 = vrot.lane.b32.xlu0 %v1773_v45, %s3847_s19 }
 0x3a5   : > { %v1468_v11 = vpop.permute.xlu1 %1467  ;;  %3407 = vst [vmem:[%s3974_s10 + $0x10] sm:$0xff] %v1288_v9  ;;  %v1821_v12 = vld.sshfl [vmem:[#allocation1] sm:$0xff pattern:$0x75316420]  ;;  %v1295_v46 = vmul.f32 %v1288_v9, %v1288_v9 }
 0x3a6   : > { %v1557_v52 = vpop.permute.xlu0 %1556  ;;  %v1469_v14 = vsel %vm320_vm5, %v1466_v40, %v1468_v11  ;;  %1823 = vrot.lane.b32.xlu1 %v1821_v12, %s3851_s27  ;;  %v4511_v15 = vld.sshfl [vmem:[#allocation1 + $0x8] sm:$0xff pattern:$0x75316420]  ;;  %v3456_v40 = vld [vmem:[#allocation2 + $0x30] sm:$0xf] }
 0x3a7   : > { %1471 = vst [vmem:[#allocation4 + $0x3c] sm:$0xf] %v1469_v14  ;;  %v1558_v33 = vsel %vm307_vm6, %v1555_v7, %v1557_v52 }
 0x3a8   : > { %1560 = vst [vmem:[#allocation4 + $0x5c] sm:$0xf] %v1558_v33  ;;  %v1692_v52 = vpop.permute.xlu2 %1691 }
 0x3a9   : > { %1832 = vst [vmem:[#allocation1] ss:$2 sm:$0xff] %v4362_v62 }
 0x3ad   : > { %v1490_v41 = vpop.permute.xlu1 %1489 }
 0x3ae   : > { %v1579_v17 = vpop.permute.xlu0 %1578  ;;  %v1493_v18 = vsel %vm346_vm8, %v1490_v41, %v1492_v42 }
 0x3af   : > { %1495 = vst [vmem:[#allocation4 + $0x44] sm:$0xf] %v1493_v18  ;;  %1292 = vadd.xlane.f32.xlu2 %v1288_v9  ;;  %v1599_v18 = vld [vmem:[#allocation4 + $0x10] sm:$0xff] }
 0x3b0   : > { %v1833_v20 = vld.sshfl [vmem:[#allocation1] sm:$0xff pattern:$0x75316420]  ;;  %v1834_v21 = vld.sshfl [vmem:[#allocation1 + $0x8] sm:$0xff pattern:$0x75316420] }
 0x3b1   : > { %1837 = vrot.lane.b32.xlu1 %v1834_v21, %s3852_s29  ;;  %1849 = vst [vmem:[#allocation1] ss:$2 sm:$0xff] %v4516_v10  ;;  %v1604_v21 = vld [vmem:[#allocation4 + $0x38] sm:$0xff] }
 0x3b5   : > { %v1509_v25 = vpop.permute.xlu1 %1508 }
 0x3b6   : > { %v1593_v26 = vpop.permute.xlu0 %1592  ;;  %v1510_v27 = vsel %vm255_vm3, %v1507_v54, %v1509_v25 }
 0x3b7   : > { %1512 = vst [vmem:[#allocation4 + $0x4c] sm:$0xf] %v1510_v27  ;;  %v1594_v24 = vsel %vm346_vm8, %v1591_v23, %v1593_v26  ;;  %v1602_v26 = vld [vmem:[#allocation4 + $0x28] sm:$0xff] }
 0x3b8   : > { %1596 = vst [vmem:[#allocation4 + $0x68] sm:$0xf] %v1594_v24  ;;  %v4524_v63 = vld.sshfl [vmem:[#allocation1] sm:$0xff pattern:$0x75316420] }
 0x3b9   : > { %v1851_v30 = vld.sshfl [vmem:[#allocation1 + $0x8] sm:$0xff pattern:$0x75316420] }
 0x3ba   : > { %1861 = vst [vmem:[#allocation1] ss:$2 sm:$0xff] %v4516_v10 }
 0x3bd   : > { %v1531_v31 = vpop.permute.xlu1 %1530 }
 0x3be   : > { %v1654_v35 = vpop.permute.xlu0 %1653  ;;  %v1534_v32 = vsel %vm281_vm2, %v1531_v31, %v1533_v60  ;;  %v1606_v43 = vld [vmem:[#allocation4 + $0x48] sm:$0xff] }
 0x3bf   : > { %1536 = vst [vmem:[#allocation4 + $0x54] sm:$0xf] %v1534_v32  ;;  %v1610_v36 = vld [vmem:[#allocation4 + $0x68] sm:$0xf] }
 0x3c0   : > { %3435 = vmatpush.msk.msra.mxu3 %vm569_vm9, %v1610_v36  ;;  %1846 = vst [vmem:[#allocation4 + $0x48] sm:$0xf] %v3456_v40  ;;  %v1726_v22 = vpop.permute.xlu2 %1725 }
 0x3c1   : > { %v1862_v16 = vld.sshfl [vmem:[#allocation1] sm:$0xff pattern:$0x75316420]  ;;  %v4529_v37 = vld.sshfl [vmem:[#allocation1 + $0x8] sm:$0xff pattern:$0x75316420] }
 0x3c2   : > { %1864 = vrot.lane.b32.xlu1 %v1862_v16, %s3846_s21  ;;  %1873 = vst [vmem:[#allocation1] ss:$2 sm:$0xff] %v4516_v10 }
 0x3c5   : > { %v1545_v38 = vpop.permute.xlu1 %1544 }
 0x3c6   : > { %v1656_v39 = vpop.permute.xlu0 %1655  ;;  %v1546_v28 = vsel %vm294_vm4, %v1543_v4, %v1545_v38  ;;  %v1607_v12 = vld [vmem:[#allocation4 + $0x50] sm:$0xff] }
 0x3c7   : > { %v1657_v42 = vsel %vm255_vm3, %v1654_v35, %v1656_v39  ;;  %1548 = vst [vmem:[#allocation4 + $0x58] sm:$0xf] %v1546_v28  ;;  %1799 = vrot.lane.b32.xlu2 %v4491_v56, %s3849_s26 }
 0x3c8   : > { %1659 = vst [vmem:[#allocation4 + $0x4] sm:$0xf] %v1657_v42  ;;  %v1740_v32 = vpop.permute.xlu2 %1739 }
 0x3c9   : > { %v1874_v45 = vld.sshfl [vmem:[#allocation1] sm:$0xff pattern:$0x75316420]  ;;  %v1875_v47 = vld.sshfl [vmem:[#allocation1 + $0x8] sm:$0xff pattern:$0x75316420] }
 0x3ca   : > { %1878 = vrot.lane.b32.xlu1 %v1875_v47, %s3847_s19  ;;  %1885 = vst [vmem:[#allocation1] ss:$2 sm:$0xff] %v4516_v10 }
 0x3cd   : > { %v1567_v48 = vpop.permute.xlu1 %1566 }
 0x3ce   : > { %v1666_v50 = vpop.permute.xlu0 %1665  ;;  %1296 = vadd.xlane.f32.xlu0 %v1295_v46  ;;  %v1570_v54 = vsel %vm320_vm5, %v1567_v48, %v1569_v2  ;;  %v1608_v11 = vld [vmem:[#allocation4 + $0x58] sm:$0xff] }
 0x3cf   : > { %1572 = vst [vmem:[#allocation4 + $0x60] sm:$0xf] %v1570_v54  ;;  %1813 = vrot.lane.b32.xlu2 %v4500_v3, %s3850_s28 }
 0x3d1   : > { %v4542_v56 = vld.sshfl [vmem:[#allocation1] sm:$0xff pattern:$0x75316420]  ;;  %v1887_v58 = vld.sshfl [vmem:[#allocation1 + $0x8] sm:$0xff pattern:$0x75316420] }
 0x3d2   : > { %1897 = vst [vmem:[#allocation1] ss:$2 sm:$0xff] %v4516_v10 }
 0x3d5   : > { %v1581_v59 = vpop.permute.xlu1 %1580 }
 0x3d6   : > { %v1668_v60 = vpop.permute.xlu0 %1667  ;;  %v1582_v61 = vsel %vm333_vm7, %v1579_v17, %v1581_v59  ;;  %v1605_v17 = vld [vmem:[#allocation4 + $0x40] sm:$0xff] }
 0x3d7   : > { %v1669_v1 = vsel %vm268_vm1, %v1666_v50, %v1668_v60  ;;  %1584 = vst [vmem:[#allocation4 + $0x64] sm:$0xf] %v1582_v61  ;;  %1835 = vrot.lane.b32.xlu2 %v1833_v20, %s3852_s29 }
 0x3d8   : > { %1671 = vst [vmem:[#allocation4 + $0x8] sm:$0xf] %v1669_v1  ;;  %v1764_v28 = vpop.permute.xlu2 %1763 }
 0x3d9   : > { %v1898_v4 = vld.sshfl [vmem:[#allocation1] sm:$0xff pattern:$0x75316420]  ;;  %v4548_v5 = vld.sshfl [vmem:[#allocation1 + $0x8] sm:$0xff pattern:$0x75316420] }
 0x3da   : > { %1900 = vrot.lane.b32.xlu1 %v1898_v4, %s3849_s26  ;;  %1909 = vst [vmem:[#allocation1] ss:$2 sm:$0xff] %v4516_v10 }
 0x3dd   : > { %v1680_v3 = vpop.permute.xlu1 %1679 }
 0x3de   : > { %v1678_v7 = vpop.permute.xlu0 %1677  ;;  %v1609_v8 = vld [vmem:[#allocation4 + $0x60] sm:$0xff] }
 0x3df   : > { %v1681_v9 = vsel %vm281_vm2, %v1678_v7, %v1680_v3  ;;  %1617 = vmatpush.msra.mxu3 %v1609_v8  ;;  %1854 = vrot.lane.b32.xlu2 %v1851_v30, %s3845_s18  ;;  %v1600_v30 = vld [vmem:[#allocation4 + $0x18] sm:$0xff] }
 0x3e0   : > { %1683 = vst [vmem:[#allocation4 + $0xc] sm:$0xf] %v1681_v9  ;;  %v1778_v57 = vpop.permute.xlu2 %1777 }
 0x3e1   : > { %1618 = vmatpush.msra.mxu3 %v1608_v11  ;;  %v1910_v14 = vld.sshfl [vmem:[#allocation1] sm:$0xff pattern:$0x75316420]  ;;  %v1911_v33 = vld.sshfl [vmem:[#allocation1 + $0x8] sm:$0xff pattern:$0x75316420] }
 0x3e2   : > { %1789 = vrot.lane.b32.xlu0 %v4486_v51, %s3848_s23  ;;  %1914 = vrot.lane.b32.xlu1 %v1911_v33, %s3850_s28  ;;  %1921 = vst [vmem:[#allocation1] ss:$2 sm:$0xff] %v4516_v10  ;;  %v1603_v51 = vld [vmem:[#allocation4 + $0x30] sm:$0xff] }
 0x3e3   : > { %1619 = vmatpush.msra.mxu3 %v1607_v12 }
 0x3e5   : > { %1620 = vmatpush.msra.mxu3 %v1606_v43  ;;  %v1714_v2 = vpop.permute.xlu1 %1713 }
 0x3e6   : > { %v1690_v41 = vpop.permute.xlu0 %1689 }
 0x3e7   : > { %1621 = vmatpush.msra.mxu3 %v1605_v17  ;;  %v1693_v20 = vsel %vm294_vm4, %v1690_v41, %v1692_v52  ;;  %1876 = vrot.lane.b32.xlu2 %v1874_v45, %s3847_s19 }
 0x3e8   : > { %1695 = vst [vmem:[#allocation4 + $0x10] sm:$0xf] %v1693_v20 }
 0x3e9   : > { %1622 = vmatpush.msra.mxu3 %v1604_v21  ;;  %v4562_v23 = vld.sshfl [vmem:[#allocation1] sm:$0xff pattern:$0x75316420]  ;;  %v1923_v25 = vld.sshfl [vmem:[#allocation1 + $0x8] sm:$0xff pattern:$0x75316420] }
 0x3ea   : > { %1811 = vrot.lane.b32.xlu0 %v4498_v29, %s3850_s28  ;;  %1933 = vst [vmem:[#allocation1] ss:$2 sm:$0xff] %v4516_v10 }
 0x3eb   : > { %1623 = vmatpush.msra.mxu3 %v1603_v51 }
 0x3ed   : > { %1624 = vmatpush.msra.mxu3 %v1602_v26  ;;  %v1728_v27 = vpop.permute.xlu1 %1727 }
 0x3ee   : > { %v1702_v24 = vpop.permute.xlu0 %1701  ;;  %v1729_v31 = vsel %vm333_vm7, %v1726_v22, %v1728_v27 }
 0x3ef   : > { %1625 = vmatpush.msra.mxu3 %v1601_v55  ;;  %1731 = vst [vmem:[#allocation4 + $0x1c] sm:$0xf] %v1729_v31  ;;  %1890 = vrot.lane.b32.xlu2 %v1887_v58, %s3848_s23 }
 0x3f1   : > { %1626 = vmatpush.msra.mxu3 %v1600_v30  ;;  %v1934_v29 = vld.sshfl [vmem:[#allocation1] sm:$0xff pattern:$0x75316420]  ;;  %v1935_v35 = vld.sshfl [vmem:[#allocation1 + $0x8] sm:$0xff pattern:$0x75316420] }
 0x3f2   : > { %1825 = vrot.lane.b32.xlu0 %v4511_v15, %s3851_s27  ;;  %1936 = vrot.lane.b32.xlu1 %v1934_v29, %s3852_s29  ;;  %1996 = vst [vmem:[#allocation1] ss:$2 sm:$0xff] %v4362_v62 }
 0x3f3   : > { %1627 = vmatpush.msra.mxu3 %v1599_v18 }
 0x3f5   : > { %1628 = vmatpush.msra.mxu3 %v1598_v0  ;;  %v1752_v36 = vpop.permute.xlu1 %1751 }
 0x3f6   : > { %v1704_v16 = vpop.permute.xlu0 %1703 }
 0x3f7   : > { %v1705_v38 = vsel %vm307_vm6, %v1702_v24, %v1704_v16  ;;  %1629 = vmatpush.msra.mxu3 %v4520_v19  ;;  %1912 = vrot.lane.b32.xlu2 %v1910_v14, %s3850_s28 }
 0x3f8   : > { %1707 = vst [vmem:[#allocation4 + $0x14] sm:$0xf] %v1705_v38  ;;  %3436 = vmatmul.msk.f32.vlgmr.msra.gmra.mxu3 %vm320_vm5, %v4412_v53 }
 0x3f9   : > { %v1997_v15 = vld.sshfl [vmem:[#allocation1] sm:$0xff pattern:$0x75316420]  ;;  %v1998_v39 = vld.sshfl [vmem:[#allocation1 + $0x8] sm:$0xff pattern:$0x75316420] }
 0x3fa   : > { %1852 = vrot.lane.b32.xlu0 %v4524_v63, %s3845_s18  ;;  %2008 = vst [vmem:[#allocation1] ss:$2 sm:$0xff] %v4362_v62 }
 0x3fd   : > { %v1766_v40 = vpop.permute.xlu1 %1765 }
 0x3fe   : > { %v1716_v42 = vpop.permute.xlu0 %1715  ;;  %v1767_v43 = vsel %vm268_vm1, %v1764_v28, %v1766_v40 }
 0x3ff   : > { %v1717_v19 = vsel %vm320_vm5, %v1714_v2, %v1716_v42  ;;  %1769 = vst [vmem:[#allocation4 + $0x2c] sm:$0xf] %v1767_v43  ;;  %1926 = vrot.lane.b32.xlu2 %v1923_v25, %s3851_s27 }
 0x400   : > { %1719 = vst [vmem:[#allocation4 + $0x18] sm:$0xf] %v1717_v19 }
 0x401   : > { %v2009_v53 = vld.sshfl [vmem:[#allocation1] sm:$0xff pattern:$0x75316420]  ;;  %v2010_v63 = vld.sshfl [vmem:[#allocation1 + $0x8] sm:$0xff pattern:$0x75316420] }
 0x402   : > { %1866 = vrot.lane.b32.xlu0 %v4529_v37, %s3846_s21  ;;  %2020 = vst [vmem:[#allocation1] ss:$2 sm:$0xff] %v4362_v62 }
 0x405   : > { %v1788_v8 = vpop.permute.xlu1 %1787 }
 0x406   : > { %v1738_v45 = vpop.permute.xlu0 %1737 }
 0x407   : > { %v1741_v46 = vsel %vm346_vm8, %v1738_v45, %v1740_v32 }
 0x408   : > { %1743 = vst [vmem:[#allocation4 + $0x20] sm:$0xf] %v1741_v46 }
 0x409   : > { %v2021_v47 = vld.sshfl [vmem:[#allocation1] sm:$0xff pattern:$0x75316420]  ;;  %v2022_v48 = vld.sshfl [vmem:[#allocation1 + $0x8] sm:$0xff pattern:$0x75316420] }
 0x40a   : > { %1888 = vrot.lane.b32.xlu0 %v4542_v56, %s3848_s23  ;;  %2025 = vrot.lane.b32.xlu2 %v2022_v48, %s3847_s19  ;;  %2032 = vst [vmem:[#allocation1] ss:$2 sm:$0xff] %v4362_v62 }
 0x40d   : > { %v1802_v12 = vpop.permute.xlu1 %1801 }
 0x40e   : > { %v1754_v50 = vpop.permute.xlu0 %1753 }
 0x40f   : > { %v1755_v37 = vsel %vm255_vm3, %v1752_v36, %v1754_v50  ;;  %v4667_v50 = vld [vmem:[#allocation2 + $0x38] sm:$0xff] }
 0x410   : > { %1757 = vst [vmem:[#allocation4 + $0x28] sm:$0xf] %v1755_v37 }
 0x411   : > { %v2033_v54 = vld.sshfl [vmem:[#allocation1] sm:$0xff pattern:$0x75316420]  ;;  %v2034_v55 = vld.sshfl [vmem:[#allocation1 + $0x8] sm:$0xff pattern:$0x75316420] }
 0x412   : > { %1902 = vrot.lane.b32.xlu0 %v4548_v5, %s3849_s26  ;;  %2044 = vst [vmem:[#allocation1] ss:$2 sm:$0xff] %v4362_v62  ;;  %2037 = vrot.lane.b32.xlu1 %v2034_v55, %s3848_s23 }
 0x416   : > { %v1776_v56 = vpop.permute.xlu0 %1775 }
 0x417   : > { %v1779_v58 = vsel %vm281_vm2, %v1776_v56, %v1778_v57 }
 0x418   : > { %1781 = vst [vmem:[#allocation4 + $0x30] sm:$0xf] %v1779_v58  ;;  %v1824_v41 = vpop.permute.xlu1 %1823 }
 0x419   : > { %v2045_v59 = vld.sshfl [vmem:[#allocation1] sm:$0xff pattern:$0x75316420]  ;;  %v4598_v60 = vld.sshfl [vmem:[#allocation1 + $0x8] sm:$0xff pattern:$0x75316420] }
 0x41a   : > { %1924 = vrot.lane.b32.xlu0 %v4562_v23, %s3851_s27  ;;  %2056 = vst [vmem:[#allocation1] ss:$2 sm:$0xff] %v4362_v62 }
 0x421   : > { %v2057_v61 = vld.sshfl [vmem:[#allocation1] sm:$0xff pattern:$0x75316420]  ;;  %v4602_v0 = vld.sshfl [vmem:[#allocation1 + $0x8] sm:$0xff pattern:$0x75316420] }
 0x422   : > { %1938 = vrot.lane.b32.xlu0 %v1935_v35, %s3852_s29  ;;  %2059 = vrot.lane.b32.xlu2 %v2057_v61, %s3850_s28  ;;  %2068 = vst [vmem:[#allocation1] ss:$2 sm:$0xff] %v4362_v62  ;;  %v4610_v5 = vpop.xlane.xlu2 %1292 }
 0x423   : > { %v1838_v51 = vpop.permute.xlu1 %1837 }
 0x429   : > { %v2069_v1 = vld.sshfl [vmem:[#allocation1] sm:$0xff pattern:$0x75316420]  ;;  %v2070_v4 = vld.sshfl [vmem:[#allocation1 + $0x8] sm:$0xff pattern:$0x75316420] }
 0x42a   : > { %1999 = vrot.lane.b32.xlu0 %v1997_v15, %s3845_s18  ;;  %2080 = vst [vmem:[#allocation1] ss:$2 sm:$0xff] %v4362_v62  ;;  %2073 = vrot.lane.b32.xlu1 %v2070_v4, %s3851_s27  ;;  %v1800_v9 = vpop.permute.xlu2 %1799 }
 0x42b   : > { %2071 = vrot.lane.b32.xlu2 %v2069_v1, %s3851_s27  ;;  %v1803_v52 = vsel %vm307_vm6, %v1800_v9, %v1802_v12 }
 0x42c   : > { %1805 = vst [vmem:[#allocation4 + $0x38] sm:$0xf] %v1803_v52 }
 0x431   : > { %v4613_v3 = vld.sshfl [vmem:[#allocation1] sm:$0xff pattern:$0x75316420]  ;;  %v2082_v7 = vld.sshfl [vmem:[#allocation1 + $0x8] sm:$0xff pattern:$0x75316420] }
 0x432   : > { %2001 = vrot.lane.b32.xlu0 %v1998_v39, %s3845_s18  ;;  %2094 = vst [vmem:[#allocation1] ss:$2 sm:$0xff] %v4516_v10  ;;  %v1814_v14 = vpop.permute.xlu2 %1813 }
 0x433   : > { %2085 = vrot.lane.b32.xlu2 %v2082_v7, %s3852_s29 }
 0x434   : > { %v1865_v24 = vpop.permute.xlu1 %1864 }
 0x439   : > { %v2095_v62 = vld.sshfl [vmem:[#allocation1] sm:$0xff pattern:$0x75316420]  ;;  %v4618_v11 = vld.sshfl [vmem:[#allocation1 + $0x8] sm:$0xff pattern:$0x75316420] }
 0x43a   : > { %2011 = vrot.lane.b32.xlu0 %v2009_v53, %s3846_s21  ;;  %2097 = vrot.lane.b32.xlu1 %v2095_v62, %s3845_s18  ;;  %2106 = vst [vmem:[#allocation1] ss:$2 sm:$0xff] %v4516_v10  ;;  %v1836_v17 = vpop.permute.xlu2 %1835  ;;  %v3486_v62 = vld [vmem:[#allocation2 + $0x38] sm:$0xf] }
 0x43b   : > { %v1839_v22 = vsel %vm346_vm8, %v1836_v17, %v1838_v51  ;;  %v3477_v17 = vld [vmem:[#allocation2 + $0x30] sm:$0xf]  ;;  %v4707_v51 = vld [vmem:[#allocation4] sm:$0xff] }
 0x43c   : > { %1841 = vst [vmem:[#allocation4 + $0x44] sm:$0xf] %v1839_v22  ;;  %v1879_v16 = vpop.permute.xlu1 %1878 }
 0x441   : > { %v2108_v33 = vld.sshfl [vmem:[#allocation1 + $0x8] sm:$0xff pattern:$0x75316420]  ;;  %v2107_v2 = vld.sshfl [vmem:[#allocation1] sm:$0xff pattern:$0x75316420]  ;;  %v4632_v21 = vpop.xlane.xlu0 %1296 }
 0x442   : > { %2013 = vrot.lane.b32.xlu0 %v2010_v63, %s3846_s21  ;;  %2111 = vrot.lane.b32.xlu1 %v2108_v33, %s3846_s21  ;;  %2118 = vst [vmem:[#allocation1] ss:$2 sm:$0xff] %v4516_v10  ;;  %v1855_v23 = vpop.permute.xlu2 %1854 }
 0x443   : > { %2109 = vrot.lane.b32.xlu2 %v2107_v2, %s3846_s21 }
 0x449   : > { %v2120_v18 = vld.sshfl [vmem:[#allocation1 + $0x8] sm:$0xff pattern:$0x75316420]  ;;  %v4628_v20 = vld.sshfl [vmem:[#allocation1] sm:$0xff pattern:$0x75316420] }
 0x44a   : > { %2023 = vrot.lane.b32.xlu0 %v2021_v47, %s3847_s19  ;;  %2130 = vst [vmem:[#allocation1] ss:$2 sm:$0xff] %v4516_v10  ;;  %v1877_v31 = vpop.permute.xlu2 %1876 }
 0x44b   : > { %2123 = vrot.lane.b32.xlu2 %v2120_v18, %s3847_s19  ;;  %v1880_v38 = vsel %vm281_vm2, %v1877_v31, %v1879_v16  ;;  %v3468_v18 = vld [vmem:[#allocation2 + $0x28] sm:$0xf] }
 0x44c   : > { %1882 = vst [vmem:[#allocation4 + $0x54] sm:$0xf] %v1880_v38  ;;  %v1901_v43 = vpop.permute.xlu1 %1900 }
 0x44d   : > { %1993 = vst [vmem:[#allocation4] sm:$0xf] %v3468_v18 }
 0x451   : > { %v4636_v25 = vld.sshfl [vmem:[#allocation1 + $0x8] sm:$0xff pattern:$0x75316420]  ;;  %v4638_v26 = vld.sshfl [vmem:[#allocation1] sm:$0xff pattern:$0x75316420] }
 0x452   : > { %2035 = vrot.lane.b32.xlu0 %v2033_v54, %s3848_s23  ;;  %2142 = vst [vmem:[#allocation1] ss:$2 sm:$0xff] %v4516_v10  ;;  %v1891_v40 = vpop.permute.xlu2 %1890 }
 0x454   : > { %v1790_v27 = vpop.permute.xlu0 %1789  ;;  %v1915_v47 = vpop.permute.xlu1 %1914 }
 0x455   : > { %v1791_v30 = vsel %vm294_vm4, %v1788_v8, %v1790_v27 }
 0x456   : > { %1793 = vst [vmem:[#allocation4 + $0x34] sm:$0xf] %v1791_v30 }
 0x459   : > { %v4643_v29 = vld.sshfl [vmem:[#allocation1] sm:$0xff pattern:$0x75316420]  ;;  %v4645_v35 = vld.sshfl [vmem:[#allocation1 + $0x8] sm:$0xff pattern:$0x75316420] }
 0x45a   : > { %2047 = vrot.lane.b32.xlu0 %v2045_v59, %s3849_s26  ;;  %2154 = vst [vmem:[#allocation1] ss:$2 sm:$0xff] %v4516_v10  ;;  %v1913_v46 = vpop.permute.xlu2 %1912 }
 0x45b   : > { %v1916_v48 = vsel %vm320_vm5, %v1913_v46, %v1915_v47 }
 0x45c   : > { %v1812_v32 = vpop.permute.xlu0 %1811  ;;  %1918 = vst [vmem:[#allocation4 + $0x60] sm:$0xf] %v1916_v48 }
 0x45d   : > { %v1815_v36 = vsel %vm320_vm5, %v1812_v32, %v1814_v14  ;;  %v1949_v46 = vld [vmem:[#allocation4 + $0x30] sm:$0xff] }
 0x45e   : > { %1817 = vst [vmem:[#allocation4 + $0x3c] sm:$0xf] %v1815_v36 }
 0x461   : > { %v4652_v15 = vld.sshfl [vmem:[#allocation1] sm:$0xff pattern:$0x75316420]  ;;  %v4654_v39 = vld.sshfl [vmem:[#allocation1 + $0x8] sm:$0xff pattern:$0x75316420] }
 0x462   : > { %2049 = vrot.lane.b32.xlu0 %v4598_v60, %s3849_s26  ;;  %2166 = vst [vmem:[#allocation1] ss:$2 sm:$0xff] %v4516_v10  ;;  %v1927_v4 = vpop.permute.xlu2 %1926 }
 0x464   : > { %v1826_v28 = vpop.permute.xlu0 %1825  ;;  %v1937_v14 = vpop.permute.xlu1 %1936 }
 0x465   : > { %v1827_v42 = vsel %vm333_vm7, %v1824_v41, %v1826_v28  ;;  %v1947_v41 = vld [vmem:[#allocation4 + $0x20] sm:$0xff] }
 0x466   : > { %1829 = vst [vmem:[#allocation4 + $0x40] sm:$0xf] %v1827_v42 }
 0x467   : > { %2091 = vst [vmem:[#allocation4 + $0x24] sm:$0xf] %v3477_v17 }
 0x469   : > { %v4660_v19 = vld.sshfl [vmem:[#allocation1 + $0x8] sm:$0xff pattern:$0x75316420]  ;;  %v4662_v53 = vld.sshfl [vmem:[#allocation1] sm:$0xff pattern:$0x75316420] }
 0x46a   : > { %2061 = vrot.lane.b32.xlu0 %v4602_v0, %s3850_s28  ;;  %2178 = vst [vmem:[#allocation1] ss:$2 sm:$0xff] %v4516_v10 }
 0x46c   : > { %v1853_v63 = vpop.permute.xlu0 %1852 }
 0x46d   : > { %v1856_v45 = vsel %vm255_vm3, %v1853_v63, %v1855_v23  ;;  %v1950_v63 = vld [vmem:[#allocation4 + $0x38] sm:$0xff] }
 0x46e   : > { %1858 = vst [vmem:[#allocation4 + $0x4c] sm:$0xf] %v1856_v45 }
 0x471   : > { %v4671_v37 = vld.sshfl [vmem:[#allocation1] sm:$0xff pattern:$0x75316420]  ;;  %v4673_v54 = vld.sshfl [vmem:[#allocation1 + $0x8] sm:$0xff pattern:$0x75316420] }
 0x472   : > { %2083 = vrot.lane.b32.xlu0 %v4613_v3, %s3852_s29  ;;  %2195 = vst [vmem:[#allocation1] ss:$2 sm:$0xff] %v4667_v50 }
 0x474   : > { %v1867_v55 = vpop.permute.xlu0 %1866 }
 0x475   : > { %v1868_v57 = vsel %vm268_vm1, %v1865_v24, %v1867_v55  ;;  %v1952_v9 = vld [vmem:[#allocation4 + $0x48] sm:$0xff] }
 0x476   : > { %1870 = vst [vmem:[#allocation4 + $0x50] sm:$0xf] %v1868_v57 }
 0x477   : > { %2192 = vst [vmem:[#allocation4 + $0x48] sm:$0xf] %v3486_v62 }
 0x479   : > { %v4679_v56 = vld.sshfl [vmem:[#allocation1] sm:$0xff pattern:$0x75316420]  ;;  %v4681_v58 = vld.sshfl [vmem:[#allocation1 + $0x8] sm:$0xff pattern:$0x75316420] }
 0x47a   : > { %2099 = vrot.lane.b32.xlu0 %v4618_v11, %s3845_s18  ;;  %2207 = vst [vmem:[#allocation1] ss:$2 sm:$0xff] %v4667_v50  ;;  %v4695_v11 = vpop.permute.xlu2 %2025 }
 0x47b   : > { %v1631_v59 = vpop.f32.mrf.mxu3 }
 0x47c   : > { %v1889_v60 = vpop.permute.xlu0 %1888  ;;  %v1634_v61 = vmul.f32 %v4504_v44, %v1631_v59 }
 0x47d   : > { %v1892_v0 = vsel %vm294_vm4, %v1889_v60, %v1891_v40  ;;  %v1953_v40 = vld [vmem:[#allocation4 + $0x50] sm:$0xff] }
 0x47e   : > { %3437 = vst [vmem:[%s3974_s10 + $0x18] sm:$0xff] %v1634_v61  ;;  %1638 = vadd.xlane.f32.xlu1 %v1634_v61  ;;  %v1641_v1 = vmul.f32 %v1634_v61, %v1634_v61 }
 0x47f   : > { %1894 = vst [vmem:[#allocation4 + $0x58] sm:$0xf] %v1892_v0 }
 0x480   : > { %1642 = vadd.xlane.f32.xlu2 %v1641_v1  ;;  %v1944_v1 = vld [vmem:[#allocation4 + $0x8] sm:$0xff] }
 0x481   : > { %v4689_v3 = vld.sshfl [vmem:[#allocation1 + $0x8] sm:$0xff pattern:$0x75316420]  ;;  %v4691_v7 = vld.sshfl [vmem:[#allocation1] sm:$0xff pattern:$0x75316420] }
 0x482   : > { %2121 = vrot.lane.b32.xlu0 %v4628_v20, %s3847_s19  ;;  %2219 = vst [vmem:[#allocation1] ss:$2 sm:$0xff] %v4667_v50  ;;  %v4705_v20 = vpop.permute.xlu2 %2059 }
 0x484   : > { %v1903_v8 = vpop.permute.xlu0 %1902  ;;  %v4711_v23 = vpop.permute.xlu1 %2037 }
 0x485   : > { %v1904_v44 = vsel %vm307_vm6, %v1901_v43, %v1903_v8 }
 0x486   : > { %1906 = vst [vmem:[#allocation4 + $0x5c] sm:$0xf] %v1904_v44 }
 0x489   : > { %v4699_v12 = vld.sshfl [vmem:[#allocation1] sm:$0xff pattern:$0x75316420]  ;;  %v4701_v52 = vld.sshfl [vmem:[#allocation1 + $0x8] sm:$0xff pattern:$0x75316420] }
 0x48a   : > { %2135 = vrot.lane.b32.xlu0 %v4636_v25, %s3848_s23  ;;  %2231 = vst [vmem:[#allocation1] ss:$2 sm:$0xff] %v4667_v50  ;;  %v2072_v30 = vpop.permute.xlu2 %2071 }
 0x48c   : > { %v1925_v33 = vpop.permute.xlu0 %1924 }
 0x48d   : > { %v1928_v2 = vsel %vm333_vm7, %v1925_v33, %v1927_v4  ;;  %v1954_v28 = vld [vmem:[#allocation4 + $0x58] sm:$0xff] }
 0x48e   : > { %1930 = vst [vmem:[#allocation4 + $0x64] sm:$0xf] %v1928_v2 }
 0x491   : > { %v2232_v22 = vld.sshfl [vmem:[#allocation1] sm:$0xff pattern:$0x75316420]  ;;  %v4713_v25 = vld.sshfl [vmem:[#allocation1 + $0x8] sm:$0xff pattern:$0x75316420] }
 0x492   : > { %2157 = vrot.lane.b32.xlu0 %v4652_v15, %s3850_s28  ;;  %2243 = vst [vmem:[#allocation1] ss:$2 sm:$0xff] %v4667_v50  ;;  %v1946_v15 = vld [vmem:[#allocation4 + $0x18] sm:$0xff]  ;;  %v4746_v45 = vpop.permute.xlu2 %2085 }
 0x494   : > { %v1939_v27 = vpop.permute.xlu0 %1938 }
 0x495   : > { %v1940_v24 = vsel %vm346_vm8, %v1937_v14, %v1939_v27 }
 0x496   : > { %1942 = vst [vmem:[#allocation4 + $0x68] sm:$0xf] %v1940_v24 }
 0x497   : > { %2133 = vrot.lane.b32.xlu1 %v4638_v26, %s3848_s23 }
 0x498   : > { %2145 = vrot.lane.b32.xlu2 %v4643_v29, %s3849_s26  ;;  %v1955_v29 = vld [vmem:[#allocation4 + $0x60] sm:$0xff] }
 0x499   : > { %v4723_v31 = vld.sshfl [vmem:[#allocation1 + $0x8] sm:$0xff pattern:$0x75316420]  ;;  %v4725_v32 = vld.sshfl [vmem:[#allocation1] sm:$0xff pattern:$0x75316420] }
 0x49a   : > { %2171 = vrot.lane.b32.xlu0 %v4660_v19, %s3851_s27  ;;  %2255 = vst [vmem:[#allocation1] ss:$2 sm:$0xff] %v4667_v50 }
 0x49c   : > { %v2000_v36 = vpop.permute.xlu0 %1999  ;;  %v2074_v38 = vpop.permute.xlu1 %2073 }
 0x49d   : > { %v1956_v16 = vld [vmem:[#allocation4 + $0x68] sm:$0xf]  ;;  %v2075_v26 = vsel %vm333_vm7, %v2072_v30, %v2074_v38 }
 0x49e   : > { %3465 = vmatpush.msk.msrb.mxu0 %vm569_vm9, %v1956_v16  ;;  %2077 = vst [vmem:[#allocation4 + $0x1c] sm:$0xf] %v2075_v26 }
 0x49f   : > { %2147 = vrot.lane.b32.xlu1 %v4645_v35, %s3849_s26 }
 0x4a0   : > { %1963 = vmatpush.msrb.mxu0 %v1955_v29  ;;  %2159 = vrot.lane.b32.xlu2 %v4654_v39, %s3850_s28  ;;  %v1951_v39 = vld [vmem:[#allocation4 + $0x40] sm:$0xff] }
 0x4a1   : > { %v4736_v42 = vld.sshfl [vmem:[#allocation1] sm:$0xff pattern:$0x75316420]  ;;  %v4738_v43 = vld.sshfl [vmem:[#allocation1 + $0x8] sm:$0xff pattern:$0x75316420] }
 0x4a2   : > { %1964 = vmatpush.msrb.mxu0 %v1954_v28  ;;  %2198 = vrot.lane.b32.xlu0 %v4679_v56, %s3845_s18  ;;  %2267 = vst [vmem:[#allocation1] ss:$2 sm:$0xff] %v4667_v50  ;;  %v2110_v56 = vpop.permute.xlu2 %2109 }
 0x4a4   : > { %v2002_v19 = vpop.permute.xlu0 %2001  ;;  %1965 = vmatpush.msrb.mxu0 %v1953_v40 }
 0x4a5   : > { %v2003_v35 = vsel %vm255_vm3, %v2000_v36, %v2002_v19 }
 0x4a6   : > { %1966 = vmatpush.msrb.mxu0 %v1952_v9  ;;  %2005 = vst [vmem:[#allocation4 + $0x4] sm:$0xf] %v2003_v35 }
 0x4a7   : > { %2169 = vrot.lane.b32.xlu1 %v4662_v53, %s3851_s27  ;;  %v1948_v53 = vld [vmem:[#allocation4 + $0x28] sm:$0xff] }
 0x4a8   : > { %1967 = vmatpush.msrb.mxu0 %v1951_v39  ;;  %2181 = vrot.lane.b32.xlu2 %v4671_v37, %s3852_s29  ;;  %v1945_v37 = vld [vmem:[#allocation4 + $0x10] sm:$0xff] }
 0x4a9   : > { %v2268_v47 = vld.sshfl [vmem:[#allocation1] sm:$0xff pattern:$0x75316420]  ;;  %v2269_v48 = vld.sshfl [vmem:[#allocation1 + $0x8] sm:$0xff pattern:$0x75316420] }
 0x4aa   : > { %1968 = vmatpush.msrb.mxu0 %v1950_v63  ;;  %2212 = vrot.lane.b32.xlu0 %v4689_v3, %s3846_s21  ;;  %2279 = vst [vmem:[#allocation1] ss:$2 sm:$0xff] %v4667_v50 }
 0x4ac   : > { %v2012_v55 = vpop.permute.xlu0 %2011  ;;  %1969 = vmatpush.msrb.mxu0 %v1949_v46  ;;  %v4751_v57 = vpop.permute.xlu1 %2097 }
 0x4ae   : > { %1970 = vmatpush.msrb.mxu0 %v1948_v53 }
 0x4af   : > { %2183 = vrot.lane.b32.xlu1 %v4673_v54, %s3852_s29 }
 0x4b0   : > { %1971 = vmatpush.msrb.mxu0 %v1947_v41  ;;  %2200 = vrot.lane.b32.xlu2 %v4681_v58, %s3845_s18  ;;  %v4766_v58 = vld [vmem:[#allocation7] sm:$0xff] }
 0x4b1   : > { %v2281_v59 = vld.sshfl [vmem:[#allocation1 + $0x8] sm:$0xff pattern:$0x75316420]  ;;  %v2280_v60 = vld.sshfl [vmem:[#allocation1] sm:$0xff pattern:$0x75316420] }
 0x4b2   : > { %1972 = vmatpush.msrb.mxu0 %v1946_v15  ;;  %2234 = vrot.lane.b32.xlu0 %v2232_v22, %s3848_s23  ;;  %2342 = vst [vmem:[#allocation1] ss:$2 sm:$0xff] %v4516_v10 }
 0x4b4   : > { %v2014_v61 = vpop.permute.xlu0 %2013  ;;  %1973 = vmatpush.msrb.mxu0 %v1945_v37  ;;  %v2112_v4 = vpop.permute.xlu1 %2111 }
 0x4b5   : > { %v2015_v0 = vsel %vm268_vm1, %v2012_v55, %v2014_v61  ;;  %v2113_v54 = vsel %vm268_vm1, %v2110_v56, %v2112_v4 }
 0x4b6   : > { %1974 = vmatpush.msrb.mxu0 %v1944_v1  ;;  %2017 = vst [vmem:[#allocation4 + $0x8] sm:$0xf] %v2015_v0 }
 0x4b7   : > { %2210 = vrot.lane.b32.xlu1 %v4691_v7, %s3846_s21  ;;  %2115 = vst [vmem:[#allocation4 + $0x2c] sm:$0xf] %v2113_v54 }
 0x4b8   : > { %1975 = vmatpush.msrb.mxu0 %v4707_v51  ;;  %2222 = vrot.lane.b32.xlu2 %v4699_v12, %s3847_s19 }
 0x4b9   : > { %3466 = vmatmul.msk.f32.vlgmr.msrb.gmra.mxu0 %vm320_vm5, %v4766_v58  ;;  %v2343_v3 = vld.sshfl [vmem:[#allocation1] sm:$0xff pattern:$0x75316420]  ;;  %v2344_v8 = vld.sshfl [vmem:[#allocation1 + $0x8] sm:$0xff pattern:$0x75316420] }
 0x4ba   : > { %2248 = vrot.lane.b32.xlu0 %v4723_v31, %s3849_s26  ;;  %2354 = vst [vmem:[#allocation1] ss:$2 sm:$0xff] %v4516_v10 }
 0x4bc   : > { %v2024_v44 = vpop.permute.xlu0 %2023 }
 0x4bd   : > { %v2027_v7 = vsel %vm281_vm2, %v2024_v44, %v4695_v11 }
 0x4be   : > { %2029 = vst [vmem:[#allocation4 + $0xc] sm:$0xf] %v2027_v7 }
 0x4bf   : > { %2224 = vrot.lane.b32.xlu1 %v4701_v52, %s3847_s19 }
 0x4c0   : > { %2236 = vrot.lane.b32.xlu2 %v4713_v25, %s3848_s23 }
 0x4c1   : > { %v2355_v9 = vld.sshfl [vmem:[#allocation1] sm:$0xff pattern:$0x75316420]  ;;  %v2356_v62 = vld.sshfl [vmem:[#allocation1 + $0x8] sm:$0xff pattern:$0x75316420] }
 0x4c2   : > { %2270 = vrot.lane.b32.xlu0 %v2268_v47, %s3851_s27  ;;  %2366 = vst [vmem:[#allocation1] ss:$2 sm:$0xff] %v4516_v10 }
 0x4c4   : > { %v2036_v12 = vpop.permute.xlu0 %2035 }
 0x4c5   : > { %v2039_v14 = vsel %vm294_vm4, %v2036_v12, %v4711_v23 }
 0x4c6   : > { %2041 = vst [vmem:[#allocation4 + $0x10] sm:$0xf] %v2039_v14 }
 0x4c7   : > { %2246 = vrot.lane.b32.xlu1 %v4725_v32, %s3849_s26 }
 0x4c8   : > { %2258 = vrot.lane.b32.xlu2 %v4736_v42, %s3850_s28 }
 0x4c9   : > { %v2367_v11 = vld.sshfl [vmem:[#allocation1] sm:$0xff pattern:$0x75316420]  ;;  %v2368_v52 = vld.sshfl [vmem:[#allocation1 + $0x8] sm:$0xff pattern:$0x75316420] }
 0x4ca   : > { %2284 = vrot.lane.b32.xlu0 %v2281_v59, %s3852_s29  ;;  %2378 = vst [vmem:[#allocation1] ss:$2 sm:$0xff] %v4516_v10 }
 0x4cc   : > { %v2048_v33 = vpop.permute.xlu0 %2047 }
 0x4cf   : > { %2260 = vrot.lane.b32.xlu1 %v4738_v43, %s3850_s28 }
 0x4d0   : > { %2272 = vrot.lane.b32.xlu2 %v2269_v48, %s3851_s27 }
 0x4d1   : > { %v2379_v2 = vld.sshfl [vmem:[#allocation1] sm:$0xff pattern:$0x75316420]  ;;  %v2380_v41 = vld.sshfl [vmem:[#allocation1 + $0x8] sm:$0xff pattern:$0x75316420] }
 0x4d2   : > { %2345 = vrot.lane.b32.xlu0 %v2343_v3, %s3845_s18  ;;  %2390 = vst [vmem:[#allocation1] ss:$2 sm:$0xff] %v4516_v10 }
 0x4d4   : > { %v2050_v17 = vpop.permute.xlu0 %2049 }
 0x4d5   : > { %v2051_v18 = vsel %vm307_vm6, %v2048_v33, %v2050_v17 }
 0x4d6   : > { %2053 = vst [vmem:[#allocation4 + $0x14] sm:$0xf] %v2051_v18 }
 0x4d7   : > { %2282 = vrot.lane.b32.xlu1 %v2280_v60, %s3852_s29 }
 0x4d8   : > { %2347 = vrot.lane.b32.xlu2 %v2344_v8, %s3845_s18 }
 0x4d9   : > { %v2391_v51 = vld.sshfl [vmem:[#allocation1] sm:$0xff pattern:$0x75316420]  ;;  %v2392_v22 = vld.sshfl [vmem:[#allocation1 + $0x8] sm:$0xff pattern:$0x75316420] }
 0x4da   : > { %2359 = vrot.lane.b32.xlu0 %v2356_v62, %s3846_s21  ;;  %2402 = vst [vmem:[#allocation1] ss:$2 sm:$0xff] %v4516_v10 }
 0x4dc   : > { %v2062_v23 = vpop.permute.xlu0 %2061 }
 0x4dd   : > { %v2063_v25 = vsel %vm320_vm5, %v4705_v20, %v2062_v23  ;;  %v2124_v20 = vpop.permute.xlu2 %2123 }
 0x4de   : > { %2065 = vst [vmem:[#allocation4 + $0x18] sm:$0xf] %v2063_v25 }
 0x4df   : > { %2357 = vrot.lane.b32.xlu1 %v2355_v9, %s3846_s21 }
 0x4e0   : > { %2369 = vrot.lane.b32.xlu2 %v2367_v11, %s3847_s19 }
 0x4e1   : > { %v2403_v27 = vld.sshfl [vmem:[#allocation1] sm:$0xff pattern:$0x75316420]  ;;  %v2404_v24 = vld.sshfl [vmem:[#allocation1 + $0x8] sm:$0xff pattern:$0x75316420] }
 0x4e2   : > { %2381 = vrot.lane.b32.xlu0 %v2379_v2, %s3848_s23  ;;  %2414 = vst [vmem:[#allocation1] ss:$2 sm:$0xff] %v4516_v10 }
 0x4e4   : > { %v2084_v30 = vpop.permute.xlu0 %2083 }
 0x4e5   : > { %v2087_v31 = vsel %vm346_vm8, %v2084_v30, %v4746_v45  ;;  %v4862_v30 = vld [vmem:[#allocation2 + $0x40] sm:$0xff] }
 0x4e6   : > { %2089 = vst [vmem:[#allocation4 + $0x20] sm:$0xf] %v2087_v31 }
 0x4e7   : > { %2371 = vrot.lane.b32.xlu1 %v2368_v52, %s3847_s19 }
 0x4e8   : > { %2383 = vrot.lane.b32.xlu2 %v2380_v41, %s3848_s23 }
 0x4e9   : > { %v2415_v32 = vld.sshfl [vmem:[#allocation1] sm:$0xff pattern:$0x75316420]  ;;  %v2416_v36 = vld.sshfl [vmem:[#allocation1 + $0x8] sm:$0xff pattern:$0x75316420] }
 0x4ea   : > { %2395 = vrot.lane.b32.xlu0 %v2392_v22, %s3849_s26  ;;  %2426 = vst [vmem:[#allocation1] ss:$2 sm:$0xff] %v4516_v10 }
 0x4ec   : > { %v2100_v16 = vpop.permute.xlu0 %2099 }
 0x4ed   : > { %v2101_v38 = vsel %vm255_vm3, %v4751_v57, %v2100_v16 }
 0x4ee   : > { %2103 = vst [vmem:[#allocation4 + $0x28] sm:$0xf] %v2101_v38 }
 0x4ef   : > { %2393 = vrot.lane.b32.xlu1 %v2391_v51, %s3849_s26 }
 0x4f0   : > { %2405 = vrot.lane.b32.xlu2 %v2403_v27, %s3850_s28 }
 0x4f1   : > { %v2428_v26 = vld.sshfl [vmem:[#allocation1 + $0x8] sm:$0xff pattern:$0x75316420]  ;;  %v2427_v29 = vld.sshfl [vmem:[#allocation1] sm:$0xff pattern:$0x75316420]  ;;  %v4825_v35 = vpop.xlane.xlu1 %1638 }
 0x4f2   : > { %2417 = vrot.lane.b32.xlu0 %v2415_v32, %s3851_s27  ;;  %2440 = vst [vmem:[#allocation1] ss:$2 sm:$0xff] %v4667_v50 }
 0x4f3   : > { %v4816_v15 = vpop.xlane.xlu2 %1642 }
 0x4f4   : > { %v2122_v28 = vpop.permute.xlu0 %2121 }
 0x4f5   : > { %v2125_v40 = vsel %vm281_vm2, %v2122_v28, %v2124_v20 }
 0x4f6   : > { %2127 = vst [vmem:[#allocation4 + $0x30] sm:$0xf] %v2125_v40 }
 0x4f7   : > { %2407 = vrot.lane.b32.xlu1 %v2404_v24, %s3850_s28 }
 0x4f8   : > { %2419 = vrot.lane.b32.xlu2 %v2416_v36, %s3851_s27 }
 0x4f9   : > { %v2441_v10 = vld.sshfl [vmem:[#allocation1] sm:$0xff pattern:$0x75316420]  ;;  %v2442_v42 = vld.sshfl [vmem:[#allocation1 + $0x8] sm:$0xff pattern:$0x75316420] }
 0x4fa   : > { %2452 = vst [vmem:[#allocation1] ss:$2 sm:$0xff] %v4667_v50 }
 0x4fb   : > { %v2146_v43 = vpop.permute.xlu2 %2145 }
 0x4fc   : > { %v2136_v19 = vpop.permute.xlu0 %2135 }
 0x4ff   : > { %2431 = vrot.lane.b32.xlu1 %v2428_v26, %s3852_s29  ;;  %v4869_v26 = vld [vmem:[#allocation10] ss:$0 sm:$0xff] }
 0x500   : > { %2429 = vrot.lane.b32.xlu2 %v2427_v29, %s3852_s29 }
 0x501   : > { %v2453_v39 = vld.sshfl [vmem:[#allocation1] sm:$0xff pattern:$0x75316420]  ;;  %v2454_v63 = vld.sshfl [vmem:[#allocation1 + $0x8] sm:$0xff pattern:$0x75316420] }
 0x502   : > { %2464 = vst [vmem:[#allocation1] ss:$2 sm:$0xff] %v4667_v50  ;;  %2455 = vrot.lane.b32.xlu0 %v2453_v39, %s3846_s21  ;;  %v3516_v39 = vld [vmem:[#allocation2 + $0x40] sm:$0xf] }
 0x503   : > { %v2160_v45 = vpop.permute.xlu2 %2159 }
 0x504   : > { %v2158_v46 = vpop.permute.xlu0 %2157 }
 0x505   : > { %v2161_v47 = vsel %vm320_vm5, %v2158_v46, %v2160_v45 }
 0x506   : > { %2163 = vst [vmem:[#allocation4 + $0x3c] sm:$0xf] %v2161_v47 }
 0x507   : > { %2445 = vrot.lane.b32.xlu1 %v2442_v42, %s3845_s18 }
 0x508   : > { %2443 = vrot.lane.b32.xlu2 %v2441_v10, %s3845_s18 }
 0x509   : > { %v2134_v48 = vpop.permute.xlu1 %2133  ;;  %v2465_v53 = vld.sshfl [vmem:[#allocation1] sm:$0xff pattern:$0x75316420]  ;;  %v2466_v37 = vld.sshfl [vmem:[#allocation1 + $0x8] sm:$0xff pattern:$0x75316420] }
 0x50a   : > { %v2137_v55 = vsel %vm294_vm4, %v2134_v48, %v2136_v19  ;;  %2476 = vst [vmem:[#allocation1] ss:$2 sm:$0xff] %v4667_v50  ;;  %2469 = vrot.lane.b32.xlu0 %v2466_v37, %s3847_s19 }
 0x50b   : > { %2139 = vst [vmem:[#allocation4 + $0x34] sm:$0xf] %v2137_v55  ;;  %v2182_v57 = vpop.permute.xlu2 %2181 }
 0x50c   : > { %v2172_v56 = vpop.permute.xlu0 %2171 }
 0x50f   : > { %2467 = vrot.lane.b32.xlu1 %v2465_v53, %s3847_s19 }
 0x510   : > { %2457 = vrot.lane.b32.xlu2 %v2454_v63, %s3846_s21 }
 0x511   : > { %v2148_v59 = vpop.permute.xlu1 %2147  ;;  %v4838_v0 = vld.sshfl [vmem:[#allocation1] sm:$0xff pattern:$0x75316420]  ;;  %v4840_v1 = vld.sshfl [vmem:[#allocation1 + $0x8] sm:$0xff pattern:$0x75316420] }
 0x512   : > { %v2149_v60 = vsel %vm307_vm6, %v2146_v43, %v2148_v59  ;;  %2488 = vst [vmem:[#allocation1] ss:$2 sm:$0xff] %v4667_v50  ;;  %v2293_v59 = vld [vmem:[#allocation4 + $0x20] sm:$0xff] }
 0x513   : > { %2151 = vst [vmem:[#allocation4 + $0x38] sm:$0xf] %v2149_v60  ;;  %v2201_v61 = vpop.permute.xlu2 %2200  ;;  %v3507_v60 = vld [vmem:[#allocation2 + $0x38] sm:$0xf] }
 0x514   : > { %v2199_v4 = vpop.permute.xlu0 %2198  ;;  %2437 = vst [vmem:[#allocation4 + $0x24] sm:$0xf] %v3507_v60 }
 0x515   : > { %v2202_v54 = vsel %vm255_vm3, %v2199_v4, %v2201_v61 }
 0x516   : > { %2204 = vst [vmem:[#allocation4 + $0x4c] sm:$0xf] %v2202_v54  ;;  %v4890_v54 = vld [vmem:[#allocation4] sm:$0xff] }
 0x519   : > { %v2170_v3 = vpop.permute.xlu1 %2169  ;;  %v2489_v7 = vld.sshfl [vmem:[#allocation1] sm:$0xff pattern:$0x75316420]  ;;  %v4845_v9 = vld.sshfl [vmem:[#allocation1 + $0x8] sm:$0xff pattern:$0x75316420] }
 0x51a   : > { %v2173_v8 = vsel %vm333_vm7, %v2170_v3, %v2172_v56  ;;  %2491 = vrot.lane.b32.xlu0 %v2489_v7, %s3849_s26  ;;  %2500 = vst [vmem:[#allocation1] ss:$2 sm:$0xff] %v4667_v50 }
 0x51b   : > { %2175 = vst [vmem:[#allocation4 + $0x40] sm:$0xf] %v2173_v8  ;;  %v2223_v44 = vpop.permute.xlu2 %2222 }
 0x51c   : > { %v2213_v62 = vpop.permute.xlu0 %2212 }
 0x51d   : > { %v2298_v19 = vld [vmem:[#allocation4 + $0x48] sm:$0xff] }
 0x51e   : > { %2538 = vst [vmem:[#allocation4 + $0x48] sm:$0xf] %v3516_v39 }
 0x521   : > { %v2184_v12 = vpop.permute.xlu1 %2183  ;;  %v4850_v52 = vld.sshfl [vmem:[#allocation1] sm:$0xff pattern:$0x75316420]  ;;  %v2502_v33 = vld.sshfl [vmem:[#allocation1 + $0x8] sm:$0xff pattern:$0x75316420] }
 0x522   : > { %v2185_v14 = vsel %vm346_vm8, %v2182_v57, %v2184_v12  ;;  %2512 = vst [vmem:[#allocation1] ss:$2 sm:$0xff] %v4667_v50  ;;  %2505 = vrot.lane.b32.xlu0 %v2502_v33, %s3850_s28  ;;  %v3498_v12 = vld [vmem:[#allocation2 + $0x30] sm:$0xf] }
 0x523   : > { %2187 = vst [vmem:[#allocation4 + $0x44] sm:$0xf] %v2185_v14  ;;  %v2237_v11 = vpop.permute.xlu2 %2236 }
 0x524   : > { %v2235_v2 = vpop.permute.xlu0 %2234  ;;  %2339 = vst [vmem:[#allocation4] sm:$0xf] %v3498_v12 }
 0x525   : > { %v2238_v41 = vsel %vm294_vm4, %v2235_v2, %v2237_v11 }
 0x526   : > { %2240 = vst [vmem:[#allocation4 + $0x58] sm:$0xf] %v2238_v41 }
 0x529   : > { %v2211_v17 = vpop.permute.xlu1 %2210  ;;  %v4856_v22 = vld.sshfl [vmem:[#allocation1] sm:$0xff pattern:$0x75316420]  ;;  %v4858_v23 = vld.sshfl [vmem:[#allocation1 + $0x8] sm:$0xff pattern:$0x75316420] }
 0x52a   : > { %v2214_v18 = vsel %vm268_vm1, %v2211_v17, %v2213_v62  ;;  %2524 = vst [vmem:[#allocation1] ss:$2 sm:$0xff] %v4667_v50  ;;  %v2297_v33 = vld [vmem:[#allocation4 + $0x40] sm:$0xff]  ;;  %v2296_v17 = vld [vmem:[#allocation4 + $0x38] sm:$0xff] }
 0x52b   : > { %2216 = vst [vmem:[#allocation4 + $0x50] sm:$0xf] %v2214_v18  ;;  %v2259_v51 = vpop.permute.xlu2 %2258  ;;  %v2290_v18 = vld [vmem:[#allocation4 + $0x8] sm:$0xff] }
 0x52c   : > { %v2249_v25 = vpop.permute.xlu0 %2248 }
 0x531   : > { %v2225_v27 = vpop.permute.xlu1 %2224  ;;  %v2525_v20 = vld.sshfl [vmem:[#allocation1] sm:$0xff pattern:$0x75316420]  ;;  %v4864_v32 = vld.sshfl [vmem:[#allocation1 + $0x8] sm:$0xff pattern:$0x75316420] }
 0x532   : > { %v2226_v24 = vsel %vm281_vm2, %v2223_v44, %v2225_v27  ;;  %2527 = vrot.lane.b32.xlu0 %v2525_v20, %s3852_s29  ;;  %2541 = vst [vmem:[#allocation1] ss:$2 sm:$0xff] %v4862_v30  ;;  %v2291_v27 = vld [vmem:[#allocation4 + $0x10] sm:$0xff] }
 0x533   : > { %2228 = vst [vmem:[#allocation4 + $0x54] sm:$0xf] %v2226_v24  ;;  %v2273_v31 = vpop.permute.xlu2 %2272 }
 0x534   : > { %v2271_v36 = vpop.permute.xlu0 %2270 }
 0x535   : > { %v2274_v16 = vsel %vm333_vm7, %v2271_v36, %v2273_v31  ;;  %v2295_v31 = vld [vmem:[#allocation4 + $0x30] sm:$0xff] }
 0x536   : > { %v1977_v38 = vpop.f32.mrf.mxu0  ;;  %2276 = vst [vmem:[#allocation4 + $0x64] sm:$0xf] %v2274_v16 }
 0x537   : > { %v1980_v29 = vmul.f32 %v4869_v26, %v1977_v38  ;;  %v2292_v38 = vld [vmem:[#allocation4 + $0x18] sm:$0xff] }
 0x539   : > { %3467 = vst [vmem:[%s3974_s10 + $0x20] sm:$0xff] %v1980_v29  ;;  %1984 = vadd.xlane.f32.xlu2 %v1980_v29  ;;  %v2247_v28 = vpop.permute.xlu1 %2246  ;;  %v1987_v40 = vmul.f32 %v1980_v29, %v1980_v29  ;;  %v2542_v42 = vld.sshfl [vmem:[#allocation1] sm:$0xff pattern:$0x75316420] }
 0x53a   : > { %v2250_v10 = vsel %vm307_vm6, %v2247_v28, %v2249_v25  ;;  %v4874_v43 = vld.sshfl [vmem:[#allocation1 + $0x8] sm:$0xff pattern:$0x75316420]  ;;  %2544 = vrot.lane.b32.xlu0 %v2542_v42, %s3845_s18 }
 0x53b   : > { %2252 = vst [vmem:[#allocation4 + $0x5c] sm:$0xf] %v2250_v10  ;;  %1988 = vadd.xlane.f32.xlu1 %v1987_v40  ;;  %v2348_v61 = vpop.permute.xlu2 %2347 }
 0x53c   : > { %2553 = vst [vmem:[#allocation1] ss:$2 sm:$0xff] %v4862_v30  ;;  %v2285_v46 = vpop.permute.xlu0 %2284 }
 0x541   : > { %v2261_v63 = vpop.permute.xlu1 %2260 }
 0x542   : > { %v2262_v45 = vsel %vm320_vm5, %v2259_v51, %v2261_v63  ;;  %v2300_v11 = vld [vmem:[#allocation4 + $0x58] sm:$0xff] }
 0x543   : > { %2264 = vst [vmem:[#allocation4 + $0x60] sm:$0xf] %v2262_v45  ;;  %v4879_v47 = vld.sshfl [vmem:[#allocation1] sm:$0xff pattern:$0x75316420]  ;;  %v2370_v14 = vpop.permute.xlu2 %2369 }
 0x544   : > { %v2555_v48 = vld.sshfl [vmem:[#allocation1 + $0x8] sm:$0xff pattern:$0x75316420]  ;;  %v2346_v57 = vpop.permute.xlu0 %2345 }
 0x545   : > { %2565 = vst [vmem:[#allocation1] ss:$2 sm:$0xff] %v4862_v30  ;;  %2558 = vrot.lane.b32.xlu0 %v2555_v48, %s3846_s21  ;;  %v2349_v4 = vsel %vm255_vm3, %v2346_v57, %v2348_v61 }
 0x546   : > { %2351 = vst [vmem:[#allocation4 + $0x4] sm:$0xf] %v2349_v4 }
 0x549   : > { %v2283_v55 = vpop.permute.xlu1 %2282 }
 0x54a   : > { %v2286_v53 = vsel %vm346_vm8, %v2283_v55, %v2285_v46  ;;  %v2301_v8 = vld [vmem:[#allocation4 + $0x60] sm:$0xff] }
 0x54b   : > { %2288 = vst [vmem:[#allocation4 + $0x68] sm:$0xf] %v2286_v53 }
 0x54c   : > { %v4884_v37 = vld.sshfl [vmem:[#allocation1] sm:$0xff pattern:$0x75316420]  ;;  %v4886_v56 = vld.sshfl [vmem:[#allocation1 + $0x8] sm:$0xff pattern:$0x75316420]  ;;  %v2360_v62 = vpop.permute.xlu0 %2359 }
 0x54d   : > { %2577 = vst [vmem:[#allocation1] ss:$2 sm:$0xff] %v4862_v30 }
 0x551   : > { %2479 = vrot.lane.b32.xlu2 %v4838_v0, %s3848_s23  ;;  %v2299_v0 = vld [vmem:[#allocation4 + $0x50] sm:$0xff]  ;;  %v2358_v41 = vpop.permute.xlu1 %2357 }
 0x552   : > { %v2302_v3 = vld [vmem:[#allocation4 + $0x68] sm:$0xf]  ;;  %v2361_v25 = vsel %vm268_vm1, %v2358_v41, %v2360_v62 }
 0x553   : > { %3495 = vmatpush.msk.msrb.mxu1 %vm569_vm9, %v2302_v3  ;;  %2363 = vst [vmem:[#allocation4 + $0x8] sm:$0xf] %v2361_v25 }
 0x554   : > { %v2578_v44 = vld.sshfl [vmem:[#allocation1] sm:$0xff pattern:$0x75316420]  ;;  %2481 = vrot.lane.b32.xlu1 %v4840_v1, %s3848_s23  ;;  %v2579_v7 = vld.sshfl [vmem:[#allocation1 + $0x8] sm:$0xff pattern:$0x75316420]  ;;  %v2382_v51 = vpop.permute.xlu0 %2381 }
 0x555   : > { %2580 = vrot.lane.b32.xlu0 %v2578_v44, %s3848_s23  ;;  %2309 = vmatpush.msrb.mxu1 %v2301_v8  ;;  %2589 = vst [vmem:[#allocation1] ss:$2 sm:$0xff] %v4862_v30 }
 0x557   : > { %2310 = vmatpush.msrb.mxu1 %v2300_v11 }
 0x559   : > { %2311 = vmatpush.msrb.mxu1 %v2299_v0  ;;  %2493 = vrot.lane.b32.xlu2 %v4845_v9, %s3849_s26  ;;  %v2384_v9 = vpop.permute.xlu2 %2383  ;;  %v2372_v16 = vpop.permute.xlu1 %2371 }
 0x55a   : > { %v2385_v24 = vsel %vm294_vm4, %v2382_v51, %v2384_v9  ;;  %v2373_v29 = vsel %vm281_vm2, %v2370_v14, %v2372_v16  ;;  %v952_v51 = vadd.f32 %v4465_v34, %v4312_v13 }
 0x55b   : > { %2312 = vmatpush.msrb.mxu1 %v2298_v19  ;;  %2387 = vst [vmem:[#allocation4 + $0x10] sm:$0xf] %v2385_v24 }
 0x55c   : > { %v2590_v1 = vld.sshfl [vmem:[#allocation1] sm:$0xff pattern:$0x75316420]  ;;  %v4901_v2 = vld.sshfl [vmem:[#allocation1 + $0x8] sm:$0xff pattern:$0x75316420]  ;;  %2503 = vrot.lane.b32.xlu1 %v4850_v52, %s3850_s28  ;;  %v2396_v40 = vpop.permute.xlu0 %2395 }
 0x55d   : > { %2582 = vrot.lane.b32.xlu0 %v2579_v7, %s3848_s23  ;;  %2313 = vmatpush.msrb.mxu1 %v2297_v33  ;;  %2601 = vst [vmem:[#allocation1] ss:$2 sm:$0xff] %v4862_v30  ;;  %v2294_v52 = vld [vmem:[#allocation4 + $0x28] sm:$0xff] }
 0x55e   : > { %2375 = vst [vmem:[#allocation4 + $0xc] sm:$0xf] %v2373_v29 }
 0x55f   : > { %2314 = vmatpush.msrb.mxu1 %v2296_v17 }
 0x561   : > { %2315 = vmatpush.msrb.mxu1 %v2295_v31  ;;  %2515 = vrot.lane.b32.xlu2 %v4856_v22, %s3851_s27  ;;  %v2394_v10 = vpop.permute.xlu1 %2393 }
 0x563   : > { %2316 = vmatpush.msrb.mxu1 %v2294_v52 }
 0x564   : > { %v2602_v20 = vld.sshfl [vmem:[#allocation1] sm:$0xff pattern:$0x75316420]  ;;  %2517 = vrot.lane.b32.xlu1 %v4858_v23, %s3851_s27  ;;  %v2603_v36 = vld.sshfl [vmem:[#allocation1 + $0x8] sm:$0xff pattern:$0x75316420]  ;;  %v2406_v23 = vpop.permute.xlu2 %2405  ;;  %v2418_v45 = vpop.permute.xlu0 %2417 }
 0x565   : > { %2592 = vrot.lane.b32.xlu0 %v2590_v1, %s3849_s26  ;;  %2317 = vmatpush.msrb.mxu1 %v2293_v59  ;;  %2613 = vst [vmem:[#allocation1] ss:$2 sm:$0xff] %v4862_v30 }
 0x567   : > { %2318 = vmatpush.msrb.mxu1 %v2292_v38 }
 0x569   : > { %2319 = vmatpush.msrb.mxu1 %v2291_v27  ;;  %2529 = vrot.lane.b32.xlu2 %v4864_v32, %s3852_s29  ;;  %v2397_v32 = vsel %vm307_vm6, %v2394_v10, %v2396_v40  ;;  %v2408_v63 = vpop.permute.xlu1 %2407  ;;  %v1298_v27 = vadd.f32 %v4632_v21, %v952_v51 }
 0x56a   : > { %2399 = vst [vmem:[#allocation4 + $0x14] sm:$0xf] %v2397_v32  ;;  %v2409_v46 = vsel %vm320_vm5, %v2406_v23, %v2408_v63 }
 0x56b   : > { %2320 = vmatpush.msrb.mxu1 %v2290_v18  ;;  %2411 = vst [vmem:[#allocation4 + $0x18] sm:$0xf] %v2409_v46  ;;  %v948_v18 = vadd.f32 %v4484_v49, %v4304_v6 }
 0x56c   : > { %v2614_v22 = vld.sshfl [vmem:[#allocation1] sm:$0xff pattern:$0x75316420]  ;;  %v2615_v28 = vld.sshfl [vmem:[#allocation1 + $0x8] sm:$0xff pattern:$0x75316420]  ;;  %2556 = vrot.lane.b32.xlu1 %v4879_v47, %s3846_s21  ;;  %v2420_v39 = vpop.permute.xlu2 %2419 }
 0x56d   : > { %2604 = vrot.lane.b32.xlu0 %v2602_v20, %s3850_s28  ;;  %2321 = vmatpush.msrb.mxu1 %v4890_v54  ;;  %2625 = vst [vmem:[#allocation1] ss:$2 sm:$0xff] %v4862_v30  ;;  %v1294_v25 = vadd.f32 %v4610_v5, %v948_v18 }
 0x56e   : > { %3496 = vmatmul.msk.f32.vlgmr.msrb.gmra.mxu1 %vm320_vm5, %v4766_v58 }
 0x56f   : > { %v1640_v24 = vadd.f32 %v4825_v35, %v1294_v25 }
 0x571   : > { %2546 = vrot.lane.b32.xlu2 %v4874_v43, %s3845_s18  ;;  %v2421_v43 = vsel %vm333_vm7, %v2418_v45, %v2420_v39  ;;  %v2432_v53 = vpop.permute.xlu1 %2431 }
 0x572   : > { %2423 = vst [vmem:[#allocation4 + $0x1c] sm:$0xf] %v2421_v43 }
 0x574   : > { %v2626_v42 = vld.sshfl [vmem:[#allocation1] sm:$0xff pattern:$0x75316420]  ;;  %2570 = vrot.lane.b32.xlu1 %v4886_v56, %s3847_s19  ;;  %v2627_v19 = vld.sshfl [vmem:[#allocation1 + $0x8] sm:$0xff pattern:$0x75316420]  ;;  %v2430_v55 = vpop.permute.xlu2 %2429  ;;  %v2456_v57 = vpop.permute.xlu0 %2455 }
 0x575   : > { %2606 = vrot.lane.b32.xlu0 %v2603_v36, %s3850_s28  ;;  %2688 = vst [vmem:[#allocation1] ss:$2 sm:$0xff] %v4667_v50  ;;  %v2433_v59 = vsel %vm346_vm8, %v2430_v55, %v2432_v53  ;;  %v1644_v36 = vadd.f32 %v4816_v15, %v1298_v27 }
 0x576   : > { %2435 = vst [vmem:[#allocation4 + $0x20] sm:$0xf] %v2433_v59 }
 0x579   : > { %2568 = vrot.lane.b32.xlu2 %v4884_v37, %s3847_s19  ;;  %v2446_v61 = vpop.permute.xlu1 %2445 }
 0x57c   : > { %v4936_v47 = vld.sshfl [vmem:[#allocation1] sm:$0xff pattern:$0x75316420]  ;;  %v4938_v48 = vld.sshfl [vmem:[#allocation1 + $0x8] sm:$0xff pattern:$0x75316420]  ;;  %2618 = vrot.lane.b32.xlu1 %v2615_v28, %s3851_s27  ;;  %v2444_v60 = vpop.permute.xlu2 %2443  ;;  %v2470_v54 = vpop.permute.xlu0 %2469 }
 0x57d   : > { %2628 = vrot.lane.b32.xlu0 %v2626_v42, %s3852_s29  ;;  %2700 = vst [vmem:[#allocation1] ss:$2 sm:$0xff] %v4667_v50  ;;  %v2447_v4 = vsel %vm255_vm3, %v2444_v60, %v2446_v61 }
 0x57e   : > { %2449 = vst [vmem:[#allocation4 + $0x28] sm:$0xf] %v2447_v4 }
 0x581   : > { %2594 = vrot.lane.b32.xlu2 %v4901_v2, %s3849_s26  ;;  %v2468_v62 = vpop.permute.xlu1 %2467 }
 0x582   : > { %v2471_v12 = vsel %vm281_vm2, %v2468_v62, %v2470_v54 }
 0x583   : > { %2473 = vst [vmem:[#allocation4 + $0x30] sm:$0xf] %v2471_v12 }
 0x584   : > { %v4945_v37 = vld.sshfl [vmem:[#allocation1] sm:$0xff pattern:$0x75316420]  ;;  %v4947_v56 = vld.sshfl [vmem:[#allocation1 + $0x8] sm:$0xff pattern:$0x75316420]  ;;  %v2458_v44 = vpop.permute.xlu2 %2457 }
 0x585   : > { %2712 = vst [vmem:[#allocation1] ss:$2 sm:$0xff] %v4667_v50  ;;  %2630 = vrot.lane.b32.xlu0 %v2627_v19, %s3852_s29  ;;  %v2459_v7 = vsel %vm268_vm1, %v2456_v57, %v2458_v44 }
 0x586   : > { %2461 = vst [vmem:[#allocation4 + $0x2c] sm:$0xf] %v2459_v7 }
 0x589   : > { %2616 = vrot.lane.b32.xlu2 %v2614_v22, %s3851_s27 }
 0x58c   : > { %v4954_v3 = vld.sshfl [vmem:[#allocation1] sm:$0xff pattern:$0x75316420]  ;;  %v4956_v8 = vld.sshfl [vmem:[#allocation1 + $0x8] sm:$0xff pattern:$0x75316420]  ;;  %v2492_v0 = vpop.permute.xlu0 %2491 }
 0x58d   : > { %2724 = vst [vmem:[#allocation1] ss:$2 sm:$0xff] %v4667_v50 }
 0x594   : > { %v4961_v14 = vld.sshfl [vmem:[#allocation1] sm:$0xff pattern:$0x75316420]  ;;  %v4963_v11 = vld.sshfl [vmem:[#allocation1 + $0x8] sm:$0xff pattern:$0x75316420]  ;;  %v2506_v2 = vpop.permute.xlu0 %2505 }
 0x595   : > { %2736 = vst [vmem:[#allocation1] ss:$2 sm:$0xff] %v4667_v50 }
 0x59c   : > { %v4966_v33 = vld.sshfl [vmem:[#allocation1] sm:$0xff pattern:$0x75316420]  ;;  %v4968_v1 = vld.sshfl [vmem:[#allocation1 + $0x8] sm:$0xff pattern:$0x75316420] }
 0x59d   : > { %2748 = vst [vmem:[#allocation1] ss:$2 sm:$0xff] %v4667_v50 }
 0x5a4   : > { %v2749_v41 = vld.sshfl [vmem:[#allocation1] sm:$0xff pattern:$0x75316420]  ;;  %v2750_v17 = vld.sshfl [vmem:[#allocation1 + $0x8] sm:$0xff pattern:$0x75316420]  ;;  %v2528_v9 = vpop.permute.xlu0 %2527 }
 0x5a5   : > { %2760 = vst [vmem:[#allocation1] ss:$2 sm:$0xff] %v4667_v50  ;;  %2753 = vrot.lane.b32.xlu1 %v2750_v17, %s3850_s28  ;;  %2751 = vrot.lane.b32.xlu2 %v2749_v41, %s3850_s28 }
 0x5ac   : > { %v2761_v31 = vld.sshfl [vmem:[#allocation1] sm:$0xff pattern:$0x75316420]  ;;  %v1985_v52 = vpop.xlane.xlu2 %1984  ;;  %v2762_v20 = vld.sshfl [vmem:[#allocation1 + $0x8] sm:$0xff pattern:$0x75316420]  ;;  %v2545_v34 = vpop.permute.xlu0 %2544 }
 0x5ad   : > { %2763 = vrot.lane.b32.xlu0 %v2761_v31, %s3851_s27  ;;  %v4983_v16 = vadd.f32 %v1985_v52, %v1640_v24  ;;  %2772 = vst [vmem:[#allocation1] ss:$2 sm:$0xff] %v4667_v50  ;;  %2765 = vrot.lane.b32.xlu2 %v2762_v20, %s3851_s27  ;;  %v3546_v52 = vld [vmem:[#allocation2 + $0x48] sm:$0xf] }
 0x5ae   : > { %v1989_v6 = vpop.xlane.xlu1 %1988 }
 0x5af   : > { %v4987_v13 = vadd.f32 %v1989_v6, %v1644_v36 }
 0x5b4   : > { %v2774_v49 = vld.sshfl [vmem:[#allocation1 + $0x8] sm:$0xff pattern:$0x75316420]  ;;  %v2773_v5 = vld.sshfl [vmem:[#allocation1] sm:$0xff pattern:$0x75316420]  ;;  %v2480_v21 = vpop.permute.xlu2 %2479 }
 0x5b5   : > { %2777 = vrot.lane.b32.xlu0 %v2774_v49, %s3852_s29  ;;  %2786 = vst [vmem:[#allocation1] ss:$2 sm:$0xff] %v4862_v30  ;;  %2775 = vrot.lane.b32.xlu1 %v2773_v5, %s3852_s29 }
 0x5b7   : > { %v2559_v50 = vpop.permute.xlu0 %2558 }
 0x5bc   : > { %v2787_v15 = vld.sshfl [vmem:[#allocation1] sm:$0xff pattern:$0x75316420]  ;;  %v2788_v35 = vld.sshfl [vmem:[#allocation1 + $0x8] sm:$0xff pattern:$0x75316420]  ;;  %v2494_v38 = vpop.permute.xlu2 %2493 }
 0x5bd   : > { %2789 = vrot.lane.b32.xlu0 %v2787_v15, %s3845_s18  ;;  %2798 = vst [vmem:[#allocation1] ss:$2 sm:$0xff] %v4862_v30  ;;  %v2495_v29 = vsel %vm307_vm6, %v2492_v0, %v2494_v38  ;;  %2791 = vrot.lane.b32.xlu2 %v2788_v35, %s3845_s18  ;;  %v2639_v38 = vld [vmem:[#allocation4 + $0x20] sm:$0xff] }
 0x5be   : > { %2497 = vst [vmem:[#allocation4 + $0x38] sm:$0xf] %v2495_v29  ;;  %v5037_v29 = vld [vmem:[#allocation2 + $0x48] sm:$0xff] }
 0x5c4   : > { %v2800_v22 = vld.sshfl [vmem:[#allocation1 + $0x8] sm:$0xff pattern:$0x75316420]  ;;  %v2799_v28 = vld.sshfl [vmem:[#allocation1] sm:$0xff pattern:$0x75316420]  ;;  %v2516_v23 = vpop.permute.xlu2 %2515 }
 0x5c5   : > { %2803 = vrot.lane.b32.xlu0 %v2800_v22, %s3846_s21  ;;  %2801 = vrot.lane.b32.xlu1 %v2799_v28, %s3846_s21  ;;  %2810 = vst [vmem:[#allocation1] ss:$2 sm:$0xff] %v4862_v30 }
 0x5c6   : > { %v2482_v40 = vpop.permute.xlu1 %2481 }
 0x5c7   : > { %v2581_v10 = vpop.permute.xlu0 %2580  ;;  %v2483_v32 = vsel %vm294_vm4, %v2480_v21, %v2482_v40  ;;  %v2635_v40 = vld [vmem:[#allocation4] sm:$0xff] }
 0x5c8   : > { %2485 = vst [vmem:[#allocation4 + $0x34] sm:$0xf] %v2483_v32 }
 0x5cc   : > { %v2812_v42 = vld.sshfl [vmem:[#allocation1 + $0x8] sm:$0xff pattern:$0x75316420]  ;;  %v2530_v19 = vpop.permute.xlu2 %2529  ;;  %v5000_v39 = vld.sshfl [vmem:[#allocation1] sm:$0xff pattern:$0x75316420] }
 0x5cd   : > { %2815 = vrot.lane.b32.xlu1 %v2812_v42, %s3847_s19  ;;  %v2531_v63 = vsel %vm346_vm8, %v2528_v9, %v2530_v19  ;;  %2822 = vst [vmem:[#allocation1] ss:$2 sm:$0xff] %v4862_v30 }
 0x5ce   : > { %2533 = vst [vmem:[#allocation4 + $0x44] sm:$0xf] %v2531_v63  ;;  %v2504_v45 = vpop.permute.xlu1 %2503 }
 0x5cf   : > { %v2583_v43 = vpop.permute.xlu0 %2582  ;;  %v2507_v46 = vsel %vm320_vm5, %v2504_v45, %v2506_v2 }
 0x5d0   : > { %v2584_v55 = vsel %vm294_vm4, %v2581_v10, %v2583_v43  ;;  %2509 = vst [vmem:[#allocation4 + $0x3c] sm:$0xf] %v2507_v46  ;;  %v3528_v10 = vld [vmem:[#allocation2 + $0x38] sm:$0xf] }
 0x5d1   : > { %2586 = vst [vmem:[#allocation4 + $0x58] sm:$0xf] %v2584_v55 }
 0x5d2   : > { %2685 = vst [vmem:[#allocation4] sm:$0xf] %v3528_v10 }
 0x5d4   : > { %v2547_v53 = vpop.permute.xlu2 %2546  ;;  %v2823_v57 = vld.sshfl [vmem:[#allocation1] sm:$0xff pattern:$0x75316420]  ;;  %v5007_v59 = vld.sshfl [vmem:[#allocation1 + $0x8] sm:$0xff pattern:$0x75316420] }
 0x5d5   : > { %v2548_v60 = vsel %vm255_vm3, %v2545_v34, %v2547_v53  ;;  %2825 = vrot.lane.b32.xlu0 %v2823_v57, %s3848_s23  ;;  %2834 = vst [vmem:[#allocation1] ss:$2 sm:$0xff] %v4862_v30 }
 0x5d6   : > { %2550 = vst [vmem:[#allocation4 + $0x4c] sm:$0xf] %v2548_v60  ;;  %v2518_v61 = vpop.permute.xlu1 %2517 }
 0x5d7   : > { %v2593_v4 = vpop.permute.xlu0 %2592  ;;  %v2519_v54 = vsel %vm333_vm7, %v2516_v23, %v2518_v61  ;;  %v2642_v57 = vld [vmem:[#allocation4 + $0x38] sm:$0xff] }
 0x5d8   : > { %2521 = vst [vmem:[#allocation4 + $0x40] sm:$0xf] %v2519_v54 }
 0x5dc   : > { %v2569_v44 = vpop.permute.xlu2 %2568  ;;  %v5013_v7 = vld.sshfl [vmem:[#allocation1] sm:$0xff pattern:$0x75316420]  ;;  %v2836_v62 = vld.sshfl [vmem:[#allocation1 + $0x8] sm:$0xff pattern:$0x75316420] }
 0x5dd   : > { %2846 = vst [vmem:[#allocation1] ss:$2 sm:$0xff] %v4862_v30  ;;  %2839 = vrot.lane.b32.xlu0 %v2836_v62, %s3849_s26  ;;  %v2644_v31 = vld [vmem:[#allocation4 + $0x48] sm:$0xff] }
 0x5de   : > { %v2557_v12 = vpop.permute.xlu1 %2556  ;;  %2884 = vst [vmem:[#allocation4 + $0x48] sm:$0xf] %v3546_v52 }
 0x5df   : > { %v2605_v0 = vpop.permute.xlu0 %2604  ;;  %v2560_v2 = vsel %vm268_vm1, %v2557_v12, %v2559_v50  ;;  %v3537_v50 = vld [vmem:[#allocation2 + $0x40] sm:$0xf] }
 0x5e0   : > { %2562 = vst [vmem:[#allocation4 + $0x50] sm:$0xf] %v2560_v2  ;;  %v2643_v53 = vld [vmem:[#allocation4 + $0x40] sm:$0xff] }
 0x5e1   : > { %2783 = vst [vmem:[#allocation4 + $0x24] sm:$0xf] %v3537_v50 }
 0x5e4   : > { %v2595_v41 = vpop.permute.xlu2 %2594  ;;  %v5018_v17 = vld.sshfl [vmem:[#allocation1] sm:$0xff pattern:$0x75316420]  ;;  %v5020_v18 = vld.sshfl [vmem:[#allocation1 + $0x8] sm:$0xff pattern:$0x75316420] }
 0x5e5   : > { %v2596_v51 = vsel %vm307_vm6, %v2593_v4, %v2595_v41  ;;  %2858 = vst [vmem:[#allocation1] ss:$2 sm:$0xff] %v4862_v30  ;;  %v2641_v4 = vld [vmem:[#allocation4 + $0x30] sm:$0xff] }
 0x5e6   : > { %2598 = vst [vmem:[#allocation4 + $0x5c] sm:$0xf] %v2596_v51  ;;  %v2571_v25 = vpop.permute.xlu1 %2570 }
 0x5e7   : > { %v2607_v9 = vpop.permute.xlu0 %2606  ;;  %v2572_v27 = vsel %vm281_vm2, %v2569_v44, %v2571_v25  ;;  %v2638_v44 = vld [vmem:[#allocation4 + $0x18] sm:$0xff] }
 0x5e8   : > { %v2608_v24 = vsel %vm320_vm5, %v2605_v0, %v2607_v9  ;;  %2574 = vst [vmem:[#allocation4 + $0x54] sm:$0xf] %v2572_v27  ;;  %v2637_v0 = vld [vmem:[#allocation4 + $0x10] sm:$0xff] }
 0x5e9   : > { %2610 = vst [vmem:[#allocation4 + $0x60] sm:$0xf] %v2608_v24 }
 0x5eb   : > { %v2323_v20 = vpop.f32.mrf.mxu1 }
 0x5ec   : > { %v5027_v36 = vmul.f32 %v4869_v26, %v2323_v20  ;;  %v2617_v6 = vpop.permute.xlu2 %2616  ;;  %v2859_v34 = vld.sshfl [vmem:[#allocation1] sm:$0xff pattern:$0x75316420]  ;;  %v5029_v49 = vld.sshfl [vmem:[#allocation1 + $0x8] sm:$0xff pattern:$0x75316420] }
 0x5ed   : > { %2861 = vrot.lane.b32.xlu0 %v2859_v34, %s3851_s27  ;;  %2870 = vst [vmem:[#allocation1] ss:$2 sm:$0xff] %v4862_v30  ;;  %v2646_v45 = vld [vmem:[#allocation4 + $0x58] sm:$0xff] }
 0x5ee   : > { %2330 = vadd.xlane.f32.xlu2 %v5027_v36  ;;  %v2619_v5 = vpop.permute.xlu1 %2618  ;;  %v2333_v35 = vmul.f32 %v5027_v36, %v5027_v36 }
 0x5ef   : > { %v2629_v21 = vpop.permute.xlu0 %2628  ;;  %v2620_v15 = vsel %vm333_vm7, %v2617_v6, %v2619_v5  ;;  %v2645_v43 = vld [vmem:[#allocation4 + $0x50] sm:$0xff] }
 0x5f0   : > { %2622 = vst [vmem:[#allocation4 + $0x64] sm:$0xf] %v2620_v15 }
 0x5f4   : > { %v2872_v22 = vld.sshfl [vmem:[#allocation1 + $0x8] sm:$0xff pattern:$0x75316420]  ;;  %v5040_v28 = vld.sshfl [vmem:[#allocation1] sm:$0xff pattern:$0x75316420] }
 0x5f5   : > { %2875 = vrot.lane.b32.xlu0 %v2872_v22, %s3852_s29  ;;  %2887 = vst [vmem:[#allocation1] ss:$2 sm:$0xff] %v5037_v29 }
 0x5f7   : > { %v2631_v30 = vpop.permute.xlu0 %2630  ;;  %2334 = vadd.xlane.f32.xlu1 %v2333_v35  ;;  %v2647_v63 = vld [vmem:[#allocation4 + $0x60] sm:$0xff] }
 0x5f8   : > { %v2632_v23 = vsel %vm346_vm8, %v2629_v21, %v2631_v30 }
 0x5f9   : > { %2634 = vst [vmem:[#allocation4 + $0x68] sm:$0xf] %v2632_v23 }
 0x5fc   : > { %v2889_v32 = vld.sshfl [vmem:[#allocation1 + $0x8] sm:$0xff pattern:$0x75316420]  ;;  %v5044_v42 = vld.sshfl [vmem:[#allocation1] sm:$0xff pattern:$0x75316420] }
 0x5fd   : > { %2892 = vrot.lane.b32.xlu0 %v2889_v32, %s3845_s18  ;;  %2899 = vst [vmem:[#allocation1] ss:$2 sm:$0xff] %v5037_v29 }
 0x5ff   : > { %v2752_v54 = vpop.permute.xlu2 %2751 }
 0x600   : > { %v2648_v19 = vld [vmem:[#allocation4 + $0x68] sm:$0xf] }
 0x601   : > { %3525 = vmatpush.msk.msrb.mxu2 %vm569_vm9, %v2648_v19 }
 0x603   : > { %2655 = vmatpush.msrb.mxu2 %v2647_v63 }
 0x604   : > { %v2900_v46 = vld.sshfl [vmem:[#allocation1] sm:$0xff pattern:$0x75316420]  ;;  %v2901_v55 = vld.sshfl [vmem:[#allocation1 + $0x8] sm:$0xff pattern:$0x75316420] }
 0x605   : > { %2656 = vmatpush.msrb.mxu2 %v2646_v45  ;;  %2902 = vrot.lane.b32.xlu0 %v2900_v46, %s3846_s21  ;;  %2911 = vst [vmem:[#allocation1] ss:$2 sm:$0xff] %v5037_v29 }
 0x606   : > { %2813 = vrot.lane.b32.xlu2 %v5000_v39, %s3847_s19  ;;  %v2640_v39 = vld [vmem:[#allocation4 + $0x28] sm:$0xff] }
 0x607   : > { %2657 = vmatpush.msrb.mxu2 %v2645_v43  ;;  %v2766_v41 = vpop.permute.xlu2 %2765 }
 0x609   : > { %2658 = vmatpush.msrb.mxu2 %v2644_v31 }
 0x60b   : > { %2659 = vmatpush.msrb.mxu2 %v2643_v53 }
 0x60c   : > { %v2913_v60 = vld.sshfl [vmem:[#allocation1 + $0x8] sm:$0xff pattern:$0x75316420]  ;;  %v2912_v61 = vld.sshfl [vmem:[#allocation1] sm:$0xff pattern:$0x75316420] }
 0x60d   : > { %2660 = vmatpush.msrb.mxu2 %v2642_v57  ;;  %2916 = vrot.lane.b32.xlu0 %v2913_v60, %s3847_s19  ;;  %2923 = vst [vmem:[#allocation1] ss:$2 sm:$0xff] %v5037_v29 }
 0x60e   : > { %2827 = vrot.lane.b32.xlu2 %v5007_v59, %s3848_s23 }
 0x60f   : > { %2661 = vmatpush.msrb.mxu2 %v2641_v4 }
 0x610   : > { %2837 = vrot.lane.b32.xlu1 %v5013_v7, %s3849_s26  ;;  %v2636_v7 = vld [vmem:[#allocation4 + $0x8] sm:$0xff] }
 0x611   : > { %2662 = vmatpush.msrb.mxu2 %v2640_v39 }
 0x613   : > { %2663 = vmatpush.msrb.mxu2 %v2639_v38 }
 0x614   : > { %v2924_v62 = vld.sshfl [vmem:[#allocation1] sm:$0xff pattern:$0x75316420]  ;;  %v2925_v12 = vld.sshfl [vmem:[#allocation1 + $0x8] sm:$0xff pattern:$0x75316420] }
 0x615   : > { %2664 = vmatpush.msrb.mxu2 %v2638_v44  ;;  %2935 = vst [vmem:[#allocation1] ss:$2 sm:$0xff] %v5037_v29 }
 0x616   : > { %2849 = vrot.lane.b32.xlu2 %v5018_v17, %s3850_s28 }
 0x617   : > { %2665 = vmatpush.msrb.mxu2 %v2637_v0  ;;  %v2754_v59 = vpop.permute.xlu1 %2753  ;;  %v2792_v52 = vpop.permute.xlu2 %2791 }
 0x618   : > { %2851 = vrot.lane.b32.xlu1 %v5020_v18, %s3850_s28  ;;  %v2755_v2 = vsel %vm320_vm5, %v2752_v54, %v2754_v59 }
 0x619   : > { %2666 = vmatpush.msrb.mxu2 %v2636_v7  ;;  %2757 = vst [vmem:[#allocation4 + $0x18] sm:$0xf] %v2755_v2 }
 0x61b   : > { %2667 = vmatpush.msrb.mxu2 %v2635_v40 }
 0x61c   : > { %3526 = vmatmul.msk.f32.vlgmr.msrb.gmra.mxu2 %vm320_vm5, %v4766_v58  ;;  %v2936_v51 = vld.sshfl [vmem:[#allocation1] sm:$0xff pattern:$0x75316420]  ;;  %v2937_v25 = vld.sshfl [vmem:[#allocation1 + $0x8] sm:$0xff pattern:$0x75316420] }
 0x61d   : > { %2938 = vrot.lane.b32.xlu0 %v2936_v51, %s3849_s26  ;;  %2947 = vst [vmem:[#allocation1] ss:$2 sm:$0xff] %v5037_v29 }
 0x61e   : > { %2863 = vrot.lane.b32.xlu2 %v5029_v49, %s3851_s27 }
 0x61f   : > { %v2764_v17 = vpop.permute.xlu0 %2763 }
 0x620   : > { %2873 = vrot.lane.b32.xlu1 %v5040_v28, %s3852_s29  ;;  %v2767_v18 = vsel %vm333_vm7, %v2764_v17, %v2766_v41 }
 0x621   : > { %2769 = vst [vmem:[#allocation4 + $0x1c] sm:$0xf] %v2767_v18 }
 0x624   : > { %v2949_v9 = vld.sshfl [vmem:[#allocation1 + $0x8] sm:$0xff pattern:$0x75316420]  ;;  %v2948_v27 = vld.sshfl [vmem:[#allocation1] sm:$0xff pattern:$0x75316420] }
 0x625   : > { %2952 = vrot.lane.b32.xlu0 %v2949_v9, %s3850_s28  ;;  %2959 = vst [vmem:[#allocation1] ss:$2 sm:$0xff] %v5037_v29 }
 0x626   : > { %2904 = vrot.lane.b32.xlu2 %v2901_v55, %s3846_s21 }
 0x627   : > { %v2778_v58 = vpop.permute.xlu0 %2777  ;;  %v2776_v24 = vpop.permute.xlu1 %2775 }
 0x628   : > { %2890 = vrot.lane.b32.xlu1 %v5044_v42, %s3845_s18  ;;  %v2779_v31 = vsel %vm346_vm8, %v2776_v24, %v2778_v58 }
 0x629   : > { %2781 = vst [vmem:[#allocation4 + $0x20] sm:$0xf] %v2779_v31 }
 0x62c   : > { %v2961_v20 = vld.sshfl [vmem:[#allocation1 + $0x8] sm:$0xff pattern:$0x75316420]  ;;  %v2960_v6 = vld.sshfl [vmem:[#allocation1] sm:$0xff pattern:$0x75316420] }
 0x62d   : > { %2971 = vst [vmem:[#allocation1] ss:$2 sm:$0xff] %v5037_v29 }
 0x62e   : > { %2926 = vrot.lane.b32.xlu2 %v2924_v62, %s3848_s23 }
 0x62f   : > { %v2790_v34 = vpop.permute.xlu0 %2789 }
 0x630   : > { %2914 = vrot.lane.b32.xlu1 %v2912_v61, %s3847_s19  ;;  %v2793_v49 = vsel %vm255_vm3, %v2790_v34, %v2792_v52 }
 0x631   : > { %2795 = vst [vmem:[#allocation4 + $0x28] sm:$0xf] %v2793_v49 }
 0x634   : > { %v2973_v5 = vld.sshfl [vmem:[#allocation1 + $0x8] sm:$0xff pattern:$0x75316420]  ;;  %v2972_v38 = vld.sshfl [vmem:[#allocation1] sm:$0xff pattern:$0x75316420] }
 0x635   : > { %2976 = vrot.lane.b32.xlu0 %v2973_v5, %s3852_s29 }
 0x636   : > { %2940 = vrot.lane.b32.xlu2 %v2937_v25, %s3849_s26 }
 0x637   : > { %v2804_v21 = vpop.permute.xlu0 %2803  ;;  %v2802_v15 = vpop.permute.xlu1 %2801 }
 0x638   : > { %v2805_v35 = vsel %vm268_vm1, %v2802_v15, %v2804_v21  ;;  %2928 = vrot.lane.b32.xlu1 %v2925_v12, %s3848_s23 }
 0x639   : > { %2807 = vst [vmem:[#allocation4 + $0x2c] sm:$0xf] %v2805_v35 }
 0x63d   : > { %2729 = vrot.lane.b32.xlu0 %v4963_v11, %s3848_s23 }
 0x63e   : > { %2962 = vrot.lane.b32.xlu2 %v2960_v6, %s3851_s27 }
 0x63f   : > { %v2816_v50 = vpop.permute.xlu1 %2815 }
 0x640   : > { %2950 = vrot.lane.b32.xlu1 %v2948_v27, %s3850_s28 }
 0x645   : > { %2703 = vrot.lane.b32.xlu0 %v4945_v37, %s3846_s21 }
 0x646   : > { %2739 = vrot.lane.b32.xlu2 %v4966_v33, %s3849_s26 }
 0x647   : > { %v2826_v11 = vpop.permute.xlu0 %2825 }
 0x648   : > { %2964 = vrot.lane.b32.xlu1 %v2961_v20, %s3851_s27 }
 0x64d   : > { %2717 = vrot.lane.b32.xlu0 %v4956_v8, %s3847_s19 }
 0x64e   : > { %2705 = vrot.lane.b32.xlu2 %v4947_v56, %s3846_s21 }
 0x64f   : > { %v2840_v37 = vpop.permute.xlu0 %2839 }
 0x650   : > { %2974 = vrot.lane.b32.xlu1 %v2972_v38, %s3852_s29 }
 0x656   : > { %2691 = vrot.lane.b32.xlu2 %v4936_v47, %s3845_s18 }
 0x658   : > { %2727 = vrot.lane.b32.xlu1 %v4961_v14, %s3848_s23  ;;  %s3771_s23 = scalar_lea.hbm %s5210_s3, 128 }
 0x65f   : > { %v2862_v29 = vpop.permute.xlu0 %2861 }
 0x660   : > { %2741 = vrot.lane.b32.xlu1 %v4968_v1, %s3849_s26 }
 0x661   : > { %v2331_v33 = vpop.xlane.xlu2 %2330 }
 0x662   : > { %v5109_v8 = vadd.f32 %v2331_v33, %v4983_v16 }
 0x667   : > { %v2876_v14 = vpop.permute.xlu0 %2875 }
 0x668   : > { %2715 = vrot.lane.b32.xlu1 %v4954_v3, %s3847_s19 }
 0x669   : > { %v2814_v56 = vpop.permute.xlu2 %2813 }
 0x66a   : > { %v2335_v22 = vpop.xlane.xlu1 %2334  ;;  %v2817_v47 = vsel %vm281_vm2, %v2814_v56, %v2816_v50 }
 0x66b   : > { %v5115_v28 = vadd.f32 %v2335_v22, %v4987_v13  ;;  %2819 = vst [vmem:[#allocation4 + $0x30] sm:$0xf] %v2817_v47  ;;  %v2986_v47 = vld [vmem:[#allocation4 + $0x28] sm:$0xff] }
 0x66f   : > { %v2893_v30 = vpop.permute.xlu0 %2892 }
 0x670   : > { %2693 = vrot.lane.b32.xlu1 %v4938_v48, %s3845_s18  ;;  %s3767_s18 = scalar_lea.hbm %s3766_s9, 64 }
 0x671   : > { %v2828_v1 = vpop.permute.xlu2 %2827  ;;  %p3768_p6 = scmp.ne.s32.totalorder %s3766_s9, %s3767_s18  ;;  %p3773_p11 = scmp.lt.s32.totalorder %s3771_s23, %s3767_s18 }
 0x672   : > { %v2829_v16 = vsel %vm294_vm4, %v2826_v11, %v2828_v1  ;;  %v2984_v1 = vld [vmem:[#allocation4 + $0x18] sm:$0xff] }
 0x673   : > { %2831 = vst [vmem:[#allocation4 + $0x34] sm:$0xf] %v2829_v16  ;;  %p3769_p7 = pnand %p3768_p6, %p3916_p4  ;;  %p3774_p12 = por %p3773_p11, %p3772_p10 }
 0x675   : > { %p3770_p9 = pneg %p3769_p7 }
 0x677   : > { %v2903_v32 = vpop.permute.xlu0 %2902  ;;  %p3775_p13 = pnand %p3774_p12, %p3770_p9 }
 0x679   : > { %v2850_v23 = vpop.permute.xlu2 %2849 }
 0x67f   : > { %v2917_v45 = vpop.permute.xlu0 %2916 }
 0x681   : > { %v2864_v40 = vpop.permute.xlu2 %2863 }
 0x682   : > { %v2838_v3 = vpop.permute.xlu1 %2837  ;;  %v2865_v10 = vsel %vm333_vm7, %v2862_v29, %v2864_v40  ;;  %v2987_v29 = vld [vmem:[#allocation4 + $0x30] sm:$0xff] }
 0x683   : > { %v2841_v42 = vsel %vm307_vm6, %v2838_v3, %v2840_v37  ;;  %2867 = vst [vmem:[#allocation4 + $0x40] sm:$0xf] %v2865_v10 }
 0x684   : > { %2843 = vst [vmem:[#allocation4 + $0x38] sm:$0xf] %v2841_v42 }
 0x689   : > { %v2905_v13 = vpop.permute.xlu2 %2904 }
 0x68a   : > { %v2852_v19 = vpop.permute.xlu1 %2851  ;;  %v2906_v63 = vsel %vm268_vm1, %v2903_v32, %v2905_v13  ;;  %v3666_v32 = vld [vmem:[#allocation7] sm:$0xff] }
 0x68b   : > { %v2853_v48 = vsel %vm320_vm5, %v2850_v23, %v2852_v19  ;;  %2908 = vst [vmem:[#allocation4 + $0x50] sm:$0xf] %v2906_v63  ;;  %v3853_v63 = vmov 0  }
 0x68c   : > { %2855 = vst [vmem:[#allocation4 + $0x3c] sm:$0xf] %v2853_v48  ;;  %3656 = vset.pattern.permute.xlu2 %v3853_v63  ;;  %3657 = vset.pattern.permute.xlu1 %v3853_v63 }
 0x68d   : > { %3658 = vset.pattern.permute.xlu0 %v3853_v63 }
 0x68f   : > { %v2939_v53 = vpop.permute.xlu0 %2938 }
 0x691   : > { %v2927_v43 = vpop.permute.xlu2 %2926 }
 0x692   : > { %v2874_v46 = vpop.permute.xlu1 %2873 }
 0x693   : > { %v2877_v55 = vsel %vm346_vm8, %v2874_v46, %v2876_v14  ;;  %v2988_v33 = vld [vmem:[#allocation4 + $0x38] sm:$0xff]  ;;  %v2985_v14 = vld [vmem:[#allocation4 + $0x20] sm:$0xff]  ;;  %v3029_v46 = vld [vmem:[#allocation5] sm:$0xff] }
 0x694   : > { %2879 = vst [vmem:[#allocation4 + $0x44] sm:$0xf] %v2877_v55 }
 0x697   : > { %v2953_v44 = vpop.permute.xlu0 %2952 }
 0x699   : > { %v2941_v57 = vpop.permute.xlu2 %2940 }
 0x69a   : > { %v2891_v60 = vpop.permute.xlu1 %2890  ;;  %v2942_v61 = vsel %vm307_vm6, %v2939_v53, %v2941_v57 }
 0x69b   : > { %v2894_v4 = vsel %vm255_vm3, %v2891_v60, %v2893_v30  ;;  %2944 = vst [vmem:[#allocation4 + $0x5c] sm:$0xf] %v2942_v61  ;;  %v2989_v37 = vld [vmem:[#allocation4 + $0x40] sm:$0xff]  ;;  %v3033_v60 = vld [vmem:[#allocation6] sm:$0xff] }
 0x69c   : > { %2896 = vst [vmem:[#allocation4 + $0x4c] sm:$0xf] %v2894_v4 }
 0x69f   : > { %v2669_v39 = vpop.f32.mrf.mxu2 }
 0x6a0   : > { %v5128_v54 = vmul.f32 %v4869_v26, %v2669_v39 }
 0x6a1   : > { %v2963_v59 = vpop.permute.xlu2 %2962 }
 0x6a2   : > { %2676 = vadd.xlane.f32.xlu0 %v5128_v54  ;;  %v2915_v62 = vpop.permute.xlu1 %2914  ;;  %v2679_v12 = vmul.f32 %v5128_v54, %v5128_v54 }
 0x6a3   : > { %v2918_v0 = vsel %vm281_vm2, %v2915_v62, %v2917_v45  ;;  %v2990_v11 = vld [vmem:[#allocation4 + $0x48] sm:$0xff] }
 0x6a4   : > { %2920 = vst [vmem:[#allocation4 + $0x54] sm:$0xf] %v2918_v0  ;;  %2680 = vadd.xlane.f32.xlu2 %v2679_v12 }
 0x6a7   : > { %v2977_v7 = vpop.permute.xlu0 %2976 }
 0x6a9   : > { %v2740_v51 = vpop.permute.xlu2 %2739 }
 0x6aa   : > { %v2929_v2 = vpop.permute.xlu1 %2928 }
 0x6ab   : > { %v2930_v41 = vsel %vm294_vm4, %v2927_v43, %v2929_v2  ;;  %v2991_v15 = vld [vmem:[#allocation4 + $0x50] sm:$0xff] }
 0x6ac   : > { %2932 = vst [vmem:[#allocation4 + $0x58] sm:$0xf] %v2930_v41 }
 0x6af   : > { %v2730_v25 = vpop.permute.xlu0 %2729 }
 0x6b1   : > { %v2706_v9 = vpop.permute.xlu2 %2705 }
 0x6b2   : > { %v2951_v17 = vpop.permute.xlu1 %2950 }
 0x6b3   : > { %v2954_v18 = vsel %vm320_vm5, %v2951_v17, %v2953_v44  ;;  %v2992_v21 = vld [vmem:[#allocation4 + $0x58] sm:$0xff] }
 0x6b4   : > { %2956 = vst [vmem:[#allocation4 + $0x60] sm:$0xf] %v2954_v18 }
 0x6b7   : > { %v2704_v27 = vpop.permute.xlu0 %2703 }
 0x6b8   : > { %v2707_v58 = vsel %vm268_vm1, %v2704_v27, %v2706_v9 }
 0x6b9   : > { %2709 = vst [vmem:[#allocation4 + $0x8] sm:$0xf] %v2707_v58  ;;  %v2692_v16 = vpop.permute.xlu2 %2691 }
 0x6ba   : > { %v2965_v24 = vpop.permute.xlu1 %2964 }
 0x6bb   : > { %v2966_v31 = vsel %vm333_vm7, %v2963_v59, %v2965_v24 }
 0x6bc   : > { %2968 = vst [vmem:[#allocation4 + $0x64] sm:$0xf] %v2966_v31  ;;  %v3059_v31 = vld [vmem:[%s3974_s10] sm:$0xff] }
 0x6bf   : > { %v2718_v50 = vpop.permute.xlu0 %2717 }
 0x6c2   : > { %v2975_v52 = vpop.permute.xlu1 %2974 }
 0x6c3   : > { %v2978_v20 = vsel %vm346_vm8, %v2975_v52, %v2977_v7  ;;  %v2993_v5 = vld [vmem:[#allocation4 + $0x60] sm:$0xff]  ;;  %v3060_v52 = vld [vmem:[%s3974_s10 + $0x8] sm:$0xff] }
 0x6c4   : > { %2980 = vst [vmem:[#allocation4 + $0x68] sm:$0xf] %v2978_v20  ;;  %v3061_v20 = vld [vmem:[%s3974_s10 + $0x10] sm:$0xff] }
 0x6ca   : > { %v2728_v6 = vpop.permute.xlu1 %2727 }
 0x6cb   : > { %v2731_v34 = vsel %vm294_vm4, %v2728_v6, %v2730_v25  ;;  %v2994_v49 = vld [vmem:[#allocation4 + $0x68] sm:$0xf] }
 0x6cc   : > { %2733 = vst [vmem:[#allocation4 + $0x10] sm:$0xf] %v2731_v34  ;;  %3555 = vmatpush.msk.msrb.mxu3 %vm569_vm9, %v2994_v49  ;;  %v3062_v6 = vld [vmem:[%s3974_s10 + $0x18] sm:$0xff]  ;;  %v3063_v34 = vld [vmem:[%s3974_s10 + $0x20] sm:$0xff] }
 0x6ce   : > { %3001 = vmatpush.msrb.mxu3 %v2993_v5 }
 0x6d0   : > { %3002 = vmatpush.msrb.mxu3 %v2992_v21 }
 0x6d2   : > { %3003 = vmatpush.msrb.mxu3 %v2991_v15  ;;  %v2742_v35 = vpop.permute.xlu1 %2741 }
 0x6d3   : > { %v2743_v38 = vsel %vm307_vm6, %v2740_v51, %v2742_v35 }
 0x6d4   : > { %2745 = vst [vmem:[#allocation4 + $0x14] sm:$0xf] %v2743_v38  ;;  %3004 = vmatpush.msrb.mxu3 %v2990_v11 }
 0x6d6   : > { %3005 = vmatpush.msrb.mxu3 %v2989_v37 }
 0x6d8   : > { %3006 = vmatpush.msrb.mxu3 %v2988_v33 }
 0x6da   : > { %3007 = vmatpush.msrb.mxu3 %v2987_v29  ;;  %v2716_v56 = vpop.permute.xlu1 %2715 }
 0x6db   : > { %v2719_v22 = vsel %vm281_vm2, %v2716_v56, %v2718_v50  ;;  %v2983_v30 = vld [vmem:[#allocation4 + $0x10] sm:$0xff] }
 0x6dc   : > { %2721 = vst [vmem:[#allocation4 + $0xc] sm:$0xf] %v2719_v22  ;;  %3008 = vmatpush.msrb.mxu3 %v2986_v47 }
 0x6de   : > { %3009 = vmatpush.msrb.mxu3 %v2985_v14 }
 0x6e0   : > { %3010 = vmatpush.msrb.mxu3 %v2984_v1 }
 0x6e2   : > { %3011 = vmatpush.msrb.mxu3 %v2983_v30  ;;  %v2694_v23 = vpop.permute.xlu1 %2693 }
 0x6e3   : > { %v2695_v40 = vsel %vm255_vm3, %v2692_v16, %v2694_v23  ;;  %v2982_v3 = vld [vmem:[#allocation4 + $0x8] sm:$0xff] }
 0x6e4   : > { %2697 = vst [vmem:[#allocation4 + $0x4] sm:$0xf] %v2695_v40  ;;  %3012 = vmatpush.msrb.mxu3 %v2982_v3 }
 0x6eb   : > { %v2981_v10 = vld [vmem:[#allocation4] sm:$0xff] }
 0x6ec   : > { %3013 = vmatpush.msrb.mxu3 %v2981_v10 }
 0x6ed   : > { %3556 = vmatmul.msk.f32.vlgmr.msrb.gmra.mxu3 %vm320_vm5, %v3666_v32 }
 0x715   : > { %v2677_v48 = vpop.xlane.xlu0 %2676 }
 0x716   : > { %v2678_v43 = vadd.f32 %v2677_v48, %v5109_v8 }
 0x717   : > { %v2681_v45 = vpop.xlane.xlu2 %2680 }
 0x718   : > { %v2682_v53 = vadd.f32 %v2681_v45, %v5115_v28 }
 0x770   : > { %v3015_v42 = vpop.f32.mrf.mxu3 }
 0x771   : > { %v3018_v13 = vmul.f32 %v4869_v26, %v3015_v42 }
 0x773   : > { %3022 = vadd.xlane.f32.xlu1 %v3018_v13  ;;  %v3025_v19 = vmul.f32 %v3018_v13, %v3018_v13 }
 0x775   : > { %3026 = vadd.xlane.f32.xlu0 %v3025_v19 }
 0x7e6   : > { %v3023_v55 = vpop.xlane.xlu1 %3022 }
 0x7e7   : > { %v3024_v57 = vadd.f32 %v3023_v55, %v2678_v43 }
 0x7e8   : > { %v3027_v61 = vpop.xlane.xlu0 %3026 }
 0x7e9   : > { %v3030_v4 = vadd.f32 %v3029_v46, %v3024_v57  ;;  %v3028_v26 = vadd.f32 %v3027_v61, %v2682_v53 }
 0x7eb   : > { %3032 = vst.msk [vmem:[#allocation5] sm:$0xff] %vm200_vm0, %v3030_v4  ;;  %v3034_v39 = vadd.f32 %v3033_v60, %v3028_v26 }
 0x7ed   : > { %3035 = vst.msk [vmem:[#allocation6] sm:$0xff] %vm200_vm0, %v3034_v39 }
 0x7f2   : > { %v3039_v44 = vld [vmem:[#allocation5] sm:$0xff] }
 0x7f3   : > { %v3040_v62 = vmul.f32 0.001953125, %v3039_v44 }
 0x7f4   : > { %v3041_v12 = vld [vmem:[#allocation6] sm:$0xff] }
 0x7f5   : > { %v3042_v0 = vmul.f32 0.001953125, %v3041_v12  ;;  %v3043_v59 = vmul.f32 %v3040_v62, %v3040_v62  ;;  %v3057_v9 = vsub.f32 0.0, %v3040_v62 }
 0x7f7   : > { %v3044_v8 = vsub.f32 %v3042_v0, %v3043_v59 }
 0x7f9   : > { %v3045_v7 = vmax.f32 %v3044_v8, 0.0 }
 0x7fb   : > { %v3046_v2 = vadd.f32 1e-05, %v3045_v7 }
 0x7fd   : > { %3660 = vrsqrt.f32 %v3046_v2  ;;  %vm3053_vm11 = vweird.f32 %v3046_v2 }
 0x803   : > { %v3661_v28 = vpop.eup %3660 }
 0x804   : > { %v3048_v41 = vmul.f32 %v3661_v28, %v3046_v2  ;;  %vm3054_vm10 = vweird.f32 %v3661_v28 }
 0x805   : > { %vm3055_vm12 = vmor %vm3053_vm11, %vm3054_vm10 }
 0x806   : > { %v3049_v51 = vmul.f32 %v3661_v28, %v3048_v41 }
 0x808   : > { %v3050_v25 = vmul.f32 0.5, %v3049_v51 }
 0x80a   : > { %v3051_v17 = vsub.f32 1.5, %v3050_v25 }
 0x80c   : > { %v3052_v18 = vmul.f32 %v3661_v28, %v3051_v17 }
 0x80e   : > { %v3056_v27 = vsel %vm3055_vm12, %v3661_v28, %v3052_v18 }
 0x80f   : > { %3069 = vperm.xlu2 %3656, %v3056_v27   ;;  %v3058_v58 = vmul.f32 %v3057_v9, %v3056_v27 }
 0x811   : > { %3082 = vperm.xlu1 %3657, %v3058_v58  }
 0x869   : > { %v3070_v24 = vpop.permute.xlu2 %3069 }
 0x86a   : > { %v3072_v49 = vmul.f32 %v3070_v24, %v3059_v31  ;;  %v3073_v5 = vmul.f32 %v3070_v24, %v3060_v52  ;;  %v3074_v21 = vmul.f32 %v3070_v24, %v3061_v20  ;;  %v3075_v15 = vmul.f32 %v3070_v24, %v3062_v6 }
 0x86b   : > { %v3076_v35 = vmul.f32 %v3070_v24, %v3063_v34  ;;  %v3077_v38 = vmul.f32 %v3070_v24, %v5027_v36  ;;  %v3078_v11 = vmul.f32 %v3070_v24, %v5128_v54  ;;  %v3079_v37 = vmul.f32 %v3070_v24, %v3018_v13 }
 0x883   : > { %v3083_v33 = vpop.permute.xlu1 %3082 }
 0x884   : > { %v3085_v50 = vadd.f32 %v3083_v33, %v3072_v49  ;;  %v3086_v29 = vadd.f32 %v3083_v33, %v3073_v5  ;;  %v3087_v56 = vadd.f32 %v3083_v33, %v3074_v21  ;;  %v3088_v22 = vadd.f32 %v3083_v33, %v3075_v15 }
 0x885   : > { %v3089_v47 = vadd.f32 %v3083_v33, %v3076_v35  ;;  %v3090_v14 = vadd.f32 %v3083_v33, %v3077_v38  ;;  %v3091_v1 = vadd.f32 %v3083_v33, %v3078_v11  ;;  %v3092_v16 = vadd.f32 %v3083_v33, %v3079_v37 }
 0x886   : > { %vm3093_vm13 = vcmp.ge.f32.partialorder %v3085_v50, 0.0  ;;  %vm3094_vm14 = vcmp.ge.f32.partialorder %v3086_v29, 0.0  ;;  %vm3095_vm15 = vcmp.ge.f32.partialorder %v3087_v56, 0.0  ;;  %vm3096_vm0 = vcmp.ge.f32.partialorder %v3088_v22, 0.0 }
 0x887   : > { %vm3097_vm1 = vcmp.ge.f32.partialorder %v3089_v47, 0.0  ;;  %v3101_v36 = vmul.f32 0.2, %v3085_v50  ;;  %v3102_v30 = vmul.f32 0.2, %v3086_v29  ;;  %vm3098_vm2 = vcmp.ge.f32.partialorder %v3090_v14, 0.0 }
 0x888   : > { %v3103_v54 = vmul.f32 0.2, %v3087_v56  ;;  %v3104_v23 = vmul.f32 0.2, %v3088_v22  ;;  %v3105_v40 = vmul.f32 0.2, %v3089_v47 }
 0x889   : > { %v3106_v3 = vmul.f32 0.2, %v3090_v14  ;;  %v3107_v10 = vmul.f32 0.2, %v3091_v1  ;;  %v3109_v32 = vsel %vm3093_vm13, %v3085_v50, %v3101_v36  ;;  %v3110_v42 = vsel %vm3094_vm14, %v3086_v29, %v3102_v30 }
 0x88a   : > { %vm3099_vm3 = vcmp.ge.f32.partialorder %v3091_v1, 0.0  ;;  %v3108_v13 = vmul.f32 0.2, %v3092_v16  ;;  %v3111_v19 = vsel %vm3095_vm15, %v3087_v56, %v3103_v54  ;;  %v3112_v63 = vsel %vm3096_vm0, %v3088_v22, %v3104_v23  ;;  %3117 = vst [vmem:[%s3974_s10] sm:$0xff] %v3109_v32 }
 0x88b   : > { %vm3100_vm4 = vcmp.ge.f32.partialorder %v3092_v16, 0.0  ;;  %v3113_v48 = vsel %vm3097_vm1, %v3089_v47, %v3105_v40  ;;  %3118 = vst [vmem:[%s3974_s10 + $0x8] sm:$0xff] %v3110_v42  ;;  %v3114_v45 = vsel %vm3098_vm2, %v3090_v14, %v3106_v3  ;;  %v3115_v43 = vsel %vm3099_vm3, %v3091_v1, %v3107_v10 }
 0x88c   : > { %3119 = vst [vmem:[%s3974_s10 + $0x10] sm:$0xff] %v3111_v19  ;;  %v3116_v46 = vsel %vm3100_vm4, %v3092_v16, %v3108_v13 }
 0x88d   : > { %3120 = vst [vmem:[%s3974_s10 + $0x18] sm:$0xff] %v3112_v63 }
 0x88e   : > { %3121 = vst [vmem:[%s3974_s10 + $0x20] sm:$0xff] %v3113_v48 }
 0x88f   : > { %3122 = vst [vmem:[%s3974_s10 + $0x28] sm:$0xff] %v3114_v45 }
 0x890   : > { %3123 = vst [vmem:[%s3974_s10 + $0x30] sm:$0xff] %v3115_v43 }
 0x891   : > { %3124 = vst [vmem:[%s3974_s10 + $0x38] sm:$0xff] %v3116_v46 }
 0x892   : > { %3778 = shalt.err (!%p3775_p13)
}
 0x893   : > { %s3854_s11 = smov 128   ;;  %s3855_s10 = smov 8  }
 0x894   : > { %3575 = dma.vmem_to_hbm [thread:$0]  (%p3916_p4), %s3139_s15, 1024, %s3141_s7, %s3126_s8, %s3854_s11, %s3854_s11, %s3855_s10  }
 0x895 PF: > { %p3592_p0 = scmp.ge.s32.totalorder %s3839_s17, 2  ;;  %s3155_s27 = sand.u32 1, %s3819_s12  }
 0x896   : > { %s3156_s29 = scalar_lea.sflag [#allocation9], %s3155_s27 }
 0x897   : > { %p3585_p1 = pnand %p3592_p0, %p3923_p8 }
 0x899   : > { %p3586_p2 = pneg %p3585_p1 }
 0x89b   : > { %3814 = dma.done.wait (%p3586_p2), %s3156_s29, 1024  }
 0x89c   : > { %3816 = vsyncadd (%p3586_p2), %s3156_s29, 4294966272  ;;  %s18_s17 = sadd.s32 1, %s3839_s17   ;;  %s5215_s12 = smov %s3823_s13 }
 0x89d   : > { %p15_p3 = scmp.ge.s32.totalorder %s18_s17, 4   ;;  %s5216_s13 = smov %s3827_s14 }
 0x89e   : > { %s5217_s14 = smov %s3929_s25  ;;  %s5218_s15 = smov %s3835_s16 }
 0x89f   : > { %s5219_s16 = smov %s5221_s20  ;;  %17 = sbr.rel (!%p15_p3) target bundleno = 6 (0x6), region = 113 }
 0x8a4   :  { %3162 = vsyncpa [#allocation8], 1 }
 0x8a5   :  { %3164 = vsyncpa [#allocation8 + $0x1], 1 }
 0x8a6   :  { %3165 = vsyncpa [#allocation11], 1 }
 0x8a7   :  { %3166 = vsyncpa [#allocation9], 1 }
 0x8a8   :  { %3168 = vsyncpa [#allocation9 + $0x1], 1 }
 0x8a9   :  { %3169 = vsyncmov [#allocation3] }
 0x8ac   :  { %s3170_s22 = vpop.sfrf %3169 }
 0x8ad   :  { %p3563_p4 = scmp.ne.s32.totalorder %s3170_s22, 0 }
 0x8af   :  { %3174 = shalt.err (%p3563_p4)  }
 0x8b0   :  { %3176 = vsyncmov [#allocation3 + $0x1] }
 0x8b3   :  { %s3177_s24 = vpop.sfrf %3176 }
 0x8b4   :  { %p3564_p8 = scmp.ne.s32.totalorder %s3177_s24, 0 }
 0x8b6   :  { %3181 = shalt.err (%p3564_p8)  }

</bundles_post_ra>
